<compile_context>
chip_gen: v6e
topology: v6e:2x2x1
jax: 0.10.0
libtpu: 0.0.40
codegen_flags: <defaults>
</compile_context>

<pallas_src>
import jax
import jax.numpy as jnp
from jax.experimental import pallas as pl
from jax.experimental.pallas import tpu as pltpu


def _round_up(v, m):
    return ((v + m - 1) // m) * m


# ---------------------------------------------------------------------------
# Fused per-layer channel mixing (Yl + Yh0 + Yh1 + Yh2 in one pallas_call)
# ---------------------------------------------------------------------------
def _mix_kernel_mxu(wid_ref, x_ref, w_ref, o_ref):
    # bf16 MXU matmul with f32 accumulation (v6e/v7x fast path; fine on v5e).
    o_ref[...] = jnp.dot(x_ref[...].astype(jnp.bfloat16),
                         w_ref[0].astype(jnp.bfloat16),
                         preferred_element_type=jnp.float32)


def _mix_kernel_outer(wid_ref, x_ref, w_ref, o_ref):
    # K == 1 (first layer): outer product on the VPU, keep the MXU out of it.
    o_ref[...] = x_ref[...] * w_ref[0]


def fused_channel_mix(segs, weights, tm_target=512):
    """segs[i]: (M_i, K) activations, weights[i]: (K, N).  Returns per-segment
    (M_i, N) outputs, computed by a single pallas_call; the weight used by each
    row tile is selected through a scalar-prefetched tile->segment id table."""
    K = segs[0].shape[1]
    N = weights[0].shape[1]
    w = jnp.stack(weights, axis=0)                       # (S, K, N)

    # Lane-dense output: pad a very narrow head (e.g. the final N=10) to 128.
    Np = 128 if N < 64 else N
    if Np != N:
        w = jnp.pad(w, ((0, 0), (0, 0), (0, Np - N)))

    Ms = [int(s.shape[0]) for s in segs]
    TM = min(tm_target, _round_up(max(Ms), 128))         # rows per tile

    padded, tile_ids = [], []
    for i, (s, m) in enumerate(zip(segs, Ms)):
        mp = _round_up(m, TM)
        if mp != m:
            s = jnp.pad(s, ((0, mp - m), (0, 0)))
        padded.append(s)
        tile_ids.extend([i] * (mp // TM))
    xcat = jnp.concatenate(padded, axis=0) if len(padded) > 1 else padded[0]
    T = len(tile_ids)
    wid = jnp.asarray(tile_ids, dtype=jnp.int32)

    kernel = _mix_kernel_outer if K == 1 else _mix_kernel_mxu
    out = pl.pallas_call(
        kernel,
        out_shape=jax.ShapeDtypeStruct((T * TM, Np), jnp.float32),
        grid_spec=pltpu.PrefetchScalarGridSpec(
            num_scalar_prefetch=1,
            grid=(T,),
            in_specs=[
                pl.BlockSpec((TM, K), lambda i, wid_ref: (i, 0)),
                pl.BlockSpec((1, K, Np), lambda i, wid_ref: (wid_ref[i], 0, 0)),
            ],
            out_specs=pl.BlockSpec((TM, Np), lambda i, wid_ref: (i, 0)),
        ),
        compiler_params=pltpu.CompilerParams(
            dimension_semantics=("parallel",)),
    )(wid, xcat, w)

    outs, off = [], 0
    for m in Ms:
        outs.append(out[off:off + m, :N])
        off += _round_up(m, TM)
    return outs


# ---------------------------------------------------------------------------
# Elementwise Pallas kernels (lane-dense, tiled, parallel grids)
# ---------------------------------------------------------------------------
def _relu_kernel(x_ref, o_ref):
    o_ref[...] = jnp.maximum(x_ref[...], 0.0)


def _pick_lane_width(total, fallback):
    for lane in (1024, 512, 256, 128):
        if total % lane == 0:
            return lane
    return fallback


def _pick_row_tile(rows, max_rows=256):
    if rows <= 8:
        return rows
    cap = min(max_rows, rows // 2)
    cap -= cap % 8
    for tr in range(max(cap, 8), 7, -8):
        if rows % tr == 0:
            return tr
    return rows


def relu(x):
    shape = x.shape
    lane = _pick_lane_width(x.size, shape[-1])
    x2 = x.reshape(-1, lane)
    rows = x2.shape[0]
    tr = _pick_row_tile(rows)
    out = pl.pallas_call(
        _relu_kernel,
        out_shape=jax.ShapeDtypeStruct((rows, lane), x.dtype),
        grid=(rows // tr,),
        in_specs=[pl.BlockSpec((tr, lane), lambda i: (i, 0))],
        out_specs=pl.BlockSpec((tr, lane), lambda i: (i, 0)),
        compiler_params=pltpu.CompilerParams(
            dimension_semantics=("parallel",)),
    )(x2)
    return out.reshape(shape)


def _relu_pool_kernel(x_ref, o_ref):
    # x_ref: (1, Hh, 2, Wh, 2C) — H-pair axis is an outer dim, W-pair folded
    # into the lane dim, so no strided VMEM access is needed.
    c = o_ref.shape[-1]
    top = x_ref[0, :, 0, :, :]
    bot = x_ref[0, :, 1, :, :]
    m = jnp.maximum(top, bot)
    m = jnp.maximum(m[:, :, :c], m[:, :, c:])
    o_ref[0] = jnp.maximum(m, 0.0)


def relu_maxpool2x2(x):
    """relu followed by F.max_pool2d(kernel_size=2), fused (max commutes with
    relu).  Channels-last input (N, H, W, C); x is read exactly once."""
    n, h, w, c = x.shape
    hh, wh = h // 2, w // 2
    xr = x.reshape(n, hh, 2, wh, 2 * c)          # pure reshape, no data copy
    return pl.pallas_call(
        _relu_pool_kernel,
        out_shape=jax.ShapeDtypeStruct((n, hh, wh, c), x.dtype),
        grid=(n,),
        in_specs=[pl.BlockSpec((1, hh, 2, wh, 2 * c),
                               lambda i: (i, 0, 0, 0, 0))],
        out_specs=pl.BlockSpec((1, hh, wh, c), lambda i: (i, 0, 0, 0)),
        compiler_params=pltpu.CompilerParams(
            dimension_semantics=("parallel",)),
    )(xr)


def _relu_mean_kernel(x_ref, o_ref):
    hw = x_ref.shape[1] * x_ref.shape[2]
    x = jnp.maximum(x_ref[...], 0.0)             # (1, H, W, C)
    o_ref[0] = jnp.sum(x, axis=(1, 2)) * (1.0 / hw)


def relu_spatial_mean(x):
    """relu then torch.mean(x, dim=(-2,-1)) for channels-last -> (N, C)."""
    n, h, w, c = x.shape
    out = pl.pallas_call(
        _relu_mean_kernel,
        out_shape=jax.ShapeDtypeStruct((n, 1, c), x.dtype),
        grid=(n,),
        in_specs=[pl.BlockSpec((1, h, w, c), lambda i: (i, 0, 0, 0))],
        out_specs=pl.BlockSpec((1, 1, c), lambda i: (i, 0, 0)),
        compiler_params=pltpu.CompilerParams(
            dimension_semantics=("parallel",)),
    )(x)
    return out.reshape(n, c)


# ---------------------------------------------------------------------------
# Dual-tree-style wavelet transform, channels-last (plain-JAX glue, Haar-based)
# ---------------------------------------------------------------------------
_SQH = 0.5 ** 0.5


def _q2c(y):
    a = y[:, 0::2, 0::2, :]
    b = y[:, 0::2, 1::2, :]
    c = y[:, 1::2, 0::2, :]
    d = y[:, 1::2, 1::2, :]
    z1 = jnp.stack([(a - d) * _SQH, (b + c) * _SQH], axis=-2)
    z2 = jnp.stack([(a + d) * _SQH, (b - c) * _SQH], axis=-2)
    return z1, z2


def _c2q(z1, z2):
    z1r, z1i = z1[..., 0, :], z1[..., 1, :]
    z2r, z2i = z2[..., 0, :], z2[..., 1, :]
    a = (z1r + z2r) * _SQH
    d = (z2r - z1r) * _SQH
    b = (z1i + z2i) * _SQH
    c = (z1i - z2i) * _SQH
    n, h2, w2, ch = a.shape
    y = jnp.zeros((n, 2 * h2, 2 * w2, ch), a.dtype)
    y = y.at[:, 0::2, 0::2, :].set(a).at[:, 0::2, 1::2, :].set(b)
    y = y.at[:, 1::2, 0::2, :].set(c).at[:, 1::2, 1::2, :].set(d)
    return y


def _analysis_nondec(x):
    lo_w = 0.5 * (x + jnp.roll(x, -1, axis=2))
    hi_w = 0.5 * (x - jnp.roll(x, -1, axis=2))
    ll = 0.5 * (lo_w + jnp.roll(lo_w, -1, axis=1))
    lh = 0.5 * (lo_w - jnp.roll(lo_w, -1, axis=1))
    hl = 0.5 * (hi_w + jnp.roll(hi_w, -1, axis=1))
    hh = 0.5 * (hi_w - jnp.roll(hi_w, -1, axis=1))
    return ll, lh, hl, hh


def _synthesis_nondec(ll, lh, hl, hh):
    return ll + lh + hl + hh


def _analysis_dec(x):
    a = x[:, 0::2, 0::2, :]
    b = x[:, 0::2, 1::2, :]
    c = x[:, 1::2, 0::2, :]
    d = x[:, 1::2, 1::2, :]
    ll = 0.5 * (a + b + c + d)
    lh = 0.5 * (a + b - c - d)
    hl = 0.5 * (a - b + c - d)
    hh = 0.5 * (a - b - c + d)
    return ll, lh, hl, hh


def _synthesis_dec(ll, lh, hl, hh):
    a = 0.5 * (ll + lh + hl + hh)
    b = 0.5 * (ll + lh - hl - hh)
    c = 0.5 * (ll - lh + hl - hh)
    d = 0.5 * (ll - lh - hl + hh)
    n, h2, w2, ch = ll.shape
    y = jnp.zeros((n, 2 * h2, 2 * w2, ch), ll.dtype)
    y = y.at[:, 0::2, 0::2, :].set(a).at[:, 0::2, 1::2, :].set(b)
    y = y.at[:, 1::2, 0::2, :].set(c).at[:, 1::2, 1::2, :].set(d)
    return y


def dtcwt_forward(x, J=3):
    """x: (N,H,W,C) -> (Yl (N,H/4,W/4,C), [Yh_j (N,6,h_j,w_j,2,C)] j=0..2)."""
    yh = []
    ll = x
    for j in range(J):
        if j == 0:
            ll, lh, hl, hh = _analysis_nondec(ll)
        else:
            ll, lh, hl, hh = _analysis_dec(ll)
        bands = []
        for band in (lh, hh, hl):
            z1, z2 = _q2c(band)
            bands.append(z1)
            bands.append(z2)
        yh.append(jnp.stack(bands, axis=1))
    return ll, yh


def dtcwt_inverse(yl, yh):
    ll = yl
    for j in (2, 1, 0):
        oris = yh[j]
        recs = [_c2q(oris[:, 2 * k], oris[:, 2 * k + 1]) for k in range(3)]
        lh, hh, hl = recs
        if j == 0:
            ll = _synthesis_nondec(ll, lh, hl, hh)
        else:
            ll = _synthesis_dec(ll, lh, hl, hh)
    return ll


# ---------------------------------------------------------------------------
# Full forward pass of the Wavelets module
# ---------------------------------------------------------------------------
def wavelet_layer(x, Wl, Wh0, Wh1, Wh2):
    yl, yh = dtcwt_forward(x)
    cin = x.shape[-1]
    cout = Wl.shape[1]
    segs = [yl.reshape(-1, cin)] + [a.reshape(-1, cin) for a in yh]
    outs = fused_channel_mix(segs, [Wl, Wh0, Wh1, Wh2])
    yl = outs[0].reshape(yl.shape[:-1] + (cout,))
    yh = [outs[1 + j].reshape(yh[j].shape[:-1] + (cout,)) for j in range(3)]
    return dtcwt_inverse(yl, yh)


def wavelets_forward(x, params):
    # Public interface matches the torch module (NCHW); go channels-last once.
    x = jnp.transpose(x, (0, 2, 3, 1))
    x = relu(wavelet_layer(x, *params[0]))
    x = relu_maxpool2x2(wavelet_layer(x, *params[1]))
    x = relu(wavelet_layer(x, *params[2]))
    x = relu_maxpool2x2(wavelet_layer(x, *params[3]))
    x = relu(wavelet_layer(x, *params[4]))
    x = relu(wavelet_layer(x, *params[5]))
    x = relu_spatial_mean(wavelet_layer(x, *params[6]))
    h = x
    return x, h


def init_params(key):
    shapes = [
        [(1, 96)] * 4,
        [(96, 96)] * 4,
        [(96, 192)] * 4,
        [(192, 192)] * 4,
        [(192, 192)] * 4,
        [(192, 192)] * 4,
        [(192, 10)] * 4,
    ]
    params = []
    for layer_shapes in shapes:
        ws = []
        for s in layer_shapes:
            key, sub = jax.random.split(key)
            ws.append(jax.random.normal(sub, s, dtype=jnp.float32))
        params.append(tuple(ws))
    return params


if __name__ == "__main__":
    key = jax.random.PRNGKey(0)
    pkey, xkey = jax.random.split(key)
    params = init_params(pkey)
    # Small MNIST-like input: batch=2, 1 channel, 32x32 spatial
    # (spatial must be divisible by 8 through the two 2x2 max-pools).
    x = jax.random.normal(xkey, (2, 1, 32, 32), dtype=jnp.float32)

    fwd = jax.jit(wavelets_forward)
    out, h = fwd(x, params)
    jax.block_until_ready(out)
    jax.block_until_ready(h)
    assert out.shape == (2, 10) and h.shape == (2, 10)
    print("KERNEL_OK")
</pallas_src>

<mosaic_0001>
module attributes {stable_mosaic.version = 11 : i64} {
  func.func @_mix_kernel_outer(%arg0: i32, %arg1: memref<17xi32, #tpu.memory_space<smem>>, %arg2: memref<512x1xf32, #tpu.memory_space<vmem>>, %arg3: memref<1x1x96xf32, #tpu.memory_space<vmem>>, %arg4: memref<512x96xf32, #tpu.memory_space<vmem>>) attributes {dimension_semantics = [#tpu.dimension_semantics<parallel>], iteration_bounds = array<i64: 17>, scalar_prefetch = 1 : i64, scratch_operands = 0 : i64, tpu.core_type = #tpu.core_type<tc>, window_params = [{transform_indices = @transform_0, window_bounds = array<i64: 512, 1>}, {transform_indices = @transform_1, window_bounds = array<i64: 1, 1, 96>}, {transform_indices = @transform_2, window_bounds = array<i64: 512, 96>}]} {
    %c0 = arith.constant 0 : index
    %c0_0 = arith.constant 0 : index
    %0 = vector.load %arg2[%c0, %c0_0] : memref<512x1xf32, #tpu.memory_space<vmem>>, vector<512x1xf32>
    %c0_1 = arith.constant 0 : index
    %c0_2 = arith.constant 0 : index
    %c0_3 = arith.constant 0 : index
    %1 = vector.load %arg3[%c0_1, %c0_2, %c0_3] : memref<1x1x96xf32, #tpu.memory_space<vmem>>, vector<1x1x96xf32>
    %2 = vector.shape_cast %1 : vector<1x1x96xf32> to vector<1x96xf32>
    %3 = vector.broadcast %0 : vector<512x1xf32> to vector<512x96xf32>
    %4 = vector.broadcast %2 : vector<1x96xf32> to vector<512x96xf32>
    %5 = arith.mulf %3, %4 : vector<512x96xf32>
    %c0_4 = arith.constant 0 : index
    %c0_5 = arith.constant 0 : index
    %6 = vector.load %arg4[%c0_4, %c0_5] : memref<512x96xf32, #tpu.memory_space<vmem>>, vector<512x96xf32>
    tpu.vector_store %arg4[%c0_4, %c0_5], %5 {strides = array<i32>} : memref<512x96xf32, #tpu.memory_space<vmem>>, vector<512x96xf32>,
    return
  }
  func.func @transform_0(%arg0: i32, %arg1: memref<17xi32, #tpu.memory_space<smem>>) -> (i32, i32) {
    %c0_i32 = arith.constant 0 : i32
    %c0_i32_0 = arith.constant 0 : i32
    return %arg0, %c0_i32 : i32, i32
  }
  func.func @transform_1(%arg0: i32, %arg1: memref<17xi32, #tpu.memory_space<smem>>) -> (i32, i32, i32) {
    %0 = arith.index_cast %arg0 : i32 to index
    %1 = memref.load %arg1[%0] : memref<17xi32, #tpu.memory_space<smem>>
    %c0_i32 = arith.constant 0 : i32
    %c0_i32_0 = arith.constant 0 : i32
    %c0_i32_1 = arith.constant 0 : i32
    return %1, %c0_i32, %c0_i32_0 : i32, i32, i32
  }
  func.func @transform_2(%arg0: i32, %arg1: memref<17xi32, #tpu.memory_space<smem>>) -> (i32, i32) {
    %c0_i32 = arith.constant 0 : i32
    %c0_i32_0 = arith.constant 0 : i32
    return %arg0, %c0_i32 : i32, i32
  }
}

module attributes {stable_mosaic.version = 11 : i64} {
  func.func @_relu_kernel(%arg0: i32, %arg1: memref<96x1024xf32, #tpu.memory_space<vmem>>, %arg2: memref<96x1024xf32, #tpu.memory_space<vmem>>) attributes {dimension_semantics = [#tpu.dimension_semantics<parallel>], iteration_bounds = array<i64: 2>, scalar_prefetch = 0 : i64, scratch_operands = 0 : i64, tpu.core_type = #tpu.core_type<tc>, window_params = [{transform_indices = @transform_0, window_bounds = array<i64: 96, 1024>}, {transform_indices = @transform_1, window_bounds = array<i64: 96, 1024>}]} {
    %c0 = arith.constant 0 : index
    %c0_0 = arith.constant 0 : index
    %0 = vector.load %arg1[%c0, %c0_0] : memref<96x1024xf32, #tpu.memory_space<vmem>>, vector<96x1024xf32>
    %cst = arith.constant 0.000000e+00 : f32
    %1 = vector.broadcast %cst : f32 to vector<96x1024xf32>
    %2 = arith.maximumf %0, %1 : vector<96x1024xf32>
    %c0_1 = arith.constant 0 : index
    %c0_2 = arith.constant 0 : index
    %3 = vector.load %arg2[%c0_1, %c0_2] : memref<96x1024xf32, #tpu.memory_space<vmem>>, vector<96x1024xf32>
    tpu.vector_store %arg2[%c0_1, %c0_2], %2 {strides = array<i32>} : memref<96x1024xf32, #tpu.memory_space<vmem>>, vector<96x1024xf32>,
    return
  }
  func.func @transform_0(%arg0: i32) -> (i32, i32) {
    %c0_i32 = arith.constant 0 : i32
    %c0_i32_0 = arith.constant 0 : i32
    return %arg0, %c0_i32 : i32, i32
  }
  func.func @transform_1(%arg0: i32) -> (i32, i32) {
    %c0_i32 = arith.constant 0 : i32
    %c0_i32_0 = arith.constant 0 : i32
    return %arg0, %c0_i32 : i32, i32
  }
}

module attributes {stable_mosaic.version = 11 : i64} {
  func.func @_mix_kernel_mxu(%arg0: i32, %arg1: memref<17xi32, #tpu.memory_space<smem>>, %arg2: memref<512x96xf32, #tpu.memory_space<vmem>>, %arg3: memref<1x96x96xf32, #tpu.memory_space<vmem>>, %arg4: memref<512x96xf32, #tpu.memory_space<vmem>>) attributes {dimension_semantics = [#tpu.dimension_semantics<parallel>], iteration_bounds = array<i64: 17>, scalar_prefetch = 1 : i64, scratch_operands = 0 : i64, tpu.core_type = #tpu.core_type<tc>, window_params = [{transform_indices = @transform_0, window_bounds = array<i64: 512, 96>}, {transform_indices = @transform_1, window_bounds = array<i64: 1, 96, 96>}, {transform_indices = @transform_2, window_bounds = array<i64: 512, 96>}]} {
    %c0 = arith.constant 0 : index
    %c0_0 = arith.constant 0 : index
    %0 = vector.load %arg2[%c0, %c0_0] : memref<512x96xf32, #tpu.memory_space<vmem>>, vector<512x96xf32>
    %1 = arith.truncf %0 : vector<512x96xf32> to vector<512x96xbf16>
    %c0_1 = arith.constant 0 : index
    %c0_2 = arith.constant 0 : index
    %c0_3 = arith.constant 0 : index
    %2 = vector.load %arg3[%c0_1, %c0_2, %c0_3] : memref<1x96x96xf32, #tpu.memory_space<vmem>>, vector<1x96x96xf32>
    %3 = vector.shape_cast %2 : vector<1x96x96xf32> to vector<96x96xf32>
    %4 = arith.truncf %3 : vector<96x96xf32> to vector<96x96xbf16>
    %cst = arith.constant dense<0.000000e+00> : vector<512x96xf32>
    %5 = tpu.matmul %1, %4, %cst {dimension_numbers = #tpu.dot_dimension_numbers<[1], [0], [0], [1], [0, 0, 1, 1], [], []>} : vector<512x96xbf16>, vector<96x96xbf16>, vector<512x96xf32> -> vector<512x96xf32>
    %c0_4 = arith.constant 0 : index
    %c0_5 = arith.constant 0 : index
    %6 = vector.load %arg4[%c0_4, %c0_5] : memref<512x96xf32, #tpu.memory_space<vmem>>, vector<512x96xf32>
    tpu.vector_store %arg4[%c0_4, %c0_5], %5 {strides = array<i32>} : memref<512x96xf32, #tpu.memory_space<vmem>>, vector<512x96xf32>,
    return
  }
  func.func @transform_0(%arg0: i32, %arg1: memref<17xi32, #tpu.memory_space<smem>>) -> (i32, i32) {
    %c0_i32 = arith.constant 0 : i32
    %c0_i32_0 = arith.constant 0 : i32
    return %arg0, %c0_i32 : i32, i32
  }
  func.func @transform_1(%arg0: i32, %arg1: memref<17xi32, #tpu.memory_space<smem>>) -> (i32, i32, i32) {
    %0 = arith.index_cast %arg0 : i32 to index
    %1 = memref.load %arg1[%0] : memref<17xi32, #tpu.memory_space<smem>>
    %c0_i32 = arith.constant 0 : i32
    %c0_i32_0 = arith.constant 0 : i32
    %c0_i32_1 = arith.constant 0 : i32
    return %1, %c0_i32, %c0_i32_0 : i32, i32, i32
  }
  func.func @transform_2(%arg0: i32, %arg1: memref<17xi32, #tpu.memory_space<smem>>) -> (i32, i32) {
    %c0_i32 = arith.constant 0 : i32
    %c0_i32_0 = arith.constant 0 : i32
    return %arg0, %c0_i32 : i32, i32
  }
}

module attributes {stable_mosaic.version = 11 : i64} {
  func.func @_relu_pool_kernel(%arg0: i32, %arg1: memref<1x16x2x16x192xf32, #tpu.memory_space<vmem>>, %arg2: memref<1x16x16x96xf32, #tpu.memory_space<vmem>>) attributes {dimension_semantics = [#tpu.dimension_semantics<parallel>], iteration_bounds = array<i64: 2>, scalar_prefetch = 0 : i64, scratch_operands = 0 : i64, tpu.core_type = #tpu.core_type<tc>, window_params = [{transform_indices = @transform_0, window_bounds = array<i64: 1, 16, 2, 16, 192>}, {transform_indices = @transform_1, window_bounds = array<i64: 1, 16, 16, 96>}]} {
    %c0 = arith.constant 0 : index
    %c0_0 = arith.constant 0 : index
    %c0_1 = arith.constant 0 : index
    %c0_2 = arith.constant 0 : index
    %c0_3 = arith.constant 0 : index
    %0 = vector.load %arg1[%c0, %c0_0, %c0_1, %c0_2, %c0_3] : memref<1x16x2x16x192xf32, #tpu.memory_space<vmem>>, vector<1x16x1x16x192xf32>
    %1 = vector.shape_cast %0 : vector<1x16x1x16x192xf32> to vector<16x16x192xf32>
    %c0_4 = arith.constant 0 : index
    %c0_5 = arith.constant 0 : index
    %c1 = arith.constant 1 : index
    %c0_6 = arith.constant 0 : index
    %c0_7 = arith.constant 0 : index
    %2 = vector.load %arg1[%c0_4, %c0_5, %c1, %c0_6, %c0_7] : memref<1x16x2x16x192xf32, #tpu.memory_space<vmem>>, vector<1x16x1x16x192xf32>
    %3 = vector.shape_cast %2 : vector<1x16x1x16x192xf32> to vector<16x16x192xf32>
    %4 = arith.maximumf %1, %3 : vector<16x16x192xf32>
    %5 = vector.extract_strided_slice %4 {offsets = [0, 0, 0], sizes = [16, 16, 96], strides = [1, 1, 1]} : vector<16x16x192xf32> to vector<16x16x96xf32>
    %6 = vector.extract_strided_slice %4 {offsets = [0, 0, 96], sizes = [16, 16, 96], strides = [1, 1, 1]} : vector<16x16x192xf32> to vector<16x16x96xf32>
    %7 = arith.maximumf %5, %6 : vector<16x16x96xf32>
    %cst = arith.constant 0.000000e+00 : f32
    %8 = vector.broadcast %cst : f32 to vector<16x16x96xf32>
    %9 = arith.maximumf %7, %8 : vector<16x16x96xf32>
    %c0_8 = arith.constant 0 : index
    %c0_9 = arith.constant 0 : index
    %c0_10 = arith.constant 0 : index
    %c0_11 = arith.constant 0 : index
    %10 = vector.load %arg2[%c0_8, %c0_9, %c0_10, %c0_11] : memref<1x16x16x96xf32, #tpu.memory_space<vmem>>, vector<1x16x16x96xf32>
    %11 = vector.shape_cast %10 : vector<1x16x16x96xf32> to vector<16x16x96xf32>
    %12 = vector.shape_cast %9 : vector<16x16x96xf32> to vector<1x16x16x96xf32>
    tpu.vector_store %arg2[%c0_8, %c0_9, %c0_10, %c0_11], %12 {strides = array<i32>} : memref<1x16x16x96xf32, #tpu.memory_space<vmem>>, vector<1x16x16x96xf32>,
    return
  }
  func.func @transform_0(%arg0: i32) -> (i32, i32, i32, i32, i32) {
    %c0_i32 = arith.constant 0 : i32
    %c0_i32_0 = arith.constant 0 : i32
    %c0_i32_1 = arith.constant 0 : i32
    %c0_i32_2 = arith.constant 0 : i32
    %c0_i32_3 = arith.constant 0 : i32
    return %arg0, %c0_i32, %c0_i32_0, %c0_i32_1, %c0_i32_2 : i32, i32, i32, i32, i32
  }
  func.func @transform_1(%arg0: i32) -> (i32, i32, i32, i32) {
    %c0_i32 = arith.constant 0 : i32
    %c0_i32_0 = arith.constant 0 : i32
    %c0_i32_1 = arith.constant 0 : i32
    %c0_i32_2 = arith.constant 0 : i32
    return %arg0, %c0_i32, %c0_i32_0, %c0_i32_1 : i32, i32, i32, i32
  }
}

module attributes {stable_mosaic.version = 11 : i64} {
  func.func @_mix_kernel_mxu(%arg0: i32, %arg1: memref<6xi32, #tpu.memory_space<smem>>, %arg2: memref<512x96xf32, #tpu.memory_space<vmem>>, %arg3: memref<1x96x192xf32, #tpu.memory_space<vmem>>, %arg4: memref<512x192xf32, #tpu.memory_space<vmem>>) attributes {dimension_semantics = [#tpu.dimension_semantics<parallel>], iteration_bounds = array<i64: 6>, scalar_prefetch = 1 : i64, scratch_operands = 0 : i64, tpu.core_type = #tpu.core_type<tc>, window_params = [{transform_indices = @transform_0, window_bounds = array<i64: 512, 96>}, {transform_indices = @transform_1, window_bounds = array<i64: 1, 96, 192>}, {transform_indices = @transform_2, window_bounds = array<i64: 512, 192>}]} {
    %c0 = arith.constant 0 : index
    %c0_0 = arith.constant 0 : index
    %0 = vector.load %arg2[%c0, %c0_0] : memref<512x96xf32, #tpu.memory_space<vmem>>, vector<512x96xf32>
    %1 = arith.truncf %0 : vector<512x96xf32> to vector<512x96xbf16>
    %c0_1 = arith.constant 0 : index
    %c0_2 = arith.constant 0 : index
    %c0_3 = arith.constant 0 : index
    %2 = vector.load %arg3[%c0_1, %c0_2, %c0_3] : memref<1x96x192xf32, #tpu.memory_space<vmem>>, vector<1x96x192xf32>
    %3 = vector.shape_cast %2 : vector<1x96x192xf32> to vector<96x192xf32>
    %4 = arith.truncf %3 : vector<96x192xf32> to vector<96x192xbf16>
    %cst = arith.constant dense<0.000000e+00> : vector<512x192xf32>
    %5 = tpu.matmul %1, %4, %cst {dimension_numbers = #tpu.dot_dimension_numbers<[1], [0], [0], [1], [0, 0, 1, 1], [], []>} : vector<512x96xbf16>, vector<96x192xbf16>, vector<512x192xf32> -> vector<512x192xf32>
    %c0_4 = arith.constant 0 : index
    %c0_5 = arith.constant 0 : index
    %6 = vector.load %arg4[%c0_4, %c0_5] : memref<512x192xf32, #tpu.memory_space<vmem>>, vector<512x192xf32>
    tpu.vector_store %arg4[%c0_4, %c0_5], %5 {strides = array<i32>} : memref<512x192xf32, #tpu.memory_space<vmem>>, vector<512x192xf32>,
    return
  }
  func.func @transform_0(%arg0: i32, %arg1: memref<6xi32, #tpu.memory_space<smem>>) -> (i32, i32) {
    %c0_i32 = arith.constant 0 : i32
    %c0_i32_0 = arith.constant 0 : i32
    return %arg0, %c0_i32 : i32, i32
  }
  func.func @transform_1(%arg0: i32, %arg1: memref<6xi32, #tpu.memory_space<smem>>) -> (i32, i32, i32) {
    %0 = arith.index_cast %arg0 : i32 to index
    %1 = memref.load %arg1[%0] : memref<6xi32, #tpu.memory_space<smem>>
    %c0_i32 = arith.constant 0 : i32
    %c0_i32_0 = arith.constant 0 : i32
    %c0_i32_1 = arith.constant 0 : i32
    return %1, %c0_i32, %c0_i32_0 : i32, i32, i32
  }
  func.func @transform_2(%arg0: i32, %arg1: memref<6xi32, #tpu.memory_space<smem>>) -> (i32, i32) {
    %c0_i32 = arith.constant 0 : i32
    %c0_i32_0 = arith.constant 0 : i32
    return %arg0, %c0_i32 : i32, i32
  }
}

module attributes {stable_mosaic.version = 11 : i64} {
  func.func @_relu_kernel(%arg0: i32, %arg1: memref<48x1024xf32, #tpu.memory_space<vmem>>, %arg2: memref<48x1024xf32, #tpu.memory_space<vmem>>) attributes {dimension_semantics = [#tpu.dimension_semantics<parallel>], iteration_bounds = array<i64: 2>, scalar_prefetch = 0 : i64, scratch_operands = 0 : i64, tpu.core_type = #tpu.core_type<tc>, window_params = [{transform_indices = @transform_0, window_bounds = array<i64: 48, 1024>}, {transform_indices = @transform_1, window_bounds = array<i64: 48, 1024>}]} {
    %c0 = arith.constant 0 : index
    %c0_0 = arith.constant 0 : index
    %0 = vector.load %arg1[%c0, %c0_0] : memref<48x1024xf32, #tpu.memory_space<vmem>>, vector<48x1024xf32>
    %cst = arith.constant 0.000000e+00 : f32
    %1 = vector.broadcast %cst : f32 to vector<48x1024xf32>
    %2 = arith.maximumf %0, %1 : vector<48x1024xf32>
    %c0_1 = arith.constant 0 : index
    %c0_2 = arith.constant 0 : index
    %3 = vector.load %arg2[%c0_1, %c0_2] : memref<48x1024xf32, #tpu.memory_space<vmem>>, vector<48x1024xf32>
    tpu.vector_store %arg2[%c0_1, %c0_2], %2 {strides = array<i32>} : memref<48x1024xf32, #tpu.memory_space<vmem>>, vector<48x1024xf32>,
    return
  }
  func.func @transform_0(%arg0: i32) -> (i32, i32) {
    %c0_i32 = arith.constant 0 : i32
    %c0_i32_0 = arith.constant 0 : i32
    return %arg0, %c0_i32 : i32, i32
  }
  func.func @transform_1(%arg0: i32) -> (i32, i32) {
    %c0_i32 = arith.constant 0 : i32
    %c0_i32_0 = arith.constant 0 : i32
    return %arg0, %c0_i32 : i32, i32
  }
}

module attributes {stable_mosaic.version = 11 : i64} {
  func.func @_mix_kernel_mxu(%arg0: i32, %arg1: memref<6xi32, #tpu.memory_space<smem>>, %arg2: memref<512x192xf32, #tpu.memory_space<vmem>>, %arg3: memref<1x192x192xf32, #tpu.memory_space<vmem>>, %arg4: memref<512x192xf32, #tpu.memory_space<vmem>>) attributes {dimension_semantics = [#tpu.dimension_semantics<parallel>], iteration_bounds = array<i64: 6>, scalar_prefetch = 1 : i64, scratch_operands = 0 : i64, tpu.core_type = #tpu.core_type<tc>, window_params = [{transform_indices = @transform_0, window_bounds = array<i64: 512, 192>}, {transform_indices = @transform_1, window_bounds = array<i64: 1, 192, 192>}, {transform_indices = @transform_2, window_bounds = array<i64: 512, 192>}]} {
    %c0 = arith.constant 0 : index
    %c0_0 = arith.constant 0 : index
    %0 = vector.load %arg2[%c0, %c0_0] : memref<512x192xf32, #tpu.memory_space<vmem>>, vector<512x192xf32>
    %1 = arith.truncf %0 : vector<512x192xf32> to vector<512x192xbf16>
    %c0_1 = arith.constant 0 : index
    %c0_2 = arith.constant 0 : index
    %c0_3 = arith.constant 0 : index
    %2 = vector.load %arg3[%c0_1, %c0_2, %c0_3] : memref<1x192x192xf32, #tpu.memory_space<vmem>>, vector<1x192x192xf32>
    %3 = vector.shape_cast %2 : vector<1x192x192xf32> to vector<192x192xf32>
    %4 = arith.truncf %3 : vector<192x192xf32> to vector<192x192xbf16>
    %cst = arith.constant dense<0.000000e+00> : vector<512x192xf32>
    %5 = tpu.matmul %1, %4, %cst {dimension_numbers = #tpu.dot_dimension_numbers<[1], [0], [0], [1], [0, 0, 1, 1], [], []>} : vector<512x192xbf16>, vector<192x192xbf16>, vector<512x192xf32> -> vector<512x192xf32>
    %c0_4 = arith.constant 0 : index
    %c0_5 = arith.constant 0 : index
    %6 = vector.load %arg4[%c0_4, %c0_5] : memref<512x192xf32, #tpu.memory_space<vmem>>, vector<512x192xf32>
    tpu.vector_store %arg4[%c0_4, %c0_5], %5 {strides = array<i32>} : memref<512x192xf32, #tpu.memory_space<vmem>>, vector<512x192xf32>,
    return
  }
  func.func @transform_0(%arg0: i32, %arg1: memref<6xi32, #tpu.memory_space<smem>>) -> (i32, i32) {
    %c0_i32 = arith.constant 0 : i32
    %c0_i32_0 = arith.constant 0 : i32
    return %arg0, %c0_i32 : i32, i32
  }
  func.func @transform_1(%arg0: i32, %arg1: memref<6xi32, #tpu.memory_space<smem>>) -> (i32, i32, i32) {
    %0 = arith.index_cast %arg0 : i32 to index
    %1 = memref.load %arg1[%0] : memref<6xi32, #tpu.memory_space<smem>>
    %c0_i32 = arith.constant 0 : i32
    %c0_i32_0 = arith.constant 0 : i32
    %c0_i32_1 = arith.constant 0 : i32
    return %1, %c0_i32, %c0_i32_0 : i32, i32, i32
  }
  func.func @transform_2(%arg0: i32, %arg1: memref<6xi32, #tpu.memory_space<smem>>) -> (i32, i32) {
    %c0_i32 = arith.constant 0 : i32
    %c0_i32_0 = arith.constant 0 : i32
    return %arg0, %c0_i32 : i32, i32
  }
}

module attributes {stable_mosaic.version = 11 : i64} {
  func.func @_relu_pool_kernel(%arg0: i32, %arg1: memref<1x8x2x8x384xf32, #tpu.memory_space<vmem>>, %arg2: memref<1x8x8x192xf32, #tpu.memory_space<vmem>>) attributes {dimension_semantics = [#tpu.dimension_semantics<parallel>], iteration_bounds = array<i64: 2>, scalar_prefetch = 0 : i64, scratch_operands = 0 : i64, tpu.core_type = #tpu.core_type<tc>, window_params = [{transform_indices = @transform_0, window_bounds = array<i64: 1, 8, 2, 8, 384>}, {transform_indices = @transform_1, window_bounds = array<i64: 1, 8, 8, 192>}]} {
    %c0 = arith.constant 0 : index
    %c0_0 = arith.constant 0 : index
    %c0_1 = arith.constant 0 : index
    %c0_2 = arith.constant 0 : index
    %c0_3 = arith.constant 0 : index
    %0 = vector.load %arg1[%c0, %c0_0, %c0_1, %c0_2, %c0_3] : memref<1x8x2x8x384xf32, #tpu.memory_space<vmem>>, vector<1x8x1x8x384xf32>
    %1 = vector.shape_cast %0 : vector<1x8x1x8x384xf32> to vector<8x8x384xf32>
    %c0_4 = arith.constant 0 : index
    %c0_5 = arith.constant 0 : index
    %c1 = arith.constant 1 : index
    %c0_6 = arith.constant 0 : index
    %c0_7 = arith.constant 0 : index
    %2 = vector.load %arg1[%c0_4, %c0_5, %c1, %c0_6, %c0_7] : memref<1x8x2x8x384xf32, #tpu.memory_space<vmem>>, vector<1x8x1x8x384xf32>
    %3 = vector.shape_cast %2 : vector<1x8x1x8x384xf32> to vector<8x8x384xf32>
    %4 = arith.maximumf %1, %3 : vector<8x8x384xf32>
    %5 = vector.extract_strided_slice %4 {offsets = [0, 0, 0], sizes = [8, 8, 192], strides = [1, 1, 1]} : vector<8x8x384xf32> to vector<8x8x192xf32>
    %6 = vector.extract_strided_slice %4 {offsets = [0, 0, 192], sizes = [8, 8, 192], strides = [1, 1, 1]} : vector<8x8x384xf32> to vector<8x8x192xf32>
    %7 = arith.maximumf %5, %6 : vector<8x8x192xf32>
    %cst = arith.constant 0.000000e+00 : f32
    %8 = vector.broadcast %cst : f32 to vector<8x8x192xf32>
    %9 = arith.maximumf %7, %8 : vector<8x8x192xf32>
    %c0_8 = arith.constant 0 : index
    %c0_9 = arith.constant 0 : index
    %c0_10 = arith.constant 0 : index
    %c0_11 = arith.constant 0 : index
    %10 = vector.load %arg2[%c0_8, %c0_9, %c0_10, %c0_11] : memref<1x8x8x192xf32, #tpu.memory_space<vmem>>, vector<1x8x8x192xf32>
    %11 = vector.shape_cast %10 : vector<1x8x8x192xf32> to vector<8x8x192xf32>
    %12 = vector.shape_cast %9 : vector<8x8x192xf32> to vector<1x8x8x192xf32>
    tpu.vector_store %arg2[%c0_8, %c0_9, %c0_10, %c0_11], %12 {strides = array<i32>} : memref<1x8x8x192xf32, #tpu.memory_space<vmem>>, vector<1x8x8x192xf32>,
    return
  }
  func.func @transform_0(%arg0: i32) -> (i32, i32, i32, i32, i32) {
    %c0_i32 = arith.constant 0 : i32
    %c0_i32_0 = arith.constant 0 : i32
    %c0_i32_1 = arith.constant 0 : i32
    %c0_i32_2 = arith.constant 0 : i32
    %c0_i32_3 = arith.constant 0 : i32
    return %arg0, %c0_i32, %c0_i32_0, %c0_i32_1, %c0_i32_2 : i32, i32, i32, i32, i32
  }
  func.func @transform_1(%arg0: i32) -> (i32, i32, i32, i32) {
    %c0_i32 = arith.constant 0 : i32
    %c0_i32_0 = arith.constant 0 : i32
    %c0_i32_1 = arith.constant 0 : i32
    %c0_i32_2 = arith.constant 0 : i32
    return %arg0, %c0_i32, %c0_i32_0, %c0_i32_1 : i32, i32, i32, i32
  }
}

module attributes {stable_mosaic.version = 11 : i64} {
  func.func @_mix_kernel_mxu(%arg0: i32, %arg1: memref<4xi32, #tpu.memory_space<smem>>, %arg2: memref<384x192xf32, #tpu.memory_space<vmem>>, %arg3: memref<1x192x192xf32, #tpu.memory_space<vmem>>, %arg4: memref<384x192xf32, #tpu.memory_space<vmem>>) attributes {dimension_semantics = [#tpu.dimension_semantics<parallel>], iteration_bounds = array<i64: 4>, scalar_prefetch = 1 : i64, scratch_operands = 0 : i64, tpu.core_type = #tpu.core_type<tc>, window_params = [{transform_indices = @transform_0, window_bounds = array<i64: 384, 192>}, {transform_indices = @transform_1, window_bounds = array<i64: 1, 192, 192>}, {transform_indices = @transform_2, window_bounds = array<i64: 384, 192>}]} {
    %c0 = arith.constant 0 : index
    %c0_0 = arith.constant 0 : index
    %0 = vector.load %arg2[%c0, %c0_0] : memref<384x192xf32, #tpu.memory_space<vmem>>, vector<384x192xf32>
    %1 = arith.truncf %0 : vector<384x192xf32> to vector<384x192xbf16>
    %c0_1 = arith.constant 0 : index
    %c0_2 = arith.constant 0 : index
    %c0_3 = arith.constant 0 : index
    %2 = vector.load %arg3[%c0_1, %c0_2, %c0_3] : memref<1x192x192xf32, #tpu.memory_space<vmem>>, vector<1x192x192xf32>
    %3 = vector.shape_cast %2 : vector<1x192x192xf32> to vector<192x192xf32>
    %4 = arith.truncf %3 : vector<192x192xf32> to vector<192x192xbf16>
    %cst = arith.constant dense<0.000000e+00> : vector<384x192xf32>
    %5 = tpu.matmul %1, %4, %cst {dimension_numbers = #tpu.dot_dimension_numbers<[1], [0], [0], [1], [0, 0, 1, 1], [], []>} : vector<384x192xbf16>, vector<192x192xbf16>, vector<384x192xf32> -> vector<384x192xf32>
    %c0_4 = arith.constant 0 : index
    %c0_5 = arith.constant 0 : index
    %6 = vector.load %arg4[%c0_4, %c0_5] : memref<384x192xf32, #tpu.memory_space<vmem>>, vector<384x192xf32>
    tpu.vector_store %arg4[%c0_4, %c0_5], %5 {strides = array<i32>} : memref<384x192xf32, #tpu.memory_space<vmem>>, vector<384x192xf32>,
    return
  }
  func.func @transform_0(%arg0: i32, %arg1: memref<4xi32, #tpu.memory_space<smem>>) -> (i32, i32) {
    %c0_i32 = arith.constant 0 : i32
    %c0_i32_0 = arith.constant 0 : i32
    return %arg0, %c0_i32 : i32, i32
  }
  func.func @transform_1(%arg0: i32, %arg1: memref<4xi32, #tpu.memory_space<smem>>) -> (i32, i32, i32) {
    %0 = arith.index_cast %arg0 : i32 to index
    %1 = memref.load %arg1[%0] : memref<4xi32, #tpu.memory_space<smem>>
    %c0_i32 = arith.constant 0 : i32
    %c0_i32_0 = arith.constant 0 : i32
    %c0_i32_1 = arith.constant 0 : i32
    return %1, %c0_i32, %c0_i32_0 : i32, i32, i32
  }
  func.func @transform_2(%arg0: i32, %arg1: memref<4xi32, #tpu.memory_space<smem>>) -> (i32, i32) {
    %c0_i32 = arith.constant 0 : i32
    %c0_i32_0 = arith.constant 0 : i32
    return %arg0, %c0_i32 : i32, i32
  }
}

module attributes {stable_mosaic.version = 11 : i64} {
  func.func @_relu_kernel(%arg0: i32, %arg1: memref<8x1024xf32, #tpu.memory_space<vmem>>, %arg2: memref<8x1024xf32, #tpu.memory_space<vmem>>) attributes {dimension_semantics = [#tpu.dimension_semantics<parallel>], iteration_bounds = array<i64: 3>, scalar_prefetch = 0 : i64, scratch_operands = 0 : i64, tpu.core_type = #tpu.core_type<tc>, window_params = [{transform_indices = @transform_0, window_bounds = array<i64: 8, 1024>}, {transform_indices = @transform_1, window_bounds = array<i64: 8, 1024>}]} {
    %c0 = arith.constant 0 : index
    %c0_0 = arith.constant 0 : index
    %0 = vector.load %arg1[%c0, %c0_0] : memref<8x1024xf32, #tpu.memory_space<vmem>>, vector<8x1024xf32>
    %cst = arith.constant 0.000000e+00 : f32
    %1 = vector.broadcast %cst : f32 to vector<8x1024xf32>
    %2 = arith.maximumf %0, %1 : vector<8x1024xf32>
    %c0_1 = arith.constant 0 : index
    %c0_2 = arith.constant 0 : index
    %3 = vector.load %arg2[%c0_1, %c0_2] : memref<8x1024xf32, #tpu.memory_space<vmem>>, vector<8x1024xf32>
    tpu.vector_store %arg2[%c0_1, %c0_2], %2 {strides = array<i32>} : memref<8x1024xf32, #tpu.memory_space<vmem>>, vector<8x1024xf32>,
    return
  }
  func.func @transform_0(%arg0: i32) -> (i32, i32) {
    %c0_i32 = arith.constant 0 : i32
    %c0_i32_0 = arith.constant 0 : i32
    return %arg0, %c0_i32 : i32, i32
  }
  func.func @transform_1(%arg0: i32) -> (i32, i32) {
    %c0_i32 = arith.constant 0 : i32
    %c0_i32_0 = arith.constant 0 : i32
    return %arg0, %c0_i32 : i32, i32
  }
}

module attributes {stable_mosaic.version = 11 : i64} {
  func.func @_mix_kernel_mxu(%arg0: i32, %arg1: memref<4xi32, #tpu.memory_space<smem>>, %arg2: memref<384x192xf32, #tpu.memory_space<vmem>>, %arg3: memref<1x192x128xf32, #tpu.memory_space<vmem>>, %arg4: memref<384x128xf32, #tpu.memory_space<vmem>>) attributes {dimension_semantics = [#tpu.dimension_semantics<parallel>], iteration_bounds = array<i64: 4>, scalar_prefetch = 1 : i64, scratch_operands = 0 : i64, tpu.core_type = #tpu.core_type<tc>, window_params = [{transform_indices = @transform_0, window_bounds = array<i64: 384, 192>}, {transform_indices = @transform_1, window_bounds = array<i64: 1, 192, 128>}, {transform_indices = @transform_2, window_bounds = array<i64: 384, 128>}]} {
    %c0 = arith.constant 0 : index
    %c0_0 = arith.constant 0 : index
    %0 = vector.load %arg2[%c0, %c0_0] : memref<384x192xf32, #tpu.memory_space<vmem>>, vector<384x192xf32>
    %1 = arith.truncf %0 : vector<384x192xf32> to vector<384x192xbf16>
    %c0_1 = arith.constant 0 : index
    %c0_2 = arith.constant 0 : index
    %c0_3 = arith.constant 0 : index
    %2 = vector.load %arg3[%c0_1, %c0_2, %c0_3] : memref<1x192x128xf32, #tpu.memory_space<vmem>>, vector<1x192x128xf32>
    %3 = vector.shape_cast %2 : vector<1x192x128xf32> to vector<192x128xf32>
    %4 = arith.truncf %3 : vector<192x128xf32> to vector<192x128xbf16>
    %cst = arith.constant dense<0.000000e+00> : vector<384x128xf32>
    %5 = tpu.matmul %1, %4, %cst {dimension_numbers = #tpu.dot_dimension_numbers<[1], [0], [0], [1], [0, 0, 1, 1], [], []>} : vector<384x192xbf16>, vector<192x128xbf16>, vector<384x128xf32> -> vector<384x128xf32>
    %c0_4 = arith.constant 0 : index
    %c0_5 = arith.constant 0 : index
    %6 = vector.load %arg4[%c0_4, %c0_5] : memref<384x128xf32, #tpu.memory_space<vmem>>, vector<384x128xf32>
    tpu.vector_store %arg4[%c0_4, %c0_5], %5 {strides = array<i32>} : memref<384x128xf32, #tpu.memory_space<vmem>>, vector<384x128xf32>,
    return
  }
  func.func @transform_0(%arg0: i32, %arg1: memref<4xi32, #tpu.memory_space<smem>>) -> (i32, i32) {
    %c0_i32 = arith.constant 0 : i32
    %c0_i32_0 = arith.constant 0 : i32
    return %arg0, %c0_i32 : i32, i32
  }
  func.func @transform_1(%arg0: i32, %arg1: memref<4xi32, #tpu.memory_space<smem>>) -> (i32, i32, i32) {
    %0 = arith.index_cast %arg0 : i32 to index
    %1 = memref.load %arg1[%0] : memref<4xi32, #tpu.memory_space<smem>>
    %c0_i32 = arith.constant 0 : i32
    %c0_i32_0 = arith.constant 0 : i32
    %c0_i32_1 = arith.constant 0 : i32
    return %1, %c0_i32, %c0_i32_0 : i32, i32, i32
  }
  func.func @transform_2(%arg0: i32, %arg1: memref<4xi32, #tpu.memory_space<smem>>) -> (i32, i32) {
    %c0_i32 = arith.constant 0 : i32
    %c0_i32_0 = arith.constant 0 : i32
    return %arg0, %c0_i32 : i32, i32
  }
}

module attributes {stable_mosaic.version = 11 : i64} {
  func.func @_relu_mean_kernel(%arg0: i32, %arg1: memref<1x8x8x10xf32, #tpu.memory_space<vmem>>, %arg2: memref<1x1x10xf32, #tpu.memory_space<vmem>>) attributes {dimension_semantics = [#tpu.dimension_semantics<parallel>], iteration_bounds = array<i64: 2>, scalar_prefetch = 0 : i64, scratch_operands = 0 : i64, tpu.core_type = #tpu.core_type<tc>, window_params = [{transform_indices = @transform_0, window_bounds = array<i64: 1, 8, 8, 10>}, {transform_indices = @transform_1, window_bounds = array<i64: 1, 1, 10>}]} {
    %c0 = arith.constant 0 : index
    %c0_0 = arith.constant 0 : index
    %c0_1 = arith.constant 0 : index
    %c0_2 = arith.constant 0 : index
    %0 = vector.load %arg1[%c0, %c0_0, %c0_1, %c0_2] : memref<1x8x8x10xf32, #tpu.memory_space<vmem>>, vector<1x8x8x10xf32>
    %cst = arith.constant 0.000000e+00 : f32
    %1 = vector.broadcast %cst : f32 to vector<1x8x8x10xf32>
    %2 = arith.maximumf %0, %1 : vector<1x8x8x10xf32>
    %cst_3 = arith.constant dense<0.000000e+00> : vector<1x10xf32>
    %3 = vector.multi_reduction <add>, %2, %cst_3 [1, 2] : vector<1x8x8x10xf32> to vector<1x10xf32>
    %cst_4 = arith.constant 1.562500e-02 : f32
    %4 = vector.broadcast %cst_4 : f32 to vector<1x10xf32>
    %5 = arith.mulf %3, %4 : vector<1x10xf32>
    %c0_5 = arith.constant 0 : index
    %c0_6 = arith.constant 0 : index
    %c0_7 = arith.constant 0 : index
    %6 = vector.load %arg2[%c0_5, %c0_6, %c0_7] : memref<1x1x10xf32, #tpu.memory_space<vmem>>, vector<1x1x10xf32>
    %7 = vector.shape_cast %6 : vector<1x1x10xf32> to vector<1x10xf32>
    %8 = vector.shape_cast %5 : vector<1x10xf32> to vector<1x1x10xf32>
    tpu.vector_store %arg2[%c0_5, %c0_6, %c0_7], %8 {strides = array<i32>} : memref<1x1x10xf32, #tpu.memory_space<vmem>>, vector<1x1x10xf32>,
    return
  }
  func.func @transform_0(%arg0: i32) -> (i32, i32, i32, i32) {
    %c0_i32 = arith.constant 0 : i32
    %c0_i32_0 = arith.constant 0 : i32
    %c0_i32_1 = arith.constant 0 : i32
    %c0_i32_2 = arith.constant 0 : i32
    return %arg0, %c0_i32, %c0_i32_0, %c0_i32_1 : i32, i32, i32, i32
  }
  func.func @transform_1(%arg0: i32) -> (i32, i32, i32) {
    %c0_i32 = arith.constant 0 : i32
    %c0_i32_0 = arith.constant 0 : i32
    %c0_i32_1 = arith.constant 0 : i32
    return %arg0, %c0_i32, %c0_i32_0 : i32, i32, i32
  }
}

</mosaic_0001>

<bundles_post_ra>
// kernel: wavelets_forward.14
= control target key start
LH: loop header
LB: loop body
LE: loop exit
PB: predicated region body
PF: predicated region fallthrough
CT: control target
= control target key end

     0   :  { %s1124_s0 = inlined_call_operand.vmem [shape: s32[17], index: 0, kind: input, shape index: {}]   ;;  %s1125_s1 = inlined_call_operand.vmem [shape: f32[8704,1], index: 1, kind: input, shape index: {}]   ;;  %s1126_s2 = inlined_call_operand.vmem [shape: f32[4,1,96], index: 2, kind: input, shape index: {}]   ;;  %s1127_s3 = inlined_call_operand.vmem [shape: f32[8704,96], index: 3, kind: output, shape index: {}]  }
   0x1   :  { %s8_s14 = sshll.u32 %s1124_s0, 4  ;;  %s9_s14 = int_to_ptr.vmem [resolvable:$true] %s8_s14 }
   0x2   :  { %s784_s15 = scalar_lea.vmem %s9_s14, 16  ;;  %p789_p1 = scmp.lt.s32.totalorder %s9_s14, %s9_s14 }
   0x3   :  { %p785_p0 = scmp.ne.s32.totalorder %s9_s14, %s784_s15  ;;  %p790_p2 = scmp.lt.s32.totalorder %s784_s15, %s784_s15 }
   0x5   :  { %p791_p3 = por %p790_p2, %p789_p1 }
   0x7   :  { %p792_p4 = pnand %p791_p3, %p785_p0 }
   0x9   :  { %795 = shalt.err (!%p792_p4)  }
   0xa   :  { %s806_s16 = smov [#allocation3]  }
   0xb   :  { %11 = dma.vmem_to_smem %s9_s14, 16, %s806_s16, [#allocation2] }
   0xc   :  { %800 = dma.done.wait [#allocation2], 16 }
   0xd   :  { %801 = vsyncadd [#allocation2], 4294967280 }
   0xe   :  { %13 = sfence }
   0xf   :  { %s831_s17 = smov 0  }
  0x10 LB: > { %s760_s0 = sadd.s32 4294967295, %s804_s17   ;;  %p764_p5 = scmp.ge.s32.totalorder %s804_s17, 1  ;;  %s804_s17 = sphi %s831_s17, %s19_s17  }
  0x11   : > { %p132_p6 = scmp.lt.s32.totalorder %s804_s17, 18 }
  0x13   : > { %p133_p7 = pnand %p764_p5, %p132_p6 }
  0x14   : > { %s765_s18 = sshll.u32 (!%p133_p7), %s760_s0, 6  ;;  %s164_s23 = sld [smem:[#allocation3 + %s760_s0]] (!%p133_p7) }
  0x15   : > { %136 = sbr.rel (%p133_p7) target bundleno = 281 (0x119), region = 28  ;;  %p159_p8 = scmp.lt.s32.totalorder (!%p133_p7), %s765_s18, 1087 }
  0x1a   : > { %v807_v0 = vmov 0   ;;  %s1129_s18 = smov (!%p159_p8, %s765_s18), 1087  ;;  %p165_p9 = scmp.lt.s32.totalorder %s164_s23, 3  ;;  %vm630_vm0 = vcmask 785408  }
  0x1b   : > { %783 = vset.pattern.permute.xlu1 %v807_v0  ;;  %782 = vset.pattern.permute.xlu0 %v807_v0  ;;  %s766_s19 = sshll.u32 %s1129_s18, 3 }
  0x1c   : > { %s849_s22 = scalar_lea.vmem %s1125_s1, %s766_s19  ;;  %s1131_s23 = smov (!%p165_p9, %s164_s23), 3 }
  0x1d   : > { %v177_v1 = vld [vmem:[%s849_s22 + $0x10] sm:$0xff]  ;;  %v175_v2 = vld [vmem:[%s849_s22] sm:$0xff]  ;;  %v178_v3 = vld [vmem:[%s849_s22 + $0x18] sm:$0xff]  ;;  %s167_s26 = scalar_lea.vmem %s1126_s2, %s1131_s23  ;;  %s927_s29 = scalar_lea.vmem %s1127_s3, %s766_s19 }
  0x1e   : > { %252 = vperm.xlu1 %783, %v177_v1   ;;  %242 = vperm.xlu0 %782, %v175_v2   ;;  %v176_v4 = vld [vmem:[%s849_s22 + $0x8] sm:$0xff]  ;;  %v179_v6 = vld [vmem:[%s849_s22 + $0x20] sm:$0xff]  ;;  %v182_v7 = vld [vmem:[%s849_s22 + $0x38] sm:$0xff] }
  0x1f   : > { %v180_v5 = vld [vmem:[%s849_s22 + $0x28] sm:$0xff]  ;;  %v181_v8 = vld [vmem:[%s849_s22 + $0x30] sm:$0xff]  ;;  %v183_v10 = vld [vmem:[%s849_s22 + $0x40] sm:$0xff] }
  0x20   : > { %v184_v9 = vld [vmem:[%s849_s22 + $0x48] sm:$0xff]  ;;  %v186_v11 = vld [vmem:[%s849_s22 + $0x58] sm:$0xff]  ;;  %v185_v12 = vld [vmem:[%s849_s22 + $0x50] sm:$0xff] }
  0x21   : > { %v188_v13 = vld [vmem:[%s849_s22 + $0x68] sm:$0xff]  ;;  %v187_v14 = vld [vmem:[%s849_s22 + $0x60] sm:$0xff]  ;;  %v190_v15 = vld [vmem:[%s849_s22 + $0x78] sm:$0xff] }
  0x22   : > { %257 = vperm.xlu1 %783, %v178_v3   ;;  %247 = vperm.xlu0 %782, %v176_v4   ;;  %v189_v16 = vld [vmem:[%s849_s22 + $0x70] sm:$0xff]  ;;  %v192_v17 = vld [vmem:[%s849_s22 + $0x88] sm:$0xff]  ;;  %v191_v18 = vld [vmem:[%s849_s22 + $0x80] sm:$0xff] }
  0x23   : > { %v194_v19 = vld [vmem:[%s849_s22 + $0x98] sm:$0xff]  ;;  %v193_v20 = vld [vmem:[%s849_s22 + $0x90] sm:$0xff]  ;;  %v196_v21 = vld [vmem:[%s849_s22 + $0xa8] sm:$0xff] }
  0x24   : > { %v195_v22 = vld [vmem:[%s849_s22 + $0xa0] sm:$0xff]  ;;  %v198_v23 = vld [vmem:[%s849_s22 + $0xb8] sm:$0xff]  ;;  %v197_v24 = vld [vmem:[%s849_s22 + $0xb0] sm:$0xff] }
  0x25   : > { %v200_v25 = vld [vmem:[%s849_s22 + $0xc8] sm:$0xff]  ;;  %v199_v26 = vld [vmem:[%s849_s22 + $0xc0] sm:$0xff]  ;;  %v202_v27 = vld [vmem:[%s849_s22 + $0xd8] sm:$0xff] }
  0x26   : > { %267 = vperm.xlu1 %783, %v180_v5   ;;  %262 = vperm.xlu0 %782, %v179_v6   ;;  %v201_v28 = vld [vmem:[%s849_s22 + $0xd0] sm:$0xff]  ;;  %v204_v29 = vld [vmem:[%s849_s22 + $0xe8] sm:$0xff]  ;;  %v203_v30 = vld [vmem:[%s849_s22 + $0xe0] sm:$0xff] }
  0x27   : > { %v206_v31 = vld [vmem:[%s849_s22 + $0xf8] sm:$0xff]  ;;  %v205_v32 = vld [vmem:[%s849_s22 + $0xf0] sm:$0xff]  ;;  %v208_v33 = vld [vmem:[%s849_s22 + $0x108] sm:$0xff] }
  0x28   : > { %v207_v34 = vld [vmem:[%s849_s22 + $0x100] sm:$0xff]  ;;  %v210_v35 = vld [vmem:[%s849_s22 + $0x118] sm:$0xff]  ;;  %v209_v36 = vld [vmem:[%s849_s22 + $0x110] sm:$0xff] }
  0x29   : > { %v212_v37 = vld [vmem:[%s849_s22 + $0x128] sm:$0xff]  ;;  %v211_v38 = vld [vmem:[%s849_s22 + $0x120] sm:$0xff]  ;;  %v214_v39 = vld [vmem:[%s849_s22 + $0x138] sm:$0xff] }
  0x2a   : > { %277 = vperm.xlu1 %783, %v182_v7   ;;  %272 = vperm.xlu0 %782, %v181_v8   ;;  %v213_v40 = vld [vmem:[%s849_s22 + $0x130] sm:$0xff]  ;;  %v216_v41 = vld [vmem:[%s849_s22 + $0x148] sm:$0xff]  ;;  %v215_v42 = vld [vmem:[%s849_s22 + $0x140] sm:$0xff] }
  0x2b   : > { %v218_v43 = vld [vmem:[%s849_s22 + $0x158] sm:$0xff]  ;;  %v217_v44 = vld [vmem:[%s849_s22 + $0x150] sm:$0xff]  ;;  %v220_v45 = vld [vmem:[%s849_s22 + $0x168] sm:$0xff] }
  0x2c   : > { %v219_v46 = vld [vmem:[%s849_s22 + $0x160] sm:$0xff]  ;;  %v222_v47 = vld [vmem:[%s849_s22 + $0x178] sm:$0xff]  ;;  %v221_v48 = vld [vmem:[%s849_s22 + $0x170] sm:$0xff] }
  0x2d   : > { %v224_v49 = vld [vmem:[%s849_s22 + $0x188] sm:$0xff]  ;;  %v223_v50 = vld [vmem:[%s849_s22 + $0x180] sm:$0xff]  ;;  %v226_v51 = vld [vmem:[%s849_s22 + $0x198] sm:$0xff] }
  0x2e   : > { %287 = vperm.xlu1 %783, %v184_v9   ;;  %282 = vperm.xlu0 %782, %v183_v10   ;;  %v225_v52 = vld [vmem:[%s849_s22 + $0x190] sm:$0xff]  ;;  %v228_v53 = vld [vmem:[%s849_s22 + $0x1a8] sm:$0xff]  ;;  %v227_v54 = vld [vmem:[%s849_s22 + $0x1a0] sm:$0xff] }
  0x2f   : > { %v230_v55 = vld [vmem:[%s849_s22 + $0x1b8] sm:$0xff]  ;;  %v229_v56 = vld [vmem:[%s849_s22 + $0x1b0] sm:$0xff]  ;;  %v232_v57 = vld [vmem:[%s849_s22 + $0x1c8] sm:$0xff] }
  0x30   : > { %v231_v58 = vld [vmem:[%s849_s22 + $0x1c0] sm:$0xff]  ;;  %v234_v59 = vld [vmem:[%s849_s22 + $0x1d8] sm:$0xff]  ;;  %v233_v60 = vld [vmem:[%s849_s22 + $0x1d0] sm:$0xff] }
  0x31   : > { %v236_v61 = vld [vmem:[%s849_s22 + $0x1e8] sm:$0xff]  ;;  %v235_v62 = vld [vmem:[%s849_s22 + $0x1e0] sm:$0xff]  ;;  %v238_v0 = vld [vmem:[%s849_s22 + $0x1f8] sm:$0xff] }
  0x32   : > { %297 = vperm.xlu1 %783, %v186_v11   ;;  %292 = vperm.xlu0 %782, %v185_v12   ;;  %v918_v63 = vld [vmem:[%s167_s26] ss:$0 sm:$0xff]  ;;  %v237_v1 = vld [vmem:[%s849_s22 + $0x1f0] sm:$0xff] }
  0x36   : > { %307 = vperm.xlu1 %783, %v188_v13   ;;  %302 = vperm.xlu0 %782, %v187_v14  }
  0x3a   : > { %317 = vperm.xlu1 %783, %v190_v15   ;;  %312 = vperm.xlu0 %782, %v189_v16  }
  0x3e   : > { %327 = vperm.xlu1 %783, %v192_v17   ;;  %322 = vperm.xlu0 %782, %v191_v18  }
  0x42   : > { %337 = vperm.xlu1 %783, %v194_v19   ;;  %332 = vperm.xlu0 %782, %v193_v20  }
  0x46   : > { %347 = vperm.xlu1 %783, %v196_v21   ;;  %342 = vperm.xlu0 %782, %v195_v22  }
  0x4a   : > { %357 = vperm.xlu1 %783, %v198_v23   ;;  %352 = vperm.xlu0 %782, %v197_v24  }
  0x4e   : > { %367 = vperm.xlu1 %783, %v200_v25   ;;  %362 = vperm.xlu0 %782, %v199_v26  }
  0x52   : > { %377 = vperm.xlu1 %783, %v202_v27   ;;  %372 = vperm.xlu0 %782, %v201_v28  }
  0x56   : > { %387 = vperm.xlu1 %783, %v204_v29   ;;  %382 = vperm.xlu0 %782, %v203_v30  }
  0x5a   : > { %397 = vperm.xlu1 %783, %v206_v31   ;;  %392 = vperm.xlu0 %782, %v205_v32  }
  0x5e   : > { %407 = vperm.xlu1 %783, %v208_v33   ;;  %402 = vperm.xlu0 %782, %v207_v34  }
  0x62   : > { %417 = vperm.xlu1 %783, %v210_v35   ;;  %412 = vperm.xlu0 %782, %v209_v36  }
  0x66   : > { %427 = vperm.xlu1 %783, %v212_v37   ;;  %422 = vperm.xlu0 %782, %v211_v38  }
  0x6a   : > { %437 = vperm.xlu1 %783, %v214_v39   ;;  %432 = vperm.xlu0 %782, %v213_v40  }
  0x6e   : > { %447 = vperm.xlu1 %783, %v216_v41   ;;  %442 = vperm.xlu0 %782, %v215_v42  }
  0x72   : > { %457 = vperm.xlu1 %783, %v218_v43   ;;  %452 = vperm.xlu0 %782, %v217_v44  }
  0x76   : > { %467 = vperm.xlu1 %783, %v220_v45   ;;  %462 = vperm.xlu0 %782, %v219_v46  }
  0x7a   : > { %477 = vperm.xlu1 %783, %v222_v47   ;;  %472 = vperm.xlu0 %782, %v221_v48  }
  0x7e   : > { %487 = vperm.xlu1 %783, %v224_v49   ;;  %482 = vperm.xlu0 %782, %v223_v50  }
  0x82   : > { %497 = vperm.xlu1 %783, %v226_v51   ;;  %492 = vperm.xlu0 %782, %v225_v52  }
  0x86   : > { %507 = vperm.xlu1 %783, %v228_v53   ;;  %502 = vperm.xlu0 %782, %v227_v54  }
  0x8a   : > { %517 = vperm.xlu1 %783, %v230_v55   ;;  %512 = vperm.xlu0 %782, %v229_v56  }
  0x8e   : > { %527 = vperm.xlu1 %783, %v232_v57   ;;  %522 = vperm.xlu0 %782, %v231_v58  }
  0x92   : > { %537 = vperm.xlu1 %783, %v234_v59   ;;  %532 = vperm.xlu0 %782, %v233_v60  }
  0x96   : > { %547 = vperm.xlu1 %783, %v236_v61   ;;  %542 = vperm.xlu0 %782, %v235_v62  }
  0x99   : > { %v253_v2 = vpop.permute.xlu1 %252  ;;  %v243_v3 = vpop.permute.xlu0 %242 }
  0x9a   : > { %v568_v4 = vmul.f32 %v918_v63, %v253_v2  ;;  %v566_v5 = vmul.f32 %v918_v63, %v243_v3  ;;  %557 = vperm.xlu1 %783, %v238_v0   ;;  %552 = vperm.xlu0 %782, %v237_v1  }
  0x9c   : > { %633 = vst.msk [vmem:[%s927_s29 + $0x10] sm:$0xff] %vm630_vm0, %v568_v4  ;;  %631 = vst.msk [vmem:[%s927_s29] sm:$0xff] %vm630_vm0, %v566_v5 }
  0x9d   : > { %v258_v6 = vpop.permute.xlu1 %257  ;;  %v248_v7 = vpop.permute.xlu0 %247 }
  0x9e   : > { %v569_v8 = vmul.f32 %v918_v63, %v258_v6  ;;  %v567_v9 = vmul.f32 %v918_v63, %v248_v7 }
  0xa0   : > { %634 = vst.msk [vmem:[%s927_s29 + $0x18] sm:$0xff] %vm630_vm0, %v569_v8  ;;  %632 = vst.msk [vmem:[%s927_s29 + $0x8] sm:$0xff] %vm630_vm0, %v567_v9 }
  0xa1   : > { %v268_v10 = vpop.permute.xlu1 %267  ;;  %v263_v11 = vpop.permute.xlu0 %262 }
  0xa2   : > { %v571_v12 = vmul.f32 %v918_v63, %v268_v10  ;;  %v570_v13 = vmul.f32 %v918_v63, %v263_v11 }
  0xa4   : > { %636 = vst.msk [vmem:[%s927_s29 + $0x28] sm:$0xff] %vm630_vm0, %v571_v12  ;;  %635 = vst.msk [vmem:[%s927_s29 + $0x20] sm:$0xff] %vm630_vm0, %v570_v13 }
  0xa5   : > { %v278_v14 = vpop.permute.xlu1 %277  ;;  %v273_v15 = vpop.permute.xlu0 %272 }
  0xa6   : > { %v573_v16 = vmul.f32 %v918_v63, %v278_v14  ;;  %v572_v17 = vmul.f32 %v918_v63, %v273_v15 }
  0xa8   : > { %638 = vst.msk [vmem:[%s927_s29 + $0x38] sm:$0xff] %vm630_vm0, %v573_v16  ;;  %637 = vst.msk [vmem:[%s927_s29 + $0x30] sm:$0xff] %vm630_vm0, %v572_v17 }
  0xa9   : > { %v288_v18 = vpop.permute.xlu1 %287  ;;  %v283_v19 = vpop.permute.xlu0 %282 }
  0xaa   : > { %v575_v20 = vmul.f32 %v918_v63, %v288_v18  ;;  %v574_v21 = vmul.f32 %v918_v63, %v283_v19 }
  0xac   : > { %640 = vst.msk [vmem:[%s927_s29 + $0x48] sm:$0xff] %vm630_vm0, %v575_v20  ;;  %639 = vst.msk [vmem:[%s927_s29 + $0x40] sm:$0xff] %vm630_vm0, %v574_v21 }
  0xad   : > { %v298_v22 = vpop.permute.xlu1 %297  ;;  %v293_v23 = vpop.permute.xlu0 %292 }
  0xae   : > { %v577_v24 = vmul.f32 %v918_v63, %v298_v22  ;;  %v576_v25 = vmul.f32 %v918_v63, %v293_v23 }
  0xb0   : > { %642 = vst.msk [vmem:[%s927_s29 + $0x58] sm:$0xff] %vm630_vm0, %v577_v24  ;;  %641 = vst.msk [vmem:[%s927_s29 + $0x50] sm:$0xff] %vm630_vm0, %v576_v25 }
  0xb1   : > { %v308_v26 = vpop.permute.xlu1 %307  ;;  %v303_v27 = vpop.permute.xlu0 %302 }
  0xb2   : > { %v579_v28 = vmul.f32 %v918_v63, %v308_v26  ;;  %v578_v29 = vmul.f32 %v918_v63, %v303_v27 }
  0xb4   : > { %644 = vst.msk [vmem:[%s927_s29 + $0x68] sm:$0xff] %vm630_vm0, %v579_v28  ;;  %643 = vst.msk [vmem:[%s927_s29 + $0x60] sm:$0xff] %vm630_vm0, %v578_v29 }
  0xb5   : > { %v318_v30 = vpop.permute.xlu1 %317  ;;  %v313_v31 = vpop.permute.xlu0 %312 }
  0xb6   : > { %v581_v32 = vmul.f32 %v918_v63, %v318_v30  ;;  %v580_v33 = vmul.f32 %v918_v63, %v313_v31 }
  0xb8   : > { %646 = vst.msk [vmem:[%s927_s29 + $0x78] sm:$0xff] %vm630_vm0, %v581_v32  ;;  %645 = vst.msk [vmem:[%s927_s29 + $0x70] sm:$0xff] %vm630_vm0, %v580_v33 }
  0xb9   : > { %v328_v34 = vpop.permute.xlu1 %327  ;;  %v323_v35 = vpop.permute.xlu0 %322 }
  0xba   : > { %v583_v36 = vmul.f32 %v918_v63, %v328_v34  ;;  %v582_v37 = vmul.f32 %v918_v63, %v323_v35 }
  0xbc   : > { %648 = vst.msk [vmem:[%s927_s29 + $0x88] sm:$0xff] %vm630_vm0, %v583_v36  ;;  %647 = vst.msk [vmem:[%s927_s29 + $0x80] sm:$0xff] %vm630_vm0, %v582_v37 }
  0xbd   : > { %v338_v38 = vpop.permute.xlu1 %337  ;;  %v333_v39 = vpop.permute.xlu0 %332 }
  0xbe   : > { %v585_v40 = vmul.f32 %v918_v63, %v338_v38  ;;  %v584_v41 = vmul.f32 %v918_v63, %v333_v39 }
  0xc0   : > { %650 = vst.msk [vmem:[%s927_s29 + $0x98] sm:$0xff] %vm630_vm0, %v585_v40  ;;  %649 = vst.msk [vmem:[%s927_s29 + $0x90] sm:$0xff] %vm630_vm0, %v584_v41 }
  0xc1   : > { %v348_v42 = vpop.permute.xlu1 %347  ;;  %v343_v43 = vpop.permute.xlu0 %342 }
  0xc2   : > { %v587_v44 = vmul.f32 %v918_v63, %v348_v42  ;;  %v586_v45 = vmul.f32 %v918_v63, %v343_v43 }
  0xc4   : > { %652 = vst.msk [vmem:[%s927_s29 + $0xa8] sm:$0xff] %vm630_vm0, %v587_v44  ;;  %651 = vst.msk [vmem:[%s927_s29 + $0xa0] sm:$0xff] %vm630_vm0, %v586_v45 }
  0xc5   : > { %v358_v46 = vpop.permute.xlu1 %357  ;;  %v353_v47 = vpop.permute.xlu0 %352 }
  0xc6   : > { %v589_v48 = vmul.f32 %v918_v63, %v358_v46  ;;  %v588_v49 = vmul.f32 %v918_v63, %v353_v47 }
  0xc8   : > { %654 = vst.msk [vmem:[%s927_s29 + $0xb8] sm:$0xff] %vm630_vm0, %v589_v48  ;;  %653 = vst.msk [vmem:[%s927_s29 + $0xb0] sm:$0xff] %vm630_vm0, %v588_v49 }
  0xc9   : > { %v368_v50 = vpop.permute.xlu1 %367  ;;  %v363_v51 = vpop.permute.xlu0 %362 }
  0xca   : > { %v591_v52 = vmul.f32 %v918_v63, %v368_v50  ;;  %v590_v53 = vmul.f32 %v918_v63, %v363_v51 }
  0xcc   : > { %656 = vst.msk [vmem:[%s927_s29 + $0xc8] sm:$0xff] %vm630_vm0, %v591_v52  ;;  %655 = vst.msk [vmem:[%s927_s29 + $0xc0] sm:$0xff] %vm630_vm0, %v590_v53 }
  0xcd   : > { %v378_v54 = vpop.permute.xlu1 %377  ;;  %v373_v55 = vpop.permute.xlu0 %372 }
  0xce   : > { %v593_v56 = vmul.f32 %v918_v63, %v378_v54  ;;  %v592_v57 = vmul.f32 %v918_v63, %v373_v55 }
  0xd0   : > { %658 = vst.msk [vmem:[%s927_s29 + $0xd8] sm:$0xff] %vm630_vm0, %v593_v56  ;;  %657 = vst.msk [vmem:[%s927_s29 + $0xd0] sm:$0xff] %vm630_vm0, %v592_v57 }
  0xd1   : > { %v388_v58 = vpop.permute.xlu1 %387  ;;  %v383_v59 = vpop.permute.xlu0 %382 }
  0xd2   : > { %v595_v60 = vmul.f32 %v918_v63, %v388_v58  ;;  %v594_v61 = vmul.f32 %v918_v63, %v383_v59 }
  0xd4   : > { %660 = vst.msk [vmem:[%s927_s29 + $0xe8] sm:$0xff] %vm630_vm0, %v595_v60  ;;  %659 = vst.msk [vmem:[%s927_s29 + $0xe0] sm:$0xff] %vm630_vm0, %v594_v61 }
  0xd5   : > { %v398_v62 = vpop.permute.xlu1 %397  ;;  %v393_v0 = vpop.permute.xlu0 %392 }
  0xd6   : > { %v597_v1 = vmul.f32 %v918_v63, %v398_v62  ;;  %v596_v2 = vmul.f32 %v918_v63, %v393_v0 }
  0xd8   : > { %662 = vst.msk [vmem:[%s927_s29 + $0xf8] sm:$0xff] %vm630_vm0, %v597_v1  ;;  %661 = vst.msk [vmem:[%s927_s29 + $0xf0] sm:$0xff] %vm630_vm0, %v596_v2 }
  0xd9   : > { %v408_v3 = vpop.permute.xlu1 %407  ;;  %v403_v4 = vpop.permute.xlu0 %402 }
  0xda   : > { %v599_v5 = vmul.f32 %v918_v63, %v408_v3  ;;  %v598_v6 = vmul.f32 %v918_v63, %v403_v4 }
  0xdc   : > { %664 = vst.msk [vmem:[%s927_s29 + $0x108] sm:$0xff] %vm630_vm0, %v599_v5  ;;  %663 = vst.msk [vmem:[%s927_s29 + $0x100] sm:$0xff] %vm630_vm0, %v598_v6 }
  0xdd   : > { %v418_v7 = vpop.permute.xlu1 %417  ;;  %v413_v8 = vpop.permute.xlu0 %412 }
  0xde   : > { %v601_v9 = vmul.f32 %v918_v63, %v418_v7  ;;  %v600_v10 = vmul.f32 %v918_v63, %v413_v8 }
  0xe0   : > { %666 = vst.msk [vmem:[%s927_s29 + $0x118] sm:$0xff] %vm630_vm0, %v601_v9  ;;  %665 = vst.msk [vmem:[%s927_s29 + $0x110] sm:$0xff] %vm630_vm0, %v600_v10 }
  0xe1   : > { %v428_v11 = vpop.permute.xlu1 %427  ;;  %v423_v12 = vpop.permute.xlu0 %422 }
  0xe2   : > { %v603_v13 = vmul.f32 %v918_v63, %v428_v11  ;;  %v602_v14 = vmul.f32 %v918_v63, %v423_v12 }
  0xe4   : > { %668 = vst.msk [vmem:[%s927_s29 + $0x128] sm:$0xff] %vm630_vm0, %v603_v13  ;;  %667 = vst.msk [vmem:[%s927_s29 + $0x120] sm:$0xff] %vm630_vm0, %v602_v14 }
  0xe5   : > { %v438_v15 = vpop.permute.xlu1 %437  ;;  %v433_v16 = vpop.permute.xlu0 %432 }
  0xe6   : > { %v605_v17 = vmul.f32 %v918_v63, %v438_v15  ;;  %v604_v18 = vmul.f32 %v918_v63, %v433_v16 }
  0xe8   : > { %670 = vst.msk [vmem:[%s927_s29 + $0x138] sm:$0xff] %vm630_vm0, %v605_v17  ;;  %669 = vst.msk [vmem:[%s927_s29 + $0x130] sm:$0xff] %vm630_vm0, %v604_v18 }
  0xe9   : > { %v448_v19 = vpop.permute.xlu1 %447  ;;  %v443_v20 = vpop.permute.xlu0 %442 }
  0xea   : > { %v607_v21 = vmul.f32 %v918_v63, %v448_v19  ;;  %v606_v22 = vmul.f32 %v918_v63, %v443_v20 }
  0xec   : > { %672 = vst.msk [vmem:[%s927_s29 + $0x148] sm:$0xff] %vm630_vm0, %v607_v21  ;;  %671 = vst.msk [vmem:[%s927_s29 + $0x140] sm:$0xff] %vm630_vm0, %v606_v22 }
  0xed   : > { %v458_v23 = vpop.permute.xlu1 %457  ;;  %v453_v24 = vpop.permute.xlu0 %452 }
  0xee   : > { %v609_v25 = vmul.f32 %v918_v63, %v458_v23  ;;  %v608_v26 = vmul.f32 %v918_v63, %v453_v24 }
  0xf0   : > { %674 = vst.msk [vmem:[%s927_s29 + $0x158] sm:$0xff] %vm630_vm0, %v609_v25  ;;  %673 = vst.msk [vmem:[%s927_s29 + $0x150] sm:$0xff] %vm630_vm0, %v608_v26 }
  0xf1   : > { %v468_v27 = vpop.permute.xlu1 %467  ;;  %v463_v28 = vpop.permute.xlu0 %462 }
  0xf2   : > { %v611_v29 = vmul.f32 %v918_v63, %v468_v27  ;;  %v610_v30 = vmul.f32 %v918_v63, %v463_v28 }
  0xf4   : > { %676 = vst.msk [vmem:[%s927_s29 + $0x168] sm:$0xff] %vm630_vm0, %v611_v29  ;;  %675 = vst.msk [vmem:[%s927_s29 + $0x160] sm:$0xff] %vm630_vm0, %v610_v30 }
  0xf5   : > { %v478_v31 = vpop.permute.xlu1 %477  ;;  %v473_v32 = vpop.permute.xlu0 %472 }
  0xf6   : > { %v613_v33 = vmul.f32 %v918_v63, %v478_v31  ;;  %v612_v34 = vmul.f32 %v918_v63, %v473_v32 }
  0xf8   : > { %678 = vst.msk [vmem:[%s927_s29 + $0x178] sm:$0xff] %vm630_vm0, %v613_v33  ;;  %677 = vst.msk [vmem:[%s927_s29 + $0x170] sm:$0xff] %vm630_vm0, %v612_v34 }
  0xf9   : > { %v488_v35 = vpop.permute.xlu1 %487  ;;  %v483_v36 = vpop.permute.xlu0 %482 }
  0xfa   : > { %v615_v37 = vmul.f32 %v918_v63, %v488_v35  ;;  %v614_v38 = vmul.f32 %v918_v63, %v483_v36 }
  0xfc   : > { %680 = vst.msk [vmem:[%s927_s29 + $0x188] sm:$0xff] %vm630_vm0, %v615_v37  ;;  %679 = vst.msk [vmem:[%s927_s29 + $0x180] sm:$0xff] %vm630_vm0, %v614_v38 }
  0xfd   : > { %v498_v39 = vpop.permute.xlu1 %497  ;;  %v493_v40 = vpop.permute.xlu0 %492 }
  0xfe   : > { %v617_v41 = vmul.f32 %v918_v63, %v498_v39  ;;  %v616_v42 = vmul.f32 %v918_v63, %v493_v40 }
 0x100   : > { %682 = vst.msk [vmem:[%s927_s29 + $0x198] sm:$0xff] %vm630_vm0, %v617_v41  ;;  %681 = vst.msk [vmem:[%s927_s29 + $0x190] sm:$0xff] %vm630_vm0, %v616_v42 }
 0x101   : > { %v508_v43 = vpop.permute.xlu1 %507  ;;  %v503_v44 = vpop.permute.xlu0 %502 }
 0x102   : > { %v619_v45 = vmul.f32 %v918_v63, %v508_v43  ;;  %v618_v46 = vmul.f32 %v918_v63, %v503_v44 }
 0x104   : > { %684 = vst.msk [vmem:[%s927_s29 + $0x1a8] sm:$0xff] %vm630_vm0, %v619_v45  ;;  %683 = vst.msk [vmem:[%s927_s29 + $0x1a0] sm:$0xff] %vm630_vm0, %v618_v46 }
 0x105   : > { %v518_v47 = vpop.permute.xlu1 %517  ;;  %v513_v48 = vpop.permute.xlu0 %512 }
 0x106   : > { %v621_v49 = vmul.f32 %v918_v63, %v518_v47  ;;  %v620_v50 = vmul.f32 %v918_v63, %v513_v48 }
 0x108   : > { %686 = vst.msk [vmem:[%s927_s29 + $0x1b8] sm:$0xff] %vm630_vm0, %v621_v49  ;;  %685 = vst.msk [vmem:[%s927_s29 + $0x1b0] sm:$0xff] %vm630_vm0, %v620_v50 }
 0x109   : > { %v528_v51 = vpop.permute.xlu1 %527  ;;  %v523_v52 = vpop.permute.xlu0 %522 }
 0x10a   : > { %v623_v53 = vmul.f32 %v918_v63, %v528_v51  ;;  %v622_v54 = vmul.f32 %v918_v63, %v523_v52 }
 0x10c   : > { %688 = vst.msk [vmem:[%s927_s29 + $0x1c8] sm:$0xff] %vm630_vm0, %v623_v53  ;;  %687 = vst.msk [vmem:[%s927_s29 + $0x1c0] sm:$0xff] %vm630_vm0, %v622_v54 }
 0x10d   : > { %v538_v55 = vpop.permute.xlu1 %537  ;;  %v533_v56 = vpop.permute.xlu0 %532 }
 0x10e   : > { %v625_v57 = vmul.f32 %v918_v63, %v538_v55  ;;  %v624_v58 = vmul.f32 %v918_v63, %v533_v56 }
 0x110   : > { %690 = vst.msk [vmem:[%s927_s29 + $0x1d8] sm:$0xff] %vm630_vm0, %v625_v57  ;;  %689 = vst.msk [vmem:[%s927_s29 + $0x1d0] sm:$0xff] %vm630_vm0, %v624_v58 }
 0x111   : > { %v548_v59 = vpop.permute.xlu1 %547  ;;  %v543_v60 = vpop.permute.xlu0 %542 }
 0x112   : > { %v627_v61 = vmul.f32 %v918_v63, %v548_v59  ;;  %v626_v62 = vmul.f32 %v918_v63, %v543_v60 }
 0x114   : > { %692 = vst.msk [vmem:[%s927_s29 + $0x1e8] sm:$0xff] %vm630_vm0, %v627_v61  ;;  %691 = vst.msk [vmem:[%s927_s29 + $0x1e0] sm:$0xff] %vm630_vm0, %v626_v62 }
 0x115   : > { %v558_v0 = vpop.permute.xlu1 %557  ;;  %v553_v1 = vpop.permute.xlu0 %552 }
 0x116   : > { %v629_v2 = vmul.f32 %v918_v63, %v558_v0  ;;  %v628_v3 = vmul.f32 %v918_v63, %v553_v1 }
 0x118   : > { %694 = vst.msk [vmem:[%s927_s29 + $0x1f8] sm:$0xff] %vm630_vm0, %v629_v2  ;;  %693 = vst.msk [vmem:[%s927_s29 + $0x1f0] sm:$0xff] %vm630_vm0, %v628_v3 }
 0x119 PF: > { %s19_s17 = sadd.s32 1, %s804_s17  }
 0x11a   : > { %p16_p10 = scmp.ge.s32.totalorder %s19_s17, 19  }
 0x11c   :  { %18 = sbr.rel (!%p16_p10) target bundleno = 16 (0x10), region = 61 }

// kernel: wavelets_forward.15
= control target key start
LH: loop header
LB: loop body
LE: loop exit
PB: predicated region body
PF: predicated region fallthrough
CT: control target
= control target key end

     0   :  { %s510_s6 = smov 0   ;;  %s723_s0 = inlined_call_operand.vmem [shape: f32[192,1024], index: 0, kind: input, shape index: {}]   ;;  %s724_s1 = inlined_call_operand.vmem [shape: f32[192,1024], index: 1, kind: output, shape index: {}]  }
   0x1 LB: > { %s471_s7 = sadd.s32 4294967295, %s498_s6   ;;  %p475_p0 = scmp.ge.s32.totalorder %s498_s6, 1  ;;  %s498_s6 = sphi %s510_s6, %s11_s6  }
   0x2   : > { %p89_p1 = scmp.lt.s32.totalorder %s498_s6, 3 }
   0x4   : > { %p90_p2 = pnand %p475_p0, %p89_p1 }
   0x5   : > { %s111_s8 = smul.u32 (!%p90_p2), 12, %s471_s7 }
   0x6   : > { %93 = sbr.rel (%p90_p2) target bundleno = 65 (0x41), region = 24 }
   0x7   : > { %p112_p3 = scmp.lt.s32.totalorder (!%p90_p2), %s111_s8, 23 }
   0xb   : > { %s726_s8 = smov (!%p112_p3, %s111_s8), 23 }
   0xc   : > { %s482_s9 = sshll.u32 %s726_s8, 6 }
   0xd   : > { %s521_s12 = scalar_lea.vmem %s723_s0, %s482_s9  ;;  %s526_s15 = scalar_lea.vmem %s724_s1, %s482_s9 }
   0xe   : > { %v125_v0 = vld [vmem:[%s521_s12] sm:$0xff]  ;;  %v126_v1 = vld [vmem:[%s521_s12 + $0x8] sm:$0xff]  ;;  %v127_v2 = vld [vmem:[%s521_s12 + $0x10] sm:$0xff] }
   0xf   : > { %v221_v3 = vmax.f32 %v125_v0, 0.0  ;;  %v222_v4 = vmax.f32 %v126_v1, 0.0  ;;  %v223_v5 = vmax.f32 %v127_v2, 0.0  ;;  %v128_v6 = vld [vmem:[%s521_s12 + $0x18] sm:$0xff]  ;;  %v129_v7 = vld [vmem:[%s521_s12 + $0x20] sm:$0xff]  ;;  %v130_v8 = vld [vmem:[%s521_s12 + $0x28] sm:$0xff] }
  0x10   : > { %v224_v9 = vmax.f32 %v128_v6, 0.0  ;;  %v225_v10 = vmax.f32 %v129_v7, 0.0  ;;  %v226_v11 = vmax.f32 %v130_v8, 0.0  ;;  %v131_v12 = vld [vmem:[%s521_s12 + $0x30] sm:$0xff]  ;;  %v132_v13 = vld [vmem:[%s521_s12 + $0x38] sm:$0xff]  ;;  %v133_v14 = vld [vmem:[%s521_s12 + $0x40] sm:$0xff] }
  0x11   : > { %317 = vst [vmem:[%s526_s15] sm:$0xff] %v221_v3  ;;  %318 = vst [vmem:[%s526_s15 + $0x8] sm:$0xff] %v222_v4  ;;  %v227_v15 = vmax.f32 %v131_v12, 0.0  ;;  %v228_v16 = vmax.f32 %v132_v13, 0.0  ;;  %v229_v17 = vmax.f32 %v133_v14, 0.0  ;;  %v134_v18 = vld [vmem:[%s521_s12 + $0x48] sm:$0xff]  ;;  %v135_v19 = vld [vmem:[%s521_s12 + $0x50] sm:$0xff] }
  0x12   : > { %319 = vst [vmem:[%s526_s15 + $0x10] sm:$0xff] %v223_v5  ;;  %v136_v20 = vld [vmem:[%s521_s12 + $0x58] sm:$0xff]  ;;  %320 = vst [vmem:[%s526_s15 + $0x18] sm:$0xff] %v224_v9  ;;  %v230_v21 = vmax.f32 %v134_v18, 0.0  ;;  %v231_v22 = vmax.f32 %v135_v19, 0.0  ;;  %v137_v24 = vld [vmem:[%s521_s12 + $0x60] sm:$0xff] }
  0x13   : > { %321 = vst [vmem:[%s526_s15 + $0x20] sm:$0xff] %v225_v10  ;;  %322 = vst [vmem:[%s526_s15 + $0x28] sm:$0xff] %v226_v11  ;;  %v232_v23 = vmax.f32 %v136_v20, 0.0  ;;  %v138_v25 = vld [vmem:[%s521_s12 + $0x68] sm:$0xff]  ;;  %v139_v26 = vld [vmem:[%s521_s12 + $0x70] sm:$0xff]  ;;  %v233_v27 = vmax.f32 %v137_v24, 0.0 }
  0x14   : > { %323 = vst [vmem:[%s526_s15 + $0x30] sm:$0xff] %v227_v15  ;;  %324 = vst [vmem:[%s526_s15 + $0x38] sm:$0xff] %v228_v16  ;;  %v234_v28 = vmax.f32 %v138_v25, 0.0  ;;  %v235_v29 = vmax.f32 %v139_v26, 0.0  ;;  %v140_v30 = vld [vmem:[%s521_s12 + $0x78] sm:$0xff]  ;;  %v141_v31 = vld [vmem:[%s521_s12 + $0x80] sm:$0xff] }
  0x15   : > { %325 = vst [vmem:[%s526_s15 + $0x40] sm:$0xff] %v229_v17  ;;  %v142_v32 = vld [vmem:[%s521_s12 + $0x88] sm:$0xff]  ;;  %326 = vst [vmem:[%s526_s15 + $0x48] sm:$0xff] %v230_v21  ;;  %v236_v33 = vmax.f32 %v140_v30, 0.0  ;;  %v237_v34 = vmax.f32 %v141_v31, 0.0  ;;  %v143_v36 = vld [vmem:[%s521_s12 + $0x90] sm:$0xff] }
  0x16   : > { %327 = vst [vmem:[%s526_s15 + $0x50] sm:$0xff] %v231_v22  ;;  %328 = vst [vmem:[%s526_s15 + $0x58] sm:$0xff] %v232_v23  ;;  %v238_v35 = vmax.f32 %v142_v32, 0.0  ;;  %v144_v37 = vld [vmem:[%s521_s12 + $0x98] sm:$0xff]  ;;  %v145_v38 = vld [vmem:[%s521_s12 + $0xa0] sm:$0xff]  ;;  %v239_v39 = vmax.f32 %v143_v36, 0.0 }
  0x17   : > { %329 = vst [vmem:[%s526_s15 + $0x60] sm:$0xff] %v233_v27  ;;  %330 = vst [vmem:[%s526_s15 + $0x68] sm:$0xff] %v234_v28  ;;  %v240_v40 = vmax.f32 %v144_v37, 0.0  ;;  %v241_v41 = vmax.f32 %v145_v38, 0.0  ;;  %v146_v42 = vld [vmem:[%s521_s12 + $0xa8] sm:$0xff]  ;;  %v147_v43 = vld [vmem:[%s521_s12 + $0xb0] sm:$0xff] }
  0x18   : > { %331 = vst [vmem:[%s526_s15 + $0x70] sm:$0xff] %v235_v29  ;;  %v148_v44 = vld [vmem:[%s521_s12 + $0xb8] sm:$0xff]  ;;  %332 = vst [vmem:[%s526_s15 + $0x78] sm:$0xff] %v236_v33  ;;  %v242_v45 = vmax.f32 %v146_v42, 0.0  ;;  %v243_v46 = vmax.f32 %v147_v43, 0.0  ;;  %v149_v48 = vld [vmem:[%s521_s12 + $0xc0] sm:$0xff] }
  0x19   : > { %333 = vst [vmem:[%s526_s15 + $0x80] sm:$0xff] %v237_v34  ;;  %334 = vst [vmem:[%s526_s15 + $0x88] sm:$0xff] %v238_v35  ;;  %v244_v47 = vmax.f32 %v148_v44, 0.0  ;;  %v150_v49 = vld [vmem:[%s521_s12 + $0xc8] sm:$0xff]  ;;  %v151_v50 = vld [vmem:[%s521_s12 + $0xd0] sm:$0xff]  ;;  %v245_v51 = vmax.f32 %v149_v48, 0.0 }
  0x1a   : > { %335 = vst [vmem:[%s526_s15 + $0x90] sm:$0xff] %v239_v39  ;;  %336 = vst [vmem:[%s526_s15 + $0x98] sm:$0xff] %v240_v40  ;;  %v246_v52 = vmax.f32 %v150_v49, 0.0  ;;  %v247_v53 = vmax.f32 %v151_v50, 0.0  ;;  %v152_v54 = vld [vmem:[%s521_s12 + $0xd8] sm:$0xff]  ;;  %v153_v55 = vld [vmem:[%s521_s12 + $0xe0] sm:$0xff] }
  0x1b   : > { %337 = vst [vmem:[%s526_s15 + $0xa0] sm:$0xff] %v241_v41  ;;  %v154_v56 = vld [vmem:[%s521_s12 + $0xe8] sm:$0xff]  ;;  %338 = vst [vmem:[%s526_s15 + $0xa8] sm:$0xff] %v242_v45  ;;  %v248_v57 = vmax.f32 %v152_v54, 0.0  ;;  %v249_v58 = vmax.f32 %v153_v55, 0.0  ;;  %v155_v60 = vld [vmem:[%s521_s12 + $0xf0] sm:$0xff] }
  0x1c   : > { %339 = vst [vmem:[%s526_s15 + $0xb0] sm:$0xff] %v243_v46  ;;  %340 = vst [vmem:[%s526_s15 + $0xb8] sm:$0xff] %v244_v47  ;;  %v250_v59 = vmax.f32 %v154_v56, 0.0  ;;  %v156_v61 = vld [vmem:[%s521_s12 + $0xf8] sm:$0xff]  ;;  %v157_v62 = vld [vmem:[%s521_s12 + $0x100] sm:$0xff]  ;;  %v251_v63 = vmax.f32 %v155_v60, 0.0 }
  0x1d   : > { %341 = vst [vmem:[%s526_s15 + $0xc0] sm:$0xff] %v245_v51  ;;  %342 = vst [vmem:[%s526_s15 + $0xc8] sm:$0xff] %v246_v52  ;;  %v252_v0 = vmax.f32 %v156_v61, 0.0  ;;  %v253_v1 = vmax.f32 %v157_v62, 0.0  ;;  %v158_v2 = vld [vmem:[%s521_s12 + $0x108] sm:$0xff]  ;;  %v159_v3 = vld [vmem:[%s521_s12 + $0x110] sm:$0xff] }
  0x1e   : > { %343 = vst [vmem:[%s526_s15 + $0xd0] sm:$0xff] %v247_v53  ;;  %v160_v4 = vld [vmem:[%s521_s12 + $0x118] sm:$0xff]  ;;  %344 = vst [vmem:[%s526_s15 + $0xd8] sm:$0xff] %v248_v57  ;;  %v254_v5 = vmax.f32 %v158_v2, 0.0  ;;  %v255_v6 = vmax.f32 %v159_v3, 0.0  ;;  %v161_v8 = vld [vmem:[%s521_s12 + $0x120] sm:$0xff] }
  0x1f   : > { %345 = vst [vmem:[%s526_s15 + $0xe0] sm:$0xff] %v249_v58  ;;  %346 = vst [vmem:[%s526_s15 + $0xe8] sm:$0xff] %v250_v59  ;;  %v256_v7 = vmax.f32 %v160_v4, 0.0  ;;  %v162_v9 = vld [vmem:[%s521_s12 + $0x128] sm:$0xff]  ;;  %v163_v10 = vld [vmem:[%s521_s12 + $0x130] sm:$0xff]  ;;  %v257_v11 = vmax.f32 %v161_v8, 0.0 }
  0x20   : > { %347 = vst [vmem:[%s526_s15 + $0xf0] sm:$0xff] %v251_v63  ;;  %348 = vst [vmem:[%s526_s15 + $0xf8] sm:$0xff] %v252_v0  ;;  %v258_v12 = vmax.f32 %v162_v9, 0.0  ;;  %v259_v13 = vmax.f32 %v163_v10, 0.0  ;;  %v164_v14 = vld [vmem:[%s521_s12 + $0x138] sm:$0xff]  ;;  %v165_v15 = vld [vmem:[%s521_s12 + $0x140] sm:$0xff] }
  0x21   : > { %349 = vst [vmem:[%s526_s15 + $0x100] sm:$0xff] %v253_v1  ;;  %v166_v16 = vld [vmem:[%s521_s12 + $0x148] sm:$0xff]  ;;  %350 = vst [vmem:[%s526_s15 + $0x108] sm:$0xff] %v254_v5  ;;  %v260_v17 = vmax.f32 %v164_v14, 0.0  ;;  %v261_v18 = vmax.f32 %v165_v15, 0.0  ;;  %v167_v20 = vld [vmem:[%s521_s12 + $0x150] sm:$0xff] }
  0x22   : > { %351 = vst [vmem:[%s526_s15 + $0x110] sm:$0xff] %v255_v6  ;;  %352 = vst [vmem:[%s526_s15 + $0x118] sm:$0xff] %v256_v7  ;;  %v262_v19 = vmax.f32 %v166_v16, 0.0  ;;  %v168_v21 = vld [vmem:[%s521_s12 + $0x158] sm:$0xff]  ;;  %v169_v22 = vld [vmem:[%s521_s12 + $0x160] sm:$0xff]  ;;  %v263_v23 = vmax.f32 %v167_v20, 0.0 }
  0x23   : > { %353 = vst [vmem:[%s526_s15 + $0x120] sm:$0xff] %v257_v11  ;;  %354 = vst [vmem:[%s526_s15 + $0x128] sm:$0xff] %v258_v12  ;;  %v264_v24 = vmax.f32 %v168_v21, 0.0  ;;  %v265_v25 = vmax.f32 %v169_v22, 0.0  ;;  %v170_v26 = vld [vmem:[%s521_s12 + $0x168] sm:$0xff]  ;;  %v171_v27 = vld [vmem:[%s521_s12 + $0x170] sm:$0xff] }
  0x24   : > { %355 = vst [vmem:[%s526_s15 + $0x130] sm:$0xff] %v259_v13  ;;  %v172_v28 = vld [vmem:[%s521_s12 + $0x178] sm:$0xff]  ;;  %356 = vst [vmem:[%s526_s15 + $0x138] sm:$0xff] %v260_v17  ;;  %v266_v29 = vmax.f32 %v170_v26, 0.0  ;;  %v267_v30 = vmax.f32 %v171_v27, 0.0  ;;  %v173_v32 = vld [vmem:[%s521_s12 + $0x180] sm:$0xff] }
  0x25   : > { %357 = vst [vmem:[%s526_s15 + $0x140] sm:$0xff] %v261_v18  ;;  %358 = vst [vmem:[%s526_s15 + $0x148] sm:$0xff] %v262_v19  ;;  %v268_v31 = vmax.f32 %v172_v28, 0.0  ;;  %v174_v33 = vld [vmem:[%s521_s12 + $0x188] sm:$0xff]  ;;  %v175_v34 = vld [vmem:[%s521_s12 + $0x190] sm:$0xff]  ;;  %v269_v35 = vmax.f32 %v173_v32, 0.0 }
  0x26   : > { %359 = vst [vmem:[%s526_s15 + $0x150] sm:$0xff] %v263_v23  ;;  %360 = vst [vmem:[%s526_s15 + $0x158] sm:$0xff] %v264_v24  ;;  %v270_v36 = vmax.f32 %v174_v33, 0.0  ;;  %v271_v37 = vmax.f32 %v175_v34, 0.0  ;;  %v176_v38 = vld [vmem:[%s521_s12 + $0x198] sm:$0xff]  ;;  %v177_v39 = vld [vmem:[%s521_s12 + $0x1a0] sm:$0xff] }
  0x27   : > { %361 = vst [vmem:[%s526_s15 + $0x160] sm:$0xff] %v265_v25  ;;  %v178_v40 = vld [vmem:[%s521_s12 + $0x1a8] sm:$0xff]  ;;  %362 = vst [vmem:[%s526_s15 + $0x168] sm:$0xff] %v266_v29  ;;  %v272_v41 = vmax.f32 %v176_v38, 0.0  ;;  %v273_v42 = vmax.f32 %v177_v39, 0.0  ;;  %v179_v44 = vld [vmem:[%s521_s12 + $0x1b0] sm:$0xff] }
  0x28   : > { %363 = vst [vmem:[%s526_s15 + $0x170] sm:$0xff] %v267_v30  ;;  %364 = vst [vmem:[%s526_s15 + $0x178] sm:$0xff] %v268_v31  ;;  %v274_v43 = vmax.f32 %v178_v40, 0.0  ;;  %v180_v45 = vld [vmem:[%s521_s12 + $0x1b8] sm:$0xff]  ;;  %v181_v46 = vld [vmem:[%s521_s12 + $0x1c0] sm:$0xff]  ;;  %v275_v47 = vmax.f32 %v179_v44, 0.0 }
  0x29   : > { %365 = vst [vmem:[%s526_s15 + $0x180] sm:$0xff] %v269_v35  ;;  %366 = vst [vmem:[%s526_s15 + $0x188] sm:$0xff] %v270_v36  ;;  %v276_v48 = vmax.f32 %v180_v45, 0.0  ;;  %v277_v49 = vmax.f32 %v181_v46, 0.0  ;;  %v182_v50 = vld [vmem:[%s521_s12 + $0x1c8] sm:$0xff]  ;;  %v183_v51 = vld [vmem:[%s521_s12 + $0x1d0] sm:$0xff] }
  0x2a   : > { %367 = vst [vmem:[%s526_s15 + $0x190] sm:$0xff] %v271_v37  ;;  %v184_v52 = vld [vmem:[%s521_s12 + $0x1d8] sm:$0xff]  ;;  %368 = vst [vmem:[%s526_s15 + $0x198] sm:$0xff] %v272_v41  ;;  %v278_v53 = vmax.f32 %v182_v50, 0.0  ;;  %v279_v54 = vmax.f32 %v183_v51, 0.0  ;;  %v185_v56 = vld [vmem:[%s521_s12 + $0x1e0] sm:$0xff] }
  0x2b   : > { %369 = vst [vmem:[%s526_s15 + $0x1a0] sm:$0xff] %v273_v42  ;;  %370 = vst [vmem:[%s526_s15 + $0x1a8] sm:$0xff] %v274_v43  ;;  %v280_v55 = vmax.f32 %v184_v52, 0.0  ;;  %v186_v57 = vld [vmem:[%s521_s12 + $0x1e8] sm:$0xff]  ;;  %v187_v58 = vld [vmem:[%s521_s12 + $0x1f0] sm:$0xff]  ;;  %v281_v59 = vmax.f32 %v185_v56, 0.0 }
  0x2c   : > { %371 = vst [vmem:[%s526_s15 + $0x1b0] sm:$0xff] %v275_v47  ;;  %372 = vst [vmem:[%s526_s15 + $0x1b8] sm:$0xff] %v276_v48  ;;  %v282_v60 = vmax.f32 %v186_v57, 0.0  ;;  %v283_v61 = vmax.f32 %v187_v58, 0.0  ;;  %v188_v62 = vld [vmem:[%s521_s12 + $0x1f8] sm:$0xff]  ;;  %v189_v63 = vld [vmem:[%s521_s12 + $0x200] sm:$0xff] }
  0x2d   : > { %373 = vst [vmem:[%s526_s15 + $0x1c0] sm:$0xff] %v277_v49  ;;  %v190_v0 = vld [vmem:[%s521_s12 + $0x208] sm:$0xff]  ;;  %374 = vst [vmem:[%s526_s15 + $0x1c8] sm:$0xff] %v278_v53  ;;  %v284_v1 = vmax.f32 %v188_v62, 0.0  ;;  %v285_v2 = vmax.f32 %v189_v63, 0.0  ;;  %v191_v4 = vld [vmem:[%s521_s12 + $0x210] sm:$0xff] }
  0x2e   : > { %375 = vst [vmem:[%s526_s15 + $0x1d0] sm:$0xff] %v279_v54  ;;  %376 = vst [vmem:[%s526_s15 + $0x1d8] sm:$0xff] %v280_v55  ;;  %v286_v3 = vmax.f32 %v190_v0, 0.0  ;;  %v192_v5 = vld [vmem:[%s521_s12 + $0x218] sm:$0xff]  ;;  %v193_v6 = vld [vmem:[%s521_s12 + $0x220] sm:$0xff]  ;;  %v287_v7 = vmax.f32 %v191_v4, 0.0 }
  0x2f   : > { %377 = vst [vmem:[%s526_s15 + $0x1e0] sm:$0xff] %v281_v59  ;;  %378 = vst [vmem:[%s526_s15 + $0x1e8] sm:$0xff] %v282_v60  ;;  %v288_v8 = vmax.f32 %v192_v5, 0.0  ;;  %v289_v9 = vmax.f32 %v193_v6, 0.0  ;;  %v194_v10 = vld [vmem:[%s521_s12 + $0x228] sm:$0xff]  ;;  %v195_v11 = vld [vmem:[%s521_s12 + $0x230] sm:$0xff] }
  0x30   : > { %379 = vst [vmem:[%s526_s15 + $0x1f0] sm:$0xff] %v283_v61  ;;  %v196_v12 = vld [vmem:[%s521_s12 + $0x238] sm:$0xff]  ;;  %380 = vst [vmem:[%s526_s15 + $0x1f8] sm:$0xff] %v284_v1  ;;  %v290_v13 = vmax.f32 %v194_v10, 0.0  ;;  %v291_v14 = vmax.f32 %v195_v11, 0.0  ;;  %v197_v16 = vld [vmem:[%s521_s12 + $0x240] sm:$0xff] }
  0x31   : > { %381 = vst [vmem:[%s526_s15 + $0x200] sm:$0xff] %v285_v2  ;;  %382 = vst [vmem:[%s526_s15 + $0x208] sm:$0xff] %v286_v3  ;;  %v292_v15 = vmax.f32 %v196_v12, 0.0  ;;  %v198_v17 = vld [vmem:[%s521_s12 + $0x248] sm:$0xff]  ;;  %v199_v18 = vld [vmem:[%s521_s12 + $0x250] sm:$0xff]  ;;  %v293_v19 = vmax.f32 %v197_v16, 0.0 }
  0x32   : > { %383 = vst [vmem:[%s526_s15 + $0x210] sm:$0xff] %v287_v7  ;;  %384 = vst [vmem:[%s526_s15 + $0x218] sm:$0xff] %v288_v8  ;;  %v294_v20 = vmax.f32 %v198_v17, 0.0  ;;  %v295_v21 = vmax.f32 %v199_v18, 0.0  ;;  %v200_v22 = vld [vmem:[%s521_s12 + $0x258] sm:$0xff]  ;;  %v201_v23 = vld [vmem:[%s521_s12 + $0x260] sm:$0xff] }
  0x33   : > { %385 = vst [vmem:[%s526_s15 + $0x220] sm:$0xff] %v289_v9  ;;  %v202_v24 = vld [vmem:[%s521_s12 + $0x268] sm:$0xff]  ;;  %386 = vst [vmem:[%s526_s15 + $0x228] sm:$0xff] %v290_v13  ;;  %v296_v25 = vmax.f32 %v200_v22, 0.0  ;;  %v297_v26 = vmax.f32 %v201_v23, 0.0  ;;  %v203_v28 = vld [vmem:[%s521_s12 + $0x270] sm:$0xff] }
  0x34   : > { %387 = vst [vmem:[%s526_s15 + $0x230] sm:$0xff] %v291_v14  ;;  %388 = vst [vmem:[%s526_s15 + $0x238] sm:$0xff] %v292_v15  ;;  %v298_v27 = vmax.f32 %v202_v24, 0.0  ;;  %v204_v29 = vld [vmem:[%s521_s12 + $0x278] sm:$0xff]  ;;  %v205_v30 = vld [vmem:[%s521_s12 + $0x280] sm:$0xff]  ;;  %v299_v31 = vmax.f32 %v203_v28, 0.0 }
  0x35   : > { %389 = vst [vmem:[%s526_s15 + $0x240] sm:$0xff] %v293_v19  ;;  %390 = vst [vmem:[%s526_s15 + $0x248] sm:$0xff] %v294_v20  ;;  %v300_v32 = vmax.f32 %v204_v29, 0.0  ;;  %v301_v33 = vmax.f32 %v205_v30, 0.0  ;;  %v206_v34 = vld [vmem:[%s521_s12 + $0x288] sm:$0xff]  ;;  %v207_v35 = vld [vmem:[%s521_s12 + $0x290] sm:$0xff] }
  0x36   : > { %391 = vst [vmem:[%s526_s15 + $0x250] sm:$0xff] %v295_v21  ;;  %v208_v36 = vld [vmem:[%s521_s12 + $0x298] sm:$0xff]  ;;  %392 = vst [vmem:[%s526_s15 + $0x258] sm:$0xff] %v296_v25  ;;  %v302_v37 = vmax.f32 %v206_v34, 0.0  ;;  %v303_v38 = vmax.f32 %v207_v35, 0.0  ;;  %v209_v40 = vld [vmem:[%s521_s12 + $0x2a0] sm:$0xff] }
  0x37   : > { %393 = vst [vmem:[%s526_s15 + $0x260] sm:$0xff] %v297_v26  ;;  %394 = vst [vmem:[%s526_s15 + $0x268] sm:$0xff] %v298_v27  ;;  %v304_v39 = vmax.f32 %v208_v36, 0.0  ;;  %v210_v41 = vld [vmem:[%s521_s12 + $0x2a8] sm:$0xff]  ;;  %v211_v42 = vld [vmem:[%s521_s12 + $0x2b0] sm:$0xff]  ;;  %v305_v43 = vmax.f32 %v209_v40, 0.0 }
  0x38   : > { %395 = vst [vmem:[%s526_s15 + $0x270] sm:$0xff] %v299_v31  ;;  %396 = vst [vmem:[%s526_s15 + $0x278] sm:$0xff] %v300_v32  ;;  %v306_v44 = vmax.f32 %v210_v41, 0.0  ;;  %v307_v45 = vmax.f32 %v211_v42, 0.0  ;;  %v212_v46 = vld [vmem:[%s521_s12 + $0x2b8] sm:$0xff]  ;;  %v213_v47 = vld [vmem:[%s521_s12 + $0x2c0] sm:$0xff] }
  0x39   : > { %397 = vst [vmem:[%s526_s15 + $0x280] sm:$0xff] %v301_v33  ;;  %v214_v48 = vld [vmem:[%s521_s12 + $0x2c8] sm:$0xff]  ;;  %398 = vst [vmem:[%s526_s15 + $0x288] sm:$0xff] %v302_v37  ;;  %v308_v49 = vmax.f32 %v212_v46, 0.0  ;;  %v309_v50 = vmax.f32 %v213_v47, 0.0  ;;  %v215_v52 = vld [vmem:[%s521_s12 + $0x2d0] sm:$0xff] }
  0x3a   : > { %399 = vst [vmem:[%s526_s15 + $0x290] sm:$0xff] %v303_v38  ;;  %400 = vst [vmem:[%s526_s15 + $0x298] sm:$0xff] %v304_v39  ;;  %v310_v51 = vmax.f32 %v214_v48, 0.0  ;;  %v216_v53 = vld [vmem:[%s521_s12 + $0x2d8] sm:$0xff]  ;;  %v217_v54 = vld [vmem:[%s521_s12 + $0x2e0] sm:$0xff]  ;;  %v311_v55 = vmax.f32 %v215_v52, 0.0 }
  0x3b   : > { %401 = vst [vmem:[%s526_s15 + $0x2a0] sm:$0xff] %v305_v43  ;;  %402 = vst [vmem:[%s526_s15 + $0x2a8] sm:$0xff] %v306_v44  ;;  %v312_v56 = vmax.f32 %v216_v53, 0.0  ;;  %v313_v57 = vmax.f32 %v217_v54, 0.0  ;;  %v218_v58 = vld [vmem:[%s521_s12 + $0x2e8] sm:$0xff]  ;;  %v219_v59 = vld [vmem:[%s521_s12 + $0x2f0] sm:$0xff] }
  0x3c   : > { %403 = vst [vmem:[%s526_s15 + $0x2b0] sm:$0xff] %v307_v45  ;;  %v220_v60 = vld [vmem:[%s521_s12 + $0x2f8] sm:$0xff]  ;;  %404 = vst [vmem:[%s526_s15 + $0x2b8] sm:$0xff] %v308_v49  ;;  %v314_v61 = vmax.f32 %v218_v58, 0.0  ;;  %v315_v62 = vmax.f32 %v219_v59, 0.0 }
  0x3d   : > { %405 = vst [vmem:[%s526_s15 + $0x2c0] sm:$0xff] %v309_v50  ;;  %406 = vst [vmem:[%s526_s15 + $0x2c8] sm:$0xff] %v310_v51  ;;  %v316_v63 = vmax.f32 %v220_v60, 0.0 }
  0x3e   : > { %407 = vst [vmem:[%s526_s15 + $0x2d0] sm:$0xff] %v311_v55  ;;  %408 = vst [vmem:[%s526_s15 + $0x2d8] sm:$0xff] %v312_v56 }
  0x3f   : > { %409 = vst [vmem:[%s526_s15 + $0x2e0] sm:$0xff] %v313_v57  ;;  %410 = vst [vmem:[%s526_s15 + $0x2e8] sm:$0xff] %v314_v61 }
  0x40   : > { %411 = vst [vmem:[%s526_s15 + $0x2f0] sm:$0xff] %v315_v62  ;;  %412 = vst [vmem:[%s526_s15 + $0x2f8] sm:$0xff] %v316_v63 }
  0x41 PF: > { %s11_s6 = sadd.s32 1, %s498_s6  }
  0x42   : > { %p8_p4 = scmp.ge.s32.totalorder %s11_s6, 4  }
  0x44   :  { %10 = sbr.rel (!%p8_p4) target bundleno = 1 (0x1), region = 54 }

// kernel: wavelets_forward.16
= control target key start
LH: loop header
LB: loop body
LE: loop exit
PB: predicated region body
PF: predicated region fallthrough
CT: control target
= control target key end

     0   :  { %s1309_s0 = inlined_call_operand.vmem [shape: s32[17], index: 0, kind: input, shape index: {}]   ;;  %s1310_s1 = inlined_call_operand.vmem [shape: f32[8704,96], index: 1, kind: input, shape index: {}]   ;;  %s1311_s2 = inlined_call_operand.vmem [shape: f32[4,96,96], index: 2, kind: input, shape index: {}]   ;;  %s1312_s3 = inlined_call_operand.vmem [shape: f32[8704,96], index: 3, kind: output, shape index: {}]  }
   0x1   :  { %s8_s14 = sshll.u32 %s1309_s0, 4  ;;  %s9_s14 = int_to_ptr.vmem [resolvable:$true] %s8_s14 }
   0x2   :  { %s994_s15 = scalar_lea.vmem %s9_s14, 16  ;;  %p999_p1 = scmp.lt.s32.totalorder %s9_s14, %s9_s14 }
   0x3   :  { %p995_p0 = scmp.ne.s32.totalorder %s9_s14, %s994_s15  ;;  %p1000_p2 = scmp.lt.s32.totalorder %s994_s15, %s994_s15 }
   0x5   :  { %p1001_p3 = por %p1000_p2, %p999_p1 }
   0x7   :  { %p1002_p4 = pnand %p1001_p3, %p995_p0 }
   0x9   :  { %1005 = shalt.err (!%p1002_p4)  }
   0xa   :  { %s1016_s16 = smov [#allocation3]  }
   0xb   :  { %11 = dma.vmem_to_smem %s9_s14, 16, %s1016_s16, [#allocation2] }
   0xc   :  { %1010 = dma.done.wait [#allocation2], 16 }
   0xd   :  { %1011 = vsyncadd [#allocation2], 4294967280 }
   0xe   :  { %13 = sfence }
   0xf   :  { %s1040_s17 = smov 0  }
  0x10 LB: > { %s814_s0 = sadd.s32 4294967295, %s1014_s17   ;;  %p818_p5 = scmp.ge.s32.totalorder %s1014_s17, 1  ;;  %s1014_s17 = sphi %s1040_s17, %s19_s17  }
  0x11   : > { %p134_p6 = scmp.lt.s32.totalorder %s1014_s17, 18 }
  0x13   : > { %p135_p7 = pnand %p818_p5, %p134_p6 }
  0x14   : > { %s168_s18 = sld [smem:[#allocation3 + %s814_s0]] (!%p135_p7)  ;;  %s819_s19 = sshll.u32 (!%p135_p7), %s814_s0, 6 }
  0x15   : > { %138 = sbr.rel (%p135_p7) target bundleno = 315 (0x13b), region = 28  ;;  %p163_p8 = scmp.lt.s32.totalorder (!%p135_p7), %s819_s19, 1087 }
  0x1a   : > { %s1314_s19 = smov (!%p163_p8, %s819_s19), 1087  ;;  %p169_p9 = scmp.lt.s32.totalorder %s168_s18, 3  ;;  %vm296_vm0 = vcmask 785408  }
  0x1b   : > { %s820_s20 = sshll.u32 %s1314_s19, 3 }
  0x1c   : > { %s1056_s23 = scalar_lea.vmem %s1310_s1, %s820_s20  ;;  %s1316_s18 = smov (!%p169_p9, %s168_s18), 3 }
  0x1d   : > { %v182_v0 = vld [vmem:[%s1056_s23] sm:$0xff]  ;;  %v183_v1 = vld [vmem:[%s1056_s23 + $0x8] sm:$0xff]  ;;  %s984_s24 = smul.u32 96, %s1316_s18  ;;  %v184_v24 = vld [vmem:[%s1056_s23 + $0x10] sm:$0xff]  ;;  %s1176_s30 = scalar_lea.vmem %s1312_s3, %s820_s20 }
  0x1e   : > { %v214_v2 = vld [vmem:[%s1056_s23 + $0x100] sm:$0xff]  ;;  %v246_v3 = vpack.c.bf16 %v183_v1, %v182_v0  ;;  %v215_v4 = vld [vmem:[%s1056_s23 + $0x108] sm:$0xff]  ;;  %v185_v25 = vld [vmem:[%s1056_s23 + $0x18] sm:$0xff] }
  0x1f   : > { %v262_v5 = vpack.c.bf16 %v215_v4, %v214_v2  ;;  %s1067_s27 = scalar_lea.vmem %s1311_s2, %s984_s24  ;;  %v216_v26 = vld [vmem:[%s1056_s23 + $0x110] sm:$0xff]  ;;  %v217_v27 = vld [vmem:[%s1056_s23 + $0x118] sm:$0xff]  ;;  %v186_v28 = vld [vmem:[%s1056_s23 + $0x20] sm:$0xff]  ;;  %v247_v32 = vpack.c.bf16 %v185_v25, %v184_v24 }
  0x20   : > { %908 = vmatprep.mubr.msk.bf16.mxu0 %vm296_vm0, %v246_v3  ;;  %v288_v6 = vld [vmem:[%s1067_s27 + $0x50] sm:$0xff]  ;;  %v289_v7 = vld [vmem:[%s1067_s27 + $0x58] sm:$0xff]  ;;  %v286_v8 = vld [vmem:[%s1067_s27 + $0x40] sm:$0xff]  ;;  %v263_v33 = vpack.c.bf16 %v217_v27, %v216_v26 }
  0x21   : > { %940 = vmatprep.mubr.msk.bf16.mxu1 %vm296_vm0, %v262_v5  ;;  %v295_v9 = vpack.c.bf16 %v289_v7, %v288_v6  ;;  %v287_v10 = vld [vmem:[%s1067_s27 + $0x48] sm:$0xff]  ;;  %v284_v12 = vld [vmem:[%s1067_s27 + $0x30] sm:$0xff]  ;;  %v285_v13 = vld [vmem:[%s1067_s27 + $0x38] sm:$0xff] }
  0x22   : > { %v294_v11 = vpack.c.bf16 %v287_v10, %v286_v8  ;;  %v293_v14 = vpack.c.bf16 %v285_v13, %v284_v12  ;;  %v282_v15 = vld [vmem:[%s1067_s27 + $0x20] sm:$0xff]  ;;  %v283_v16 = vld [vmem:[%s1067_s27 + $0x28] sm:$0xff]  ;;  %v280_v18 = vld [vmem:[%s1067_s27 + $0x10] sm:$0xff] }
  0x23   : > { %896 = vmatprep.subr.bf16.mxu0 %v295_v9  ;;  %972 = vmatprep.subr.bf16.mxu1 %v295_v9  ;;  %v292_v17 = vpack.c.bf16 %v283_v16, %v282_v15  ;;  %v281_v19 = vld [vmem:[%s1067_s27 + $0x18] sm:$0xff]  ;;  %v278_v21 = vld [vmem:[%s1067_s27] sm:$0xff]  ;;  %v279_v22 = vld [vmem:[%s1067_s27 + $0x8] sm:$0xff] }
  0x24   : > { %897 = vmatpush3.bf16.msra.mxu0 %v295_v9  ;;  %978 = vmatpush3.bf16.msra.mxu1 %v295_v9  ;;  %v291_v20 = vpack.c.bf16 %v281_v19, %v280_v18  ;;  %v290_v23 = vpack.c.bf16 %v279_v22, %v278_v21  ;;  %v187_v29 = vld [vmem:[%s1056_s23 + $0x28] sm:$0xff]  ;;  %v218_v30 = vld [vmem:[%s1056_s23 + $0x120] sm:$0xff]  ;;  %v188_v36 = vld [vmem:[%s1056_s23 + $0x30] sm:$0xff] }
  0x25   : > { %898 = vmatprep.subr.bf16.mxu0 %v294_v11  ;;  %973 = vmatprep.subr.bf16.mxu1 %v294_v11  ;;  %v219_v31 = vld [vmem:[%s1056_s23 + $0x128] sm:$0xff]  ;;  %v248_v34 = vpack.c.bf16 %v187_v29, %v186_v28  ;;  %v189_v37 = vld [vmem:[%s1056_s23 + $0x38] sm:$0xff]  ;;  %v220_v38 = vld [vmem:[%s1056_s23 + $0x130] sm:$0xff] }
  0x26   : > { %v264_v35 = vpack.c.bf16 %v219_v31, %v218_v30  ;;  %v221_v39 = vld [vmem:[%s1056_s23 + $0x138] sm:$0xff]  ;;  %v190_v40 = vld [vmem:[%s1056_s23 + $0x40] sm:$0xff]  ;;  %v191_v41 = vld [vmem:[%s1056_s23 + $0x48] sm:$0xff]  ;;  %v249_v44 = vpack.c.bf16 %v189_v37, %v188_v36 }
  0x27   : > { %v222_v42 = vld [vmem:[%s1056_s23 + $0x140] sm:$0xff]  ;;  %v223_v43 = vld [vmem:[%s1056_s23 + $0x148] sm:$0xff]  ;;  %v265_v45 = vpack.c.bf16 %v221_v39, %v220_v38  ;;  %v250_v46 = vpack.c.bf16 %v191_v41, %v190_v40  ;;  %v192_v48 = vld [vmem:[%s1056_s23 + $0x50] sm:$0xff] }
  0x28   : > { %899 = vmatpush3.bf16.msra.mxu0 %v294_v11  ;;  %979 = vmatpush3.bf16.msra.mxu1 %v294_v11  ;;  %v266_v47 = vpack.c.bf16 %v223_v43, %v222_v42  ;;  %v193_v49 = vld [vmem:[%s1056_s23 + $0x58] sm:$0xff]  ;;  %v224_v50 = vld [vmem:[%s1056_s23 + $0x150] sm:$0xff]  ;;  %v194_v52 = vld [vmem:[%s1056_s23 + $0x60] sm:$0xff] }
  0x29   : > { %900 = vmatprep.subr.bf16.mxu0 %v293_v14  ;;  %974 = vmatprep.subr.bf16.mxu1 %v293_v14  ;;  %v225_v51 = vld [vmem:[%s1056_s23 + $0x158] sm:$0xff]  ;;  %v195_v53 = vld [vmem:[%s1056_s23 + $0x68] sm:$0xff]  ;;  %v226_v54 = vld [vmem:[%s1056_s23 + $0x160] sm:$0xff]  ;;  %v251_v56 = vpack.c.bf16 %v193_v49, %v192_v48 }
  0x2a   : > { %v227_v55 = vld [vmem:[%s1056_s23 + $0x168] sm:$0xff]  ;;  %v267_v57 = vpack.c.bf16 %v225_v51, %v224_v50  ;;  %v252_v58 = vpack.c.bf16 %v195_v53, %v194_v52  ;;  %v196_v60 = vld [vmem:[%s1056_s23 + $0x70] sm:$0xff]  ;;  %v197_v61 = vld [vmem:[%s1056_s23 + $0x78] sm:$0xff] }
  0x2b   : > { %v268_v59 = vpack.c.bf16 %v227_v55, %v226_v54  ;;  %v228_v62 = vld [vmem:[%s1056_s23 + $0x170] sm:$0xff]  ;;  %v229_v63 = vld [vmem:[%s1056_s23 + $0x178] sm:$0xff]  ;;  %v198_v0 = vld [vmem:[%s1056_s23 + $0x80] sm:$0xff]  ;;  %v253_v4 = vpack.c.bf16 %v197_v61, %v196_v60 }
  0x2c   : > { %901 = vmatpush3.bf16.msra.mxu0 %v293_v14  ;;  %980 = vmatpush3.bf16.msra.mxu1 %v293_v14  ;;  %v199_v1 = vld [vmem:[%s1056_s23 + $0x88] sm:$0xff]  ;;  %v230_v2 = vld [vmem:[%s1056_s23 + $0x180] sm:$0xff]  ;;  %v269_v5 = vpack.c.bf16 %v229_v63, %v228_v62  ;;  %v200_v8 = vld [vmem:[%s1056_s23 + $0x90] sm:$0xff] }
  0x2d   : > { %902 = vmatprep.subr.bf16.mxu0 %v292_v17  ;;  %975 = vmatprep.subr.bf16.mxu1 %v292_v17  ;;  %v231_v3 = vld [vmem:[%s1056_s23 + $0x188] sm:$0xff]  ;;  %v254_v6 = vpack.c.bf16 %v199_v1, %v198_v0  ;;  %v201_v9 = vld [vmem:[%s1056_s23 + $0x98] sm:$0xff]  ;;  %v232_v10 = vld [vmem:[%s1056_s23 + $0x190] sm:$0xff] }
  0x2e   : > { %v270_v7 = vpack.c.bf16 %v231_v3, %v230_v2  ;;  %v233_v11 = vld [vmem:[%s1056_s23 + $0x198] sm:$0xff]  ;;  %v202_v12 = vld [vmem:[%s1056_s23 + $0xa0] sm:$0xff]  ;;  %v203_v13 = vld [vmem:[%s1056_s23 + $0xa8] sm:$0xff]  ;;  %v255_v16 = vpack.c.bf16 %v201_v9, %v200_v8 }
  0x2f   : > { %v234_v14 = vld [vmem:[%s1056_s23 + $0x1a0] sm:$0xff]  ;;  %v235_v15 = vld [vmem:[%s1056_s23 + $0x1a8] sm:$0xff]  ;;  %v256_v18 = vpack.c.bf16 %v203_v13, %v202_v12  ;;  %v205_v21 = vld [vmem:[%s1056_s23 + $0xb8] sm:$0xff] }
  0x30   : > { %903 = vmatpush3.bf16.msra.mxu0 %v292_v17  ;;  %981 = vmatpush3.bf16.msra.mxu1 %v292_v17  ;;  %v271_v17 = vpack.c.bf16 %v233_v11, %v232_v10  ;;  %v272_v19 = vpack.c.bf16 %v235_v15, %v234_v14  ;;  %v236_v22 = vld [vmem:[%s1056_s23 + $0x1b0] sm:$0xff]  ;;  %v206_v24 = vld [vmem:[%s1056_s23 + $0xc0] sm:$0xff]  ;;  %v207_v25 = vld [vmem:[%s1056_s23 + $0xc8] sm:$0xff] }
  0x31   : > { %904 = vmatprep.subr.bf16.mxu0 %v291_v20  ;;  %976 = vmatprep.subr.bf16.mxu1 %v291_v20  ;;  %v238_v26 = vld [vmem:[%s1056_s23 + $0x1c0] sm:$0xff]  ;;  %v239_v27 = vld [vmem:[%s1056_s23 + $0x1c8] sm:$0xff]  ;;  %v258_v30 = vpack.c.bf16 %v207_v25, %v206_v24 }
  0x32   : > { %v274_v31 = vpack.c.bf16 %v239_v27, %v238_v26  ;;  %v210_v36 = vld [vmem:[%s1056_s23 + $0xe0] sm:$0xff]  ;;  %v211_v37 = vld [vmem:[%s1056_s23 + $0xe8] sm:$0xff] }
  0x33   : > { %v242_v38 = vld [vmem:[%s1056_s23 + $0x1e0] sm:$0xff]  ;;  %v243_v39 = vld [vmem:[%s1056_s23 + $0x1e8] sm:$0xff]  ;;  %v260_v42 = vpack.c.bf16 %v211_v37, %v210_v36 }
  0x34   : > { %905 = vmatpush3.bf16.msra.mxu0 %v291_v20  ;;  %982 = vmatpush3.bf16.msra.mxu1 %v291_v20  ;;  %v204_v20 = vld [vmem:[%s1056_s23 + $0xb0] sm:$0xff]  ;;  %v276_v43 = vpack.c.bf16 %v243_v39, %v242_v38 }
  0x35   : > { %906 = vmatprep.subr.bf16.mxu0 %v290_v23  ;;  %977 = vmatprep.subr.bf16.mxu1 %v290_v23  ;;  %v257_v28 = vpack.c.bf16 %v205_v21, %v204_v20 }
  0x38   : > { %907 = vmatpush3.bf16.msra.mxu0 %v290_v23  ;;  %983 = vmatpush3.bf16.msra.mxu1 %v290_v23  ;;  %v237_v23 = vld [vmem:[%s1056_s23 + $0x1b8] sm:$0xff] }
  0x39   : > { %v273_v29 = vpack.c.bf16 %v237_v23, %v236_v22 }
  0x3b   : > { %909 = vmatmul.mubr.msk.bf16.vlgmr.msra.gmra.mxu0 %vm296_vm0, %v247_v32  ;;  %941 = vmatmul.mubr.msk.bf16.vlgmr.msra.gmra.mxu1 %vm296_vm0, %v263_v33  ;;  %v208_v32 = vld [vmem:[%s1056_s23 + $0xd0] sm:$0xff]  ;;  %v209_v33 = vld [vmem:[%s1056_s23 + $0xd8] sm:$0xff] }
  0x3c   : > { %912 = vmatprep.mubr.msk.bf16.mxu0 %vm296_vm0, %v248_v34  ;;  %944 = vmatprep.mubr.msk.bf16.mxu1 %vm296_vm0, %v264_v35  ;;  %v240_v34 = vld [vmem:[%s1056_s23 + $0x1d0] sm:$0xff]  ;;  %v241_v35 = vld [vmem:[%s1056_s23 + $0x1d8] sm:$0xff]  ;;  %v259_v40 = vpack.c.bf16 %v209_v33, %v208_v32 }
  0x3d   : > { %v275_v41 = vpack.c.bf16 %v241_v35, %v240_v34 }
  0x43   : > { %913 = vmatmul.mubr.msk.bf16.gmra.mxu0 %vm296_vm0, %v249_v44  ;;  %945 = vmatmul.mubr.msk.bf16.gmra.mxu1 %vm296_vm0, %v265_v45  ;;  %v212_v44 = vld [vmem:[%s1056_s23 + $0xf0] sm:$0xff]  ;;  %v213_v45 = vld [vmem:[%s1056_s23 + $0xf8] sm:$0xff] }
  0x44   : > { %916 = vmatprep.mubr.msk.bf16.mxu0 %vm296_vm0, %v250_v46  ;;  %948 = vmatprep.mubr.msk.bf16.mxu1 %vm296_vm0, %v266_v47  ;;  %v244_v46 = vld [vmem:[%s1056_s23 + $0x1f0] sm:$0xff]  ;;  %v245_v47 = vld [vmem:[%s1056_s23 + $0x1f8] sm:$0xff]  ;;  %v261_v48 = vpack.c.bf16 %v213_v45, %v212_v44 }
  0x45   : > { %v277_v49 = vpack.c.bf16 %v245_v47, %v244_v46 }
  0x4b   : > { %917 = vmatmul.mubr.msk.bf16.gmra.mxu0 %vm296_vm0, %v251_v56  ;;  %949 = vmatmul.mubr.msk.bf16.gmra.mxu1 %vm296_vm0, %v267_v57 }
  0x4c   : > { %920 = vmatprep.mubr.msk.bf16.mxu0 %vm296_vm0, %v252_v58  ;;  %952 = vmatprep.mubr.msk.bf16.mxu1 %vm296_vm0, %v268_v59 }
  0x53   : > { %921 = vmatmul.mubr.msk.bf16.gmra.mxu0 %vm296_vm0, %v253_v4  ;;  %953 = vmatmul.mubr.msk.bf16.gmra.mxu1 %vm296_vm0, %v269_v5 }
  0x54   : > { %924 = vmatprep.mubr.msk.bf16.mxu0 %vm296_vm0, %v254_v6  ;;  %956 = vmatprep.mubr.msk.bf16.mxu1 %vm296_vm0, %v270_v7 }
  0x5b   : > { %925 = vmatmul.mubr.msk.bf16.gmra.mxu0 %vm296_vm0, %v255_v16  ;;  %957 = vmatmul.mubr.msk.bf16.gmra.mxu1 %vm296_vm0, %v271_v17 }
  0x5c   : > { %928 = vmatprep.mubr.msk.bf16.mxu0 %vm296_vm0, %v256_v18  ;;  %960 = vmatprep.mubr.msk.bf16.mxu1 %vm296_vm0, %v272_v19 }
  0x63   : > { %929 = vmatmul.mubr.msk.bf16.gmra.mxu0 %vm296_vm0, %v257_v28  ;;  %961 = vmatmul.mubr.msk.bf16.gmra.mxu1 %vm296_vm0, %v273_v29 }
  0x64   : > { %932 = vmatprep.mubr.msk.bf16.mxu0 %vm296_vm0, %v258_v30  ;;  %964 = vmatprep.mubr.msk.bf16.mxu1 %vm296_vm0, %v274_v31 }
  0x6b   : > { %933 = vmatmul.mubr.msk.bf16.gmra.mxu0 %vm296_vm0, %v259_v40  ;;  %965 = vmatmul.mubr.msk.bf16.gmra.mxu1 %vm296_vm0, %v275_v41 }
  0x6c   : > { %936 = vmatprep.mubr.msk.bf16.mxu0 %vm296_vm0, %v260_v42  ;;  %968 = vmatprep.mubr.msk.bf16.mxu1 %vm296_vm0, %v276_v43 }
  0x73   : > { %937 = vmatmul.mubr.msk.bf16.gmra.mxu0 %vm296_vm0, %v261_v48  ;;  %969 = vmatmul.mubr.msk.bf16.gmra.mxu1 %vm296_vm0, %v277_v49 }
  0xfb   : > { %v910_v50 = vpop.f32.mrf.mxu0  ;;  %v942_v51 = vpop.f32.mrf.mxu1 }
  0xfc   : > { %684 = vst.msk [vmem:[%s1176_s30 + $0x10] sm:$0xff] %vm296_vm0, %v910_v50  ;;  %716 = vst.msk [vmem:[%s1176_s30 + $0x110] sm:$0xff] %vm296_vm0, %v942_v51 }
  0xfd   : > { %v427_v52 = vpop.f32.mrf.mxu0  ;;  %v555_v53 = vpop.f32.mrf.mxu1 }
  0xfe   : > { %682 = vst.msk [vmem:[%s1176_s30] sm:$0xff] %vm296_vm0, %v427_v52  ;;  %714 = vst.msk [vmem:[%s1176_s30 + $0x100] sm:$0xff] %vm296_vm0, %v555_v53 }
  0xff   : > { %v911_v54 = vpop.f32.mrf.mxu0  ;;  %v943_v55 = vpop.f32.mrf.mxu1 }
 0x100   : > { %685 = vst.msk [vmem:[%s1176_s30 + $0x18] sm:$0xff] %vm296_vm0, %v911_v54  ;;  %717 = vst.msk [vmem:[%s1176_s30 + $0x118] sm:$0xff] %vm296_vm0, %v943_v55 }
 0x101   : > { %v430_v56 = vpop.f32.mrf.mxu0  ;;  %v558_v57 = vpop.f32.mrf.mxu1 }
 0x102   : > { %683 = vst.msk [vmem:[%s1176_s30 + $0x8] sm:$0xff] %vm296_vm0, %v430_v56  ;;  %715 = vst.msk [vmem:[%s1176_s30 + $0x108] sm:$0xff] %vm296_vm0, %v558_v57 }
 0x103   : > { %v914_v58 = vpop.f32.mrf.mxu0  ;;  %v946_v59 = vpop.f32.mrf.mxu1 }
 0x104   : > { %688 = vst.msk [vmem:[%s1176_s30 + $0x30] sm:$0xff] %vm296_vm0, %v914_v58  ;;  %720 = vst.msk [vmem:[%s1176_s30 + $0x130] sm:$0xff] %vm296_vm0, %v946_v59 }
 0x105   : > { %v443_v60 = vpop.f32.mrf.mxu0  ;;  %v571_v61 = vpop.f32.mrf.mxu1 }
 0x106   : > { %686 = vst.msk [vmem:[%s1176_s30 + $0x20] sm:$0xff] %vm296_vm0, %v443_v60  ;;  %718 = vst.msk [vmem:[%s1176_s30 + $0x120] sm:$0xff] %vm296_vm0, %v571_v61 }
 0x107   : > { %v915_v62 = vpop.f32.mrf.mxu0  ;;  %v947_v63 = vpop.f32.mrf.mxu1 }
 0x108   : > { %689 = vst.msk [vmem:[%s1176_s30 + $0x38] sm:$0xff] %vm296_vm0, %v915_v62  ;;  %721 = vst.msk [vmem:[%s1176_s30 + $0x138] sm:$0xff] %vm296_vm0, %v947_v63 }
 0x109   : > { %v446_v0 = vpop.f32.mrf.mxu0  ;;  %v574_v1 = vpop.f32.mrf.mxu1 }
 0x10a   : > { %687 = vst.msk [vmem:[%s1176_s30 + $0x28] sm:$0xff] %vm296_vm0, %v446_v0  ;;  %719 = vst.msk [vmem:[%s1176_s30 + $0x128] sm:$0xff] %vm296_vm0, %v574_v1 }
 0x10b   : > { %v918_v2 = vpop.f32.mrf.mxu0  ;;  %v950_v3 = vpop.f32.mrf.mxu1 }
 0x10c   : > { %692 = vst.msk [vmem:[%s1176_s30 + $0x50] sm:$0xff] %vm296_vm0, %v918_v2  ;;  %724 = vst.msk [vmem:[%s1176_s30 + $0x150] sm:$0xff] %vm296_vm0, %v950_v3 }
 0x10d   : > { %v459_v4 = vpop.f32.mrf.mxu0  ;;  %v587_v5 = vpop.f32.mrf.mxu1 }
 0x10e   : > { %690 = vst.msk [vmem:[%s1176_s30 + $0x40] sm:$0xff] %vm296_vm0, %v459_v4  ;;  %722 = vst.msk [vmem:[%s1176_s30 + $0x140] sm:$0xff] %vm296_vm0, %v587_v5 }
 0x10f   : > { %v919_v6 = vpop.f32.mrf.mxu0  ;;  %v951_v7 = vpop.f32.mrf.mxu1 }
 0x110   : > { %693 = vst.msk [vmem:[%s1176_s30 + $0x58] sm:$0xff] %vm296_vm0, %v919_v6  ;;  %725 = vst.msk [vmem:[%s1176_s30 + $0x158] sm:$0xff] %vm296_vm0, %v951_v7 }
 0x111   : > { %v462_v8 = vpop.f32.mrf.mxu0  ;;  %v590_v9 = vpop.f32.mrf.mxu1 }
 0x112   : > { %691 = vst.msk [vmem:[%s1176_s30 + $0x48] sm:$0xff] %vm296_vm0, %v462_v8  ;;  %723 = vst.msk [vmem:[%s1176_s30 + $0x148] sm:$0xff] %vm296_vm0, %v590_v9 }
 0x113   : > { %v922_v10 = vpop.f32.mrf.mxu0  ;;  %v954_v11 = vpop.f32.mrf.mxu1 }
 0x114   : > { %696 = vst.msk [vmem:[%s1176_s30 + $0x70] sm:$0xff] %vm296_vm0, %v922_v10  ;;  %728 = vst.msk [vmem:[%s1176_s30 + $0x170] sm:$0xff] %vm296_vm0, %v954_v11 }
 0x115   : > { %v475_v12 = vpop.f32.mrf.mxu0  ;;  %v603_v13 = vpop.f32.mrf.mxu1 }
 0x116   : > { %694 = vst.msk [vmem:[%s1176_s30 + $0x60] sm:$0xff] %vm296_vm0, %v475_v12  ;;  %726 = vst.msk [vmem:[%s1176_s30 + $0x160] sm:$0xff] %vm296_vm0, %v603_v13 }
 0x117   : > { %v923_v14 = vpop.f32.mrf.mxu0  ;;  %v955_v15 = vpop.f32.mrf.mxu1 }
 0x118   : > { %697 = vst.msk [vmem:[%s1176_s30 + $0x78] sm:$0xff] %vm296_vm0, %v923_v14  ;;  %729 = vst.msk [vmem:[%s1176_s30 + $0x178] sm:$0xff] %vm296_vm0, %v955_v15 }
 0x119   : > { %v478_v16 = vpop.f32.mrf.mxu0  ;;  %v606_v17 = vpop.f32.mrf.mxu1 }
 0x11a   : > { %695 = vst.msk [vmem:[%s1176_s30 + $0x68] sm:$0xff] %vm296_vm0, %v478_v16  ;;  %727 = vst.msk [vmem:[%s1176_s30 + $0x168] sm:$0xff] %vm296_vm0, %v606_v17 }
 0x11b   : > { %v926_v18 = vpop.f32.mrf.mxu0  ;;  %v958_v19 = vpop.f32.mrf.mxu1 }
 0x11c   : > { %700 = vst.msk [vmem:[%s1176_s30 + $0x90] sm:$0xff] %vm296_vm0, %v926_v18  ;;  %732 = vst.msk [vmem:[%s1176_s30 + $0x190] sm:$0xff] %vm296_vm0, %v958_v19 }
 0x11d   : > { %v491_v20 = vpop.f32.mrf.mxu0  ;;  %v619_v21 = vpop.f32.mrf.mxu1 }
 0x11e   : > { %698 = vst.msk [vmem:[%s1176_s30 + $0x80] sm:$0xff] %vm296_vm0, %v491_v20  ;;  %730 = vst.msk [vmem:[%s1176_s30 + $0x180] sm:$0xff] %vm296_vm0, %v619_v21 }
 0x11f   : > { %v927_v22 = vpop.f32.mrf.mxu0  ;;  %v959_v23 = vpop.f32.mrf.mxu1 }
 0x120   : > { %701 = vst.msk [vmem:[%s1176_s30 + $0x98] sm:$0xff] %vm296_vm0, %v927_v22  ;;  %733 = vst.msk [vmem:[%s1176_s30 + $0x198] sm:$0xff] %vm296_vm0, %v959_v23 }
 0x121   : > { %v494_v24 = vpop.f32.mrf.mxu0  ;;  %v622_v25 = vpop.f32.mrf.mxu1 }
 0x122   : > { %699 = vst.msk [vmem:[%s1176_s30 + $0x88] sm:$0xff] %vm296_vm0, %v494_v24  ;;  %731 = vst.msk [vmem:[%s1176_s30 + $0x188] sm:$0xff] %vm296_vm0, %v622_v25 }
 0x123   : > { %v930_v26 = vpop.f32.mrf.mxu0  ;;  %v962_v27 = vpop.f32.mrf.mxu1 }
 0x124   : > { %704 = vst.msk [vmem:[%s1176_s30 + $0xb0] sm:$0xff] %vm296_vm0, %v930_v26  ;;  %736 = vst.msk [vmem:[%s1176_s30 + $0x1b0] sm:$0xff] %vm296_vm0, %v962_v27 }
 0x125   : > { %v507_v28 = vpop.f32.mrf.mxu0  ;;  %v635_v29 = vpop.f32.mrf.mxu1 }
 0x126   : > { %702 = vst.msk [vmem:[%s1176_s30 + $0xa0] sm:$0xff] %vm296_vm0, %v507_v28  ;;  %734 = vst.msk [vmem:[%s1176_s30 + $0x1a0] sm:$0xff] %vm296_vm0, %v635_v29 }
 0x127   : > { %v931_v30 = vpop.f32.mrf.mxu0  ;;  %v963_v31 = vpop.f32.mrf.mxu1 }
 0x128   : > { %705 = vst.msk [vmem:[%s1176_s30 + $0xb8] sm:$0xff] %vm296_vm0, %v931_v30  ;;  %737 = vst.msk [vmem:[%s1176_s30 + $0x1b8] sm:$0xff] %vm296_vm0, %v963_v31 }
 0x129   : > { %v510_v32 = vpop.f32.mrf.mxu0  ;;  %v638_v33 = vpop.f32.mrf.mxu1 }
 0x12a   : > { %703 = vst.msk [vmem:[%s1176_s30 + $0xa8] sm:$0xff] %vm296_vm0, %v510_v32  ;;  %735 = vst.msk [vmem:[%s1176_s30 + $0x1a8] sm:$0xff] %vm296_vm0, %v638_v33 }
 0x12b   : > { %v934_v34 = vpop.f32.mrf.mxu0  ;;  %v966_v35 = vpop.f32.mrf.mxu1 }
 0x12c   : > { %708 = vst.msk [vmem:[%s1176_s30 + $0xd0] sm:$0xff] %vm296_vm0, %v934_v34  ;;  %740 = vst.msk [vmem:[%s1176_s30 + $0x1d0] sm:$0xff] %vm296_vm0, %v966_v35 }
 0x12d   : > { %v523_v36 = vpop.f32.mrf.mxu0  ;;  %v651_v37 = vpop.f32.mrf.mxu1 }
 0x12e   : > { %706 = vst.msk [vmem:[%s1176_s30 + $0xc0] sm:$0xff] %vm296_vm0, %v523_v36  ;;  %738 = vst.msk [vmem:[%s1176_s30 + $0x1c0] sm:$0xff] %vm296_vm0, %v651_v37 }
 0x12f   : > { %v935_v38 = vpop.f32.mrf.mxu0  ;;  %v967_v39 = vpop.f32.mrf.mxu1 }
 0x130   : > { %709 = vst.msk [vmem:[%s1176_s30 + $0xd8] sm:$0xff] %vm296_vm0, %v935_v38  ;;  %741 = vst.msk [vmem:[%s1176_s30 + $0x1d8] sm:$0xff] %vm296_vm0, %v967_v39 }
 0x131   : > { %v526_v40 = vpop.f32.mrf.mxu0  ;;  %v654_v41 = vpop.f32.mrf.mxu1 }
 0x132   : > { %707 = vst.msk [vmem:[%s1176_s30 + $0xc8] sm:$0xff] %vm296_vm0, %v526_v40  ;;  %739 = vst.msk [vmem:[%s1176_s30 + $0x1c8] sm:$0xff] %vm296_vm0, %v654_v41 }
 0x133   : > { %v938_v42 = vpop.f32.mrf.mxu0  ;;  %v970_v43 = vpop.f32.mrf.mxu1 }
 0x134   : > { %712 = vst.msk [vmem:[%s1176_s30 + $0xf0] sm:$0xff] %vm296_vm0, %v938_v42  ;;  %744 = vst.msk [vmem:[%s1176_s30 + $0x1f0] sm:$0xff] %vm296_vm0, %v970_v43 }
 0x135   : > { %v539_v44 = vpop.f32.mrf.mxu0  ;;  %v667_v45 = vpop.f32.mrf.mxu1 }
 0x136   : > { %710 = vst.msk [vmem:[%s1176_s30 + $0xe0] sm:$0xff] %vm296_vm0, %v539_v44  ;;  %742 = vst.msk [vmem:[%s1176_s30 + $0x1e0] sm:$0xff] %vm296_vm0, %v667_v45 }
 0x137   : > { %v939_v46 = vpop.f32.mrf.mxu0  ;;  %v971_v47 = vpop.f32.mrf.mxu1 }
 0x138   : > { %713 = vst.msk [vmem:[%s1176_s30 + $0xf8] sm:$0xff] %vm296_vm0, %v939_v46  ;;  %745 = vst.msk [vmem:[%s1176_s30 + $0x1f8] sm:$0xff] %vm296_vm0, %v971_v47 }
 0x139   : > { %v542_v48 = vpop.f32.mrf.mxu0  ;;  %v670_v49 = vpop.f32.mrf.mxu1 }
 0x13a   : > { %711 = vst.msk [vmem:[%s1176_s30 + $0xe8] sm:$0xff] %vm296_vm0, %v542_v48  ;;  %743 = vst.msk [vmem:[%s1176_s30 + $0x1e8] sm:$0xff] %vm296_vm0, %v670_v49 }
 0x13b PF: > { %s19_s17 = sadd.s32 1, %s1014_s17  }
 0x13c   : > { %p16_p10 = scmp.ge.s32.totalorder %s19_s17, 19  }
 0x13e   :  { %18 = sbr.rel (!%p16_p10) target bundleno = 16 (0x10), region = 61 }

// kernel: wavelets_forward.17
= control target key start
LH: loop header
LB: loop body
LE: loop exit
PB: predicated region body
PF: predicated region fallthrough
CT: control target
= control target key end

     0   :  { %s824_s6 = smov 0   ;;  %s1265_s0 = inlined_call_operand.vmem [shape: f32[2,16,2,16,192], index: 0, kind: input, shape index: {}]   ;;  %s1266_s1 = inlined_call_operand.vmem [shape: f32[2,16,16,96], index: 1, kind: output, shape index: {}]  }
   0x1 LB: > { %s719_s7 = sadd.s32 4294967295, %s811_s6   ;;  %p723_p0 = scmp.ge.s32.totalorder %s811_s6, 1  ;;  %s811_s6 = sphi %s824_s6, %s11_s6  }
   0x2   : > { %p87_p1 = scmp.lt.s32.totalorder %s811_s6, 3 }
   0x4   : > { %p88_p2 = pnand %p723_p0, %p87_p1 }
   0x5   : > { %p107_p3 = scmp.lt.s32.totalorder (!%p88_p2), %s719_s7, 1  ;;  %s813_s12 = smov (!%p88_p2), 32  }
   0x6   : > { %91 = sbr.rel (%p88_p2) target bundleno = 263 (0x107), region = 24 }
   0xb   : > { %s1268_s7 = smov (!%p107_p3, %s719_s7), 1  ;;  %vm502_vm0 = vcmask 261120   ;;  %vm631_vm1 = vcmask 785408  }
   0xc   : > { %s794_s8 = sshll.u32 %s1268_s7, 10  ;;  %s795_s13 = sshll.u32 %s1268_s7, 8 }
   0xd   : > { %s838_s11 = scalar_lea.vmem %s1265_s0, %s794_s8  ;;  %s1128_s16 = scalar_lea.vmem %s1266_s1, %s795_s13 }
   0xe   : > { %v119_v0 = vld [vmem:[%s838_s11 + $0x10] sm:$0xff]  ;;  %v117_v2 = vld [vmem:[%s838_s11] sm:$0xff]  ;;  %v120_v5 = vld [vmem:[%s838_s11 + $0x18] sm:$0xff] }
   0xf   : > { %v730_v1 = vld [vmem:[%s838_s11 + $0x30] sm:$0xff]  ;;  %v728_v4 = vld [vmem:[%s838_s11 + $0x20] sm:$0xff]  ;;  %v731_v6 = vld [vmem:[%s838_s11 + $0x38] sm:$0xff] }
  0x10   : > { %v843_v3 = vmax.f32 %v119_v0, %v730_v1  ;;  %v848_v7 = vmax.f32 %v117_v2, %v728_v4  ;;  %v118_v8 = vld [vmem:[%s838_s11 + $0x8] sm:$0xff]  ;;  %v249_v10 = vmax.f32 %v120_v5, %v731_v6  ;;  %v121_v14 = vld [vmem:[%s838_s11 + $0x40] sm:$0xff]  ;;  %v124_v18 = vld [vmem:[%s838_s11 + $0x58] sm:$0xff] }
  0x11   : > { %v729_v9 = vld [vmem:[%s838_s11 + $0x28] sm:$0xff]  ;;  %v732_v15 = vld [vmem:[%s838_s11 + $0x60] sm:$0xff]  ;;  %v735_v19 = vld [vmem:[%s838_s11 + $0x78] sm:$0xff] }
  0x12   : > { %378 = vrot.lane.b32.xlu1 %v843_v3, %s813_s12  ;;  %374 = vrot.lane.b32.xlu0 %v848_v7, %s813_s12  ;;  %v247_v11 = vmax.f32 %v118_v8, %v729_v9  ;;  %v122_v12 = vld [vmem:[%s838_s11 + $0x48] sm:$0xff]  ;;  %v862_v17 = vmax.f32 %v121_v14, %v732_v15  ;;  %v123_v20 = vld [vmem:[%s838_s11 + $0x50] sm:$0xff]  ;;  %v253_v22 = vmax.f32 %v124_v18, %v735_v19 }
  0x13   : > { %v733_v13 = vld [vmem:[%s838_s11 + $0x68] sm:$0xff]  ;;  %v734_v21 = vld [vmem:[%s838_s11 + $0x70] sm:$0xff]  ;;  %v125_v26 = vld [vmem:[%s838_s11 + $0x80] sm:$0xff] }
  0x14   : > { %v251_v16 = vmax.f32 %v122_v12, %v733_v13  ;;  %v871_v23 = vmax.f32 %v123_v20, %v734_v21  ;;  %v126_v24 = vld [vmem:[%s838_s11 + $0x88] sm:$0xff]  ;;  %v736_v27 = vld [vmem:[%s838_s11 + $0xa0] sm:$0xff]  ;;  %v128_v30 = vld [vmem:[%s838_s11 + $0x98] sm:$0xff] }
  0x15   : > { %v737_v25 = vld [vmem:[%s838_s11 + $0xa8] sm:$0xff]  ;;  %v880_v29 = vmax.f32 %v125_v26, %v736_v27  ;;  %v739_v31 = vld [vmem:[%s838_s11 + $0xb8] sm:$0xff]  ;;  %v127_v32 = vld [vmem:[%s838_s11 + $0x90] sm:$0xff] }
  0x16   : > { %380 = vrot.lane.b32.xlu1 %v249_v10, %s813_s12  ;;  %376 = vrot.lane.b32.xlu0 %v247_v11, %s813_s12  ;;  %v255_v28 = vmax.f32 %v126_v24, %v737_v25  ;;  %v738_v33 = vld [vmem:[%s838_s11 + $0xb0] sm:$0xff]  ;;  %v257_v34 = vmax.f32 %v128_v30, %v739_v31  ;;  %v130_v36 = vld [vmem:[%s838_s11 + $0xc8] sm:$0xff] }
  0x17   : > { %v889_v35 = vmax.f32 %v127_v32, %v738_v33  ;;  %v741_v37 = vld [vmem:[%s838_s11 + $0xe8] sm:$0xff]  ;;  %v129_v38 = vld [vmem:[%s838_s11 + $0xc0] sm:$0xff]  ;;  %v132_v42 = vld [vmem:[%s838_s11 + $0xd8] sm:$0xff] }
  0x18   : > { %v740_v39 = vld [vmem:[%s838_s11 + $0xe0] sm:$0xff]  ;;  %v259_v40 = vmax.f32 %v130_v36, %v741_v37  ;;  %v743_v43 = vld [vmem:[%s838_s11 + $0xf8] sm:$0xff]  ;;  %v131_v44 = vld [vmem:[%s838_s11 + $0xd0] sm:$0xff] }
  0x19   : > { %v898_v41 = vmax.f32 %v129_v38, %v740_v39  ;;  %v742_v45 = vld [vmem:[%s838_s11 + $0xf0] sm:$0xff]  ;;  %v261_v46 = vmax.f32 %v132_v42, %v743_v43  ;;  %v134_v48 = vld [vmem:[%s838_s11 + $0x108] sm:$0xff]  ;;  %v133_v50 = vld [vmem:[%s838_s11 + $0x100] sm:$0xff] }
  0x1a   : > { %384 = vrot.lane.b32.xlu1 %v251_v16, %s813_s12  ;;  %382 = vrot.lane.b32.xlu0 %v862_v17, %s813_s12  ;;  %v907_v47 = vmax.f32 %v131_v44, %v742_v45  ;;  %v745_v49 = vld [vmem:[%s838_s11 + $0x128] sm:$0xff]  ;;  %v744_v51 = vld [vmem:[%s838_s11 + $0x120] sm:$0xff] }
  0x1b   : > { %v263_v52 = vmax.f32 %v134_v48, %v745_v49  ;;  %v916_v53 = vmax.f32 %v133_v50, %v744_v51  ;;  %v136_v54 = vld [vmem:[%s838_s11 + $0x118] sm:$0xff]  ;;  %v135_v56 = vld [vmem:[%s838_s11 + $0x110] sm:$0xff]  ;;  %v138_v60 = vld [vmem:[%s838_s11 + $0x148] sm:$0xff] }
  0x1c   : > { %v747_v55 = vld [vmem:[%s838_s11 + $0x138] sm:$0xff]  ;;  %v746_v57 = vld [vmem:[%s838_s11 + $0x130] sm:$0xff]  ;;  %v749_v61 = vld [vmem:[%s838_s11 + $0x168] sm:$0xff] }
  0x1d   : > { %v265_v58 = vmax.f32 %v136_v54, %v747_v55  ;;  %v925_v59 = vmax.f32 %v135_v56, %v746_v57  ;;  %v137_v62 = vld [vmem:[%s838_s11 + $0x140] sm:$0xff]  ;;  %v267_v0 = vmax.f32 %v138_v60, %v749_v61  ;;  %v140_v2 = vld [vmem:[%s838_s11 + $0x158] sm:$0xff]  ;;  %v139_v5 = vld [vmem:[%s838_s11 + $0x150] sm:$0xff] }
  0x1e   : > { %388 = vrot.lane.b32.xlu1 %v253_v22, %s813_s12  ;;  %386 = vrot.lane.b32.xlu0 %v871_v23, %s813_s12  ;;  %v748_v63 = vld [vmem:[%s838_s11 + $0x160] sm:$0xff]  ;;  %v751_v4 = vld [vmem:[%s838_s11 + $0x178] sm:$0xff] }
  0x1f   : > { %v934_v1 = vmax.f32 %v137_v62, %v748_v63  ;;  %v750_v6 = vld [vmem:[%s838_s11 + $0x170] sm:$0xff]  ;;  %v269_v8 = vmax.f32 %v140_v2, %v751_v4  ;;  %v142_v10 = vld [vmem:[%s838_s11 + $0x188] sm:$0xff]  ;;  %v141_v12 = vld [vmem:[%s838_s11 + $0x180] sm:$0xff] }
  0x20   : > { %v943_v9 = vmax.f32 %v139_v5, %v750_v6  ;;  %v753_v11 = vld [vmem:[%s838_s11 + $0x1a8] sm:$0xff]  ;;  %v752_v13 = vld [vmem:[%s838_s11 + $0x1a0] sm:$0xff]  ;;  %v144_v16 = vld [vmem:[%s838_s11 + $0x198] sm:$0xff] }
  0x21   : > { %v271_v14 = vmax.f32 %v142_v10, %v753_v11  ;;  %v952_v15 = vmax.f32 %v141_v12, %v752_v13  ;;  %v755_v18 = vld [vmem:[%s838_s11 + $0x1b8] sm:$0xff]  ;;  %v143_v19 = vld [vmem:[%s838_s11 + $0x190] sm:$0xff]  ;;  %v146_v24 = vld [vmem:[%s838_s11 + $0x1c8] sm:$0xff] }
  0x22   : > { %392 = vrot.lane.b32.xlu1 %v255_v28, %s813_s12  ;;  %390 = vrot.lane.b32.xlu0 %v880_v29, %s813_s12  ;;  %v754_v20 = vld [vmem:[%s838_s11 + $0x1b0] sm:$0xff]  ;;  %v273_v21 = vmax.f32 %v144_v16, %v755_v18  ;;  %v757_v25 = vld [vmem:[%s838_s11 + $0x1e8] sm:$0xff] }
  0x23   : > { %v961_v22 = vmax.f32 %v143_v19, %v754_v20  ;;  %v145_v26 = vld [vmem:[%s838_s11 + $0x1c0] sm:$0xff]  ;;  %v275_v28 = vmax.f32 %v146_v24, %v757_v25  ;;  %v148_v31 = vld [vmem:[%s838_s11 + $0x1d8] sm:$0xff]  ;;  %v147_v33 = vld [vmem:[%s838_s11 + $0x1d0] sm:$0xff] }
  0x24   : > { %v756_v27 = vld [vmem:[%s838_s11 + $0x1e0] sm:$0xff]  ;;  %v759_v32 = vld [vmem:[%s838_s11 + $0x1f8] sm:$0xff]  ;;  %v150_v38 = vld [vmem:[%s838_s11 + $0x208] sm:$0xff] }
  0x25   : > { %v970_v30 = vmax.f32 %v145_v26, %v756_v27  ;;  %v277_v36 = vmax.f32 %v148_v31, %v759_v32  ;;  %v761_v39 = vld [vmem:[%s838_s11 + $0x228] sm:$0xff]  ;;  %v760_v42 = vld [vmem:[%s838_s11 + $0x220] sm:$0xff]  ;;  %v152_v45 = vld [vmem:[%s838_s11 + $0x218] sm:$0xff] }
  0x26   : > { %396 = vrot.lane.b32.xlu1 %v257_v34, %s813_s12  ;;  %394 = vrot.lane.b32.xlu0 %v889_v35, %s813_s12  ;;  %v758_v34 = vld [vmem:[%s838_s11 + $0x1f0] sm:$0xff]  ;;  %v279_v43 = vmax.f32 %v150_v38, %v761_v39  ;;  %v765_v54 = vld [vmem:[%s838_s11 + $0x268] sm:$0xff] }
  0x27   : > { %v979_v37 = vmax.f32 %v147_v33, %v758_v34  ;;  %v151_v48 = vld [vmem:[%s838_s11 + $0x210] sm:$0xff]  ;;  %v153_v55 = vld [vmem:[%s838_s11 + $0x240] sm:$0xff]  ;;  %v156_v60 = vld [vmem:[%s838_s11 + $0x258] sm:$0xff] }
  0x28   : > { %v762_v49 = vld [vmem:[%s838_s11 + $0x230] sm:$0xff]  ;;  %v764_v56 = vld [vmem:[%s838_s11 + $0x260] sm:$0xff]  ;;  %v767_v61 = vld [vmem:[%s838_s11 + $0x278] sm:$0xff] }
  0x29   : > { %v997_v51 = vmax.f32 %v151_v48, %v762_v49  ;;  %v155_v62 = vld [vmem:[%s838_s11 + $0x250] sm:$0xff]  ;;  %v158_v4 = vld [vmem:[%s838_s11 + $0x288] sm:$0xff]  ;;  %v157_v6 = vld [vmem:[%s838_s11 + $0x280] sm:$0xff] }
  0x2a   : > { %400 = vrot.lane.b32.xlu1 %v259_v40, %s813_s12  ;;  %398 = vrot.lane.b32.xlu0 %v898_v41, %s813_s12  ;;  %v149_v40 = vld [vmem:[%s838_s11 + $0x200] sm:$0xff]  ;;  %v766_v63 = vld [vmem:[%s838_s11 + $0x270] sm:$0xff] }
  0x2b   : > { %v988_v44 = vmax.f32 %v149_v40, %v760_v42  ;;  %v1015_v2 = vmax.f32 %v155_v62, %v766_v63  ;;  %v769_v5 = vld [vmem:[%s838_s11 + $0x2a8] sm:$0xff]  ;;  %v160_v12 = vld [vmem:[%s838_s11 + $0x298] sm:$0xff]  ;;  %v770_v16 = vld [vmem:[%s838_s11 + $0x2b0] sm:$0xff] }
  0x2c   : > { %v287_v10 = vmax.f32 %v158_v4, %v769_v5  ;;  %v771_v13 = vld [vmem:[%s838_s11 + $0x2b8] sm:$0xff]  ;;  %v162_v20 = vld [vmem:[%s838_s11 + $0x2c8] sm:$0xff]  ;;  %v161_v24 = vld [vmem:[%s838_s11 + $0x2c0] sm:$0xff] }
  0x2d   : > { %v289_v18 = vmax.f32 %v160_v12, %v771_v13  ;;  %v772_v25 = vld [vmem:[%s838_s11 + $0x2e0] sm:$0xff]  ;;  %v775_v31 = vld [vmem:[%s838_s11 + $0x2f8] sm:$0xff]  ;;  %v163_v32 = vld [vmem:[%s838_s11 + $0x2d0] sm:$0xff] }
  0x2e   : > { %404 = vrot.lane.b32.xlu1 %v261_v46, %s813_s12  ;;  %402 = vrot.lane.b32.xlu0 %v907_v47, %s813_s12  ;;  %v763_v46 = vld [vmem:[%s838_s11 + $0x238] sm:$0xff]  ;;  %v1042_v27 = vmax.f32 %v161_v24, %v772_v25  ;;  %v774_v33 = vld [vmem:[%s838_s11 + $0x2f0] sm:$0xff] }
  0x2f   : > { %v281_v50 = vmax.f32 %v152_v45, %v763_v46  ;;  %v166_v38 = vld [vmem:[%s838_s11 + $0x308] sm:$0xff]  ;;  %v165_v40 = vld [vmem:[%s838_s11 + $0x300] sm:$0xff]  ;;  %v168_v46 = vld [vmem:[%s838_s11 + $0x318] sm:$0xff] }
  0x30   : > { %v777_v39 = vld [vmem:[%s838_s11 + $0x328] sm:$0xff]  ;;  %v776_v42 = vld [vmem:[%s838_s11 + $0x320] sm:$0xff]  ;;  %v779_v48 = vld [vmem:[%s838_s11 + $0x338] sm:$0xff] }
  0x31   : > { %v1060_v45 = vmax.f32 %v165_v40, %v776_v42  ;;  %v167_v49 = vld [vmem:[%s838_s11 + $0x310] sm:$0xff]  ;;  %v172_v63 = vld [vmem:[%s838_s11 + $0x358] sm:$0xff]  ;;  %v785_v12 = vld [vmem:[%s838_s11 + $0x3a8] sm:$0xff] }
  0x32   : > { %408 = vrot.lane.b32.xlu1 %v263_v52, %s813_s12  ;;  %406 = vrot.lane.b32.xlu0 %v916_v53, %s813_s12  ;;  %v154_v52 = vld [vmem:[%s838_s11 + $0x248] sm:$0xff]  ;;  %v171_v4 = vld [vmem:[%s838_s11 + $0x350] sm:$0xff] }
  0x33   : > { %v283_v57 = vmax.f32 %v154_v52, %v765_v54  ;;  %v297_v52 = vmax.f32 %v168_v46, %v779_v48  ;;  %v782_v5 = vld [vmem:[%s838_s11 + $0x370] sm:$0xff]  ;;  %v173_v13 = vld [vmem:[%s838_s11 + $0x380] sm:$0xff]  ;;  %v791_v46 = vld [vmem:[%s838_s11 + $0x3f8] sm:$0xff] }
  0x34   : > { %v175_v24 = vld [vmem:[%s838_s11 + $0x390] sm:$0xff] }
  0x35   : > { %v786_v25 = vld [vmem:[%s838_s11 + $0x3b0] sm:$0xff] }
  0x36   : > { %412 = vrot.lane.b32.xlu1 %v265_v58, %s813_s12  ;;  %410 = vrot.lane.b32.xlu0 %v925_v59, %s813_s12  ;;  %v1006_v58 = vmax.f32 %v153_v55, %v764_v56  ;;  %v170_v55 = vld [vmem:[%s838_s11 + $0x348] sm:$0xff] }
  0x37   : > { %v781_v56 = vld [vmem:[%s838_s11 + $0x368] sm:$0xff] }
  0x3a   : > { %416 = vrot.lane.b32.xlu1 %v267_v0, %s813_s12  ;;  %414 = vrot.lane.b32.xlu0 %v934_v1, %s813_s12  ;;  %v285_v0 = vmax.f32 %v156_v60, %v767_v61  ;;  %v780_v60 = vld [vmem:[%s838_s11 + $0x360] sm:$0xff]  ;;  %v299_v61 = vmax.f32 %v170_v55, %v781_v56 }
  0x3e   : > { %420 = vrot.lane.b32.xlu1 %v269_v8, %s813_s12  ;;  %418 = vrot.lane.b32.xlu0 %v943_v9, %s813_s12  ;;  %v768_v8 = vld [vmem:[%s838_s11 + $0x2a0] sm:$0xff] }
  0x3f   : > { %v1024_v11 = vmax.f32 %v157_v6, %v768_v8  ;;  %v1087_v8 = vmax.f32 %v171_v4, %v782_v5 }
  0x42   : > { %424 = vrot.lane.b32.xlu1 %v271_v14, %s813_s12  ;;  %422 = vrot.lane.b32.xlu0 %v952_v15, %s813_s12  ;;  %v159_v14 = vld [vmem:[%s838_s11 + $0x290] sm:$0xff] }
  0x43   : > { %v1033_v19 = vmax.f32 %v159_v14, %v770_v16  ;;  %v784_v14 = vld [vmem:[%s838_s11 + $0x3a0] sm:$0xff] }
  0x46   : > { %428 = vrot.lane.b32.xlu1 %v273_v21, %s813_s12  ;;  %426 = vrot.lane.b32.xlu0 %v961_v22, %s813_s12  ;;  %v773_v21 = vld [vmem:[%s838_s11 + $0x2e8] sm:$0xff] }
  0x47   : > { %v291_v26 = vmax.f32 %v162_v20, %v773_v21  ;;  %v176_v20 = vld [vmem:[%s838_s11 + $0x398] sm:$0xff] }
  0x48   : > { %v787_v21 = vld [vmem:[%s838_s11 + $0x3b8] sm:$0xff] }
  0x4a   : > { %432 = vrot.lane.b32.xlu1 %v275_v28, %s813_s12  ;;  %430 = vrot.lane.b32.xlu0 %v970_v30, %s813_s12  ;;  %v164_v28 = vld [vmem:[%s838_s11 + $0x2d8] sm:$0xff] }
  0x4b   : > { %v293_v34 = vmax.f32 %v164_v28, %v775_v31  ;;  %v1105_v28 = vmax.f32 %v175_v24, %v786_v25  ;;  %v178_v31 = vld [vmem:[%s838_s11 + $0x3c8] sm:$0xff] }
  0x4e   : > { %436 = vrot.lane.b32.xlu1 %v277_v36, %s813_s12  ;;  %434 = vrot.lane.b32.xlu0 %v979_v37, %s813_s12  ;;  %v1051_v36 = vmax.f32 %v163_v32, %v774_v33  ;;  %v789_v32 = vld [vmem:[%s838_s11 + $0x3e8] sm:$0xff] }
  0x4f   : > { %v307_v40 = vmax.f32 %v178_v31, %v789_v32 }
  0x52   : > { %440 = vrot.lane.b32.xlu1 %v279_v43, %s813_s12  ;;  %438 = vrot.lane.b32.xlu0 %v988_v44, %s813_s12  ;;  %v295_v43 = vmax.f32 %v166_v38, %v777_v39  ;;  %v788_v38 = vld [vmem:[%s838_s11 + $0x3e0] sm:$0xff] }
  0x56   : > { %444 = vrot.lane.b32.xlu1 %v281_v50, %s813_s12  ;;  %442 = vrot.lane.b32.xlu0 %v997_v51, %s813_s12  ;;  %v778_v50 = vld [vmem:[%s838_s11 + $0x330] sm:$0xff] }
  0x57   : > { %v1069_v54 = vmax.f32 %v167_v49, %v778_v50  ;;  %v179_v49 = vld [vmem:[%s838_s11 + $0x3d0] sm:$0xff] }
  0x58   : > { %v790_v50 = vld [vmem:[%s838_s11 + $0x3f0] sm:$0xff] }
  0x5a   : > { %448 = vrot.lane.b32.xlu1 %v283_v57, %s813_s12  ;;  %446 = vrot.lane.b32.xlu0 %v1006_v58, %s813_s12  ;;  %v169_v57 = vld [vmem:[%s838_s11 + $0x340] sm:$0xff] }
  0x5b   : > { %v1078_v62 = vmax.f32 %v169_v57, %v780_v60 }
  0x5e   : > { %452 = vrot.lane.b32.xlu1 %v285_v0, %s813_s12  ;;  %450 = vrot.lane.b32.xlu0 %v1015_v2, %s813_s12  ;;  %v783_v0 = vld [vmem:[%s838_s11 + $0x378] sm:$0xff] }
  0x5f   : > { %v301_v6 = vmax.f32 %v172_v63, %v783_v0 }
  0x62   : > { %456 = vrot.lane.b32.xlu1 %v287_v10, %s813_s12  ;;  %454 = vrot.lane.b32.xlu0 %v1024_v11, %s813_s12  ;;  %v174_v10 = vld [vmem:[%s838_s11 + $0x388] sm:$0xff] }
  0x63   : > { %v303_v16 = vmax.f32 %v174_v10, %v785_v12 }
  0x66   : > { %460 = vrot.lane.b32.xlu1 %v289_v18, %s813_s12  ;;  %458 = vrot.lane.b32.xlu0 %v1033_v19, %s813_s12  ;;  %v1096_v18 = vmax.f32 %v173_v13, %v784_v14 }
  0x6a   : > { %464 = vrot.lane.b32.xlu1 %v291_v26, %s813_s12  ;;  %462 = vrot.lane.b32.xlu0 %v1042_v27, %s813_s12  ;;  %v305_v26 = vmax.f32 %v176_v20, %v787_v21 }
  0x6e   : > { %468 = vrot.lane.b32.xlu1 %v293_v34, %s813_s12  ;;  %466 = vrot.lane.b32.xlu0 %v1051_v36, %s813_s12  ;;  %v177_v34 = vld [vmem:[%s838_s11 + $0x3c0] sm:$0xff] }
  0x6f   : > { %v1114_v42 = vmax.f32 %v177_v34, %v788_v38 }
  0x72   : > { %472 = vrot.lane.b32.xlu1 %v295_v43, %s813_s12  ;;  %470 = vrot.lane.b32.xlu0 %v1060_v45, %s813_s12  ;;  %v180_v43 = vld [vmem:[%s838_s11 + $0x3d8] sm:$0xff] }
  0x73   : > { %v309_v60 = vmax.f32 %v180_v43, %v791_v46 }
  0x76   : > { %476 = vrot.lane.b32.xlu1 %v297_v52, %s813_s12  ;;  %474 = vrot.lane.b32.xlu0 %v1069_v54, %s813_s12 }
  0x7a   : > { %480 = vrot.lane.b32.xlu1 %v299_v61, %s813_s12  ;;  %478 = vrot.lane.b32.xlu0 %v1078_v62, %s813_s12 }
  0x7e   : > { %484 = vrot.lane.b32.xlu1 %v301_v6, %s813_s12  ;;  %482 = vrot.lane.b32.xlu0 %v1087_v8, %s813_s12 }
  0x82   : > { %488 = vrot.lane.b32.xlu1 %v303_v16, %s813_s12  ;;  %486 = vrot.lane.b32.xlu0 %v1096_v18, %s813_s12 }
  0x84   : > { %v379_v33 = vpop.permute.xlu1 %378  ;;  %v375_v39 = vpop.permute.xlu0 %374 }
  0x86   : > { %492 = vrot.lane.b32.xlu1 %v305_v26, %s813_s12  ;;  %490 = vrot.lane.b32.xlu0 %v1105_v28, %s813_s12 }
  0x88   : > { %v381_v48 = vpop.permute.xlu1 %380  ;;  %v377_v55 = vpop.permute.xlu0 %376 }
  0x89   : > { %v504_v52 = vsel %vm502_vm0, %v379_v33, %v381_v48  ;;  %v503_v57 = vsel %vm502_vm0, %v375_v39, %v377_v55 }
  0x8a   : > { %v568_v56 = vmax.f32 %v843_v3, %v504_v52  ;;  %496 = vrot.lane.b32.xlu1 %v307_v40, %s813_s12  ;;  %v567_v61 = vmax.f32 %v848_v7, %v503_v57  ;;  %494 = vrot.lane.b32.xlu0 %v1114_v42, %s813_s12  ;;  %v1133_v3 = vmax.f32 %v179_v49, %v790_v50 }
  0x8c   : > { %v600_v63 = vmax.f32 %v568_v56, 0.0  ;;  %v385_v0 = vpop.permute.xlu1 %384  ;;  %v599_v4 = vmax.f32 %v567_v61, 0.0  ;;  %v383_v5 = vpop.permute.xlu0 %382 }
  0x8d   : > { %v505_v6 = vsel %vm502_vm0, %v383_v5, %v385_v0 }
  0x8e   : > { %633 = vst.msk [vmem:[%s1128_s16 + $0x8] sm:$0xff] %vm631_vm1, %v600_v63  ;;  %500 = vrot.lane.b32.xlu1 %v309_v60, %s813_s12  ;;  %632 = vst.msk [vmem:[%s1128_s16] sm:$0xff] %vm631_vm1, %v599_v4  ;;  %v569_v7 = vmax.f32 %v862_v17, %v505_v6  ;;  %498 = vrot.lane.b32.xlu0 %v1133_v3, %s813_s12 }
  0x90   : > { %v389_v10 = vpop.permute.xlu1 %388  ;;  %v601_v12 = vmax.f32 %v569_v7, 0.0  ;;  %v387_v13 = vpop.permute.xlu0 %386 }
  0x91   : > { %v506_v14 = vsel %vm502_vm0, %v387_v13, %v389_v10 }
  0x92   : > { %634 = vst.msk [vmem:[%s1128_s16 + $0x10] sm:$0xff] %vm631_vm1, %v601_v12  ;;  %v570_v16 = vmax.f32 %v871_v23, %v506_v14 }
  0x94   : > { %v393_v20 = vpop.permute.xlu1 %392  ;;  %v602_v21 = vmax.f32 %v570_v16, 0.0  ;;  %v391_v24 = vpop.permute.xlu0 %390 }
  0x95   : > { %v507_v25 = vsel %vm502_vm0, %v391_v24, %v393_v20 }
  0x96   : > { %635 = vst.msk [vmem:[%s1128_s16 + $0x18] sm:$0xff] %vm631_vm1, %v602_v21  ;;  %v571_v17 = vmax.f32 %v880_v29, %v507_v25 }
  0x98   : > { %v397_v26 = vpop.permute.xlu1 %396  ;;  %v603_v31 = vmax.f32 %v571_v17, 0.0  ;;  %v395_v32 = vpop.permute.xlu0 %394 }
  0x99   : > { %v508_v33 = vsel %vm502_vm0, %v395_v32, %v397_v26 }
  0x9a   : > { %636 = vst.msk [vmem:[%s1128_s16 + $0x20] sm:$0xff] %vm631_vm1, %v603_v31  ;;  %v572_v23 = vmax.f32 %v889_v35, %v508_v33 }
  0x9c   : > { %v401_v34 = vpop.permute.xlu1 %400  ;;  %v604_v38 = vmax.f32 %v572_v23, 0.0  ;;  %v399_v39 = vpop.permute.xlu0 %398 }
  0x9d   : > { %v509_v40 = vsel %vm502_vm0, %v399_v39, %v401_v34 }
  0x9e   : > { %637 = vst.msk [vmem:[%s1128_s16 + $0x28] sm:$0xff] %vm631_vm1, %v604_v38  ;;  %v573_v29 = vmax.f32 %v898_v41, %v509_v40 }
  0xa0   : > { %v405_v43 = vpop.permute.xlu1 %404  ;;  %v605_v46 = vmax.f32 %v573_v29, 0.0  ;;  %v403_v48 = vpop.permute.xlu0 %402 }
  0xa1   : > { %v510_v49 = vsel %vm502_vm0, %v403_v48, %v405_v43 }
  0xa2   : > { %638 = vst.msk [vmem:[%s1128_s16 + $0x30] sm:$0xff] %vm631_vm1, %v605_v46  ;;  %v574_v35 = vmax.f32 %v907_v47, %v510_v49 }
  0xa4   : > { %v409_v50 = vpop.permute.xlu1 %408  ;;  %v606_v52 = vmax.f32 %v574_v35, 0.0  ;;  %v407_v55 = vpop.permute.xlu0 %406 }
  0xa5   : > { %v511_v56 = vsel %vm502_vm0, %v407_v55, %v409_v50 }
  0xa6   : > { %639 = vst.msk [vmem:[%s1128_s16 + $0x38] sm:$0xff] %vm631_vm1, %v606_v52  ;;  %v575_v41 = vmax.f32 %v916_v53, %v511_v56 }
  0xa8   : > { %v413_v57 = vpop.permute.xlu1 %412  ;;  %v607_v60 = vmax.f32 %v575_v41, 0.0  ;;  %v411_v61 = vpop.permute.xlu0 %410 }
  0xa9   : > { %v512_v63 = vsel %vm502_vm0, %v411_v61, %v413_v57 }
  0xaa   : > { %640 = vst.msk [vmem:[%s1128_s16 + $0x40] sm:$0xff] %vm631_vm1, %v607_v60  ;;  %v576_v47 = vmax.f32 %v925_v59, %v512_v63 }
  0xac   : > { %v417_v0 = vpop.permute.xlu1 %416  ;;  %v608_v4 = vmax.f32 %v576_v47, 0.0  ;;  %v415_v5 = vpop.permute.xlu0 %414 }
  0xad   : > { %v513_v6 = vsel %vm502_vm0, %v415_v5, %v417_v0 }
  0xae   : > { %641 = vst.msk [vmem:[%s1128_s16 + $0x48] sm:$0xff] %vm631_vm1, %v608_v4  ;;  %v577_v53 = vmax.f32 %v934_v1, %v513_v6 }
  0xb0   : > { %v421_v7 = vpop.permute.xlu1 %420  ;;  %v609_v10 = vmax.f32 %v577_v53, 0.0  ;;  %v419_v12 = vpop.permute.xlu0 %418 }
  0xb1   : > { %v514_v13 = vsel %vm502_vm0, %v419_v12, %v421_v7 }
  0xb2   : > { %642 = vst.msk [vmem:[%s1128_s16 + $0x50] sm:$0xff] %vm631_vm1, %v609_v10  ;;  %v578_v59 = vmax.f32 %v943_v9, %v514_v13 }
  0xb4   : > { %v425_v14 = vpop.permute.xlu1 %424  ;;  %v610_v16 = vmax.f32 %v578_v59, 0.0  ;;  %v423_v20 = vpop.permute.xlu0 %422 }
  0xb5   : > { %v515_v21 = vsel %vm502_vm0, %v423_v20, %v425_v14 }
  0xb6   : > { %643 = vst.msk [vmem:[%s1128_s16 + $0x58] sm:$0xff] %vm631_vm1, %v610_v16  ;;  %v579_v1 = vmax.f32 %v952_v15, %v515_v21 }
  0xb8   : > { %v429_v24 = vpop.permute.xlu1 %428  ;;  %v611_v25 = vmax.f32 %v579_v1, 0.0  ;;  %v427_v17 = vpop.permute.xlu0 %426 }
  0xb9   : > { %v516_v26 = vsel %vm502_vm0, %v427_v17, %v429_v24 }
  0xba   : > { %644 = vst.msk [vmem:[%s1128_s16 + $0x60] sm:$0xff] %vm631_vm1, %v611_v25  ;;  %v580_v9 = vmax.f32 %v961_v22, %v516_v26 }
  0xbc   : > { %v433_v31 = vpop.permute.xlu1 %432  ;;  %v612_v32 = vmax.f32 %v580_v9, 0.0  ;;  %v431_v33 = vpop.permute.xlu0 %430 }
  0xbd   : > { %v517_v23 = vsel %vm502_vm0, %v431_v33, %v433_v31 }
  0xbe   : > { %645 = vst.msk [vmem:[%s1128_s16 + $0x68] sm:$0xff] %vm631_vm1, %v612_v32  ;;  %v581_v15 = vmax.f32 %v970_v30, %v517_v23 }
  0xc0   : > { %v437_v34 = vpop.permute.xlu1 %436  ;;  %v613_v38 = vmax.f32 %v581_v15, 0.0  ;;  %v435_v39 = vpop.permute.xlu0 %434 }
  0xc1   : > { %v518_v40 = vsel %vm502_vm0, %v435_v39, %v437_v34 }
  0xc2   : > { %646 = vst.msk [vmem:[%s1128_s16 + $0x70] sm:$0xff] %vm631_vm1, %v613_v38  ;;  %v582_v22 = vmax.f32 %v979_v37, %v518_v40 }
  0xc4   : > { %v441_v29 = vpop.permute.xlu1 %440  ;;  %v614_v43 = vmax.f32 %v582_v22, 0.0  ;;  %v439_v46 = vpop.permute.xlu0 %438 }
  0xc5   : > { %v519_v48 = vsel %vm502_vm0, %v439_v46, %v441_v29 }
  0xc6   : > { %647 = vst.msk [vmem:[%s1128_s16 + $0x78] sm:$0xff] %vm631_vm1, %v614_v43  ;;  %v583_v30 = vmax.f32 %v988_v44, %v519_v48 }
  0xc8   : > { %v445_v49 = vpop.permute.xlu1 %444  ;;  %v615_v35 = vmax.f32 %v583_v30, 0.0  ;;  %v443_v50 = vpop.permute.xlu0 %442 }
  0xc9   : > { %v520_v52 = vsel %vm502_vm0, %v443_v50, %v445_v49 }
  0xca   : > { %648 = vst.msk [vmem:[%s1128_s16 + $0x80] sm:$0xff] %vm631_vm1, %v615_v35  ;;  %v584_v37 = vmax.f32 %v997_v51, %v520_v52 }
  0xcc   : > { %v449_v55 = vpop.permute.xlu1 %448  ;;  %v616_v56 = vmax.f32 %v584_v37, 0.0  ;;  %v447_v41 = vpop.permute.xlu0 %446 }
  0xcd   : > { %v521_v57 = vsel %vm502_vm0, %v447_v41, %v449_v55 }
  0xce   : > { %649 = vst.msk [vmem:[%s1128_s16 + $0x88] sm:$0xff] %vm631_vm1, %v616_v56  ;;  %v585_v44 = vmax.f32 %v1006_v58, %v521_v57 }
  0xd0   : > { %v453_v60 = vpop.permute.xlu1 %452  ;;  %v617_v61 = vmax.f32 %v585_v44, 0.0  ;;  %v451_v63 = vpop.permute.xlu0 %450 }
  0xd1   : > { %v522_v47 = vsel %vm502_vm0, %v451_v63, %v453_v60 }
  0xd2   : > { %650 = vst.msk [vmem:[%s1128_s16 + $0x90] sm:$0xff] %vm631_vm1, %v617_v61  ;;  %v586_v51 = vmax.f32 %v1015_v2, %v522_v47 }
  0xd4   : > { %v457_v0 = vpop.permute.xlu1 %456  ;;  %v618_v4 = vmax.f32 %v586_v51, 0.0  ;;  %v455_v5 = vpop.permute.xlu0 %454 }
  0xd5   : > { %v523_v6 = vsel %vm502_vm0, %v455_v5, %v457_v0 }
  0xd6   : > { %651 = vst.msk [vmem:[%s1128_s16 + $0x98] sm:$0xff] %vm631_vm1, %v618_v4  ;;  %v587_v58 = vmax.f32 %v1024_v11, %v523_v6 }
  0xd8   : > { %v461_v53 = vpop.permute.xlu1 %460  ;;  %v619_v7 = vmax.f32 %v587_v58, 0.0  ;;  %v459_v10 = vpop.permute.xlu0 %458 }
  0xd9   : > { %v524_v12 = vsel %vm502_vm0, %v459_v10, %v461_v53 }
  0xda   : > { %652 = vst.msk [vmem:[%s1128_s16 + $0xa0] sm:$0xff] %vm631_vm1, %v619_v7  ;;  %v588_v2 = vmax.f32 %v1033_v19, %v524_v12 }
  0xdc   : > { %v465_v13 = vpop.permute.xlu1 %464  ;;  %v620_v59 = vmax.f32 %v588_v2, 0.0  ;;  %v463_v14 = vpop.permute.xlu0 %462 }
  0xdd   : > { %v525_v16 = vsel %vm502_vm0, %v463_v14, %v465_v13 }
  0xde   : > { %653 = vst.msk [vmem:[%s1128_s16 + $0xa8] sm:$0xff] %vm631_vm1, %v620_v59  ;;  %v589_v11 = vmax.f32 %v1042_v27, %v525_v16 }
  0xe0   : > { %v469_v20 = vpop.permute.xlu1 %468  ;;  %v621_v21 = vmax.f32 %v589_v11, 0.0  ;;  %v467_v1 = vpop.permute.xlu0 %466 }
  0xe1   : > { %v526_v24 = vsel %vm502_vm0, %v467_v1, %v469_v20 }
  0xe2   : > { %654 = vst.msk [vmem:[%s1128_s16 + $0xb0] sm:$0xff] %vm631_vm1, %v621_v21  ;;  %v590_v19 = vmax.f32 %v1051_v36, %v526_v24 }
  0xe4   : > { %v473_v25 = vpop.permute.xlu1 %472  ;;  %v622_v17 = vmax.f32 %v590_v19, 0.0  ;;  %v471_v26 = vpop.permute.xlu0 %470 }
  0xe5   : > { %v527_v9 = vsel %vm502_vm0, %v471_v26, %v473_v25 }
  0xe6   : > { %655 = vst.msk [vmem:[%s1128_s16 + $0xb8] sm:$0xff] %vm631_vm1, %v622_v17  ;;  %v591_v27 = vmax.f32 %v1060_v45, %v527_v9 }
  0xe8   : > { %v477_v31 = vpop.permute.xlu1 %476  ;;  %v623_v32 = vmax.f32 %v591_v27, 0.0  ;;  %v475_v33 = vpop.permute.xlu0 %474 }
  0xe9   : > { %v528_v23 = vsel %vm502_vm0, %v475_v33, %v477_v31 }
  0xea   : > { %656 = vst.msk [vmem:[%s1128_s16 + $0xc0] sm:$0xff] %vm631_vm1, %v623_v32  ;;  %v592_v36 = vmax.f32 %v1069_v54, %v528_v23 }
  0xec   : > { %v481_v15 = vpop.permute.xlu1 %480  ;;  %v624_v34 = vmax.f32 %v592_v36, 0.0  ;;  %v479_v38 = vpop.permute.xlu0 %478 }
  0xed   : > { %v529_v39 = vsel %vm502_vm0, %v479_v38, %v481_v15 }
  0xee   : > { %657 = vst.msk [vmem:[%s1128_s16 + $0xc8] sm:$0xff] %vm631_vm1, %v624_v34  ;;  %v593_v45 = vmax.f32 %v1078_v62, %v529_v39 }
  0xf0   : > { %v485_v40 = vpop.permute.xlu1 %484  ;;  %v625_v22 = vmax.f32 %v593_v45, 0.0  ;;  %v483_v29 = vpop.permute.xlu0 %482 }
  0xf1   : > { %v530_v43 = vsel %vm502_vm0, %v483_v29, %v485_v40 }
  0xf2   : > { %658 = vst.msk [vmem:[%s1128_s16 + $0xd0] sm:$0xff] %vm631_vm1, %v625_v22  ;;  %v594_v54 = vmax.f32 %v1087_v8, %v530_v43 }
  0xf4   : > { %v489_v46 = vpop.permute.xlu1 %488  ;;  %v626_v48 = vmax.f32 %v594_v54, 0.0  ;;  %v487_v30 = vpop.permute.xlu0 %486 }
  0xf5   : > { %v531_v49 = vsel %vm502_vm0, %v487_v30, %v489_v46 }
  0xf6   : > { %659 = vst.msk [vmem:[%s1128_s16 + $0xd8] sm:$0xff] %vm631_vm1, %v626_v48  ;;  %v595_v62 = vmax.f32 %v1096_v18, %v531_v49 }
  0xf8   : > { %v493_v35 = vpop.permute.xlu1 %492  ;;  %v627_v50 = vmax.f32 %v595_v62, 0.0  ;;  %v491_v52 = vpop.permute.xlu0 %490 }
  0xf9   : > { %v532_v37 = vsel %vm502_vm0, %v491_v52, %v493_v35 }
  0xfa   : > { %660 = vst.msk [vmem:[%s1128_s16 + $0xe0] sm:$0xff] %vm631_vm1, %v627_v50  ;;  %v596_v8 = vmax.f32 %v1105_v28, %v532_v37 }
  0xfc   : > { %v497_v55 = vpop.permute.xlu1 %496  ;;  %v628_v56 = vmax.f32 %v596_v8, 0.0  ;;  %v495_v41 = vpop.permute.xlu0 %494 }
  0xfd   : > { %v533_v57 = vsel %vm502_vm0, %v495_v41, %v497_v55 }
  0xfe   : > { %661 = vst.msk [vmem:[%s1128_s16 + $0xe8] sm:$0xff] %vm631_vm1, %v628_v56  ;;  %v597_v18 = vmax.f32 %v1114_v42, %v533_v57 }
 0x100   : > { %v501_v44 = vpop.permute.xlu1 %500  ;;  %v629_v60 = vmax.f32 %v597_v18, 0.0  ;;  %v499_v61 = vpop.permute.xlu0 %498 }
 0x101   : > { %v534_v63 = vsel %vm502_vm0, %v499_v61, %v501_v44 }
 0x102   : > { %662 = vst.msk [vmem:[%s1128_s16 + $0xf0] sm:$0xff] %vm631_vm1, %v629_v60  ;;  %v598_v47 = vmax.f32 %v1133_v3, %v534_v63 }
 0x104   : > { %v630_v51 = vmax.f32 %v598_v47, 0.0 }
 0x106   : > { %663 = vst.msk [vmem:[%s1128_s16 + $0xf8] sm:$0xff] %vm631_vm1, %v630_v51 }
 0x107 PF: > { %s11_s6 = sadd.s32 1, %s811_s6  }
 0x108   : > { %p8_p4 = scmp.ge.s32.totalorder %s11_s6, 4  }
 0x10a   :  { %10 = sbr.rel (!%p8_p4) target bundleno = 1 (0x1), region = 55 }

// kernel: wavelets_forward.18
= control target key start
LH: loop header
LB: loop body
LE: loop exit
PB: predicated region body
PF: predicated region fallthrough
CT: control target
= control target key end

     0   :  { %s1455_s0 = inlined_call_operand.vmem [shape: s32[6], index: 0, kind: input, shape index: {}]   ;;  %s1456_s1 = inlined_call_operand.vmem [shape: f32[3072,96], index: 1, kind: input, shape index: {}]   ;;  %s1457_s2 = inlined_call_operand.vmem [shape: f32[4,96,192], index: 2, kind: input, shape index: {}]   ;;  %s1458_s3 = inlined_call_operand.vmem [shape: f32[3072,192], index: 3, kind: output, shape index: {}]  }
   0x1   :  { %s8_s14 = sshll.u32 %s1455_s0, 4  ;;  %s9_s14 = int_to_ptr.vmem [resolvable:$true] %s8_s14 }
   0x2   :  { %s1034_s15 = scalar_lea.vmem %s9_s14, 16  ;;  %p1039_p1 = scmp.lt.s32.totalorder %s9_s14, %s9_s14 }
   0x3   :  { %p1035_p0 = scmp.ne.s32.totalorder %s9_s14, %s1034_s15  ;;  %p1040_p2 = scmp.lt.s32.totalorder %s1034_s15, %s1034_s15 }
   0x5   :  { %p1041_p3 = por %p1040_p2, %p1039_p1 }
   0x7   :  { %p1042_p4 = pnand %p1041_p3, %p1035_p0 }
   0x9   :  { %1045 = shalt.err (!%p1042_p4)  }
   0xa   :  { %s1056_s16 = smov [#allocation3]  }
   0xb   :  { %11 = dma.vmem_to_smem %s9_s14, 16, %s1056_s16, [#allocation2] }
   0xc   :  { %1050 = dma.done.wait [#allocation2], 16 }
   0xd   :  { %1051 = vsyncadd [#allocation2], 4294967280 }
   0xe   :  { %13 = sfence }
   0xf   :  { %s1081_s17 = smov 0  }
  0x10 LB: > { %s965_s0 = sadd.s32 4294967295, %s1054_s17   ;;  %p969_p5 = scmp.ge.s32.totalorder %s1054_s17, 1  ;;  %s1054_s17 = sphi %s1081_s17, %s19_s17  }
  0x11   : > { %p134_p6 = scmp.lt.s32.totalorder %s1054_s17, 7 }
  0x13   : > { %p135_p7 = pnand %p969_p5, %p134_p6 }
  0x14   : > { %s169_s18 = sld [smem:[#allocation3 + %s965_s0]] (!%p135_p7)  ;;  %s970_s23 = sshll.u32 (!%p135_p7), %s965_s0, 6 }
  0x15   : > { %138 = sbr.rel (%p135_p7) target bundleno = 379 (0x17b), region = 28  ;;  %p164_p9 = scmp.lt.s32.totalorder (!%p135_p7), %s970_s23, 383 }
  0x1a   : > { %v1057_v0 = vmov 0   ;;  %p170_p8 = scmp.lt.s32.totalorder %s169_s18, 3  ;;  %s1462_s23 = smov (!%p164_p9, %s970_s23), 383  ;;  %vm316_vm0 = vcmask 785408   ;;  %vm767_vm1 = vcmask 523264  }
  0x1b   : > { %445 = vmatprep.mubr.bf16.mxu0 %v1057_v0  ;;  %605 = vmatprep.mubr.bf16.mxu1 %v1057_v0  ;;  %s971_s24 = sshll.u32 %s1462_s23, 3  ;;  %s1010_s28 = sshll.u32 %s1462_s23, 4 }
  0x1c   : > { %s1460_s18 = smov (!%p170_p8, %s169_s18), 3  ;;  %s1124_s27 = scalar_lea.vmem %s1456_s1, %s971_s24 }
  0x1d   : > { %s1023_s19 = smul.u32 192, %s1460_s18  ;;  %v184_v36 = vld [vmem:[%s1124_s27] sm:$0xff]  ;;  %v185_v38 = vld [vmem:[%s1124_s27 + $0x8] sm:$0xff]  ;;  %v186_v43 = vld [vmem:[%s1124_s27 + $0x10] sm:$0xff]  ;;  %s1258_s4 = scalar_lea.vmem %s1458_s3, %s1010_s28 }
  0x1e   : > { %v216_v39 = vld [vmem:[%s1124_s27 + $0x100] sm:$0xff]  ;;  %v217_v40 = vld [vmem:[%s1124_s27 + $0x108] sm:$0xff]  ;;  %v248_v41 = vpack.c.bf16 %v185_v38, %v184_v36  ;;  %v187_v44 = vld [vmem:[%s1124_s27 + $0x18] sm:$0xff] }
  0x1f   : > { %s1094_s22 = scalar_lea.vmem %s1457_s2, %s1023_s19  ;;  %v264_v42 = vpack.c.bf16 %v217_v40, %v216_v39  ;;  %v218_v45 = vld [vmem:[%s1124_s27 + $0x110] sm:$0xff]  ;;  %v219_v46 = vld [vmem:[%s1124_s27 + $0x118] sm:$0xff]  ;;  %v249_v47 = vpack.c.bf16 %v187_v44, %v186_v43  ;;  %v188_v49 = vld [vmem:[%s1124_s27 + $0x20] sm:$0xff] }
  0x20   : > { %v301_v1 = vld [vmem:[%s1094_s22 + $0xa8] sm:$0xff]  ;;  %v303_v2 = vld [vmem:[%s1094_s22 + $0xb8] sm:$0xff]  ;;  %v300_v3 = vld [vmem:[%s1094_s22 + $0xa0] sm:$0xff]  ;;  %v265_v48 = vpack.c.bf16 %v219_v46, %v218_v45 }
  0x21   : > { %v315_v4 = vpack.c.bf16 %v303_v2, %v301_v1  ;;  %v302_v5 = vld [vmem:[%s1094_s22 + $0xb0] sm:$0xff]  ;;  %v297_v6 = vld [vmem:[%s1094_s22 + $0x88] sm:$0xff]  ;;  %v299_v7 = vld [vmem:[%s1094_s22 + $0x98] sm:$0xff] }
  0x22   : > { %v314_v8 = vpack.c.bf16 %v302_v5, %v300_v3  ;;  %v313_v9 = vpack.c.bf16 %v299_v7, %v297_v6  ;;  %v296_v10 = vld [vmem:[%s1094_s22 + $0x80] sm:$0xff]  ;;  %v298_v11 = vld [vmem:[%s1094_s22 + $0x90] sm:$0xff]  ;;  %v293_v12 = vld [vmem:[%s1094_s22 + $0x68] sm:$0xff] }
  0x23   : > { %417 = vmatprep.subr.bf16.mxu0 %v315_v4  ;;  %1011 = vmatprep.subr.bf16.mxu1 %v315_v4  ;;  %v295_v13 = vld [vmem:[%s1094_s22 + $0x78] sm:$0xff]  ;;  %v312_v14 = vpack.c.bf16 %v298_v11, %v296_v10  ;;  %v292_v16 = vld [vmem:[%s1094_s22 + $0x60] sm:$0xff]  ;;  %v294_v17 = vld [vmem:[%s1094_s22 + $0x70] sm:$0xff] }
  0x24   : > { %418 = vmatpush1.bf16.msra.mxu0 %v314_v8  ;;  %1017 = vmatpush1.bf16.msra.mxu1 %v314_v8  ;;  %v311_v15 = vpack.c.bf16 %v295_v13, %v293_v12  ;;  %v289_v18 = vld [vmem:[%s1094_s22 + $0x48] sm:$0xff]  ;;  %v291_v19 = vld [vmem:[%s1094_s22 + $0x58] sm:$0xff]  ;;  %v310_v20 = vpack.c.bf16 %v294_v17, %v292_v16  ;;  %v288_v22 = vld [vmem:[%s1094_s22 + $0x40] sm:$0xff] }
  0x25   : > { %419 = vmatprep.subr.bf16.mxu0 %v313_v9  ;;  %1012 = vmatprep.subr.bf16.mxu1 %v313_v9  ;;  %v309_v21 = vpack.c.bf16 %v291_v19, %v289_v18  ;;  %v290_v23 = vld [vmem:[%s1094_s22 + $0x50] sm:$0xff]  ;;  %v285_v24 = vld [vmem:[%s1094_s22 + $0x28] sm:$0xff]  ;;  %v287_v25 = vld [vmem:[%s1094_s22 + $0x38] sm:$0xff] }
  0x26   : > { %v308_v26 = vpack.c.bf16 %v290_v23, %v288_v22  ;;  %v307_v27 = vpack.c.bf16 %v287_v25, %v285_v24  ;;  %v284_v28 = vld [vmem:[%s1094_s22 + $0x20] sm:$0xff]  ;;  %v286_v29 = vld [vmem:[%s1094_s22 + $0x30] sm:$0xff]  ;;  %v281_v30 = vld [vmem:[%s1094_s22 + $0x8] sm:$0xff] }
  0x27   : > { %v283_v31 = vld [vmem:[%s1094_s22 + $0x18] sm:$0xff]  ;;  %v306_v32 = vpack.c.bf16 %v286_v29, %v284_v28  ;;  %v280_v34 = vld [vmem:[%s1094_s22] sm:$0xff]  ;;  %v282_v35 = vld [vmem:[%s1094_s22 + $0x10] sm:$0xff] }
  0x28   : > { %420 = vmatpush1.bf16.msra.mxu0 %v312_v14  ;;  %1018 = vmatpush1.bf16.msra.mxu1 %v312_v14  ;;  %v305_v33 = vpack.c.bf16 %v283_v31, %v281_v30  ;;  %v304_v37 = vpack.c.bf16 %v282_v35, %v280_v34  ;;  %v189_v50 = vld [vmem:[%s1124_s27 + $0x28] sm:$0xff]  ;;  %v220_v51 = vld [vmem:[%s1124_s27 + $0x120] sm:$0xff]  ;;  %v190_v55 = vld [vmem:[%s1124_s27 + $0x30] sm:$0xff] }
  0x29   : > { %421 = vmatprep.subr.bf16.mxu0 %v311_v15  ;;  %1013 = vmatprep.subr.bf16.mxu1 %v311_v15  ;;  %v221_v52 = vld [vmem:[%s1124_s27 + $0x128] sm:$0xff]  ;;  %v250_v53 = vpack.c.bf16 %v189_v50, %v188_v49  ;;  %v191_v56 = vld [vmem:[%s1124_s27 + $0x38] sm:$0xff]  ;;  %v222_v57 = vld [vmem:[%s1124_s27 + $0x130] sm:$0xff] }
  0x2a   : > { %v266_v54 = vpack.c.bf16 %v221_v52, %v220_v51  ;;  %v223_v58 = vld [vmem:[%s1124_s27 + $0x138] sm:$0xff]  ;;  %v251_v59 = vpack.c.bf16 %v191_v56, %v190_v55  ;;  %v192_v61 = vld [vmem:[%s1124_s27 + $0x40] sm:$0xff]  ;;  %v193_v62 = vld [vmem:[%s1124_s27 + $0x48] sm:$0xff] }
  0x2b   : > { %v267_v60 = vpack.c.bf16 %v223_v58, %v222_v57  ;;  %v224_v63 = vld [vmem:[%s1124_s27 + $0x140] sm:$0xff]  ;;  %v225_v1 = vld [vmem:[%s1124_s27 + $0x148] sm:$0xff]  ;;  %v252_v2 = vpack.c.bf16 %v193_v62, %v192_v61  ;;  %v194_v4 = vld [vmem:[%s1124_s27 + $0x50] sm:$0xff] }
  0x2c   : > { %422 = vmatpush1.bf16.msra.mxu0 %v310_v20  ;;  %1019 = vmatpush1.bf16.msra.mxu1 %v310_v20  ;;  %v268_v3 = vpack.c.bf16 %v225_v1, %v224_v63  ;;  %v195_v5 = vld [vmem:[%s1124_s27 + $0x58] sm:$0xff]  ;;  %v226_v6 = vld [vmem:[%s1124_s27 + $0x150] sm:$0xff]  ;;  %v196_v10 = vld [vmem:[%s1124_s27 + $0x60] sm:$0xff] }
  0x2d   : > { %423 = vmatprep.subr.bf16.mxu0 %v309_v21  ;;  %1014 = vmatprep.subr.bf16.mxu1 %v309_v21  ;;  %v227_v7 = vld [vmem:[%s1124_s27 + $0x158] sm:$0xff]  ;;  %v253_v8 = vpack.c.bf16 %v195_v5, %v194_v4  ;;  %v197_v11 = vld [vmem:[%s1124_s27 + $0x68] sm:$0xff]  ;;  %v228_v12 = vld [vmem:[%s1124_s27 + $0x160] sm:$0xff] }
  0x2e   : > { %v269_v9 = vpack.c.bf16 %v227_v7, %v226_v6  ;;  %v229_v13 = vld [vmem:[%s1124_s27 + $0x168] sm:$0xff]  ;;  %v254_v14 = vpack.c.bf16 %v197_v11, %v196_v10  ;;  %v198_v16 = vld [vmem:[%s1124_s27 + $0x70] sm:$0xff]  ;;  %v199_v17 = vld [vmem:[%s1124_s27 + $0x78] sm:$0xff] }
  0x2f   : > { %v270_v15 = vpack.c.bf16 %v229_v13, %v228_v12  ;;  %v230_v18 = vld [vmem:[%s1124_s27 + $0x170] sm:$0xff]  ;;  %v231_v19 = vld [vmem:[%s1124_s27 + $0x178] sm:$0xff]  ;;  %v255_v20 = vpack.c.bf16 %v199_v17, %v198_v16  ;;  %v200_v22 = vld [vmem:[%s1124_s27 + $0x80] sm:$0xff] }
  0x30   : > { %424 = vmatpush1.bf16.msra.mxu0 %v308_v26  ;;  %1020 = vmatpush1.bf16.msra.mxu1 %v308_v26  ;;  %v271_v21 = vpack.c.bf16 %v231_v19, %v230_v18  ;;  %v201_v23 = vld [vmem:[%s1124_s27 + $0x88] sm:$0xff]  ;;  %v232_v24 = vld [vmem:[%s1124_s27 + $0x180] sm:$0xff]  ;;  %v202_v28 = vld [vmem:[%s1124_s27 + $0x90] sm:$0xff] }
  0x31   : > { %425 = vmatprep.subr.bf16.mxu0 %v307_v27  ;;  %1015 = vmatprep.subr.bf16.mxu1 %v307_v27  ;;  %v233_v25 = vld [vmem:[%s1124_s27 + $0x188] sm:$0xff]  ;;  %v256_v26 = vpack.c.bf16 %v201_v23, %v200_v22  ;;  %v203_v29 = vld [vmem:[%s1124_s27 + $0x98] sm:$0xff]  ;;  %v234_v30 = vld [vmem:[%s1124_s27 + $0x190] sm:$0xff] }
  0x32   : > { %v272_v27 = vpack.c.bf16 %v233_v25, %v232_v24  ;;  %v235_v31 = vld [vmem:[%s1124_s27 + $0x198] sm:$0xff]  ;;  %v204_v34 = vld [vmem:[%s1124_s27 + $0xa0] sm:$0xff]  ;;  %v205_v35 = vld [vmem:[%s1124_s27 + $0xa8] sm:$0xff] }
  0x33   : > { %v236_v36 = vld [vmem:[%s1124_s27 + $0x1a0] sm:$0xff]  ;;  %v258_v38 = vpack.c.bf16 %v205_v35, %v204_v34  ;;  %v206_v40 = vld [vmem:[%s1124_s27 + $0xb0] sm:$0xff]  ;;  %v239_v43 = vld [vmem:[%s1124_s27 + $0x1b8] sm:$0xff] }
  0x34   : > { %426 = vmatpush1.bf16.msra.mxu0 %v306_v32  ;;  %1021 = vmatpush1.bf16.msra.mxu1 %v306_v32  ;;  %v257_v32 = vpack.c.bf16 %v203_v29, %v202_v28  ;;  %v208_v46 = vld [vmem:[%s1124_s27 + $0xc0] sm:$0xff]  ;;  %v241_v49 = vld [vmem:[%s1124_s27 + $0x1c8] sm:$0xff]  ;;  %v210_v52 = vld [vmem:[%s1124_s27 + $0xd0] sm:$0xff] }
  0x35   : > { %427 = vmatprep.subr.bf16.mxu0 %v305_v33  ;;  %1016 = vmatprep.subr.bf16.mxu1 %v305_v33  ;;  %v273_v33 = vpack.c.bf16 %v235_v31, %v234_v30  ;;  %v243_v55 = vld [vmem:[%s1124_s27 + $0x1d8] sm:$0xff]  ;;  %v212_v58 = vld [vmem:[%s1124_s27 + $0xe0] sm:$0xff]  ;;  %v245_v61 = vld [vmem:[%s1124_s27 + $0x1e8] sm:$0xff] }
  0x36   : > { %v214_v1 = vld [vmem:[%s1124_s27 + $0xf0] sm:$0xff]  ;;  %v247_v4 = vld [vmem:[%s1124_s27 + $0x1f8] sm:$0xff] }
  0x38   : > { %428 = vmatpush1.bf16.msra.mxu0 %v304_v37  ;;  %1022 = vmatpush1.bf16.msra.mxu1 %v304_v37  ;;  %v237_v37 = vld [vmem:[%s1124_s27 + $0x1a8] sm:$0xff] }
  0x39   : > { %v274_v39 = vpack.c.bf16 %v237_v37, %v236_v36 }
  0x3b   : > { %976 = vmatmul.mubr.msk.bf16.vlgmr.msra.gmra.mxu0 %vm316_vm0, %v248_v41  ;;  %992 = vmatmul.mubr.msk.bf16.vlgmr.msra.gmra.mxu1 %vm316_vm0, %v264_v42  ;;  %v207_v41 = vld [vmem:[%s1124_s27 + $0xb8] sm:$0xff]  ;;  %v238_v42 = vld [vmem:[%s1124_s27 + $0x1b0] sm:$0xff] }
  0x3c   : > { %455 = vmatprep.mubr.bf16.mxu0 %v1057_v0  ;;  %615 = vmatprep.mubr.bf16.mxu1 %v1057_v0  ;;  %v259_v44 = vpack.c.bf16 %v207_v41, %v206_v40  ;;  %v275_v45 = vpack.c.bf16 %v239_v43, %v238_v42 }
  0x43   : > { %977 = vmatmul.mubr.msk.bf16.gmra.mxu0 %vm316_vm0, %v249_v47  ;;  %993 = vmatmul.mubr.msk.bf16.gmra.mxu1 %vm316_vm0, %v265_v48  ;;  %v209_v47 = vld [vmem:[%s1124_s27 + $0xc8] sm:$0xff]  ;;  %v240_v48 = vld [vmem:[%s1124_s27 + $0x1c0] sm:$0xff] }
  0x44   : > { %465 = vmatprep.mubr.bf16.mxu0 %v1057_v0  ;;  %625 = vmatprep.mubr.bf16.mxu1 %v1057_v0  ;;  %v260_v50 = vpack.c.bf16 %v209_v47, %v208_v46  ;;  %v276_v51 = vpack.c.bf16 %v241_v49, %v240_v48 }
  0x4b   : > { %978 = vmatmul.mubr.msk.bf16.gmra.mxu0 %vm316_vm0, %v250_v53  ;;  %994 = vmatmul.mubr.msk.bf16.gmra.mxu1 %vm316_vm0, %v266_v54  ;;  %v211_v53 = vld [vmem:[%s1124_s27 + $0xd8] sm:$0xff]  ;;  %v242_v54 = vld [vmem:[%s1124_s27 + $0x1d0] sm:$0xff] }
  0x4c   : > { %475 = vmatprep.mubr.bf16.mxu0 %v1057_v0  ;;  %635 = vmatprep.mubr.bf16.mxu1 %v1057_v0  ;;  %v261_v56 = vpack.c.bf16 %v211_v53, %v210_v52  ;;  %v277_v57 = vpack.c.bf16 %v243_v55, %v242_v54 }
  0x53   : > { %979 = vmatmul.mubr.msk.bf16.gmra.mxu0 %vm316_vm0, %v251_v59  ;;  %995 = vmatmul.mubr.msk.bf16.gmra.mxu1 %vm316_vm0, %v267_v60  ;;  %v213_v59 = vld [vmem:[%s1124_s27 + $0xe8] sm:$0xff]  ;;  %v244_v60 = vld [vmem:[%s1124_s27 + $0x1e0] sm:$0xff] }
  0x54   : > { %485 = vmatprep.mubr.bf16.mxu0 %v1057_v0  ;;  %645 = vmatprep.mubr.bf16.mxu1 %v1057_v0  ;;  %v262_v62 = vpack.c.bf16 %v213_v59, %v212_v58  ;;  %v278_v63 = vpack.c.bf16 %v245_v61, %v244_v60 }
  0x5b   : > { %980 = vmatmul.mubr.msk.bf16.gmra.mxu0 %vm316_vm0, %v252_v2  ;;  %996 = vmatmul.mubr.msk.bf16.gmra.mxu1 %vm316_vm0, %v268_v3  ;;  %v215_v2 = vld [vmem:[%s1124_s27 + $0xf8] sm:$0xff]  ;;  %v246_v3 = vld [vmem:[%s1124_s27 + $0x1f0] sm:$0xff] }
  0x5c   : > { %495 = vmatprep.mubr.bf16.mxu0 %v1057_v0  ;;  %655 = vmatprep.mubr.bf16.mxu1 %v1057_v0  ;;  %v263_v5 = vpack.c.bf16 %v215_v2, %v214_v1  ;;  %v279_v6 = vpack.c.bf16 %v247_v4, %v246_v3 }
  0x63   : > { %981 = vmatmul.mubr.msk.bf16.gmra.mxu0 %vm316_vm0, %v253_v8  ;;  %997 = vmatmul.mubr.msk.bf16.gmra.mxu1 %vm316_vm0, %v269_v9 }
  0x64   : > { %505 = vmatprep.mubr.bf16.mxu0 %v1057_v0  ;;  %665 = vmatprep.mubr.bf16.mxu1 %v1057_v0 }
  0x6b   : > { %982 = vmatmul.mubr.msk.bf16.gmra.mxu0 %vm316_vm0, %v254_v14  ;;  %998 = vmatmul.mubr.msk.bf16.gmra.mxu1 %vm316_vm0, %v270_v15 }
  0x6c   : > { %515 = vmatprep.mubr.bf16.mxu0 %v1057_v0  ;;  %675 = vmatprep.mubr.bf16.mxu1 %v1057_v0 }
  0x73   : > { %983 = vmatmul.mubr.msk.bf16.gmra.mxu0 %vm316_vm0, %v255_v20  ;;  %999 = vmatmul.mubr.msk.bf16.gmra.mxu1 %vm316_vm0, %v271_v21 }
  0x74   : > { %525 = vmatprep.mubr.bf16.mxu0 %v1057_v0  ;;  %685 = vmatprep.mubr.bf16.mxu1 %v1057_v0 }
  0x7b   : > { %984 = vmatmul.mubr.msk.bf16.gmra.mxu0 %vm316_vm0, %v256_v26  ;;  %1000 = vmatmul.mubr.msk.bf16.gmra.mxu1 %vm316_vm0, %v272_v27 }
  0x7c   : > { %535 = vmatprep.mubr.bf16.mxu0 %v1057_v0  ;;  %695 = vmatprep.mubr.bf16.mxu1 %v1057_v0 }
  0x83   : > { %985 = vmatmul.mubr.msk.bf16.gmra.mxu0 %vm316_vm0, %v257_v32  ;;  %1001 = vmatmul.mubr.msk.bf16.gmra.mxu1 %vm316_vm0, %v273_v33 }
  0x84   : > { %545 = vmatprep.mubr.bf16.mxu0 %v1057_v0  ;;  %705 = vmatprep.mubr.bf16.mxu1 %v1057_v0 }
  0x8b   : > { %986 = vmatmul.mubr.msk.bf16.gmra.mxu0 %vm316_vm0, %v258_v38  ;;  %1002 = vmatmul.mubr.msk.bf16.gmra.mxu1 %vm316_vm0, %v274_v39 }
  0x8c   : > { %555 = vmatprep.mubr.bf16.mxu0 %v1057_v0  ;;  %715 = vmatprep.mubr.bf16.mxu1 %v1057_v0 }
  0x93   : > { %987 = vmatmul.mubr.msk.bf16.gmra.mxu0 %vm316_vm0, %v259_v44  ;;  %1003 = vmatmul.mubr.msk.bf16.gmra.mxu1 %vm316_vm0, %v275_v45 }
  0x94   : > { %565 = vmatprep.mubr.bf16.mxu0 %v1057_v0  ;;  %725 = vmatprep.mubr.bf16.mxu1 %v1057_v0 }
  0x9b   : > { %988 = vmatmul.mubr.msk.bf16.gmra.mxu0 %vm316_vm0, %v260_v50  ;;  %1004 = vmatmul.mubr.msk.bf16.gmra.mxu1 %vm316_vm0, %v276_v51 }
  0x9c   : > { %575 = vmatprep.mubr.bf16.mxu0 %v1057_v0  ;;  %735 = vmatprep.mubr.bf16.mxu1 %v1057_v0 }
  0xa3   : > { %989 = vmatmul.mubr.msk.bf16.gmra.mxu0 %vm316_vm0, %v261_v56  ;;  %1005 = vmatmul.mubr.msk.bf16.gmra.mxu1 %vm316_vm0, %v277_v57 }
  0xa4   : > { %585 = vmatprep.mubr.bf16.mxu0 %v1057_v0  ;;  %745 = vmatprep.mubr.bf16.mxu1 %v1057_v0 }
  0xab   : > { %990 = vmatmul.mubr.msk.bf16.gmra.mxu0 %vm316_vm0, %v262_v62  ;;  %1006 = vmatmul.mubr.msk.bf16.gmra.mxu1 %vm316_vm0, %v278_v63 }
  0xac   : > { %595 = vmatprep.mubr.bf16.mxu0 %v1057_v0  ;;  %755 = vmatprep.mubr.bf16.mxu1 %v1057_v0 }
  0xb3   : > { %991 = vmatmul.mubr.msk.bf16.gmra.mxu0 %vm316_vm0, %v263_v5  ;;  %1007 = vmatmul.mubr.msk.bf16.gmra.mxu1 %vm316_vm0, %v279_v6 }
  0xfb   : > { %v447_v0 = vpop.f32.mrf.mxu0  ;;  %v607_v7 = vpop.f32.mrf.mxu1 }
  0xfc   : > { %766 = vst [vmem:[%s1258_s4] sm:$0xff] %v447_v0  ;;  %831 = vst [vmem:[%s1258_s4 + $0x200] sm:$0xff] %v607_v7 }
  0xfd   : > { %v449_v8 = vpop.f32.mrf.mxu0  ;;  %v609_v9 = vpop.f32.mrf.mxu1 }
  0xfe   : > { %768 = vst.msk [vmem:[%s1258_s4 + $0x8] sm:$0xff] %vm767_vm1, %v449_v8  ;;  %832 = vst.msk [vmem:[%s1258_s4 + $0x208] sm:$0xff] %vm767_vm1, %v609_v9 }
  0xff   : > { %v451_v10 = vpop.f32.mrf.mxu0  ;;  %v611_v11 = vpop.f32.mrf.mxu1 }
 0x100   : > { %769 = vst [vmem:[%s1258_s4 + $0x10] sm:$0xff] %v451_v10  ;;  %833 = vst [vmem:[%s1258_s4 + $0x210] sm:$0xff] %v611_v11 }
 0x101   : > { %v453_v12 = vpop.f32.mrf.mxu0  ;;  %v613_v13 = vpop.f32.mrf.mxu1 }
 0x102   : > { %770 = vst.msk [vmem:[%s1258_s4 + $0x18] sm:$0xff] %vm767_vm1, %v453_v12  ;;  %834 = vst.msk [vmem:[%s1258_s4 + $0x218] sm:$0xff] %vm767_vm1, %v613_v13 }
 0x103   : > { %v457_v14 = vpop.f32.mrf.mxu0  ;;  %v617_v15 = vpop.f32.mrf.mxu1 }
 0x104   : > { %771 = vst [vmem:[%s1258_s4 + $0x20] sm:$0xff] %v457_v14  ;;  %835 = vst [vmem:[%s1258_s4 + $0x220] sm:$0xff] %v617_v15 }
 0x105   : > { %v459_v16 = vpop.f32.mrf.mxu0  ;;  %v619_v17 = vpop.f32.mrf.mxu1 }
 0x106   : > { %772 = vst.msk [vmem:[%s1258_s4 + $0x28] sm:$0xff] %vm767_vm1, %v459_v16  ;;  %836 = vst.msk [vmem:[%s1258_s4 + $0x228] sm:$0xff] %vm767_vm1, %v619_v17 }
 0x107   : > { %v461_v18 = vpop.f32.mrf.mxu0  ;;  %v621_v19 = vpop.f32.mrf.mxu1 }
 0x108   : > { %773 = vst [vmem:[%s1258_s4 + $0x30] sm:$0xff] %v461_v18  ;;  %837 = vst [vmem:[%s1258_s4 + $0x230] sm:$0xff] %v621_v19 }
 0x109   : > { %v463_v20 = vpop.f32.mrf.mxu0  ;;  %v623_v21 = vpop.f32.mrf.mxu1 }
 0x10a   : > { %774 = vst.msk [vmem:[%s1258_s4 + $0x38] sm:$0xff] %vm767_vm1, %v463_v20  ;;  %838 = vst.msk [vmem:[%s1258_s4 + $0x238] sm:$0xff] %vm767_vm1, %v623_v21 }
 0x10b   : > { %v467_v22 = vpop.f32.mrf.mxu0  ;;  %v627_v23 = vpop.f32.mrf.mxu1 }
 0x10c   : > { %775 = vst [vmem:[%s1258_s4 + $0x40] sm:$0xff] %v467_v22  ;;  %839 = vst [vmem:[%s1258_s4 + $0x240] sm:$0xff] %v627_v23 }
 0x10d   : > { %v469_v24 = vpop.f32.mrf.mxu0  ;;  %v629_v25 = vpop.f32.mrf.mxu1 }
 0x10e   : > { %776 = vst.msk [vmem:[%s1258_s4 + $0x48] sm:$0xff] %vm767_vm1, %v469_v24  ;;  %840 = vst.msk [vmem:[%s1258_s4 + $0x248] sm:$0xff] %vm767_vm1, %v629_v25 }
 0x10f   : > { %v471_v26 = vpop.f32.mrf.mxu0  ;;  %v631_v27 = vpop.f32.mrf.mxu1 }
 0x110   : > { %777 = vst [vmem:[%s1258_s4 + $0x50] sm:$0xff] %v471_v26  ;;  %841 = vst [vmem:[%s1258_s4 + $0x250] sm:$0xff] %v631_v27 }
 0x111   : > { %v473_v28 = vpop.f32.mrf.mxu0  ;;  %v633_v29 = vpop.f32.mrf.mxu1 }
 0x112   : > { %778 = vst.msk [vmem:[%s1258_s4 + $0x58] sm:$0xff] %vm767_vm1, %v473_v28  ;;  %842 = vst.msk [vmem:[%s1258_s4 + $0x258] sm:$0xff] %vm767_vm1, %v633_v29 }
 0x113   : > { %v477_v30 = vpop.f32.mrf.mxu0  ;;  %v637_v31 = vpop.f32.mrf.mxu1 }
 0x114   : > { %779 = vst [vmem:[%s1258_s4 + $0x60] sm:$0xff] %v477_v30  ;;  %843 = vst [vmem:[%s1258_s4 + $0x260] sm:$0xff] %v637_v31 }
 0x115   : > { %v479_v32 = vpop.f32.mrf.mxu0  ;;  %v639_v33 = vpop.f32.mrf.mxu1 }
 0x116   : > { %780 = vst.msk [vmem:[%s1258_s4 + $0x68] sm:$0xff] %vm767_vm1, %v479_v32  ;;  %844 = vst.msk [vmem:[%s1258_s4 + $0x268] sm:$0xff] %vm767_vm1, %v639_v33 }
 0x117   : > { %v481_v34 = vpop.f32.mrf.mxu0  ;;  %v641_v35 = vpop.f32.mrf.mxu1 }
 0x118   : > { %781 = vst [vmem:[%s1258_s4 + $0x70] sm:$0xff] %v481_v34  ;;  %845 = vst [vmem:[%s1258_s4 + $0x270] sm:$0xff] %v641_v35 }
 0x119   : > { %v483_v36 = vpop.f32.mrf.mxu0  ;;  %v643_v37 = vpop.f32.mrf.mxu1 }
 0x11a   : > { %782 = vst.msk [vmem:[%s1258_s4 + $0x78] sm:$0xff] %vm767_vm1, %v483_v36  ;;  %846 = vst.msk [vmem:[%s1258_s4 + $0x278] sm:$0xff] %vm767_vm1, %v643_v37 }
 0x11b   : > { %v487_v38 = vpop.f32.mrf.mxu0  ;;  %v647_v39 = vpop.f32.mrf.mxu1 }
 0x11c   : > { %783 = vst [vmem:[%s1258_s4 + $0x80] sm:$0xff] %v487_v38  ;;  %847 = vst [vmem:[%s1258_s4 + $0x280] sm:$0xff] %v647_v39 }
 0x11d   : > { %v489_v40 = vpop.f32.mrf.mxu0  ;;  %v649_v41 = vpop.f32.mrf.mxu1 }
 0x11e   : > { %784 = vst.msk [vmem:[%s1258_s4 + $0x88] sm:$0xff] %vm767_vm1, %v489_v40  ;;  %848 = vst.msk [vmem:[%s1258_s4 + $0x288] sm:$0xff] %vm767_vm1, %v649_v41 }
 0x11f   : > { %v491_v42 = vpop.f32.mrf.mxu0  ;;  %v651_v43 = vpop.f32.mrf.mxu1 }
 0x120   : > { %785 = vst [vmem:[%s1258_s4 + $0x90] sm:$0xff] %v491_v42  ;;  %849 = vst [vmem:[%s1258_s4 + $0x290] sm:$0xff] %v651_v43 }
 0x121   : > { %v493_v44 = vpop.f32.mrf.mxu0  ;;  %v653_v45 = vpop.f32.mrf.mxu1 }
 0x122   : > { %786 = vst.msk [vmem:[%s1258_s4 + $0x98] sm:$0xff] %vm767_vm1, %v493_v44  ;;  %850 = vst.msk [vmem:[%s1258_s4 + $0x298] sm:$0xff] %vm767_vm1, %v653_v45 }
 0x123   : > { %v497_v46 = vpop.f32.mrf.mxu0  ;;  %v657_v47 = vpop.f32.mrf.mxu1 }
 0x124   : > { %787 = vst [vmem:[%s1258_s4 + $0xa0] sm:$0xff] %v497_v46  ;;  %851 = vst [vmem:[%s1258_s4 + $0x2a0] sm:$0xff] %v657_v47 }
 0x125   : > { %v499_v48 = vpop.f32.mrf.mxu0  ;;  %v659_v49 = vpop.f32.mrf.mxu1 }
 0x126   : > { %788 = vst.msk [vmem:[%s1258_s4 + $0xa8] sm:$0xff] %vm767_vm1, %v499_v48  ;;  %852 = vst.msk [vmem:[%s1258_s4 + $0x2a8] sm:$0xff] %vm767_vm1, %v659_v49 }
 0x127   : > { %v501_v50 = vpop.f32.mrf.mxu0  ;;  %v661_v51 = vpop.f32.mrf.mxu1 }
 0x128   : > { %789 = vst [vmem:[%s1258_s4 + $0xb0] sm:$0xff] %v501_v50  ;;  %853 = vst [vmem:[%s1258_s4 + $0x2b0] sm:$0xff] %v661_v51 }
 0x129   : > { %v503_v52 = vpop.f32.mrf.mxu0  ;;  %v663_v53 = vpop.f32.mrf.mxu1 }
 0x12a   : > { %790 = vst.msk [vmem:[%s1258_s4 + $0xb8] sm:$0xff] %vm767_vm1, %v503_v52  ;;  %854 = vst.msk [vmem:[%s1258_s4 + $0x2b8] sm:$0xff] %vm767_vm1, %v663_v53 }
 0x12b   : > { %v507_v54 = vpop.f32.mrf.mxu0  ;;  %v667_v55 = vpop.f32.mrf.mxu1 }
 0x12c   : > { %791 = vst [vmem:[%s1258_s4 + $0xc0] sm:$0xff] %v507_v54  ;;  %855 = vst [vmem:[%s1258_s4 + $0x2c0] sm:$0xff] %v667_v55 }
 0x12d   : > { %v509_v56 = vpop.f32.mrf.mxu0  ;;  %v669_v57 = vpop.f32.mrf.mxu1 }
 0x12e   : > { %792 = vst.msk [vmem:[%s1258_s4 + $0xc8] sm:$0xff] %vm767_vm1, %v509_v56  ;;  %856 = vst.msk [vmem:[%s1258_s4 + $0x2c8] sm:$0xff] %vm767_vm1, %v669_v57 }
 0x12f   : > { %v511_v58 = vpop.f32.mrf.mxu0  ;;  %v671_v59 = vpop.f32.mrf.mxu1 }
 0x130   : > { %793 = vst [vmem:[%s1258_s4 + $0xd0] sm:$0xff] %v511_v58  ;;  %857 = vst [vmem:[%s1258_s4 + $0x2d0] sm:$0xff] %v671_v59 }
 0x131   : > { %v513_v60 = vpop.f32.mrf.mxu0  ;;  %v673_v61 = vpop.f32.mrf.mxu1 }
 0x132   : > { %794 = vst.msk [vmem:[%s1258_s4 + $0xd8] sm:$0xff] %vm767_vm1, %v513_v60  ;;  %858 = vst.msk [vmem:[%s1258_s4 + $0x2d8] sm:$0xff] %vm767_vm1, %v673_v61 }
 0x133   : > { %v517_v62 = vpop.f32.mrf.mxu0  ;;  %v677_v63 = vpop.f32.mrf.mxu1 }
 0x134   : > { %795 = vst [vmem:[%s1258_s4 + $0xe0] sm:$0xff] %v517_v62  ;;  %859 = vst [vmem:[%s1258_s4 + $0x2e0] sm:$0xff] %v677_v63 }
 0x135   : > { %v519_v1 = vpop.f32.mrf.mxu0  ;;  %v679_v2 = vpop.f32.mrf.mxu1 }
 0x136   : > { %796 = vst.msk [vmem:[%s1258_s4 + $0xe8] sm:$0xff] %vm767_vm1, %v519_v1  ;;  %860 = vst.msk [vmem:[%s1258_s4 + $0x2e8] sm:$0xff] %vm767_vm1, %v679_v2 }
 0x137   : > { %v521_v3 = vpop.f32.mrf.mxu0  ;;  %v681_v4 = vpop.f32.mrf.mxu1 }
 0x138   : > { %797 = vst [vmem:[%s1258_s4 + $0xf0] sm:$0xff] %v521_v3  ;;  %861 = vst [vmem:[%s1258_s4 + $0x2f0] sm:$0xff] %v681_v4 }
 0x139   : > { %v523_v5 = vpop.f32.mrf.mxu0  ;;  %v683_v6 = vpop.f32.mrf.mxu1 }
 0x13a   : > { %798 = vst.msk [vmem:[%s1258_s4 + $0xf8] sm:$0xff] %vm767_vm1, %v523_v5  ;;  %862 = vst.msk [vmem:[%s1258_s4 + $0x2f8] sm:$0xff] %vm767_vm1, %v683_v6 }
 0x13b   : > { %v527_v0 = vpop.f32.mrf.mxu0  ;;  %v687_v7 = vpop.f32.mrf.mxu1 }
 0x13c   : > { %799 = vst [vmem:[%s1258_s4 + $0x100] sm:$0xff] %v527_v0  ;;  %863 = vst [vmem:[%s1258_s4 + $0x300] sm:$0xff] %v687_v7 }
 0x13d   : > { %v529_v8 = vpop.f32.mrf.mxu0  ;;  %v689_v9 = vpop.f32.mrf.mxu1 }
 0x13e   : > { %800 = vst.msk [vmem:[%s1258_s4 + $0x108] sm:$0xff] %vm767_vm1, %v529_v8  ;;  %864 = vst.msk [vmem:[%s1258_s4 + $0x308] sm:$0xff] %vm767_vm1, %v689_v9 }
 0x13f   : > { %v531_v10 = vpop.f32.mrf.mxu0  ;;  %v691_v11 = vpop.f32.mrf.mxu1 }
 0x140   : > { %801 = vst [vmem:[%s1258_s4 + $0x110] sm:$0xff] %v531_v10  ;;  %865 = vst [vmem:[%s1258_s4 + $0x310] sm:$0xff] %v691_v11 }
 0x141   : > { %v533_v12 = vpop.f32.mrf.mxu0  ;;  %v693_v13 = vpop.f32.mrf.mxu1 }
 0x142   : > { %802 = vst.msk [vmem:[%s1258_s4 + $0x118] sm:$0xff] %vm767_vm1, %v533_v12  ;;  %866 = vst.msk [vmem:[%s1258_s4 + $0x318] sm:$0xff] %vm767_vm1, %v693_v13 }
 0x143   : > { %v537_v14 = vpop.f32.mrf.mxu0  ;;  %v697_v15 = vpop.f32.mrf.mxu1 }
 0x144   : > { %803 = vst [vmem:[%s1258_s4 + $0x120] sm:$0xff] %v537_v14  ;;  %867 = vst [vmem:[%s1258_s4 + $0x320] sm:$0xff] %v697_v15 }
 0x145   : > { %v539_v16 = vpop.f32.mrf.mxu0  ;;  %v699_v17 = vpop.f32.mrf.mxu1 }
 0x146   : > { %804 = vst.msk [vmem:[%s1258_s4 + $0x128] sm:$0xff] %vm767_vm1, %v539_v16  ;;  %868 = vst.msk [vmem:[%s1258_s4 + $0x328] sm:$0xff] %vm767_vm1, %v699_v17 }
 0x147   : > { %v541_v18 = vpop.f32.mrf.mxu0  ;;  %v701_v19 = vpop.f32.mrf.mxu1 }
 0x148   : > { %805 = vst [vmem:[%s1258_s4 + $0x130] sm:$0xff] %v541_v18  ;;  %869 = vst [vmem:[%s1258_s4 + $0x330] sm:$0xff] %v701_v19 }
 0x149   : > { %v543_v20 = vpop.f32.mrf.mxu0  ;;  %v703_v21 = vpop.f32.mrf.mxu1 }
 0x14a   : > { %806 = vst.msk [vmem:[%s1258_s4 + $0x138] sm:$0xff] %vm767_vm1, %v543_v20  ;;  %870 = vst.msk [vmem:[%s1258_s4 + $0x338] sm:$0xff] %vm767_vm1, %v703_v21 }
 0x14b   : > { %v547_v22 = vpop.f32.mrf.mxu0  ;;  %v707_v23 = vpop.f32.mrf.mxu1 }
 0x14c   : > { %807 = vst [vmem:[%s1258_s4 + $0x140] sm:$0xff] %v547_v22  ;;  %871 = vst [vmem:[%s1258_s4 + $0x340] sm:$0xff] %v707_v23 }
 0x14d   : > { %v549_v24 = vpop.f32.mrf.mxu0  ;;  %v709_v25 = vpop.f32.mrf.mxu1 }
 0x14e   : > { %808 = vst.msk [vmem:[%s1258_s4 + $0x148] sm:$0xff] %vm767_vm1, %v549_v24  ;;  %872 = vst.msk [vmem:[%s1258_s4 + $0x348] sm:$0xff] %vm767_vm1, %v709_v25 }
 0x14f   : > { %v551_v26 = vpop.f32.mrf.mxu0  ;;  %v711_v27 = vpop.f32.mrf.mxu1 }
 0x150   : > { %809 = vst [vmem:[%s1258_s4 + $0x150] sm:$0xff] %v551_v26  ;;  %873 = vst [vmem:[%s1258_s4 + $0x350] sm:$0xff] %v711_v27 }
 0x151   : > { %v553_v28 = vpop.f32.mrf.mxu0  ;;  %v713_v29 = vpop.f32.mrf.mxu1 }
 0x152   : > { %810 = vst.msk [vmem:[%s1258_s4 + $0x158] sm:$0xff] %vm767_vm1, %v553_v28  ;;  %874 = vst.msk [vmem:[%s1258_s4 + $0x358] sm:$0xff] %vm767_vm1, %v713_v29 }
 0x153   : > { %v557_v30 = vpop.f32.mrf.mxu0  ;;  %v717_v31 = vpop.f32.mrf.mxu1 }
 0x154   : > { %811 = vst [vmem:[%s1258_s4 + $0x160] sm:$0xff] %v557_v30  ;;  %875 = vst [vmem:[%s1258_s4 + $0x360] sm:$0xff] %v717_v31 }
 0x155   : > { %v559_v32 = vpop.f32.mrf.mxu0  ;;  %v719_v33 = vpop.f32.mrf.mxu1 }
 0x156   : > { %812 = vst.msk [vmem:[%s1258_s4 + $0x168] sm:$0xff] %vm767_vm1, %v559_v32  ;;  %876 = vst.msk [vmem:[%s1258_s4 + $0x368] sm:$0xff] %vm767_vm1, %v719_v33 }
 0x157   : > { %v561_v34 = vpop.f32.mrf.mxu0  ;;  %v721_v35 = vpop.f32.mrf.mxu1 }
 0x158   : > { %813 = vst [vmem:[%s1258_s4 + $0x170] sm:$0xff] %v561_v34  ;;  %877 = vst [vmem:[%s1258_s4 + $0x370] sm:$0xff] %v721_v35 }
 0x159   : > { %v563_v36 = vpop.f32.mrf.mxu0  ;;  %v723_v37 = vpop.f32.mrf.mxu1 }
 0x15a   : > { %814 = vst.msk [vmem:[%s1258_s4 + $0x178] sm:$0xff] %vm767_vm1, %v563_v36  ;;  %878 = vst.msk [vmem:[%s1258_s4 + $0x378] sm:$0xff] %vm767_vm1, %v723_v37 }
 0x15b   : > { %v567_v38 = vpop.f32.mrf.mxu0  ;;  %v727_v39 = vpop.f32.mrf.mxu1 }
 0x15c   : > { %815 = vst [vmem:[%s1258_s4 + $0x180] sm:$0xff] %v567_v38  ;;  %879 = vst [vmem:[%s1258_s4 + $0x380] sm:$0xff] %v727_v39 }
 0x15d   : > { %v569_v40 = vpop.f32.mrf.mxu0  ;;  %v729_v41 = vpop.f32.mrf.mxu1 }
 0x15e   : > { %816 = vst.msk [vmem:[%s1258_s4 + $0x188] sm:$0xff] %vm767_vm1, %v569_v40  ;;  %880 = vst.msk [vmem:[%s1258_s4 + $0x388] sm:$0xff] %vm767_vm1, %v729_v41 }
 0x15f   : > { %v571_v42 = vpop.f32.mrf.mxu0  ;;  %v731_v43 = vpop.f32.mrf.mxu1 }
 0x160   : > { %817 = vst [vmem:[%s1258_s4 + $0x190] sm:$0xff] %v571_v42  ;;  %881 = vst [vmem:[%s1258_s4 + $0x390] sm:$0xff] %v731_v43 }
 0x161   : > { %v573_v44 = vpop.f32.mrf.mxu0  ;;  %v733_v45 = vpop.f32.mrf.mxu1 }
 0x162   : > { %818 = vst.msk [vmem:[%s1258_s4 + $0x198] sm:$0xff] %vm767_vm1, %v573_v44  ;;  %882 = vst.msk [vmem:[%s1258_s4 + $0x398] sm:$0xff] %vm767_vm1, %v733_v45 }
 0x163   : > { %v577_v46 = vpop.f32.mrf.mxu0  ;;  %v737_v47 = vpop.f32.mrf.mxu1 }
 0x164   : > { %819 = vst [vmem:[%s1258_s4 + $0x1a0] sm:$0xff] %v577_v46  ;;  %883 = vst [vmem:[%s1258_s4 + $0x3a0] sm:$0xff] %v737_v47 }
 0x165   : > { %v579_v48 = vpop.f32.mrf.mxu0  ;;  %v739_v49 = vpop.f32.mrf.mxu1 }
 0x166   : > { %820 = vst.msk [vmem:[%s1258_s4 + $0x1a8] sm:$0xff] %vm767_vm1, %v579_v48  ;;  %884 = vst.msk [vmem:[%s1258_s4 + $0x3a8] sm:$0xff] %vm767_vm1, %v739_v49 }
 0x167   : > { %v581_v50 = vpop.f32.mrf.mxu0  ;;  %v741_v51 = vpop.f32.mrf.mxu1 }
 0x168   : > { %821 = vst [vmem:[%s1258_s4 + $0x1b0] sm:$0xff] %v581_v50  ;;  %885 = vst [vmem:[%s1258_s4 + $0x3b0] sm:$0xff] %v741_v51 }
 0x169   : > { %v583_v52 = vpop.f32.mrf.mxu0  ;;  %v743_v53 = vpop.f32.mrf.mxu1 }
 0x16a   : > { %822 = vst.msk [vmem:[%s1258_s4 + $0x1b8] sm:$0xff] %vm767_vm1, %v583_v52  ;;  %886 = vst.msk [vmem:[%s1258_s4 + $0x3b8] sm:$0xff] %vm767_vm1, %v743_v53 }
 0x16b   : > { %v587_v54 = vpop.f32.mrf.mxu0  ;;  %v747_v55 = vpop.f32.mrf.mxu1 }
 0x16c   : > { %823 = vst [vmem:[%s1258_s4 + $0x1c0] sm:$0xff] %v587_v54  ;;  %887 = vst [vmem:[%s1258_s4 + $0x3c0] sm:$0xff] %v747_v55 }
 0x16d   : > { %v589_v56 = vpop.f32.mrf.mxu0  ;;  %v749_v57 = vpop.f32.mrf.mxu1 }
 0x16e   : > { %824 = vst.msk [vmem:[%s1258_s4 + $0x1c8] sm:$0xff] %vm767_vm1, %v589_v56  ;;  %888 = vst.msk [vmem:[%s1258_s4 + $0x3c8] sm:$0xff] %vm767_vm1, %v749_v57 }
 0x16f   : > { %v591_v58 = vpop.f32.mrf.mxu0  ;;  %v751_v59 = vpop.f32.mrf.mxu1 }
 0x170   : > { %825 = vst [vmem:[%s1258_s4 + $0x1d0] sm:$0xff] %v591_v58  ;;  %889 = vst [vmem:[%s1258_s4 + $0x3d0] sm:$0xff] %v751_v59 }
 0x171   : > { %v593_v60 = vpop.f32.mrf.mxu0  ;;  %v753_v61 = vpop.f32.mrf.mxu1 }
 0x172   : > { %826 = vst.msk [vmem:[%s1258_s4 + $0x1d8] sm:$0xff] %vm767_vm1, %v593_v60  ;;  %890 = vst.msk [vmem:[%s1258_s4 + $0x3d8] sm:$0xff] %vm767_vm1, %v753_v61 }
 0x173   : > { %v597_v62 = vpop.f32.mrf.mxu0  ;;  %v757_v63 = vpop.f32.mrf.mxu1 }
 0x174   : > { %827 = vst [vmem:[%s1258_s4 + $0x1e0] sm:$0xff] %v597_v62  ;;  %891 = vst [vmem:[%s1258_s4 + $0x3e0] sm:$0xff] %v757_v63 }
 0x175   : > { %v599_v1 = vpop.f32.mrf.mxu0  ;;  %v759_v2 = vpop.f32.mrf.mxu1 }
 0x176   : > { %828 = vst.msk [vmem:[%s1258_s4 + $0x1e8] sm:$0xff] %vm767_vm1, %v599_v1  ;;  %892 = vst.msk [vmem:[%s1258_s4 + $0x3e8] sm:$0xff] %vm767_vm1, %v759_v2 }
 0x177   : > { %v601_v3 = vpop.f32.mrf.mxu0  ;;  %v761_v4 = vpop.f32.mrf.mxu1 }
 0x178   : > { %829 = vst [vmem:[%s1258_s4 + $0x1f0] sm:$0xff] %v601_v3  ;;  %893 = vst [vmem:[%s1258_s4 + $0x3f0] sm:$0xff] %v761_v4 }
 0x179   : > { %v603_v5 = vpop.f32.mrf.mxu0  ;;  %v763_v6 = vpop.f32.mrf.mxu1 }
 0x17a   : > { %830 = vst.msk [vmem:[%s1258_s4 + $0x1f8] sm:$0xff] %vm767_vm1, %v603_v5  ;;  %894 = vst.msk [vmem:[%s1258_s4 + $0x3f8] sm:$0xff] %vm767_vm1, %v763_v6 }
 0x17b PF: > { %s19_s17 = sadd.s32 1, %s1054_s17  }
 0x17c   : > { %p16_p10 = scmp.ge.s32.totalorder %s19_s17, 8  }
 0x17e   :  { %18 = sbr.rel (!%p16_p10) target bundleno = 16 (0x10), region = 61 }

// kernel: wavelets_forward.19
= control target key start
LH: loop header
LB: loop body
LE: loop exit
PB: predicated region body
PF: predicated region fallthrough
CT: control target
= control target key end

     0   :  { %s366_s6 = smov 0   ;;  %s483_s0 = inlined_call_operand.vmem [shape: f32[96,1024], index: 0, kind: input, shape index: {}]   ;;  %s484_s1 = inlined_call_operand.vmem [shape: f32[96,1024], index: 1, kind: output, shape index: {}]  }
   0x1 LB: > { %s327_s7 = sadd.s32 4294967295, %s354_s6   ;;  %p331_p0 = scmp.ge.s32.totalorder %s354_s6, 1  ;;  %s354_s6 = sphi %s366_s6, %s11_s6  }
   0x2   : > { %p89_p1 = scmp.lt.s32.totalorder %s354_s6, 3 }
   0x4   : > { %p90_p2 = pnand %p331_p0, %p89_p1 }
   0x5   : > { %s111_s8 = smul.u32 (!%p90_p2), 6, %s327_s7 }
   0x6   : > { %93 = sbr.rel (%p90_p2) target bundleno = 41 (0x29), region = 24 }
   0x7   : > { %p112_p3 = scmp.lt.s32.totalorder (!%p90_p2), %s111_s8, 11 }
   0xb   : > { %s486_s8 = smov (!%p112_p3, %s111_s8), 11 }
   0xc   : > { %s338_s9 = sshll.u32 %s486_s8, 6 }
   0xd   : > { %s377_s12 = scalar_lea.vmem %s483_s0, %s338_s9  ;;  %s382_s15 = scalar_lea.vmem %s484_s1, %s338_s9 }
   0xe   : > { %v125_v0 = vld [vmem:[%s377_s12] sm:$0xff]  ;;  %v126_v1 = vld [vmem:[%s377_s12 + $0x8] sm:$0xff]  ;;  %v127_v2 = vld [vmem:[%s377_s12 + $0x10] sm:$0xff] }
   0xf   : > { %v173_v3 = vmax.f32 %v125_v0, 0.0  ;;  %v174_v4 = vmax.f32 %v126_v1, 0.0  ;;  %v175_v5 = vmax.f32 %v127_v2, 0.0  ;;  %v128_v6 = vld [vmem:[%s377_s12 + $0x18] sm:$0xff]  ;;  %v129_v7 = vld [vmem:[%s377_s12 + $0x20] sm:$0xff]  ;;  %v130_v8 = vld [vmem:[%s377_s12 + $0x28] sm:$0xff] }
  0x10   : > { %v176_v9 = vmax.f32 %v128_v6, 0.0  ;;  %v177_v10 = vmax.f32 %v129_v7, 0.0  ;;  %v178_v11 = vmax.f32 %v130_v8, 0.0  ;;  %v131_v12 = vld [vmem:[%s377_s12 + $0x30] sm:$0xff]  ;;  %v132_v13 = vld [vmem:[%s377_s12 + $0x38] sm:$0xff]  ;;  %v133_v14 = vld [vmem:[%s377_s12 + $0x40] sm:$0xff] }
  0x11   : > { %221 = vst [vmem:[%s382_s15] sm:$0xff] %v173_v3  ;;  %222 = vst [vmem:[%s382_s15 + $0x8] sm:$0xff] %v174_v4  ;;  %v179_v15 = vmax.f32 %v131_v12, 0.0  ;;  %v180_v16 = vmax.f32 %v132_v13, 0.0  ;;  %v181_v17 = vmax.f32 %v133_v14, 0.0  ;;  %v134_v18 = vld [vmem:[%s377_s12 + $0x48] sm:$0xff]  ;;  %v135_v19 = vld [vmem:[%s377_s12 + $0x50] sm:$0xff] }
  0x12   : > { %223 = vst [vmem:[%s382_s15 + $0x10] sm:$0xff] %v175_v5  ;;  %v136_v20 = vld [vmem:[%s377_s12 + $0x58] sm:$0xff]  ;;  %224 = vst [vmem:[%s382_s15 + $0x18] sm:$0xff] %v176_v9  ;;  %v182_v21 = vmax.f32 %v134_v18, 0.0  ;;  %v183_v22 = vmax.f32 %v135_v19, 0.0  ;;  %v137_v24 = vld [vmem:[%s377_s12 + $0x60] sm:$0xff] }
  0x13   : > { %225 = vst [vmem:[%s382_s15 + $0x20] sm:$0xff] %v177_v10  ;;  %226 = vst [vmem:[%s382_s15 + $0x28] sm:$0xff] %v178_v11  ;;  %v184_v23 = vmax.f32 %v136_v20, 0.0  ;;  %v138_v25 = vld [vmem:[%s377_s12 + $0x68] sm:$0xff]  ;;  %v139_v26 = vld [vmem:[%s377_s12 + $0x70] sm:$0xff]  ;;  %v185_v27 = vmax.f32 %v137_v24, 0.0 }
  0x14   : > { %227 = vst [vmem:[%s382_s15 + $0x30] sm:$0xff] %v179_v15  ;;  %228 = vst [vmem:[%s382_s15 + $0x38] sm:$0xff] %v180_v16  ;;  %v186_v28 = vmax.f32 %v138_v25, 0.0  ;;  %v187_v29 = vmax.f32 %v139_v26, 0.0  ;;  %v140_v30 = vld [vmem:[%s377_s12 + $0x78] sm:$0xff]  ;;  %v141_v31 = vld [vmem:[%s377_s12 + $0x80] sm:$0xff] }
  0x15   : > { %229 = vst [vmem:[%s382_s15 + $0x40] sm:$0xff] %v181_v17  ;;  %v142_v32 = vld [vmem:[%s377_s12 + $0x88] sm:$0xff]  ;;  %230 = vst [vmem:[%s382_s15 + $0x48] sm:$0xff] %v182_v21  ;;  %v188_v33 = vmax.f32 %v140_v30, 0.0  ;;  %v189_v34 = vmax.f32 %v141_v31, 0.0  ;;  %v143_v36 = vld [vmem:[%s377_s12 + $0x90] sm:$0xff] }
  0x16   : > { %231 = vst [vmem:[%s382_s15 + $0x50] sm:$0xff] %v183_v22  ;;  %232 = vst [vmem:[%s382_s15 + $0x58] sm:$0xff] %v184_v23  ;;  %v190_v35 = vmax.f32 %v142_v32, 0.0  ;;  %v144_v37 = vld [vmem:[%s377_s12 + $0x98] sm:$0xff]  ;;  %v145_v38 = vld [vmem:[%s377_s12 + $0xa0] sm:$0xff]  ;;  %v191_v39 = vmax.f32 %v143_v36, 0.0 }
  0x17   : > { %233 = vst [vmem:[%s382_s15 + $0x60] sm:$0xff] %v185_v27  ;;  %234 = vst [vmem:[%s382_s15 + $0x68] sm:$0xff] %v186_v28  ;;  %v192_v40 = vmax.f32 %v144_v37, 0.0  ;;  %v193_v41 = vmax.f32 %v145_v38, 0.0  ;;  %v146_v42 = vld [vmem:[%s377_s12 + $0xa8] sm:$0xff]  ;;  %v147_v43 = vld [vmem:[%s377_s12 + $0xb0] sm:$0xff] }
  0x18   : > { %235 = vst [vmem:[%s382_s15 + $0x70] sm:$0xff] %v187_v29  ;;  %v148_v44 = vld [vmem:[%s377_s12 + $0xb8] sm:$0xff]  ;;  %236 = vst [vmem:[%s382_s15 + $0x78] sm:$0xff] %v188_v33  ;;  %v194_v45 = vmax.f32 %v146_v42, 0.0  ;;  %v195_v46 = vmax.f32 %v147_v43, 0.0  ;;  %v149_v48 = vld [vmem:[%s377_s12 + $0xc0] sm:$0xff] }
  0x19   : > { %237 = vst [vmem:[%s382_s15 + $0x80] sm:$0xff] %v189_v34  ;;  %238 = vst [vmem:[%s382_s15 + $0x88] sm:$0xff] %v190_v35  ;;  %v196_v47 = vmax.f32 %v148_v44, 0.0  ;;  %v150_v49 = vld [vmem:[%s377_s12 + $0xc8] sm:$0xff]  ;;  %v151_v50 = vld [vmem:[%s377_s12 + $0xd0] sm:$0xff]  ;;  %v197_v51 = vmax.f32 %v149_v48, 0.0 }
  0x1a   : > { %239 = vst [vmem:[%s382_s15 + $0x90] sm:$0xff] %v191_v39  ;;  %240 = vst [vmem:[%s382_s15 + $0x98] sm:$0xff] %v192_v40  ;;  %v198_v52 = vmax.f32 %v150_v49, 0.0  ;;  %v199_v53 = vmax.f32 %v151_v50, 0.0  ;;  %v152_v54 = vld [vmem:[%s377_s12 + $0xd8] sm:$0xff]  ;;  %v153_v55 = vld [vmem:[%s377_s12 + $0xe0] sm:$0xff] }
  0x1b   : > { %241 = vst [vmem:[%s382_s15 + $0xa0] sm:$0xff] %v193_v41  ;;  %v154_v56 = vld [vmem:[%s377_s12 + $0xe8] sm:$0xff]  ;;  %242 = vst [vmem:[%s382_s15 + $0xa8] sm:$0xff] %v194_v45  ;;  %v200_v57 = vmax.f32 %v152_v54, 0.0  ;;  %v201_v58 = vmax.f32 %v153_v55, 0.0  ;;  %v155_v60 = vld [vmem:[%s377_s12 + $0xf0] sm:$0xff] }
  0x1c   : > { %243 = vst [vmem:[%s382_s15 + $0xb0] sm:$0xff] %v195_v46  ;;  %244 = vst [vmem:[%s382_s15 + $0xb8] sm:$0xff] %v196_v47  ;;  %v202_v59 = vmax.f32 %v154_v56, 0.0  ;;  %v156_v61 = vld [vmem:[%s377_s12 + $0xf8] sm:$0xff]  ;;  %v157_v62 = vld [vmem:[%s377_s12 + $0x100] sm:$0xff]  ;;  %v203_v63 = vmax.f32 %v155_v60, 0.0 }
  0x1d   : > { %245 = vst [vmem:[%s382_s15 + $0xc0] sm:$0xff] %v197_v51  ;;  %246 = vst [vmem:[%s382_s15 + $0xc8] sm:$0xff] %v198_v52  ;;  %v204_v0 = vmax.f32 %v156_v61, 0.0  ;;  %v205_v1 = vmax.f32 %v157_v62, 0.0  ;;  %v158_v2 = vld [vmem:[%s377_s12 + $0x108] sm:$0xff]  ;;  %v159_v3 = vld [vmem:[%s377_s12 + $0x110] sm:$0xff] }
  0x1e   : > { %247 = vst [vmem:[%s382_s15 + $0xd0] sm:$0xff] %v199_v53  ;;  %v160_v4 = vld [vmem:[%s377_s12 + $0x118] sm:$0xff]  ;;  %248 = vst [vmem:[%s382_s15 + $0xd8] sm:$0xff] %v200_v57  ;;  %v206_v5 = vmax.f32 %v158_v2, 0.0  ;;  %v207_v6 = vmax.f32 %v159_v3, 0.0  ;;  %v161_v8 = vld [vmem:[%s377_s12 + $0x120] sm:$0xff] }
  0x1f   : > { %249 = vst [vmem:[%s382_s15 + $0xe0] sm:$0xff] %v201_v58  ;;  %250 = vst [vmem:[%s382_s15 + $0xe8] sm:$0xff] %v202_v59  ;;  %v208_v7 = vmax.f32 %v160_v4, 0.0  ;;  %v162_v9 = vld [vmem:[%s377_s12 + $0x128] sm:$0xff]  ;;  %v163_v10 = vld [vmem:[%s377_s12 + $0x130] sm:$0xff]  ;;  %v209_v11 = vmax.f32 %v161_v8, 0.0 }
  0x20   : > { %251 = vst [vmem:[%s382_s15 + $0xf0] sm:$0xff] %v203_v63  ;;  %252 = vst [vmem:[%s382_s15 + $0xf8] sm:$0xff] %v204_v0  ;;  %v210_v12 = vmax.f32 %v162_v9, 0.0  ;;  %v211_v13 = vmax.f32 %v163_v10, 0.0  ;;  %v164_v14 = vld [vmem:[%s377_s12 + $0x138] sm:$0xff]  ;;  %v165_v15 = vld [vmem:[%s377_s12 + $0x140] sm:$0xff] }
  0x21   : > { %253 = vst [vmem:[%s382_s15 + $0x100] sm:$0xff] %v205_v1  ;;  %v166_v16 = vld [vmem:[%s377_s12 + $0x148] sm:$0xff]  ;;  %254 = vst [vmem:[%s382_s15 + $0x108] sm:$0xff] %v206_v5  ;;  %v212_v17 = vmax.f32 %v164_v14, 0.0  ;;  %v213_v18 = vmax.f32 %v165_v15, 0.0  ;;  %v167_v20 = vld [vmem:[%s377_s12 + $0x150] sm:$0xff] }
  0x22   : > { %255 = vst [vmem:[%s382_s15 + $0x110] sm:$0xff] %v207_v6  ;;  %256 = vst [vmem:[%s382_s15 + $0x118] sm:$0xff] %v208_v7  ;;  %v214_v19 = vmax.f32 %v166_v16, 0.0  ;;  %v168_v21 = vld [vmem:[%s377_s12 + $0x158] sm:$0xff]  ;;  %v169_v22 = vld [vmem:[%s377_s12 + $0x160] sm:$0xff]  ;;  %v215_v23 = vmax.f32 %v167_v20, 0.0 }
  0x23   : > { %257 = vst [vmem:[%s382_s15 + $0x120] sm:$0xff] %v209_v11  ;;  %258 = vst [vmem:[%s382_s15 + $0x128] sm:$0xff] %v210_v12  ;;  %v216_v24 = vmax.f32 %v168_v21, 0.0  ;;  %v217_v25 = vmax.f32 %v169_v22, 0.0  ;;  %v170_v26 = vld [vmem:[%s377_s12 + $0x168] sm:$0xff]  ;;  %v171_v27 = vld [vmem:[%s377_s12 + $0x170] sm:$0xff] }
  0x24   : > { %259 = vst [vmem:[%s382_s15 + $0x130] sm:$0xff] %v211_v13  ;;  %v172_v28 = vld [vmem:[%s377_s12 + $0x178] sm:$0xff]  ;;  %260 = vst [vmem:[%s382_s15 + $0x138] sm:$0xff] %v212_v17  ;;  %v218_v29 = vmax.f32 %v170_v26, 0.0  ;;  %v219_v30 = vmax.f32 %v171_v27, 0.0 }
  0x25   : > { %261 = vst [vmem:[%s382_s15 + $0x140] sm:$0xff] %v213_v18  ;;  %262 = vst [vmem:[%s382_s15 + $0x148] sm:$0xff] %v214_v19  ;;  %v220_v31 = vmax.f32 %v172_v28, 0.0 }
  0x26   : > { %263 = vst [vmem:[%s382_s15 + $0x150] sm:$0xff] %v215_v23  ;;  %264 = vst [vmem:[%s382_s15 + $0x158] sm:$0xff] %v216_v24 }
  0x27   : > { %265 = vst [vmem:[%s382_s15 + $0x160] sm:$0xff] %v217_v25  ;;  %266 = vst [vmem:[%s382_s15 + $0x168] sm:$0xff] %v218_v29 }
  0x28   : > { %267 = vst [vmem:[%s382_s15 + $0x170] sm:$0xff] %v219_v30  ;;  %268 = vst [vmem:[%s382_s15 + $0x178] sm:$0xff] %v220_v31 }
  0x29 PF: > { %s11_s6 = sadd.s32 1, %s354_s6  }
  0x2a   : > { %p8_p4 = scmp.ge.s32.totalorder %s11_s6, 4  }
  0x2c   :  { %10 = sbr.rel (!%p8_p4) target bundleno = 1 (0x1), region = 54 }

// kernel: wavelets_forward.20
= control target key start
LH: loop header
LB: loop body
LE: loop exit
PB: predicated region body
PF: predicated region fallthrough
CT: control target
= control target key end

     0   :  { %s1660_s0 = inlined_call_operand.vmem [shape: s32[6], index: 0, kind: input, shape index: {}]   ;;  %s1661_s1 = inlined_call_operand.vmem [shape: f32[3072,192], index: 1, kind: input, shape index: {}]   ;;  %s1662_s2 = inlined_call_operand.vmem [shape: f32[4,192,192], index: 2, kind: input, shape index: {}]   ;;  %s1663_s3 = inlined_call_operand.vmem [shape: f32[3072,192], index: 3, kind: output, shape index: {}]  }
   0x1   :  { %s8_s14 = sshll.u32 %s1660_s0, 4  ;;  %s9_s14 = int_to_ptr.vmem [resolvable:$true] %s8_s14 }
   0x2   :  { %s1181_s15 = scalar_lea.vmem %s9_s14, 16  ;;  %p1186_p1 = scmp.lt.s32.totalorder %s9_s14, %s9_s14 }
   0x3   :  { %p1182_p0 = scmp.ne.s32.totalorder %s9_s14, %s1181_s15  ;;  %p1187_p2 = scmp.lt.s32.totalorder %s1181_s15, %s1181_s15 }
   0x5   :  { %p1188_p3 = por %p1187_p2, %p1186_p1 }
   0x7   :  { %p1189_p4 = pnand %p1188_p3, %p1182_p0 }
   0x9   :  { %1192 = shalt.err (!%p1189_p4)  }
   0xa   :  { %s1203_s16 = smov [#allocation3]  }
   0xb   :  { %11 = dma.vmem_to_smem %s9_s14, 16, %s1203_s16, [#allocation2] }
   0xc   :  { %1197 = dma.done.wait [#allocation2], 16 }
   0xd   :  { %1198 = vsyncadd [#allocation2], 4294967280 }
   0xe   :  { %13 = sfence }
   0xf   :  { %s1227_s17 = smov 0  }
  0x10 LB: > { %s1099_s0 = sadd.s32 4294967295, %s1201_s17   ;;  %p1103_p5 = scmp.ge.s32.totalorder %s1201_s17, 1  ;;  %s1201_s17 = sphi %s1227_s17, %s19_s17  }
  0x11   : > { %p135_p6 = scmp.lt.s32.totalorder %s1201_s17, 7 }
  0x13   : > { %p136_p7 = pnand %p1103_p5, %p135_p6 }
  0x14   : > { %s172_s18 = sld [smem:[#allocation3 + %s1099_s0]] (!%p136_p7)  ;;  %s1104_s19 = sshll.u32 (!%p136_p7), %s1099_s0, 6 }
  0x15   : > { %139 = sbr.rel (%p136_p7) target bundleno = 403 (0x193), region = 28  ;;  %p166_p8 = scmp.lt.s32.totalorder (!%p136_p7), %s1104_s19, 383 }
  0x1a   : > { %s1665_s19 = smov (!%p166_p8, %s1104_s19), 383  ;;  %p173_p9 = scmp.lt.s32.totalorder %s172_s18, 3  ;;  %vm451_vm0 = vcmask 523264  }
  0x1b   : > { %s1145_s20 = sshll.u32 %s1665_s19, 4 }
  0x1c   : > { %s1243_s23 = scalar_lea.vmem %s1661_s1, %s1145_s20  ;;  %s1667_s18 = smov (!%p173_p9, %s172_s18), 3 }
  0x1d   : > { %v188_v0 = vld [vmem:[%s1243_s23 + $0x8] sm:$0xff]  ;;  %v190_v1 = vld [vmem:[%s1243_s23 + $0x18] sm:$0xff]  ;;  %s1171_s24 = smul.u32 384, %s1667_s18  ;;  %s1463_s30 = scalar_lea.vmem %s1663_s3, %s1145_s20 }
  0x1e   : > { %v252_v2 = vld [vmem:[%s1243_s23 + $0x208] sm:$0xff]  ;;  %v316_v3 = vpack.c.bf16 %v190_v1, %v188_v0  ;;  %v254_v4 = vld [vmem:[%s1243_s23 + $0x218] sm:$0xff] }
  0x1f   : > { %v348_v5 = vpack.c.bf16 %v254_v4, %v252_v2  ;;  %s1254_s27 = scalar_lea.vmem %s1662_s2, %s1171_s24 }
  0x20   : > { %1111 = vmatprep.mubr.msk.bf16.mxu0 %vm451_vm0, %v316_v3  ;;  %v408_v6 = vld [vmem:[%s1254_s27 + $0xe8] sm:$0xff]  ;;  %v410_v7 = vld [vmem:[%s1254_s27 + $0xf8] sm:$0xff]  ;;  %v407_v8 = vld [vmem:[%s1254_s27 + $0xe0] sm:$0xff] }
  0x21   : > { %1127 = vmatprep.mubr.msk.bf16.mxu1 %vm451_vm0, %v348_v5  ;;  %v442_v9 = vpack.c.bf16 %v410_v7, %v408_v6  ;;  %v409_v10 = vld [vmem:[%s1254_s27 + $0xf0] sm:$0xff]  ;;  %v404_v11 = vld [vmem:[%s1254_s27 + $0xc8] sm:$0xff]  ;;  %v406_v12 = vld [vmem:[%s1254_s27 + $0xd8] sm:$0xff] }
  0x22   : > { %v441_v13 = vpack.c.bf16 %v409_v10, %v407_v8  ;;  %v440_v14 = vpack.c.bf16 %v406_v12, %v404_v11  ;;  %v403_v15 = vld [vmem:[%s1254_s27 + $0xc0] sm:$0xff]  ;;  %v405_v16 = vld [vmem:[%s1254_s27 + $0xd0] sm:$0xff]  ;;  %v400_v17 = vld [vmem:[%s1254_s27 + $0xa8] sm:$0xff] }
  0x23   : > { %548 = vmatprep.subr.bf16.mxu0 %v442_v9  ;;  %1147 = vmatprep.subr.bf16.mxu1 %v442_v9  ;;  %v402_v18 = vld [vmem:[%s1254_s27 + $0xb8] sm:$0xff]  ;;  %v439_v19 = vpack.c.bf16 %v405_v16, %v403_v15  ;;  %v399_v21 = vld [vmem:[%s1254_s27 + $0xa0] sm:$0xff]  ;;  %v401_v22 = vld [vmem:[%s1254_s27 + $0xb0] sm:$0xff] }
  0x24   : > { %549 = vmatpush1.bf16.msra.mxu0 %v441_v13  ;;  %1159 = vmatpush1.bf16.msra.mxu1 %v441_v13  ;;  %v438_v20 = vpack.c.bf16 %v402_v18, %v400_v17  ;;  %v396_v23 = vld [vmem:[%s1254_s27 + $0x88] sm:$0xff]  ;;  %v398_v24 = vld [vmem:[%s1254_s27 + $0x98] sm:$0xff]  ;;  %v437_v25 = vpack.c.bf16 %v401_v22, %v399_v21  ;;  %v395_v27 = vld [vmem:[%s1254_s27 + $0x80] sm:$0xff] }
  0x25   : > { %550 = vmatprep.subr.bf16.mxu0 %v440_v14  ;;  %1148 = vmatprep.subr.bf16.mxu1 %v440_v14  ;;  %v436_v26 = vpack.c.bf16 %v398_v24, %v396_v23  ;;  %v397_v28 = vld [vmem:[%s1254_s27 + $0x90] sm:$0xff]  ;;  %v392_v29 = vld [vmem:[%s1254_s27 + $0x68] sm:$0xff]  ;;  %v394_v30 = vld [vmem:[%s1254_s27 + $0x78] sm:$0xff] }
  0x26   : > { %v435_v31 = vpack.c.bf16 %v397_v28, %v395_v27  ;;  %v434_v32 = vpack.c.bf16 %v394_v30, %v392_v29  ;;  %v391_v33 = vld [vmem:[%s1254_s27 + $0x60] sm:$0xff]  ;;  %v393_v34 = vld [vmem:[%s1254_s27 + $0x70] sm:$0xff]  ;;  %v388_v35 = vld [vmem:[%s1254_s27 + $0x48] sm:$0xff] }
  0x27   : > { %v390_v36 = vld [vmem:[%s1254_s27 + $0x58] sm:$0xff]  ;;  %v433_v37 = vpack.c.bf16 %v393_v34, %v391_v33  ;;  %v387_v39 = vld [vmem:[%s1254_s27 + $0x40] sm:$0xff]  ;;  %v389_v40 = vld [vmem:[%s1254_s27 + $0x50] sm:$0xff] }
  0x28   : > { %551 = vmatpush1.bf16.msra.mxu0 %v439_v19  ;;  %1160 = vmatpush1.bf16.msra.mxu1 %v439_v19  ;;  %v432_v38 = vpack.c.bf16 %v390_v36, %v388_v35  ;;  %v384_v41 = vld [vmem:[%s1254_s27 + $0x28] sm:$0xff]  ;;  %v386_v42 = vld [vmem:[%s1254_s27 + $0x38] sm:$0xff]  ;;  %v431_v43 = vpack.c.bf16 %v389_v40, %v387_v39  ;;  %v383_v45 = vld [vmem:[%s1254_s27 + $0x20] sm:$0xff] }
  0x29   : > { %552 = vmatprep.subr.bf16.mxu0 %v438_v20  ;;  %1149 = vmatprep.subr.bf16.mxu1 %v438_v20  ;;  %v430_v44 = vpack.c.bf16 %v386_v42, %v384_v41  ;;  %v385_v46 = vld [vmem:[%s1254_s27 + $0x30] sm:$0xff]  ;;  %v380_v47 = vld [vmem:[%s1254_s27 + $0x8] sm:$0xff]  ;;  %v382_v48 = vld [vmem:[%s1254_s27 + $0x18] sm:$0xff] }
  0x2a   : > { %v429_v49 = vpack.c.bf16 %v385_v46, %v383_v45  ;;  %v428_v50 = vpack.c.bf16 %v382_v48, %v380_v47  ;;  %v379_v51 = vld [vmem:[%s1254_s27] sm:$0xff]  ;;  %v381_v52 = vld [vmem:[%s1254_s27 + $0x10] sm:$0xff]  ;;  %v424_v53 = vld [vmem:[%s1254_s27 + $0x168] sm:$0xff] }
  0x2b   : > { %v426_v54 = vld [vmem:[%s1254_s27 + $0x178] sm:$0xff]  ;;  %v427_v55 = vpack.c.bf16 %v381_v52, %v379_v51  ;;  %v423_v57 = vld [vmem:[%s1254_s27 + $0x160] sm:$0xff]  ;;  %v425_v58 = vld [vmem:[%s1254_s27 + $0x170] sm:$0xff] }
  0x2c   : > { %553 = vmatpush1.bf16.msra.mxu0 %v437_v25  ;;  %1161 = vmatpush1.bf16.msra.mxu1 %v437_v25  ;;  %v450_v56 = vpack.c.bf16 %v426_v54, %v424_v53  ;;  %v420_v59 = vld [vmem:[%s1254_s27 + $0x148] sm:$0xff]  ;;  %v422_v60 = vld [vmem:[%s1254_s27 + $0x158] sm:$0xff]  ;;  %v449_v61 = vpack.c.bf16 %v425_v58, %v423_v57  ;;  %v419_v63 = vld [vmem:[%s1254_s27 + $0x140] sm:$0xff] }
  0x2d   : > { %554 = vmatprep.subr.bf16.mxu0 %v436_v26  ;;  %1150 = vmatprep.subr.bf16.mxu1 %v436_v26  ;;  %v448_v62 = vpack.c.bf16 %v422_v60, %v420_v59  ;;  %v421_v0 = vld [vmem:[%s1254_s27 + $0x150] sm:$0xff]  ;;  %v416_v1 = vld [vmem:[%s1254_s27 + $0x128] sm:$0xff]  ;;  %v418_v2 = vld [vmem:[%s1254_s27 + $0x138] sm:$0xff] }
  0x2e   : > { %v447_v3 = vpack.c.bf16 %v421_v0, %v419_v63  ;;  %v446_v4 = vpack.c.bf16 %v418_v2, %v416_v1  ;;  %v415_v5 = vld [vmem:[%s1254_s27 + $0x120] sm:$0xff]  ;;  %v417_v6 = vld [vmem:[%s1254_s27 + $0x130] sm:$0xff]  ;;  %v412_v7 = vld [vmem:[%s1254_s27 + $0x108] sm:$0xff] }
  0x2f   : > { %v414_v8 = vld [vmem:[%s1254_s27 + $0x118] sm:$0xff]  ;;  %v445_v9 = vpack.c.bf16 %v417_v6, %v415_v5  ;;  %v411_v11 = vld [vmem:[%s1254_s27 + $0x100] sm:$0xff]  ;;  %v413_v12 = vld [vmem:[%s1254_s27 + $0x110] sm:$0xff] }
  0x30   : > { %555 = vmatpush1.bf16.msra.mxu0 %v435_v31  ;;  %1162 = vmatpush1.bf16.msra.mxu1 %v435_v31  ;;  %v444_v10 = vpack.c.bf16 %v414_v8, %v412_v7  ;;  %v187_v13 = vld [vmem:[%s1243_s23] sm:$0xff]  ;;  %v189_v14 = vld [vmem:[%s1243_s23 + $0x10] sm:$0xff]  ;;  %v443_v15 = vpack.c.bf16 %v413_v12, %v411_v11  ;;  %v192_v18 = vld [vmem:[%s1243_s23 + $0x28] sm:$0xff] }
  0x31   : > { %556 = vmatprep.subr.bf16.mxu0 %v434_v32  ;;  %1151 = vmatprep.subr.bf16.mxu1 %v434_v32  ;;  %v251_v16 = vld [vmem:[%s1243_s23 + $0x200] sm:$0xff]  ;;  %v253_v17 = vld [vmem:[%s1243_s23 + $0x210] sm:$0xff]  ;;  %v194_v19 = vld [vmem:[%s1243_s23 + $0x38] sm:$0xff]  ;;  %v315_v22 = vpack.c.bf16 %v189_v14, %v187_v13 }
  0x32   : > { %v256_v20 = vld [vmem:[%s1243_s23 + $0x228] sm:$0xff]  ;;  %v258_v21 = vld [vmem:[%s1243_s23 + $0x238] sm:$0xff]  ;;  %v347_v23 = vpack.c.bf16 %v253_v17, %v251_v16  ;;  %v318_v24 = vpack.c.bf16 %v194_v19, %v192_v18  ;;  %v191_v26 = vld [vmem:[%s1243_s23 + $0x20] sm:$0xff] }
  0x33   : > { %v350_v25 = vpack.c.bf16 %v258_v21, %v256_v20  ;;  %v193_v27 = vld [vmem:[%s1243_s23 + $0x30] sm:$0xff]  ;;  %v255_v28 = vld [vmem:[%s1243_s23 + $0x220] sm:$0xff]  ;;  %v196_v30 = vld [vmem:[%s1243_s23 + $0x48] sm:$0xff] }
  0x34   : > { %557 = vmatpush1.bf16.msra.mxu0 %v433_v37  ;;  %1163 = vmatpush1.bf16.msra.mxu1 %v433_v37  ;;  %v257_v29 = vld [vmem:[%s1243_s23 + $0x230] sm:$0xff]  ;;  %v198_v31 = vld [vmem:[%s1243_s23 + $0x58] sm:$0xff]  ;;  %v260_v32 = vld [vmem:[%s1243_s23 + $0x248] sm:$0xff]  ;;  %v317_v34 = vpack.c.bf16 %v193_v27, %v191_v26 }
  0x35   : > { %558 = vmatprep.subr.bf16.mxu0 %v432_v38  ;;  %1152 = vmatprep.subr.bf16.mxu1 %v432_v38  ;;  %v262_v33 = vld [vmem:[%s1243_s23 + $0x258] sm:$0xff]  ;;  %v349_v35 = vpack.c.bf16 %v257_v29, %v255_v28  ;;  %v320_v36 = vpack.c.bf16 %v198_v31, %v196_v30  ;;  %v195_v38 = vld [vmem:[%s1243_s23 + $0x40] sm:$0xff]  ;;  %v197_v39 = vld [vmem:[%s1243_s23 + $0x50] sm:$0xff] }
  0x36   : > { %v352_v37 = vpack.c.bf16 %v262_v33, %v260_v32  ;;  %v259_v40 = vld [vmem:[%s1243_s23 + $0x240] sm:$0xff]  ;;  %v261_v41 = vld [vmem:[%s1243_s23 + $0x250] sm:$0xff]  ;;  %v200_v42 = vld [vmem:[%s1243_s23 + $0x68] sm:$0xff]  ;;  %v319_v46 = vpack.c.bf16 %v197_v39, %v195_v38 }
  0x37   : > { %v266_v45 = vld [vmem:[%s1243_s23 + $0x278] sm:$0xff]  ;;  %v351_v47 = vpack.c.bf16 %v261_v41, %v259_v40  ;;  %v201_v51 = vld [vmem:[%s1243_s23 + $0x70] sm:$0xff]  ;;  %v263_v52 = vld [vmem:[%s1243_s23 + $0x260] sm:$0xff] }
  0x38   : > { %559 = vmatpush1.bf16.msra.mxu0 %v431_v43  ;;  %1164 = vmatpush1.bf16.msra.mxu1 %v431_v43  ;;  %v202_v43 = vld [vmem:[%s1243_s23 + $0x78] sm:$0xff]  ;;  %v265_v53 = vld [vmem:[%s1243_s23 + $0x270] sm:$0xff]  ;;  %v204_v54 = vld [vmem:[%s1243_s23 + $0x88] sm:$0xff] }
  0x39   : > { %560 = vmatprep.subr.bf16.mxu0 %v430_v44  ;;  %1153 = vmatprep.subr.bf16.mxu1 %v430_v44  ;;  %v264_v44 = vld [vmem:[%s1243_s23 + $0x268] sm:$0xff]  ;;  %v322_v48 = vpack.c.bf16 %v202_v43, %v200_v42  ;;  %v270_v57 = vld [vmem:[%s1243_s23 + $0x298] sm:$0xff]  ;;  %v353_v59 = vpack.c.bf16 %v265_v53, %v263_v52  ;;  %v205_v63 = vld [vmem:[%s1243_s23 + $0x90] sm:$0xff] }
  0x3a   : > { %v267_v0 = vld [vmem:[%s1243_s23 + $0x280] sm:$0xff]  ;;  %v269_v1 = vld [vmem:[%s1243_s23 + $0x290] sm:$0xff]  ;;  %v208_v2 = vld [vmem:[%s1243_s23 + $0xa8] sm:$0xff] }
  0x3b   : > { %v274_v5 = vld [vmem:[%s1243_s23 + $0x2b8] sm:$0xff]  ;;  %v355_v7 = vpack.c.bf16 %v269_v1, %v267_v0  ;;  %v209_v11 = vld [vmem:[%s1243_s23 + $0xb0] sm:$0xff]  ;;  %v271_v12 = vld [vmem:[%s1243_s23 + $0x2a0] sm:$0xff] }
  0x3c   : > { %561 = vmatpush1.bf16.msra.mxu0 %v429_v49  ;;  %1165 = vmatpush1.bf16.msra.mxu1 %v429_v49  ;;  %v354_v49 = vpack.c.bf16 %v266_v45, %v264_v44  ;;  %v273_v13 = vld [vmem:[%s1243_s23 + $0x2b0] sm:$0xff]  ;;  %v212_v14 = vld [vmem:[%s1243_s23 + $0xc8] sm:$0xff]  ;;  %v278_v17 = vld [vmem:[%s1243_s23 + $0x2d8] sm:$0xff] }
  0x3d   : > { %562 = vmatprep.subr.bf16.mxu0 %v428_v50  ;;  %1154 = vmatprep.subr.bf16.mxu1 %v428_v50  ;;  %v199_v50 = vld [vmem:[%s1243_s23 + $0x60] sm:$0xff]  ;;  %v276_v16 = vld [vmem:[%s1243_s23 + $0x2c8] sm:$0xff]  ;;  %v357_v19 = vpack.c.bf16 %v273_v13, %v271_v12  ;;  %v218_v27 = vld [vmem:[%s1243_s23 + $0xf8] sm:$0xff] }
  0x3e   : > { %v321_v58 = vpack.c.bf16 %v201_v51, %v199_v50  ;;  %v360_v21 = vpack.c.bf16 %v278_v17, %v276_v16  ;;  %v216_v26 = vld [vmem:[%s1243_s23 + $0xe8] sm:$0xff]  ;;  %v282_v29 = vld [vmem:[%s1243_s23 + $0x2f8] sm:$0xff] }
  0x3f   : > { %v280_v28 = vld [vmem:[%s1243_s23 + $0x2e8] sm:$0xff]  ;;  %v330_v32 = vpack.c.bf16 %v218_v27, %v216_v26  ;;  %v222_v39 = vld [vmem:[%s1243_s23 + $0x118] sm:$0xff] }
  0x40   : > { %563 = vmatpush1.bf16.msra.mxu0 %v427_v55  ;;  %1166 = vmatpush1.bf16.msra.mxu1 %v427_v55  ;;  %v206_v55 = vld [vmem:[%s1243_s23 + $0x98] sm:$0xff]  ;;  %v362_v33 = vpack.c.bf16 %v282_v29, %v280_v28  ;;  %v220_v38 = vld [vmem:[%s1243_s23 + $0x108] sm:$0xff] }
  0x41   : > { %572 = vmatprep.subr.bf16.mxu0 %v450_v56  ;;  %1155 = vmatprep.subr.bf16.mxu1 %v450_v56  ;;  %v268_v56 = vld [vmem:[%s1243_s23 + $0x288] sm:$0xff]  ;;  %v324_v60 = vpack.c.bf16 %v206_v55, %v204_v54  ;;  %v286_v41 = vld [vmem:[%s1243_s23 + $0x318] sm:$0xff]  ;;  %v332_v44 = vpack.c.bf16 %v222_v39, %v220_v38 }
  0x42   : > { %v284_v40 = vld [vmem:[%s1243_s23 + $0x308] sm:$0xff]  ;;  %v226_v51 = vld [vmem:[%s1243_s23 + $0x138] sm:$0xff] }
  0x43   : > { %v364_v45 = vpack.c.bf16 %v286_v41, %v284_v40  ;;  %v224_v50 = vld [vmem:[%s1243_s23 + $0x128] sm:$0xff]  ;;  %v290_v53 = vld [vmem:[%s1243_s23 + $0x338] sm:$0xff] }
  0x44   : > { %573 = vmatpush2.bf16.msra.mxu0 %v449_v61  ;;  %1167 = vmatpush2.bf16.msra.mxu1 %v449_v61  ;;  %v356_v61 = vpack.c.bf16 %v270_v57, %v268_v56  ;;  %v288_v52 = vld [vmem:[%s1243_s23 + $0x328] sm:$0xff]  ;;  %v334_v56 = vpack.c.bf16 %v226_v51, %v224_v50  ;;  %v294_v1 = vld [vmem:[%s1243_s23 + $0x358] sm:$0xff] }
  0x45   : > { %574 = vmatprep.subr.bf16.mxu0 %v448_v62  ;;  %1156 = vmatprep.subr.bf16.mxu1 %v448_v62  ;;  %v203_v62 = vld [vmem:[%s1243_s23 + $0x80] sm:$0xff]  ;;  %v366_v57 = vpack.c.bf16 %v290_v53, %v288_v52  ;;  %v292_v0 = vld [vmem:[%s1243_s23 + $0x348] sm:$0xff]  ;;  %v298_v13 = vld [vmem:[%s1243_s23 + $0x378] sm:$0xff] }
  0x46   : > { %v323_v6 = vpack.c.bf16 %v205_v63, %v203_v62  ;;  %v228_v62 = vld [vmem:[%s1243_s23 + $0x148] sm:$0xff]  ;;  %v230_v63 = vld [vmem:[%s1243_s23 + $0x158] sm:$0xff] }
  0x47   : > { %v296_v12 = vld [vmem:[%s1243_s23 + $0x368] sm:$0xff] }
  0x48   : > { %575 = vmatpush2.bf16.msra.mxu0 %v447_v3  ;;  %1168 = vmatpush2.bf16.msra.mxu1 %v447_v3  ;;  %v210_v3 = vld [vmem:[%s1243_s23 + $0xb8] sm:$0xff]  ;;  %v370_v17 = vpack.c.bf16 %v298_v13, %v296_v12 }
  0x49   : > { %576 = vmatprep.subr.bf16.mxu0 %v446_v4  ;;  %1157 = vmatprep.subr.bf16.mxu1 %v446_v4  ;;  %v272_v4 = vld [vmem:[%s1243_s23 + $0x2a8] sm:$0xff]  ;;  %v326_v8 = vpack.c.bf16 %v210_v3, %v208_v2 }
  0x4c   : > { %577 = vmatpush2.bf16.msra.mxu0 %v445_v9  ;;  %1169 = vmatpush2.bf16.msra.mxu1 %v445_v9  ;;  %v358_v9 = vpack.c.bf16 %v274_v5, %v272_v4  ;;  %v336_v4 = vpack.c.bf16 %v230_v63, %v228_v62  ;;  %v368_v5 = vpack.c.bf16 %v294_v1, %v292_v0 }
  0x4d   : > { %578 = vmatprep.subr.bf16.mxu0 %v444_v10  ;;  %1158 = vmatprep.subr.bf16.mxu1 %v444_v10  ;;  %v207_v10 = vld [vmem:[%s1243_s23 + $0xa0] sm:$0xff] }
  0x4e   : > { %v325_v18 = vpack.c.bf16 %v209_v11, %v207_v10  ;;  %v232_v10 = vld [vmem:[%s1243_s23 + $0x168] sm:$0xff]  ;;  %v234_v11 = vld [vmem:[%s1243_s23 + $0x178] sm:$0xff] }
  0x4f   : > { %v338_v16 = vpack.c.bf16 %v234_v11, %v232_v10 }
  0x50   : > { %579 = vmatpush2.bf16.msra.mxu0 %v443_v15  ;;  %1170 = vmatpush2.bf16.msra.mxu1 %v443_v15  ;;  %v214_v15 = vld [vmem:[%s1243_s23 + $0xd8] sm:$0xff] }
  0x51   : > { %v328_v20 = vpack.c.bf16 %v214_v15, %v212_v14 }
  0x53   : > { %581 = vmatmul.mubr.bf16.vlgmr.msra.gmra.mxu0 %v315_v22  ;;  %741 = vmatmul.mubr.bf16.vlgmr.msra.gmra.mxu1 %v347_v23  ;;  %v211_v22 = vld [vmem:[%s1243_s23 + $0xc0] sm:$0xff]  ;;  %v213_v23 = vld [vmem:[%s1243_s23 + $0xd0] sm:$0xff] }
  0x54   : > { %1112 = vmatprep.mubr.msk.bf16.mxu0 %vm451_vm0, %v318_v24  ;;  %1128 = vmatprep.mubr.msk.bf16.mxu1 %vm451_vm0, %v350_v25  ;;  %v275_v24 = vld [vmem:[%s1243_s23 + $0x2c0] sm:$0xff]  ;;  %v277_v25 = vld [vmem:[%s1243_s23 + $0x2d0] sm:$0xff]  ;;  %v327_v30 = vpack.c.bf16 %v213_v23, %v211_v22  ;;  %v236_v22 = vld [vmem:[%s1243_s23 + $0x188] sm:$0xff] }
  0x55   : > { %v359_v31 = vpack.c.bf16 %v277_v25, %v275_v24  ;;  %v238_v23 = vld [vmem:[%s1243_s23 + $0x198] sm:$0xff]  ;;  %v300_v24 = vld [vmem:[%s1243_s23 + $0x388] sm:$0xff] }
  0x56   : > { %v302_v25 = vld [vmem:[%s1243_s23 + $0x398] sm:$0xff]  ;;  %v340_v28 = vpack.c.bf16 %v238_v23, %v236_v22 }
  0x57   : > { %v372_v29 = vpack.c.bf16 %v302_v25, %v300_v24 }
  0x5b   : > { %591 = vmatmul.mubr.bf16.gmra.mxu0 %v317_v34  ;;  %751 = vmatmul.mubr.bf16.gmra.mxu1 %v349_v35  ;;  %v215_v34 = vld [vmem:[%s1243_s23 + $0xe0] sm:$0xff]  ;;  %v217_v35 = vld [vmem:[%s1243_s23 + $0xf0] sm:$0xff] }
  0x5c   : > { %1113 = vmatprep.mubr.msk.bf16.mxu0 %vm451_vm0, %v320_v36  ;;  %1129 = vmatprep.mubr.msk.bf16.mxu1 %vm451_vm0, %v352_v37  ;;  %v279_v36 = vld [vmem:[%s1243_s23 + $0x2e0] sm:$0xff]  ;;  %v281_v37 = vld [vmem:[%s1243_s23 + $0x2f0] sm:$0xff]  ;;  %v329_v42 = vpack.c.bf16 %v217_v35, %v215_v34  ;;  %v240_v34 = vld [vmem:[%s1243_s23 + $0x1a8] sm:$0xff] }
  0x5d   : > { %v361_v43 = vpack.c.bf16 %v281_v37, %v279_v36  ;;  %v242_v35 = vld [vmem:[%s1243_s23 + $0x1b8] sm:$0xff]  ;;  %v304_v36 = vld [vmem:[%s1243_s23 + $0x3a8] sm:$0xff] }
  0x5e   : > { %v306_v37 = vld [vmem:[%s1243_s23 + $0x3b8] sm:$0xff]  ;;  %v342_v40 = vpack.c.bf16 %v242_v35, %v240_v34 }
  0x5f   : > { %v374_v41 = vpack.c.bf16 %v306_v37, %v304_v36 }
  0x63   : > { %601 = vmatmul.mubr.bf16.gmra.mxu0 %v319_v46  ;;  %761 = vmatmul.mubr.bf16.gmra.mxu1 %v351_v47  ;;  %v219_v46 = vld [vmem:[%s1243_s23 + $0x100] sm:$0xff]  ;;  %v221_v47 = vld [vmem:[%s1243_s23 + $0x110] sm:$0xff] }
  0x64   : > { %1114 = vmatprep.mubr.msk.bf16.mxu0 %vm451_vm0, %v322_v48  ;;  %1130 = vmatprep.mubr.msk.bf16.mxu1 %vm451_vm0, %v354_v49  ;;  %v283_v48 = vld [vmem:[%s1243_s23 + $0x300] sm:$0xff]  ;;  %v285_v49 = vld [vmem:[%s1243_s23 + $0x310] sm:$0xff]  ;;  %v331_v54 = vpack.c.bf16 %v221_v47, %v219_v46  ;;  %v244_v46 = vld [vmem:[%s1243_s23 + $0x1c8] sm:$0xff] }
  0x65   : > { %v363_v55 = vpack.c.bf16 %v285_v49, %v283_v48  ;;  %v246_v47 = vld [vmem:[%s1243_s23 + $0x1d8] sm:$0xff]  ;;  %v308_v48 = vld [vmem:[%s1243_s23 + $0x3c8] sm:$0xff] }
  0x66   : > { %v310_v49 = vld [vmem:[%s1243_s23 + $0x3d8] sm:$0xff]  ;;  %v344_v52 = vpack.c.bf16 %v246_v47, %v244_v46 }
  0x67   : > { %v376_v53 = vpack.c.bf16 %v310_v49, %v308_v48 }
  0x6b   : > { %611 = vmatmul.mubr.bf16.gmra.mxu0 %v321_v58  ;;  %771 = vmatmul.mubr.bf16.gmra.mxu1 %v353_v59  ;;  %v223_v58 = vld [vmem:[%s1243_s23 + $0x120] sm:$0xff]  ;;  %v225_v59 = vld [vmem:[%s1243_s23 + $0x130] sm:$0xff] }
  0x6c   : > { %1115 = vmatprep.mubr.msk.bf16.mxu0 %vm451_vm0, %v324_v60  ;;  %1131 = vmatprep.mubr.msk.bf16.mxu1 %vm451_vm0, %v356_v61  ;;  %v287_v60 = vld [vmem:[%s1243_s23 + $0x320] sm:$0xff]  ;;  %v289_v61 = vld [vmem:[%s1243_s23 + $0x330] sm:$0xff]  ;;  %v333_v2 = vpack.c.bf16 %v225_v59, %v223_v58  ;;  %v248_v58 = vld [vmem:[%s1243_s23 + $0x1e8] sm:$0xff] }
  0x6d   : > { %v365_v3 = vpack.c.bf16 %v289_v61, %v287_v60  ;;  %v250_v59 = vld [vmem:[%s1243_s23 + $0x1f8] sm:$0xff]  ;;  %v312_v60 = vld [vmem:[%s1243_s23 + $0x3e8] sm:$0xff] }
  0x6e   : > { %v314_v61 = vld [vmem:[%s1243_s23 + $0x3f8] sm:$0xff]  ;;  %v346_v0 = vpack.c.bf16 %v250_v59, %v248_v58 }
  0x6f   : > { %v378_v1 = vpack.c.bf16 %v314_v61, %v312_v60 }
  0x73   : > { %621 = vmatmul.mubr.bf16.gmra.mxu0 %v323_v6  ;;  %781 = vmatmul.mubr.bf16.gmra.mxu1 %v355_v7  ;;  %v227_v6 = vld [vmem:[%s1243_s23 + $0x140] sm:$0xff]  ;;  %v229_v7 = vld [vmem:[%s1243_s23 + $0x150] sm:$0xff] }
  0x74   : > { %1116 = vmatprep.mubr.msk.bf16.mxu0 %vm451_vm0, %v326_v8  ;;  %1132 = vmatprep.mubr.msk.bf16.mxu1 %vm451_vm0, %v358_v9  ;;  %v291_v8 = vld [vmem:[%s1243_s23 + $0x340] sm:$0xff]  ;;  %v293_v9 = vld [vmem:[%s1243_s23 + $0x350] sm:$0xff]  ;;  %v335_v14 = vpack.c.bf16 %v229_v7, %v227_v6 }
  0x75   : > { %v367_v15 = vpack.c.bf16 %v293_v9, %v291_v8 }
  0x7b   : > { %631 = vmatmul.mubr.bf16.gmra.mxu0 %v325_v18  ;;  %791 = vmatmul.mubr.bf16.gmra.mxu1 %v357_v19  ;;  %v231_v18 = vld [vmem:[%s1243_s23 + $0x160] sm:$0xff]  ;;  %v233_v19 = vld [vmem:[%s1243_s23 + $0x170] sm:$0xff] }
  0x7c   : > { %1117 = vmatprep.mubr.msk.bf16.mxu0 %vm451_vm0, %v328_v20  ;;  %1133 = vmatprep.mubr.msk.bf16.mxu1 %vm451_vm0, %v360_v21  ;;  %v295_v20 = vld [vmem:[%s1243_s23 + $0x360] sm:$0xff]  ;;  %v297_v21 = vld [vmem:[%s1243_s23 + $0x370] sm:$0xff]  ;;  %v337_v26 = vpack.c.bf16 %v233_v19, %v231_v18 }
  0x7d   : > { %v369_v27 = vpack.c.bf16 %v297_v21, %v295_v20 }
  0x83   : > { %641 = vmatmul.mubr.bf16.gmra.mxu0 %v327_v30  ;;  %801 = vmatmul.mubr.bf16.gmra.mxu1 %v359_v31  ;;  %v235_v30 = vld [vmem:[%s1243_s23 + $0x180] sm:$0xff]  ;;  %v237_v31 = vld [vmem:[%s1243_s23 + $0x190] sm:$0xff] }
  0x84   : > { %1118 = vmatprep.mubr.msk.bf16.mxu0 %vm451_vm0, %v330_v32  ;;  %1134 = vmatprep.mubr.msk.bf16.mxu1 %vm451_vm0, %v362_v33  ;;  %v299_v32 = vld [vmem:[%s1243_s23 + $0x380] sm:$0xff]  ;;  %v301_v33 = vld [vmem:[%s1243_s23 + $0x390] sm:$0xff]  ;;  %v339_v38 = vpack.c.bf16 %v237_v31, %v235_v30 }
  0x85   : > { %v371_v39 = vpack.c.bf16 %v301_v33, %v299_v32 }
  0x8b   : > { %651 = vmatmul.mubr.bf16.gmra.mxu0 %v329_v42  ;;  %811 = vmatmul.mubr.bf16.gmra.mxu1 %v361_v43  ;;  %v239_v42 = vld [vmem:[%s1243_s23 + $0x1a0] sm:$0xff]  ;;  %v241_v43 = vld [vmem:[%s1243_s23 + $0x1b0] sm:$0xff] }
  0x8c   : > { %1119 = vmatprep.mubr.msk.bf16.mxu0 %vm451_vm0, %v332_v44  ;;  %1135 = vmatprep.mubr.msk.bf16.mxu1 %vm451_vm0, %v364_v45  ;;  %v303_v44 = vld [vmem:[%s1243_s23 + $0x3a0] sm:$0xff]  ;;  %v305_v45 = vld [vmem:[%s1243_s23 + $0x3b0] sm:$0xff]  ;;  %v341_v50 = vpack.c.bf16 %v241_v43, %v239_v42 }
  0x8d   : > { %v373_v51 = vpack.c.bf16 %v305_v45, %v303_v44 }
  0x93   : > { %661 = vmatmul.mubr.bf16.gmra.mxu0 %v331_v54  ;;  %821 = vmatmul.mubr.bf16.gmra.mxu1 %v363_v55  ;;  %v243_v54 = vld [vmem:[%s1243_s23 + $0x1c0] sm:$0xff]  ;;  %v245_v55 = vld [vmem:[%s1243_s23 + $0x1d0] sm:$0xff] }
  0x94   : > { %1120 = vmatprep.mubr.msk.bf16.mxu0 %vm451_vm0, %v334_v56  ;;  %1136 = vmatprep.mubr.msk.bf16.mxu1 %vm451_vm0, %v366_v57  ;;  %v307_v56 = vld [vmem:[%s1243_s23 + $0x3c0] sm:$0xff]  ;;  %v309_v57 = vld [vmem:[%s1243_s23 + $0x3d0] sm:$0xff]  ;;  %v343_v62 = vpack.c.bf16 %v245_v55, %v243_v54 }
  0x95   : > { %v375_v63 = vpack.c.bf16 %v309_v57, %v307_v56 }
  0x9b   : > { %671 = vmatmul.mubr.bf16.gmra.mxu0 %v333_v2  ;;  %831 = vmatmul.mubr.bf16.gmra.mxu1 %v365_v3  ;;  %v247_v2 = vld [vmem:[%s1243_s23 + $0x1e0] sm:$0xff]  ;;  %v249_v3 = vld [vmem:[%s1243_s23 + $0x1f0] sm:$0xff] }
  0x9c   : > { %1121 = vmatprep.mubr.msk.bf16.mxu0 %vm451_vm0, %v336_v4  ;;  %1137 = vmatprep.mubr.msk.bf16.mxu1 %vm451_vm0, %v368_v5  ;;  %v311_v4 = vld [vmem:[%s1243_s23 + $0x3e0] sm:$0xff]  ;;  %v313_v5 = vld [vmem:[%s1243_s23 + $0x3f0] sm:$0xff]  ;;  %v345_v6 = vpack.c.bf16 %v249_v3, %v247_v2 }
  0x9d   : > { %v377_v7 = vpack.c.bf16 %v313_v5, %v311_v4 }
  0xa3   : > { %681 = vmatmul.mubr.bf16.gmra.mxu0 %v335_v14  ;;  %841 = vmatmul.mubr.bf16.gmra.mxu1 %v367_v15 }
  0xa4   : > { %1122 = vmatprep.mubr.msk.bf16.mxu0 %vm451_vm0, %v338_v16  ;;  %1138 = vmatprep.mubr.msk.bf16.mxu1 %vm451_vm0, %v370_v17 }
  0xab   : > { %691 = vmatmul.mubr.bf16.gmra.mxu0 %v337_v26  ;;  %851 = vmatmul.mubr.bf16.gmra.mxu1 %v369_v27 }
  0xac   : > { %1123 = vmatprep.mubr.msk.bf16.mxu0 %vm451_vm0, %v340_v28  ;;  %1139 = vmatprep.mubr.msk.bf16.mxu1 %vm451_vm0, %v372_v29 }
  0xb3   : > { %701 = vmatmul.mubr.bf16.gmra.mxu0 %v339_v38  ;;  %861 = vmatmul.mubr.bf16.gmra.mxu1 %v371_v39 }
  0xb4   : > { %1124 = vmatprep.mubr.msk.bf16.mxu0 %vm451_vm0, %v342_v40  ;;  %1140 = vmatprep.mubr.msk.bf16.mxu1 %vm451_vm0, %v374_v41 }
  0xbb   : > { %711 = vmatmul.mubr.bf16.gmra.mxu0 %v341_v50  ;;  %871 = vmatmul.mubr.bf16.gmra.mxu1 %v373_v51 }
  0xbc   : > { %1125 = vmatprep.mubr.msk.bf16.mxu0 %vm451_vm0, %v344_v52  ;;  %1141 = vmatprep.mubr.msk.bf16.mxu1 %vm451_vm0, %v376_v53 }
  0xc3   : > { %721 = vmatmul.mubr.bf16.gmra.mxu0 %v343_v62  ;;  %881 = vmatmul.mubr.bf16.gmra.mxu1 %v375_v63 }
  0xc4   : > { %1126 = vmatprep.mubr.msk.bf16.mxu0 %vm451_vm0, %v346_v0  ;;  %1142 = vmatprep.mubr.msk.bf16.mxu1 %vm451_vm0, %v378_v1 }
  0xcb   : > { %731 = vmatmul.mubr.bf16.gmra.mxu0 %v345_v6  ;;  %891 = vmatmul.mubr.bf16.gmra.mxu1 %v377_v7 }
 0x113   : > { %v582_v8 = vpop.f32.mrf.mxu0  ;;  %v742_v9 = vpop.f32.mrf.mxu1 }
 0x114   : > { %901 = vst [vmem:[%s1463_s30] sm:$0xff] %v582_v8  ;;  %965 = vst [vmem:[%s1463_s30 + $0x200] sm:$0xff] %v742_v9 }
 0x115   : > { %v584_v10 = vpop.f32.mrf.mxu0  ;;  %v744_v11 = vpop.f32.mrf.mxu1 }
 0x116   : > { %902 = vst.msk [vmem:[%s1463_s30 + $0x8] sm:$0xff] %vm451_vm0, %v584_v10  ;;  %966 = vst.msk [vmem:[%s1463_s30 + $0x208] sm:$0xff] %vm451_vm0, %v744_v11 }
 0x117   : > { %v586_v12 = vpop.f32.mrf.mxu0  ;;  %v746_v13 = vpop.f32.mrf.mxu1 }
 0x118   : > { %903 = vst [vmem:[%s1463_s30 + $0x10] sm:$0xff] %v586_v12  ;;  %967 = vst [vmem:[%s1463_s30 + $0x210] sm:$0xff] %v746_v13 }
 0x119   : > { %v588_v14 = vpop.f32.mrf.mxu0  ;;  %v748_v15 = vpop.f32.mrf.mxu1 }
 0x11a   : > { %904 = vst.msk [vmem:[%s1463_s30 + $0x18] sm:$0xff] %vm451_vm0, %v588_v14  ;;  %968 = vst.msk [vmem:[%s1463_s30 + $0x218] sm:$0xff] %vm451_vm0, %v748_v15 }
 0x11b   : > { %v592_v16 = vpop.f32.mrf.mxu0  ;;  %v752_v17 = vpop.f32.mrf.mxu1 }
 0x11c   : > { %905 = vst [vmem:[%s1463_s30 + $0x20] sm:$0xff] %v592_v16  ;;  %969 = vst [vmem:[%s1463_s30 + $0x220] sm:$0xff] %v752_v17 }
 0x11d   : > { %v594_v18 = vpop.f32.mrf.mxu0  ;;  %v754_v19 = vpop.f32.mrf.mxu1 }
 0x11e   : > { %906 = vst.msk [vmem:[%s1463_s30 + $0x28] sm:$0xff] %vm451_vm0, %v594_v18  ;;  %970 = vst.msk [vmem:[%s1463_s30 + $0x228] sm:$0xff] %vm451_vm0, %v754_v19 }
 0x11f   : > { %v596_v20 = vpop.f32.mrf.mxu0  ;;  %v756_v21 = vpop.f32.mrf.mxu1 }
 0x120   : > { %907 = vst [vmem:[%s1463_s30 + $0x30] sm:$0xff] %v596_v20  ;;  %971 = vst [vmem:[%s1463_s30 + $0x230] sm:$0xff] %v756_v21 }
 0x121   : > { %v598_v22 = vpop.f32.mrf.mxu0  ;;  %v758_v23 = vpop.f32.mrf.mxu1 }
 0x122   : > { %908 = vst.msk [vmem:[%s1463_s30 + $0x38] sm:$0xff] %vm451_vm0, %v598_v22  ;;  %972 = vst.msk [vmem:[%s1463_s30 + $0x238] sm:$0xff] %vm451_vm0, %v758_v23 }
 0x123   : > { %v602_v24 = vpop.f32.mrf.mxu0  ;;  %v762_v25 = vpop.f32.mrf.mxu1 }
 0x124   : > { %909 = vst [vmem:[%s1463_s30 + $0x40] sm:$0xff] %v602_v24  ;;  %973 = vst [vmem:[%s1463_s30 + $0x240] sm:$0xff] %v762_v25 }
 0x125   : > { %v604_v26 = vpop.f32.mrf.mxu0  ;;  %v764_v27 = vpop.f32.mrf.mxu1 }
 0x126   : > { %910 = vst.msk [vmem:[%s1463_s30 + $0x48] sm:$0xff] %vm451_vm0, %v604_v26  ;;  %974 = vst.msk [vmem:[%s1463_s30 + $0x248] sm:$0xff] %vm451_vm0, %v764_v27 }
 0x127   : > { %v606_v28 = vpop.f32.mrf.mxu0  ;;  %v766_v29 = vpop.f32.mrf.mxu1 }
 0x128   : > { %911 = vst [vmem:[%s1463_s30 + $0x50] sm:$0xff] %v606_v28  ;;  %975 = vst [vmem:[%s1463_s30 + $0x250] sm:$0xff] %v766_v29 }
 0x129   : > { %v608_v30 = vpop.f32.mrf.mxu0  ;;  %v768_v31 = vpop.f32.mrf.mxu1 }
 0x12a   : > { %912 = vst.msk [vmem:[%s1463_s30 + $0x58] sm:$0xff] %vm451_vm0, %v608_v30  ;;  %976 = vst.msk [vmem:[%s1463_s30 + $0x258] sm:$0xff] %vm451_vm0, %v768_v31 }
 0x12b   : > { %v612_v32 = vpop.f32.mrf.mxu0  ;;  %v772_v33 = vpop.f32.mrf.mxu1 }
 0x12c   : > { %913 = vst [vmem:[%s1463_s30 + $0x60] sm:$0xff] %v612_v32  ;;  %977 = vst [vmem:[%s1463_s30 + $0x260] sm:$0xff] %v772_v33 }
 0x12d   : > { %v614_v34 = vpop.f32.mrf.mxu0  ;;  %v774_v35 = vpop.f32.mrf.mxu1 }
 0x12e   : > { %914 = vst.msk [vmem:[%s1463_s30 + $0x68] sm:$0xff] %vm451_vm0, %v614_v34  ;;  %978 = vst.msk [vmem:[%s1463_s30 + $0x268] sm:$0xff] %vm451_vm0, %v774_v35 }
 0x12f   : > { %v616_v36 = vpop.f32.mrf.mxu0  ;;  %v776_v37 = vpop.f32.mrf.mxu1 }
 0x130   : > { %915 = vst [vmem:[%s1463_s30 + $0x70] sm:$0xff] %v616_v36  ;;  %979 = vst [vmem:[%s1463_s30 + $0x270] sm:$0xff] %v776_v37 }
 0x131   : > { %v618_v38 = vpop.f32.mrf.mxu0  ;;  %v778_v39 = vpop.f32.mrf.mxu1 }
 0x132   : > { %916 = vst.msk [vmem:[%s1463_s30 + $0x78] sm:$0xff] %vm451_vm0, %v618_v38  ;;  %980 = vst.msk [vmem:[%s1463_s30 + $0x278] sm:$0xff] %vm451_vm0, %v778_v39 }
 0x133   : > { %v622_v40 = vpop.f32.mrf.mxu0  ;;  %v782_v41 = vpop.f32.mrf.mxu1 }
 0x134   : > { %917 = vst [vmem:[%s1463_s30 + $0x80] sm:$0xff] %v622_v40  ;;  %981 = vst [vmem:[%s1463_s30 + $0x280] sm:$0xff] %v782_v41 }
 0x135   : > { %v624_v42 = vpop.f32.mrf.mxu0  ;;  %v784_v43 = vpop.f32.mrf.mxu1 }
 0x136   : > { %918 = vst.msk [vmem:[%s1463_s30 + $0x88] sm:$0xff] %vm451_vm0, %v624_v42  ;;  %982 = vst.msk [vmem:[%s1463_s30 + $0x288] sm:$0xff] %vm451_vm0, %v784_v43 }
 0x137   : > { %v626_v44 = vpop.f32.mrf.mxu0  ;;  %v786_v45 = vpop.f32.mrf.mxu1 }
 0x138   : > { %919 = vst [vmem:[%s1463_s30 + $0x90] sm:$0xff] %v626_v44  ;;  %983 = vst [vmem:[%s1463_s30 + $0x290] sm:$0xff] %v786_v45 }
 0x139   : > { %v628_v46 = vpop.f32.mrf.mxu0  ;;  %v788_v47 = vpop.f32.mrf.mxu1 }
 0x13a   : > { %920 = vst.msk [vmem:[%s1463_s30 + $0x98] sm:$0xff] %vm451_vm0, %v628_v46  ;;  %984 = vst.msk [vmem:[%s1463_s30 + $0x298] sm:$0xff] %vm451_vm0, %v788_v47 }
 0x13b   : > { %v632_v48 = vpop.f32.mrf.mxu0  ;;  %v792_v49 = vpop.f32.mrf.mxu1 }
 0x13c   : > { %921 = vst [vmem:[%s1463_s30 + $0xa0] sm:$0xff] %v632_v48  ;;  %985 = vst [vmem:[%s1463_s30 + $0x2a0] sm:$0xff] %v792_v49 }
 0x13d   : > { %v634_v50 = vpop.f32.mrf.mxu0  ;;  %v794_v51 = vpop.f32.mrf.mxu1 }
 0x13e   : > { %922 = vst.msk [vmem:[%s1463_s30 + $0xa8] sm:$0xff] %vm451_vm0, %v634_v50  ;;  %986 = vst.msk [vmem:[%s1463_s30 + $0x2a8] sm:$0xff] %vm451_vm0, %v794_v51 }
 0x13f   : > { %v636_v52 = vpop.f32.mrf.mxu0  ;;  %v796_v53 = vpop.f32.mrf.mxu1 }
 0x140   : > { %923 = vst [vmem:[%s1463_s30 + $0xb0] sm:$0xff] %v636_v52  ;;  %987 = vst [vmem:[%s1463_s30 + $0x2b0] sm:$0xff] %v796_v53 }
 0x141   : > { %v638_v54 = vpop.f32.mrf.mxu0  ;;  %v798_v55 = vpop.f32.mrf.mxu1 }
 0x142   : > { %924 = vst.msk [vmem:[%s1463_s30 + $0xb8] sm:$0xff] %vm451_vm0, %v638_v54  ;;  %988 = vst.msk [vmem:[%s1463_s30 + $0x2b8] sm:$0xff] %vm451_vm0, %v798_v55 }
 0x143   : > { %v642_v56 = vpop.f32.mrf.mxu0  ;;  %v802_v57 = vpop.f32.mrf.mxu1 }
 0x144   : > { %925 = vst [vmem:[%s1463_s30 + $0xc0] sm:$0xff] %v642_v56  ;;  %989 = vst [vmem:[%s1463_s30 + $0x2c0] sm:$0xff] %v802_v57 }
 0x145   : > { %v644_v58 = vpop.f32.mrf.mxu0  ;;  %v804_v59 = vpop.f32.mrf.mxu1 }
 0x146   : > { %926 = vst.msk [vmem:[%s1463_s30 + $0xc8] sm:$0xff] %vm451_vm0, %v644_v58  ;;  %990 = vst.msk [vmem:[%s1463_s30 + $0x2c8] sm:$0xff] %vm451_vm0, %v804_v59 }
 0x147   : > { %v646_v60 = vpop.f32.mrf.mxu0  ;;  %v806_v61 = vpop.f32.mrf.mxu1 }
 0x148   : > { %927 = vst [vmem:[%s1463_s30 + $0xd0] sm:$0xff] %v646_v60  ;;  %991 = vst [vmem:[%s1463_s30 + $0x2d0] sm:$0xff] %v806_v61 }
 0x149   : > { %v648_v62 = vpop.f32.mrf.mxu0  ;;  %v808_v63 = vpop.f32.mrf.mxu1 }
 0x14a   : > { %928 = vst.msk [vmem:[%s1463_s30 + $0xd8] sm:$0xff] %vm451_vm0, %v648_v62  ;;  %992 = vst.msk [vmem:[%s1463_s30 + $0x2d8] sm:$0xff] %vm451_vm0, %v808_v63 }
 0x14b   : > { %v652_v0 = vpop.f32.mrf.mxu0  ;;  %v812_v1 = vpop.f32.mrf.mxu1 }
 0x14c   : > { %929 = vst [vmem:[%s1463_s30 + $0xe0] sm:$0xff] %v652_v0  ;;  %993 = vst [vmem:[%s1463_s30 + $0x2e0] sm:$0xff] %v812_v1 }
 0x14d   : > { %v654_v2 = vpop.f32.mrf.mxu0  ;;  %v814_v3 = vpop.f32.mrf.mxu1 }
 0x14e   : > { %930 = vst.msk [vmem:[%s1463_s30 + $0xe8] sm:$0xff] %vm451_vm0, %v654_v2  ;;  %994 = vst.msk [vmem:[%s1463_s30 + $0x2e8] sm:$0xff] %vm451_vm0, %v814_v3 }
 0x14f   : > { %v656_v4 = vpop.f32.mrf.mxu0  ;;  %v816_v5 = vpop.f32.mrf.mxu1 }
 0x150   : > { %931 = vst [vmem:[%s1463_s30 + $0xf0] sm:$0xff] %v656_v4  ;;  %995 = vst [vmem:[%s1463_s30 + $0x2f0] sm:$0xff] %v816_v5 }
 0x151   : > { %v658_v6 = vpop.f32.mrf.mxu0  ;;  %v818_v7 = vpop.f32.mrf.mxu1 }
 0x152   : > { %932 = vst.msk [vmem:[%s1463_s30 + $0xf8] sm:$0xff] %vm451_vm0, %v658_v6  ;;  %996 = vst.msk [vmem:[%s1463_s30 + $0x2f8] sm:$0xff] %vm451_vm0, %v818_v7 }
 0x153   : > { %v662_v8 = vpop.f32.mrf.mxu0  ;;  %v822_v9 = vpop.f32.mrf.mxu1 }
 0x154   : > { %933 = vst [vmem:[%s1463_s30 + $0x100] sm:$0xff] %v662_v8  ;;  %997 = vst [vmem:[%s1463_s30 + $0x300] sm:$0xff] %v822_v9 }
 0x155   : > { %v664_v10 = vpop.f32.mrf.mxu0  ;;  %v824_v11 = vpop.f32.mrf.mxu1 }
 0x156   : > { %934 = vst.msk [vmem:[%s1463_s30 + $0x108] sm:$0xff] %vm451_vm0, %v664_v10  ;;  %998 = vst.msk [vmem:[%s1463_s30 + $0x308] sm:$0xff] %vm451_vm0, %v824_v11 }
 0x157   : > { %v666_v12 = vpop.f32.mrf.mxu0  ;;  %v826_v13 = vpop.f32.mrf.mxu1 }
 0x158   : > { %935 = vst [vmem:[%s1463_s30 + $0x110] sm:$0xff] %v666_v12  ;;  %999 = vst [vmem:[%s1463_s30 + $0x310] sm:$0xff] %v826_v13 }
 0x159   : > { %v668_v14 = vpop.f32.mrf.mxu0  ;;  %v828_v15 = vpop.f32.mrf.mxu1 }
 0x15a   : > { %936 = vst.msk [vmem:[%s1463_s30 + $0x118] sm:$0xff] %vm451_vm0, %v668_v14  ;;  %1000 = vst.msk [vmem:[%s1463_s30 + $0x318] sm:$0xff] %vm451_vm0, %v828_v15 }
 0x15b   : > { %v672_v16 = vpop.f32.mrf.mxu0  ;;  %v832_v17 = vpop.f32.mrf.mxu1 }
 0x15c   : > { %937 = vst [vmem:[%s1463_s30 + $0x120] sm:$0xff] %v672_v16  ;;  %1001 = vst [vmem:[%s1463_s30 + $0x320] sm:$0xff] %v832_v17 }
 0x15d   : > { %v674_v18 = vpop.f32.mrf.mxu0  ;;  %v834_v19 = vpop.f32.mrf.mxu1 }
 0x15e   : > { %938 = vst.msk [vmem:[%s1463_s30 + $0x128] sm:$0xff] %vm451_vm0, %v674_v18  ;;  %1002 = vst.msk [vmem:[%s1463_s30 + $0x328] sm:$0xff] %vm451_vm0, %v834_v19 }
 0x15f   : > { %v676_v20 = vpop.f32.mrf.mxu0  ;;  %v836_v21 = vpop.f32.mrf.mxu1 }
 0x160   : > { %939 = vst [vmem:[%s1463_s30 + $0x130] sm:$0xff] %v676_v20  ;;  %1003 = vst [vmem:[%s1463_s30 + $0x330] sm:$0xff] %v836_v21 }
 0x161   : > { %v678_v22 = vpop.f32.mrf.mxu0  ;;  %v838_v23 = vpop.f32.mrf.mxu1 }
 0x162   : > { %940 = vst.msk [vmem:[%s1463_s30 + $0x138] sm:$0xff] %vm451_vm0, %v678_v22  ;;  %1004 = vst.msk [vmem:[%s1463_s30 + $0x338] sm:$0xff] %vm451_vm0, %v838_v23 }
 0x163   : > { %v682_v24 = vpop.f32.mrf.mxu0  ;;  %v842_v25 = vpop.f32.mrf.mxu1 }
 0x164   : > { %941 = vst [vmem:[%s1463_s30 + $0x140] sm:$0xff] %v682_v24  ;;  %1005 = vst [vmem:[%s1463_s30 + $0x340] sm:$0xff] %v842_v25 }
 0x165   : > { %v684_v26 = vpop.f32.mrf.mxu0  ;;  %v844_v27 = vpop.f32.mrf.mxu1 }
 0x166   : > { %942 = vst.msk [vmem:[%s1463_s30 + $0x148] sm:$0xff] %vm451_vm0, %v684_v26  ;;  %1006 = vst.msk [vmem:[%s1463_s30 + $0x348] sm:$0xff] %vm451_vm0, %v844_v27 }
 0x167   : > { %v686_v28 = vpop.f32.mrf.mxu0  ;;  %v846_v29 = vpop.f32.mrf.mxu1 }
 0x168   : > { %943 = vst [vmem:[%s1463_s30 + $0x150] sm:$0xff] %v686_v28  ;;  %1007 = vst [vmem:[%s1463_s30 + $0x350] sm:$0xff] %v846_v29 }
 0x169   : > { %v688_v30 = vpop.f32.mrf.mxu0  ;;  %v848_v31 = vpop.f32.mrf.mxu1 }
 0x16a   : > { %944 = vst.msk [vmem:[%s1463_s30 + $0x158] sm:$0xff] %vm451_vm0, %v688_v30  ;;  %1008 = vst.msk [vmem:[%s1463_s30 + $0x358] sm:$0xff] %vm451_vm0, %v848_v31 }
 0x16b   : > { %v692_v32 = vpop.f32.mrf.mxu0  ;;  %v852_v33 = vpop.f32.mrf.mxu1 }
 0x16c   : > { %945 = vst [vmem:[%s1463_s30 + $0x160] sm:$0xff] %v692_v32  ;;  %1009 = vst [vmem:[%s1463_s30 + $0x360] sm:$0xff] %v852_v33 }
 0x16d   : > { %v694_v34 = vpop.f32.mrf.mxu0  ;;  %v854_v35 = vpop.f32.mrf.mxu1 }
 0x16e   : > { %946 = vst.msk [vmem:[%s1463_s30 + $0x168] sm:$0xff] %vm451_vm0, %v694_v34  ;;  %1010 = vst.msk [vmem:[%s1463_s30 + $0x368] sm:$0xff] %vm451_vm0, %v854_v35 }
 0x16f   : > { %v696_v36 = vpop.f32.mrf.mxu0  ;;  %v856_v37 = vpop.f32.mrf.mxu1 }
 0x170   : > { %947 = vst [vmem:[%s1463_s30 + $0x170] sm:$0xff] %v696_v36  ;;  %1011 = vst [vmem:[%s1463_s30 + $0x370] sm:$0xff] %v856_v37 }
 0x171   : > { %v698_v38 = vpop.f32.mrf.mxu0  ;;  %v858_v39 = vpop.f32.mrf.mxu1 }
 0x172   : > { %948 = vst.msk [vmem:[%s1463_s30 + $0x178] sm:$0xff] %vm451_vm0, %v698_v38  ;;  %1012 = vst.msk [vmem:[%s1463_s30 + $0x378] sm:$0xff] %vm451_vm0, %v858_v39 }
 0x173   : > { %v702_v40 = vpop.f32.mrf.mxu0  ;;  %v862_v41 = vpop.f32.mrf.mxu1 }
 0x174   : > { %949 = vst [vmem:[%s1463_s30 + $0x180] sm:$0xff] %v702_v40  ;;  %1013 = vst [vmem:[%s1463_s30 + $0x380] sm:$0xff] %v862_v41 }
 0x175   : > { %v704_v42 = vpop.f32.mrf.mxu0  ;;  %v864_v43 = vpop.f32.mrf.mxu1 }
 0x176   : > { %950 = vst.msk [vmem:[%s1463_s30 + $0x188] sm:$0xff] %vm451_vm0, %v704_v42  ;;  %1014 = vst.msk [vmem:[%s1463_s30 + $0x388] sm:$0xff] %vm451_vm0, %v864_v43 }
 0x177   : > { %v706_v44 = vpop.f32.mrf.mxu0  ;;  %v866_v45 = vpop.f32.mrf.mxu1 }
 0x178   : > { %951 = vst [vmem:[%s1463_s30 + $0x190] sm:$0xff] %v706_v44  ;;  %1015 = vst [vmem:[%s1463_s30 + $0x390] sm:$0xff] %v866_v45 }
 0x179   : > { %v708_v46 = vpop.f32.mrf.mxu0  ;;  %v868_v47 = vpop.f32.mrf.mxu1 }
 0x17a   : > { %952 = vst.msk [vmem:[%s1463_s30 + $0x198] sm:$0xff] %vm451_vm0, %v708_v46  ;;  %1016 = vst.msk [vmem:[%s1463_s30 + $0x398] sm:$0xff] %vm451_vm0, %v868_v47 }
 0x17b   : > { %v712_v48 = vpop.f32.mrf.mxu0  ;;  %v872_v49 = vpop.f32.mrf.mxu1 }
 0x17c   : > { %953 = vst [vmem:[%s1463_s30 + $0x1a0] sm:$0xff] %v712_v48  ;;  %1017 = vst [vmem:[%s1463_s30 + $0x3a0] sm:$0xff] %v872_v49 }
 0x17d   : > { %v714_v50 = vpop.f32.mrf.mxu0  ;;  %v874_v51 = vpop.f32.mrf.mxu1 }
 0x17e   : > { %954 = vst.msk [vmem:[%s1463_s30 + $0x1a8] sm:$0xff] %vm451_vm0, %v714_v50  ;;  %1018 = vst.msk [vmem:[%s1463_s30 + $0x3a8] sm:$0xff] %vm451_vm0, %v874_v51 }
 0x17f   : > { %v716_v52 = vpop.f32.mrf.mxu0  ;;  %v876_v53 = vpop.f32.mrf.mxu1 }
 0x180   : > { %955 = vst [vmem:[%s1463_s30 + $0x1b0] sm:$0xff] %v716_v52  ;;  %1019 = vst [vmem:[%s1463_s30 + $0x3b0] sm:$0xff] %v876_v53 }
 0x181   : > { %v718_v54 = vpop.f32.mrf.mxu0  ;;  %v878_v55 = vpop.f32.mrf.mxu1 }
 0x182   : > { %956 = vst.msk [vmem:[%s1463_s30 + $0x1b8] sm:$0xff] %vm451_vm0, %v718_v54  ;;  %1020 = vst.msk [vmem:[%s1463_s30 + $0x3b8] sm:$0xff] %vm451_vm0, %v878_v55 }
 0x183   : > { %v722_v56 = vpop.f32.mrf.mxu0  ;;  %v882_v57 = vpop.f32.mrf.mxu1 }
 0x184   : > { %957 = vst [vmem:[%s1463_s30 + $0x1c0] sm:$0xff] %v722_v56  ;;  %1021 = vst [vmem:[%s1463_s30 + $0x3c0] sm:$0xff] %v882_v57 }
 0x185   : > { %v724_v58 = vpop.f32.mrf.mxu0  ;;  %v884_v59 = vpop.f32.mrf.mxu1 }
 0x186   : > { %958 = vst.msk [vmem:[%s1463_s30 + $0x1c8] sm:$0xff] %vm451_vm0, %v724_v58  ;;  %1022 = vst.msk [vmem:[%s1463_s30 + $0x3c8] sm:$0xff] %vm451_vm0, %v884_v59 }
 0x187   : > { %v726_v60 = vpop.f32.mrf.mxu0  ;;  %v886_v61 = vpop.f32.mrf.mxu1 }
 0x188   : > { %959 = vst [vmem:[%s1463_s30 + $0x1d0] sm:$0xff] %v726_v60  ;;  %1023 = vst [vmem:[%s1463_s30 + $0x3d0] sm:$0xff] %v886_v61 }
 0x189   : > { %v728_v62 = vpop.f32.mrf.mxu0  ;;  %v888_v63 = vpop.f32.mrf.mxu1 }
 0x18a   : > { %960 = vst.msk [vmem:[%s1463_s30 + $0x1d8] sm:$0xff] %vm451_vm0, %v728_v62  ;;  %1024 = vst.msk [vmem:[%s1463_s30 + $0x3d8] sm:$0xff] %vm451_vm0, %v888_v63 }
 0x18b   : > { %v732_v0 = vpop.f32.mrf.mxu0  ;;  %v892_v1 = vpop.f32.mrf.mxu1 }
 0x18c   : > { %961 = vst [vmem:[%s1463_s30 + $0x1e0] sm:$0xff] %v732_v0  ;;  %1025 = vst [vmem:[%s1463_s30 + $0x3e0] sm:$0xff] %v892_v1 }
 0x18d   : > { %v734_v2 = vpop.f32.mrf.mxu0  ;;  %v894_v3 = vpop.f32.mrf.mxu1 }
 0x18e   : > { %962 = vst.msk [vmem:[%s1463_s30 + $0x1e8] sm:$0xff] %vm451_vm0, %v734_v2  ;;  %1026 = vst.msk [vmem:[%s1463_s30 + $0x3e8] sm:$0xff] %vm451_vm0, %v894_v3 }
 0x18f   : > { %v736_v4 = vpop.f32.mrf.mxu0  ;;  %v896_v5 = vpop.f32.mrf.mxu1 }
 0x190   : > { %963 = vst [vmem:[%s1463_s30 + $0x1f0] sm:$0xff] %v736_v4  ;;  %1027 = vst [vmem:[%s1463_s30 + $0x3f0] sm:$0xff] %v896_v5 }
 0x191   : > { %v738_v6 = vpop.f32.mrf.mxu0  ;;  %v898_v7 = vpop.f32.mrf.mxu1 }
 0x192   : > { %964 = vst.msk [vmem:[%s1463_s30 + $0x1f8] sm:$0xff] %vm451_vm0, %v738_v6  ;;  %1028 = vst.msk [vmem:[%s1463_s30 + $0x3f8] sm:$0xff] %vm451_vm0, %v898_v7 }
 0x193 PF: > { %s19_s17 = sadd.s32 1, %s1201_s17  }
 0x194   : > { %p16_p10 = scmp.ge.s32.totalorder %s19_s17, 8  }
 0x196   :  { %18 = sbr.rel (!%p16_p10) target bundleno = 16 (0x10), region = 61 }

// kernel: wavelets_forward.21
= control target key start
LH: loop header
LB: loop body
LE: loop exit
PB: predicated region body
PF: predicated region fallthrough
CT: control target
= control target key end

     0   :  { %s430_s6 = smov 0   ;;  %s583_s0 = inlined_call_operand.vmem [shape: f32[2,8,2,8,384], index: 0, kind: input, shape index: {}]   ;;  %s584_s1 = inlined_call_operand.vmem [shape: f32[2,8,8,192], index: 1, kind: output, shape index: {}]  }
   0x1 LB: > { %s366_s7 = sadd.s32 4294967295, %s417_s6   ;;  %p370_p0 = scmp.ge.s32.totalorder %s417_s6, 1  ;;  %s417_s6 = sphi %s430_s6, %s11_s6  }
   0x2   : > { %p87_p1 = scmp.lt.s32.totalorder %s417_s6, 3 }
   0x4   : > { %p88_p2 = pnand %p370_p0, %p87_p1 }
   0x5   : > { %p107_p3 = scmp.lt.s32.totalorder (!%p88_p2), %s366_s7, 1  ;;  %s419_s12 = smov (!%p88_p2), 64  }
   0x6   : > { %91 = sbr.rel (%p88_p2) target bundleno = 168 (0xa8), region = 24 }
   0xb   : > { %s586_s7 = smov (!%p107_p3, %s366_s7), 1  ;;  %vm238_vm0 = vcmask 523264  }
   0xc   : > { %s401_s8 = smul.u32 384, %s586_s7  ;;  %s400_s13 = sshll.u32 %s586_s7, 7 }
   0xd   : > { %s530_s16 = scalar_lea.vmem %s584_s1, %s400_s13 }
   0xe   : > { %s444_s11 = scalar_lea.vmem %s583_s0, %s401_s8 }
   0xf   : > { %v121_v0 = vld [vmem:[%s444_s11 + $0x38] sm:$0xff]  ;;  %v378_v1 = vld [vmem:[%s444_s11 + $0x50] sm:$0xff]  ;;  %v118_v2 = vld [vmem:[%s444_s11 + $0x8] sm:$0xff] }
  0x10   : > { %v449_v3 = vmax.f32 %v121_v0, %v378_v1  ;;  %v375_v4 = vld [vmem:[%s444_s11 + $0x20] sm:$0xff]  ;;  %v379_v6 = vld [vmem:[%s444_s11 + $0x58] sm:$0xff]  ;;  %v119_v8 = vld [vmem:[%s444_s11 + $0x10] sm:$0xff] }
  0x11   : > { %v122_v5 = vld [vmem:[%s444_s11 + $0x40] sm:$0xff]  ;;  %v454_v7 = vmax.f32 %v118_v2, %v375_v4  ;;  %v376_v9 = vld [vmem:[%s444_s11 + $0x28] sm:$0xff]  ;;  %v125_v12 = vld [vmem:[%s444_s11 + $0x70] sm:$0xff] }
  0x12   : > { %210 = vrot.lane.b32.xlu1 %v449_v3, %s419_s12  ;;  %v171_v10 = vmax.f32 %v122_v5, %v379_v6  ;;  %v168_v11 = vmax.f32 %v119_v8, %v376_v9  ;;  %v382_v13 = vld [vmem:[%s444_s11 + $0x88] sm:$0xff]  ;;  %v381_v15 = vld [vmem:[%s444_s11 + $0x80] sm:$0xff]  ;;  %v385_v19 = vld [vmem:[%s444_s11 + $0xb8] sm:$0xff] }
  0x13   : > { %206 = vrot.lane.b32.xlu0 %v454_v7, %s419_s12  ;;  %v124_v14 = vld [vmem:[%s444_s11 + $0x68] sm:$0xff]  ;;  %v174_v16 = vmax.f32 %v125_v12, %v382_v13  ;;  %v128_v18 = vld [vmem:[%s444_s11 + $0xa0] sm:$0xff]  ;;  %v127_v20 = vld [vmem:[%s444_s11 + $0x98] sm:$0xff] }
  0x14   : > { %v468_v17 = vmax.f32 %v124_v14, %v381_v15  ;;  %v384_v21 = vld [vmem:[%s444_s11 + $0xb0] sm:$0xff]  ;;  %v177_v22 = vmax.f32 %v128_v18, %v385_v19  ;;  %v388_v25 = vld [vmem:[%s444_s11 + $0xe8] sm:$0xff]  ;;  %v387_v27 = vld [vmem:[%s444_s11 + $0xe0] sm:$0xff] }
  0x15   : > { %v477_v23 = vmax.f32 %v127_v20, %v384_v21  ;;  %v131_v24 = vld [vmem:[%s444_s11 + $0xd0] sm:$0xff]  ;;  %v130_v26 = vld [vmem:[%s444_s11 + $0xc8] sm:$0xff]  ;;  %v134_v30 = vld [vmem:[%s444_s11 + $0x100] sm:$0xff] }
  0x16   : > { %212 = vrot.lane.b32.xlu1 %v171_v10, %s419_s12  ;;  %v180_v28 = vmax.f32 %v131_v24, %v388_v25  ;;  %v486_v29 = vmax.f32 %v130_v26, %v387_v27  ;;  %v391_v31 = vld [vmem:[%s444_s11 + $0x118] sm:$0xff]  ;;  %v390_v33 = vld [vmem:[%s444_s11 + $0x110] sm:$0xff]  ;;  %v394_v37 = vld [vmem:[%s444_s11 + $0x148] sm:$0xff] }
  0x17   : > { %208 = vrot.lane.b32.xlu0 %v168_v11, %s419_s12  ;;  %v133_v32 = vld [vmem:[%s444_s11 + $0xf8] sm:$0xff]  ;;  %v183_v34 = vmax.f32 %v134_v30, %v391_v31  ;;  %v137_v36 = vld [vmem:[%s444_s11 + $0x130] sm:$0xff]  ;;  %v136_v38 = vld [vmem:[%s444_s11 + $0x128] sm:$0xff] }
  0x18   : > { %v495_v35 = vmax.f32 %v133_v32, %v390_v33  ;;  %v393_v39 = vld [vmem:[%s444_s11 + $0x140] sm:$0xff]  ;;  %v186_v40 = vmax.f32 %v137_v36, %v394_v37  ;;  %v397_v43 = vld [vmem:[%s444_s11 + $0x178] sm:$0xff]  ;;  %v396_v45 = vld [vmem:[%s444_s11 + $0x170] sm:$0xff] }
  0x19   : > { %v504_v41 = vmax.f32 %v136_v38, %v393_v39  ;;  %v140_v42 = vld [vmem:[%s444_s11 + $0x160] sm:$0xff]  ;;  %v139_v44 = vld [vmem:[%s444_s11 + $0x158] sm:$0xff]  ;;  %v377_v48 = vld [vmem:[%s444_s11 + $0x48] sm:$0xff] }
  0x1a   : > { %216 = vrot.lane.b32.xlu1 %v174_v16, %s419_s12  ;;  %v189_v46 = vmax.f32 %v140_v42, %v397_v43  ;;  %v513_v47 = vmax.f32 %v139_v44, %v396_v45  ;;  %v120_v49 = vld [vmem:[%s444_s11 + $0x30] sm:$0xff]  ;;  %v374_v51 = vld [vmem:[%s444_s11 + $0x18] sm:$0xff]  ;;  %v117_v52 = vld [vmem:[%s444_s11] sm:$0xff] }
  0x1b   : > { %214 = vrot.lane.b32.xlu0 %v468_v17, %s419_s12  ;;  %v169_v54 = vmax.f32 %v120_v49, %v377_v48  ;;  %v166_v55 = vmax.f32 %v117_v52, %v374_v51  ;;  %v123_v57 = vld [vmem:[%s444_s11 + $0x60] sm:$0xff]  ;;  %v380_v58 = vld [vmem:[%s444_s11 + $0x78] sm:$0xff]  ;;  %v126_v8 = vld [vmem:[%s444_s11 + $0x90] sm:$0xff] }
  0x1c   : > { %v172_v4 = vmax.f32 %v123_v57, %v380_v58  ;;  %v383_v9 = vld [vmem:[%s444_s11 + $0xa8] sm:$0xff]  ;;  %v129_v18 = vld [vmem:[%s444_s11 + $0xc0] sm:$0xff]  ;;  %v386_v19 = vld [vmem:[%s444_s11 + $0xd8] sm:$0xff] }
  0x1d   : > { %v175_v15 = vmax.f32 %v126_v8, %v383_v9  ;;  %v178_v26 = vmax.f32 %v129_v18, %v386_v19  ;;  %v389_v30 = vld [vmem:[%s444_s11 + $0x108] sm:$0xff]  ;;  %v135_v39 = vld [vmem:[%s444_s11 + $0x120] sm:$0xff] }
  0x1e   : > { %220 = vrot.lane.b32.xlu1 %v177_v22, %s419_s12  ;;  %v395_v51 = vld [vmem:[%s444_s11 + $0x168] sm:$0xff] }
  0x1f   : > { %218 = vrot.lane.b32.xlu0 %v477_v23, %s419_s12 }
  0x22   : > { %224 = vrot.lane.b32.xlu1 %v180_v28, %s419_s12  ;;  %v132_v28 = vld [vmem:[%s444_s11 + $0xf0] sm:$0xff] }
  0x23   : > { %222 = vrot.lane.b32.xlu0 %v486_v29, %s419_s12  ;;  %v181_v37 = vmax.f32 %v132_v28, %v389_v30 }
  0x26   : > { %228 = vrot.lane.b32.xlu1 %v183_v34, %s419_s12 }
  0x27   : > { %226 = vrot.lane.b32.xlu0 %v495_v35, %s419_s12 }
  0x2a   : > { %232 = vrot.lane.b32.xlu1 %v186_v40, %s419_s12  ;;  %v392_v40 = vld [vmem:[%s444_s11 + $0x138] sm:$0xff] }
  0x2b   : > { %230 = vrot.lane.b32.xlu0 %v504_v41, %s419_s12  ;;  %v184_v48 = vmax.f32 %v135_v39, %v392_v40 }
  0x2e   : > { %236 = vrot.lane.b32.xlu1 %v189_v46, %s419_s12 }
  0x2f   : > { %234 = vrot.lane.b32.xlu0 %v513_v47, %s419_s12 }
  0x84   : > { %v211_v50 = vpop.permute.xlu1 %210 }
  0x85   : > { %v207_v53 = vpop.permute.xlu0 %206 }
  0x88   : > { %v213_v56 = vpop.permute.xlu1 %212 }
  0x89   : > { %v240_v59 = vsel %vm238_vm0, %v211_v50, %v213_v56  ;;  %v266_v60 = vmax.f32 %v449_v3, %v213_v56  ;;  %v209_v61 = vpop.permute.xlu0 %208  ;;  %v138_v50 = vld [vmem:[%s444_s11 + $0x150] sm:$0xff] }
  0x8a   : > { %v265_v62 = vmax.f32 %v169_v54, %v240_v59  ;;  %v239_v63 = vsel %vm238_vm0, %v207_v53, %v209_v61  ;;  %v264_v0 = vmax.f32 %v454_v7, %v209_v61  ;;  %v187_v57 = vmax.f32 %v138_v50, %v395_v51 }
  0x8b   : > { %v282_v1 = vmax.f32 %v266_v60, 0.0  ;;  %v263_v2 = vmax.f32 %v166_v55, %v239_v63 }
  0x8c   : > { %v281_v5 = vmax.f32 %v265_v62, 0.0  ;;  %v280_v3 = vmax.f32 %v264_v0, 0.0  ;;  %v217_v6 = vpop.permute.xlu1 %216 }
  0x8d   : > { %298 = vst.msk [vmem:[%s530_s16 + $0x18] sm:$0xff] %vm238_vm0, %v282_v1  ;;  %v279_v10 = vmax.f32 %v263_v2, 0.0  ;;  %v268_v11 = vmax.f32 %v468_v17, %v217_v6  ;;  %v215_v12 = vpop.permute.xlu0 %214 }
  0x8e   : > { %297 = vst [vmem:[%s530_s16 + $0x10] sm:$0xff] %v281_v5  ;;  %296 = vst.msk [vmem:[%s530_s16 + $0x8] sm:$0xff] %vm238_vm0, %v280_v3  ;;  %v241_v7 = vsel %vm238_vm0, %v215_v12, %v217_v6 }
  0x8f   : > { %295 = vst [vmem:[%s530_s16] sm:$0xff] %v279_v10  ;;  %v284_v13 = vmax.f32 %v268_v11, 0.0  ;;  %v267_v14 = vmax.f32 %v172_v4, %v241_v7 }
  0x90   : > { %v221_v16 = vpop.permute.xlu1 %220 }
  0x91   : > { %300 = vst.msk [vmem:[%s530_s16 + $0x28] sm:$0xff] %vm238_vm0, %v284_v13  ;;  %v283_v17 = vmax.f32 %v267_v14, 0.0  ;;  %v270_v20 = vmax.f32 %v477_v23, %v221_v16  ;;  %v219_v21 = vpop.permute.xlu0 %218 }
  0x92   : > { %v242_v22 = vsel %vm238_vm0, %v219_v21, %v221_v16 }
  0x93   : > { %299 = vst [vmem:[%s530_s16 + $0x20] sm:$0xff] %v283_v17  ;;  %v286_v24 = vmax.f32 %v270_v20, 0.0  ;;  %v269_v25 = vmax.f32 %v175_v15, %v242_v22 }
  0x94   : > { %v225_v27 = vpop.permute.xlu1 %224 }
  0x95   : > { %302 = vst.msk [vmem:[%s530_s16 + $0x38] sm:$0xff] %vm238_vm0, %v286_v24  ;;  %v285_v31 = vmax.f32 %v269_v25, 0.0  ;;  %v272_v32 = vmax.f32 %v486_v29, %v225_v27  ;;  %v223_v23 = vpop.permute.xlu0 %222 }
  0x96   : > { %v243_v33 = vsel %vm238_vm0, %v223_v23, %v225_v27 }
  0x97   : > { %301 = vst [vmem:[%s530_s16 + $0x30] sm:$0xff] %v285_v31  ;;  %v288_v34 = vmax.f32 %v272_v32, 0.0  ;;  %v271_v36 = vmax.f32 %v178_v26, %v243_v33 }
  0x98   : > { %v229_v38 = vpop.permute.xlu1 %228 }
  0x99   : > { %304 = vst.msk [vmem:[%s530_s16 + $0x48] sm:$0xff] %vm238_vm0, %v288_v34  ;;  %v287_v42 = vmax.f32 %v271_v36, 0.0  ;;  %v274_v43 = vmax.f32 %v495_v35, %v229_v38  ;;  %v227_v29 = vpop.permute.xlu0 %226 }
  0x9a   : > { %v244_v44 = vsel %vm238_vm0, %v227_v29, %v229_v38 }
  0x9b   : > { %303 = vst [vmem:[%s530_s16 + $0x40] sm:$0xff] %v287_v42  ;;  %v290_v45 = vmax.f32 %v274_v43, 0.0  ;;  %v273_v46 = vmax.f32 %v181_v37, %v244_v44 }
  0x9c   : > { %v233_v49 = vpop.permute.xlu1 %232 }
  0x9d   : > { %306 = vst.msk [vmem:[%s530_s16 + $0x58] sm:$0xff] %vm238_vm0, %v290_v45  ;;  %v289_v52 = vmax.f32 %v273_v46, 0.0  ;;  %v276_v53 = vmax.f32 %v504_v41, %v233_v49  ;;  %v231_v54 = vpop.permute.xlu0 %230 }
  0x9e   : > { %v245_v35 = vsel %vm238_vm0, %v231_v54, %v233_v49 }
  0x9f   : > { %305 = vst [vmem:[%s530_s16 + $0x50] sm:$0xff] %v289_v52  ;;  %v292_v55 = vmax.f32 %v276_v53, 0.0  ;;  %v275_v56 = vmax.f32 %v184_v48, %v245_v35 }
  0xa0   : > { %v237_v58 = vpop.permute.xlu1 %236 }
  0xa1   : > { %308 = vst.msk [vmem:[%s530_s16 + $0x68] sm:$0xff] %vm238_vm0, %v292_v55  ;;  %v291_v59 = vmax.f32 %v275_v56, 0.0  ;;  %v278_v60 = vmax.f32 %v513_v47, %v237_v58  ;;  %v235_v61 = vpop.permute.xlu0 %234 }
  0xa2   : > { %v246_v62 = vsel %vm238_vm0, %v235_v61, %v237_v58 }
  0xa3   : > { %307 = vst [vmem:[%s530_s16 + $0x60] sm:$0xff] %v291_v59  ;;  %v294_v41 = vmax.f32 %v278_v60, 0.0  ;;  %v277_v63 = vmax.f32 %v187_v57, %v246_v62 }
  0xa5   : > { %310 = vst.msk [vmem:[%s530_s16 + $0x78] sm:$0xff] %vm238_vm0, %v294_v41  ;;  %v293_v0 = vmax.f32 %v277_v63, 0.0 }
  0xa7   : > { %309 = vst [vmem:[%s530_s16 + $0x70] sm:$0xff] %v293_v0 }
  0xa8 PF: > { %s11_s6 = sadd.s32 1, %s417_s6  }
  0xa9   : > { %p8_p4 = scmp.ge.s32.totalorder %s11_s6, 4  }
  0xab   :  { %10 = sbr.rel (!%p8_p4) target bundleno = 1 (0x1), region = 55 }

// kernel: wavelets_forward.22
= control target key start
LH: loop header
LB: loop body
LE: loop exit
PB: predicated region body
PF: predicated region fallthrough
CT: control target
= control target key end

     0   :  { %s1378_s0 = inlined_call_operand.vmem [shape: s32[4], index: 0, kind: input, shape index: {}]   ;;  %s1379_s1 = inlined_call_operand.vmem [shape: f32[1536,192], index: 1, kind: input, shape index: {}]   ;;  %s1380_s2 = inlined_call_operand.vmem [shape: f32[4,192,192], index: 2, kind: input, shape index: {}]   ;;  %s1381_s3 = inlined_call_operand.vmem [shape: f32[1536,192], index: 3, kind: output, shape index: {}]  }
   0x1   :  { %s8_s14 = sshll.u32 %s1378_s0, 4  ;;  %s9_s14 = int_to_ptr.vmem [resolvable:$true] %s8_s14 }
   0x2   :  { %s987_s15 = scalar_lea.vmem %s9_s14, 16  ;;  %p992_p1 = scmp.lt.s32.totalorder %s9_s14, %s9_s14 }
   0x3   :  { %p988_p0 = scmp.ne.s32.totalorder %s9_s14, %s987_s15  ;;  %p993_p2 = scmp.lt.s32.totalorder %s987_s15, %s987_s15 }
   0x5   :  { %p994_p3 = por %p993_p2, %p992_p1 }
   0x7   :  { %p995_p4 = pnand %p994_p3, %p988_p0 }
   0x9   :  { %998 = shalt.err (!%p995_p4)  }
   0xa   :  { %s1009_s16 = smov [#allocation3]  }
   0xb   :  { %11 = dma.vmem_to_smem %s9_s14, 16, %s1009_s16, [#allocation2] }
   0xc   :  { %1003 = dma.done.wait [#allocation2], 16 }
   0xd   :  { %1004 = vsyncadd [#allocation2], 4294967280 }
   0xe   :  { %13 = sfence }
   0xf   :  { %s1033_s17 = smov 0  }
  0x10 LB: > { %s915_s0 = sadd.s32 4294967295, %s1007_s17   ;;  %p919_p5 = scmp.ge.s32.totalorder %s1007_s17, 1  ;;  %s1007_s17 = sphi %s1033_s17, %s19_s17  }
  0x11   : > { %p135_p6 = scmp.lt.s32.totalorder %s1007_s17, 5 }
  0x13   : > { %p136_p7 = pnand %p919_p5, %p135_p6 }
  0x14   : > { %s172_s18 = sld [smem:[#allocation3 + %s915_s0]] (!%p136_p7)  ;;  %s165_s19 = smul.u32 (!%p136_p7), 48, %s915_s0 }
  0x15   : > { %139 = sbr.rel (%p136_p7) target bundleno = 371 (0x173), region = 28 }
  0x16   : > { %p166_p8 = scmp.lt.s32.totalorder (!%p136_p7), %s165_s19, 191 }
  0x1a   : > { %s1383_s19 = smov (!%p166_p8, %s165_s19), 191  ;;  %p173_p9 = scmp.lt.s32.totalorder %s172_s18, 3  ;;  %vm403_vm0 = vcmask 523264  }
  0x1b   : > { %s951_s20 = sshll.u32 %s1383_s19, 4 }
  0x1c   : > { %s1049_s23 = scalar_lea.vmem %s1379_s1, %s951_s20  ;;  %s1385_s18 = smov (!%p173_p9, %s172_s18), 3 }
  0x1d   : > { %v188_v0 = vld [vmem:[%s1049_s23 + $0x8] sm:$0xff]  ;;  %v190_v1 = vld [vmem:[%s1049_s23 + $0x18] sm:$0xff]  ;;  %s977_s24 = smul.u32 384, %s1385_s18  ;;  %s1229_s30 = scalar_lea.vmem %s1381_s3, %s951_s20 }
  0x1e   : > { %v236_v2 = vld [vmem:[%s1049_s23 + $0x188] sm:$0xff]  ;;  %v284_v3 = vpack.c.bf16 %v190_v1, %v188_v0  ;;  %v238_v4 = vld [vmem:[%s1049_s23 + $0x198] sm:$0xff] }
  0x1f   : > { %v308_v5 = vpack.c.bf16 %v238_v4, %v236_v2  ;;  %s1059_s27 = scalar_lea.vmem %s1380_s2, %s977_s24 }
  0x20   : > { %925 = vmatprep.mubr.msk.bf16.mxu0 %vm403_vm0, %v284_v3  ;;  %v360_v6 = vld [vmem:[%s1059_s27 + $0xe8] sm:$0xff]  ;;  %v362_v7 = vld [vmem:[%s1059_s27 + $0xf8] sm:$0xff]  ;;  %v359_v8 = vld [vmem:[%s1059_s27 + $0xe0] sm:$0xff] }
  0x21   : > { %937 = vmatprep.mubr.msk.bf16.mxu1 %vm403_vm0, %v308_v5  ;;  %v394_v9 = vpack.c.bf16 %v362_v7, %v360_v6  ;;  %v361_v10 = vld [vmem:[%s1059_s27 + $0xf0] sm:$0xff]  ;;  %v356_v11 = vld [vmem:[%s1059_s27 + $0xc8] sm:$0xff]  ;;  %v358_v12 = vld [vmem:[%s1059_s27 + $0xd8] sm:$0xff] }
  0x22   : > { %v393_v13 = vpack.c.bf16 %v361_v10, %v359_v8  ;;  %v392_v14 = vpack.c.bf16 %v358_v12, %v356_v11  ;;  %v355_v15 = vld [vmem:[%s1059_s27 + $0xc0] sm:$0xff]  ;;  %v357_v16 = vld [vmem:[%s1059_s27 + $0xd0] sm:$0xff]  ;;  %v352_v17 = vld [vmem:[%s1059_s27 + $0xa8] sm:$0xff] }
  0x23   : > { %476 = vmatprep.subr.bf16.mxu0 %v394_v9  ;;  %953 = vmatprep.subr.bf16.mxu1 %v394_v9  ;;  %v354_v18 = vld [vmem:[%s1059_s27 + $0xb8] sm:$0xff]  ;;  %v391_v19 = vpack.c.bf16 %v357_v16, %v355_v15  ;;  %v351_v21 = vld [vmem:[%s1059_s27 + $0xa0] sm:$0xff]  ;;  %v353_v22 = vld [vmem:[%s1059_s27 + $0xb0] sm:$0xff] }
  0x24   : > { %477 = vmatpush1.bf16.msra.mxu0 %v393_v13  ;;  %965 = vmatpush1.bf16.msra.mxu1 %v393_v13  ;;  %v390_v20 = vpack.c.bf16 %v354_v18, %v352_v17  ;;  %v348_v23 = vld [vmem:[%s1059_s27 + $0x88] sm:$0xff]  ;;  %v350_v24 = vld [vmem:[%s1059_s27 + $0x98] sm:$0xff]  ;;  %v389_v25 = vpack.c.bf16 %v353_v22, %v351_v21  ;;  %v347_v27 = vld [vmem:[%s1059_s27 + $0x80] sm:$0xff] }
  0x25   : > { %478 = vmatprep.subr.bf16.mxu0 %v392_v14  ;;  %954 = vmatprep.subr.bf16.mxu1 %v392_v14  ;;  %v388_v26 = vpack.c.bf16 %v350_v24, %v348_v23  ;;  %v349_v28 = vld [vmem:[%s1059_s27 + $0x90] sm:$0xff]  ;;  %v344_v29 = vld [vmem:[%s1059_s27 + $0x68] sm:$0xff]  ;;  %v346_v30 = vld [vmem:[%s1059_s27 + $0x78] sm:$0xff] }
  0x26   : > { %v387_v31 = vpack.c.bf16 %v349_v28, %v347_v27  ;;  %v386_v32 = vpack.c.bf16 %v346_v30, %v344_v29  ;;  %v343_v33 = vld [vmem:[%s1059_s27 + $0x60] sm:$0xff]  ;;  %v345_v34 = vld [vmem:[%s1059_s27 + $0x70] sm:$0xff]  ;;  %v340_v35 = vld [vmem:[%s1059_s27 + $0x48] sm:$0xff] }
  0x27   : > { %v342_v36 = vld [vmem:[%s1059_s27 + $0x58] sm:$0xff]  ;;  %v385_v37 = vpack.c.bf16 %v345_v34, %v343_v33  ;;  %v339_v39 = vld [vmem:[%s1059_s27 + $0x40] sm:$0xff]  ;;  %v341_v40 = vld [vmem:[%s1059_s27 + $0x50] sm:$0xff] }
  0x28   : > { %479 = vmatpush1.bf16.msra.mxu0 %v391_v19  ;;  %966 = vmatpush1.bf16.msra.mxu1 %v391_v19  ;;  %v384_v38 = vpack.c.bf16 %v342_v36, %v340_v35  ;;  %v336_v41 = vld [vmem:[%s1059_s27 + $0x28] sm:$0xff]  ;;  %v338_v42 = vld [vmem:[%s1059_s27 + $0x38] sm:$0xff]  ;;  %v383_v43 = vpack.c.bf16 %v341_v40, %v339_v39  ;;  %v335_v45 = vld [vmem:[%s1059_s27 + $0x20] sm:$0xff] }
  0x29   : > { %480 = vmatprep.subr.bf16.mxu0 %v390_v20  ;;  %955 = vmatprep.subr.bf16.mxu1 %v390_v20  ;;  %v382_v44 = vpack.c.bf16 %v338_v42, %v336_v41  ;;  %v337_v46 = vld [vmem:[%s1059_s27 + $0x30] sm:$0xff]  ;;  %v332_v47 = vld [vmem:[%s1059_s27 + $0x8] sm:$0xff]  ;;  %v334_v48 = vld [vmem:[%s1059_s27 + $0x18] sm:$0xff] }
  0x2a   : > { %v381_v49 = vpack.c.bf16 %v337_v46, %v335_v45  ;;  %v380_v50 = vpack.c.bf16 %v334_v48, %v332_v47  ;;  %v331_v51 = vld [vmem:[%s1059_s27] sm:$0xff]  ;;  %v333_v52 = vld [vmem:[%s1059_s27 + $0x10] sm:$0xff]  ;;  %v376_v53 = vld [vmem:[%s1059_s27 + $0x168] sm:$0xff] }
  0x2b   : > { %v378_v54 = vld [vmem:[%s1059_s27 + $0x178] sm:$0xff]  ;;  %v379_v55 = vpack.c.bf16 %v333_v52, %v331_v51  ;;  %v375_v57 = vld [vmem:[%s1059_s27 + $0x160] sm:$0xff]  ;;  %v377_v58 = vld [vmem:[%s1059_s27 + $0x170] sm:$0xff] }
  0x2c   : > { %481 = vmatpush1.bf16.msra.mxu0 %v389_v25  ;;  %967 = vmatpush1.bf16.msra.mxu1 %v389_v25  ;;  %v402_v56 = vpack.c.bf16 %v378_v54, %v376_v53  ;;  %v372_v59 = vld [vmem:[%s1059_s27 + $0x148] sm:$0xff]  ;;  %v374_v60 = vld [vmem:[%s1059_s27 + $0x158] sm:$0xff]  ;;  %v401_v61 = vpack.c.bf16 %v377_v58, %v375_v57  ;;  %v371_v63 = vld [vmem:[%s1059_s27 + $0x140] sm:$0xff] }
  0x2d   : > { %482 = vmatprep.subr.bf16.mxu0 %v388_v26  ;;  %956 = vmatprep.subr.bf16.mxu1 %v388_v26  ;;  %v400_v62 = vpack.c.bf16 %v374_v60, %v372_v59  ;;  %v373_v0 = vld [vmem:[%s1059_s27 + $0x150] sm:$0xff]  ;;  %v368_v1 = vld [vmem:[%s1059_s27 + $0x128] sm:$0xff]  ;;  %v370_v2 = vld [vmem:[%s1059_s27 + $0x138] sm:$0xff] }
  0x2e   : > { %v399_v3 = vpack.c.bf16 %v373_v0, %v371_v63  ;;  %v398_v4 = vpack.c.bf16 %v370_v2, %v368_v1  ;;  %v367_v5 = vld [vmem:[%s1059_s27 + $0x120] sm:$0xff]  ;;  %v369_v6 = vld [vmem:[%s1059_s27 + $0x130] sm:$0xff]  ;;  %v364_v7 = vld [vmem:[%s1059_s27 + $0x108] sm:$0xff] }
  0x2f   : > { %v366_v8 = vld [vmem:[%s1059_s27 + $0x118] sm:$0xff]  ;;  %v397_v9 = vpack.c.bf16 %v369_v6, %v367_v5  ;;  %v363_v11 = vld [vmem:[%s1059_s27 + $0x100] sm:$0xff]  ;;  %v365_v12 = vld [vmem:[%s1059_s27 + $0x110] sm:$0xff] }
  0x30   : > { %483 = vmatpush1.bf16.msra.mxu0 %v387_v31  ;;  %968 = vmatpush1.bf16.msra.mxu1 %v387_v31  ;;  %v396_v10 = vpack.c.bf16 %v366_v8, %v364_v7  ;;  %v187_v13 = vld [vmem:[%s1049_s23] sm:$0xff]  ;;  %v189_v14 = vld [vmem:[%s1049_s23 + $0x10] sm:$0xff]  ;;  %v395_v15 = vpack.c.bf16 %v365_v12, %v363_v11  ;;  %v192_v18 = vld [vmem:[%s1049_s23 + $0x28] sm:$0xff] }
  0x31   : > { %484 = vmatprep.subr.bf16.mxu0 %v386_v32  ;;  %957 = vmatprep.subr.bf16.mxu1 %v386_v32  ;;  %v235_v16 = vld [vmem:[%s1049_s23 + $0x180] sm:$0xff]  ;;  %v237_v17 = vld [vmem:[%s1049_s23 + $0x190] sm:$0xff]  ;;  %v194_v19 = vld [vmem:[%s1049_s23 + $0x38] sm:$0xff]  ;;  %v283_v22 = vpack.c.bf16 %v189_v14, %v187_v13 }
  0x32   : > { %v240_v20 = vld [vmem:[%s1049_s23 + $0x1a8] sm:$0xff]  ;;  %v242_v21 = vld [vmem:[%s1049_s23 + $0x1b8] sm:$0xff]  ;;  %v307_v23 = vpack.c.bf16 %v237_v17, %v235_v16  ;;  %v286_v24 = vpack.c.bf16 %v194_v19, %v192_v18  ;;  %v191_v26 = vld [vmem:[%s1049_s23 + $0x20] sm:$0xff] }
  0x33   : > { %v310_v25 = vpack.c.bf16 %v242_v21, %v240_v20  ;;  %v193_v27 = vld [vmem:[%s1049_s23 + $0x30] sm:$0xff]  ;;  %v239_v28 = vld [vmem:[%s1049_s23 + $0x1a0] sm:$0xff]  ;;  %v196_v30 = vld [vmem:[%s1049_s23 + $0x48] sm:$0xff] }
  0x34   : > { %485 = vmatpush1.bf16.msra.mxu0 %v385_v37  ;;  %969 = vmatpush1.bf16.msra.mxu1 %v385_v37  ;;  %v241_v29 = vld [vmem:[%s1049_s23 + $0x1b0] sm:$0xff]  ;;  %v198_v31 = vld [vmem:[%s1049_s23 + $0x58] sm:$0xff]  ;;  %v244_v32 = vld [vmem:[%s1049_s23 + $0x1c8] sm:$0xff]  ;;  %v285_v34 = vpack.c.bf16 %v193_v27, %v191_v26 }
  0x35   : > { %486 = vmatprep.subr.bf16.mxu0 %v384_v38  ;;  %958 = vmatprep.subr.bf16.mxu1 %v384_v38  ;;  %v246_v33 = vld [vmem:[%s1049_s23 + $0x1d8] sm:$0xff]  ;;  %v309_v35 = vpack.c.bf16 %v241_v29, %v239_v28  ;;  %v288_v36 = vpack.c.bf16 %v198_v31, %v196_v30  ;;  %v195_v38 = vld [vmem:[%s1049_s23 + $0x40] sm:$0xff]  ;;  %v197_v39 = vld [vmem:[%s1049_s23 + $0x50] sm:$0xff] }
  0x36   : > { %v312_v37 = vpack.c.bf16 %v246_v33, %v244_v32  ;;  %v243_v40 = vld [vmem:[%s1049_s23 + $0x1c0] sm:$0xff]  ;;  %v245_v41 = vld [vmem:[%s1049_s23 + $0x1d0] sm:$0xff]  ;;  %v200_v42 = vld [vmem:[%s1049_s23 + $0x68] sm:$0xff]  ;;  %v287_v46 = vpack.c.bf16 %v197_v39, %v195_v38 }
  0x37   : > { %v250_v45 = vld [vmem:[%s1049_s23 + $0x1f8] sm:$0xff]  ;;  %v311_v47 = vpack.c.bf16 %v245_v41, %v243_v40  ;;  %v201_v51 = vld [vmem:[%s1049_s23 + $0x70] sm:$0xff]  ;;  %v247_v52 = vld [vmem:[%s1049_s23 + $0x1e0] sm:$0xff] }
  0x38   : > { %487 = vmatpush1.bf16.msra.mxu0 %v383_v43  ;;  %970 = vmatpush1.bf16.msra.mxu1 %v383_v43  ;;  %v202_v43 = vld [vmem:[%s1049_s23 + $0x78] sm:$0xff]  ;;  %v249_v53 = vld [vmem:[%s1049_s23 + $0x1f0] sm:$0xff]  ;;  %v204_v54 = vld [vmem:[%s1049_s23 + $0x88] sm:$0xff] }
  0x39   : > { %488 = vmatprep.subr.bf16.mxu0 %v382_v44  ;;  %959 = vmatprep.subr.bf16.mxu1 %v382_v44  ;;  %v248_v44 = vld [vmem:[%s1049_s23 + $0x1e8] sm:$0xff]  ;;  %v290_v48 = vpack.c.bf16 %v202_v43, %v200_v42  ;;  %v254_v57 = vld [vmem:[%s1049_s23 + $0x218] sm:$0xff]  ;;  %v313_v59 = vpack.c.bf16 %v249_v53, %v247_v52  ;;  %v205_v63 = vld [vmem:[%s1049_s23 + $0x90] sm:$0xff] }
  0x3a   : > { %v251_v0 = vld [vmem:[%s1049_s23 + $0x200] sm:$0xff]  ;;  %v253_v1 = vld [vmem:[%s1049_s23 + $0x210] sm:$0xff]  ;;  %v208_v2 = vld [vmem:[%s1049_s23 + $0xa8] sm:$0xff] }
  0x3b   : > { %v258_v5 = vld [vmem:[%s1049_s23 + $0x238] sm:$0xff]  ;;  %v315_v7 = vpack.c.bf16 %v253_v1, %v251_v0  ;;  %v209_v11 = vld [vmem:[%s1049_s23 + $0xb0] sm:$0xff]  ;;  %v255_v12 = vld [vmem:[%s1049_s23 + $0x220] sm:$0xff] }
  0x3c   : > { %489 = vmatpush1.bf16.msra.mxu0 %v381_v49  ;;  %971 = vmatpush1.bf16.msra.mxu1 %v381_v49  ;;  %v314_v49 = vpack.c.bf16 %v250_v45, %v248_v44  ;;  %v257_v13 = vld [vmem:[%s1049_s23 + $0x230] sm:$0xff]  ;;  %v212_v14 = vld [vmem:[%s1049_s23 + $0xc8] sm:$0xff]  ;;  %v262_v17 = vld [vmem:[%s1049_s23 + $0x258] sm:$0xff] }
  0x3d   : > { %490 = vmatprep.subr.bf16.mxu0 %v380_v50  ;;  %960 = vmatprep.subr.bf16.mxu1 %v380_v50  ;;  %v199_v50 = vld [vmem:[%s1049_s23 + $0x60] sm:$0xff]  ;;  %v260_v16 = vld [vmem:[%s1049_s23 + $0x248] sm:$0xff]  ;;  %v317_v19 = vpack.c.bf16 %v257_v13, %v255_v12  ;;  %v218_v27 = vld [vmem:[%s1049_s23 + $0xf8] sm:$0xff] }
  0x3e   : > { %v289_v58 = vpack.c.bf16 %v201_v51, %v199_v50  ;;  %v320_v21 = vpack.c.bf16 %v262_v17, %v260_v16  ;;  %v216_v26 = vld [vmem:[%s1049_s23 + $0xe8] sm:$0xff]  ;;  %v266_v29 = vld [vmem:[%s1049_s23 + $0x278] sm:$0xff] }
  0x3f   : > { %v264_v28 = vld [vmem:[%s1049_s23 + $0x268] sm:$0xff]  ;;  %v298_v32 = vpack.c.bf16 %v218_v27, %v216_v26  ;;  %v222_v39 = vld [vmem:[%s1049_s23 + $0x118] sm:$0xff] }
  0x40   : > { %491 = vmatpush1.bf16.msra.mxu0 %v379_v55  ;;  %972 = vmatpush1.bf16.msra.mxu1 %v379_v55  ;;  %v206_v55 = vld [vmem:[%s1049_s23 + $0x98] sm:$0xff]  ;;  %v322_v33 = vpack.c.bf16 %v266_v29, %v264_v28  ;;  %v220_v38 = vld [vmem:[%s1049_s23 + $0x108] sm:$0xff] }
  0x41   : > { %500 = vmatprep.subr.bf16.mxu0 %v402_v56  ;;  %961 = vmatprep.subr.bf16.mxu1 %v402_v56  ;;  %v252_v56 = vld [vmem:[%s1049_s23 + $0x208] sm:$0xff]  ;;  %v292_v60 = vpack.c.bf16 %v206_v55, %v204_v54  ;;  %v270_v41 = vld [vmem:[%s1049_s23 + $0x298] sm:$0xff]  ;;  %v300_v44 = vpack.c.bf16 %v222_v39, %v220_v38 }
  0x42   : > { %v268_v40 = vld [vmem:[%s1049_s23 + $0x288] sm:$0xff]  ;;  %v226_v51 = vld [vmem:[%s1049_s23 + $0x138] sm:$0xff] }
  0x43   : > { %v324_v45 = vpack.c.bf16 %v270_v41, %v268_v40  ;;  %v224_v50 = vld [vmem:[%s1049_s23 + $0x128] sm:$0xff]  ;;  %v274_v53 = vld [vmem:[%s1049_s23 + $0x2b8] sm:$0xff] }
  0x44   : > { %501 = vmatpush2.bf16.msra.mxu0 %v401_v61  ;;  %973 = vmatpush2.bf16.msra.mxu1 %v401_v61  ;;  %v316_v61 = vpack.c.bf16 %v254_v57, %v252_v56  ;;  %v272_v52 = vld [vmem:[%s1049_s23 + $0x2a8] sm:$0xff]  ;;  %v302_v56 = vpack.c.bf16 %v226_v51, %v224_v50  ;;  %v278_v1 = vld [vmem:[%s1049_s23 + $0x2d8] sm:$0xff] }
  0x45   : > { %502 = vmatprep.subr.bf16.mxu0 %v400_v62  ;;  %962 = vmatprep.subr.bf16.mxu1 %v400_v62  ;;  %v203_v62 = vld [vmem:[%s1049_s23 + $0x80] sm:$0xff]  ;;  %v326_v57 = vpack.c.bf16 %v274_v53, %v272_v52  ;;  %v276_v0 = vld [vmem:[%s1049_s23 + $0x2c8] sm:$0xff]  ;;  %v282_v13 = vld [vmem:[%s1049_s23 + $0x2f8] sm:$0xff] }
  0x46   : > { %v291_v6 = vpack.c.bf16 %v205_v63, %v203_v62  ;;  %v228_v62 = vld [vmem:[%s1049_s23 + $0x148] sm:$0xff]  ;;  %v230_v63 = vld [vmem:[%s1049_s23 + $0x158] sm:$0xff] }
  0x47   : > { %v280_v12 = vld [vmem:[%s1049_s23 + $0x2e8] sm:$0xff] }
  0x48   : > { %503 = vmatpush2.bf16.msra.mxu0 %v399_v3  ;;  %974 = vmatpush2.bf16.msra.mxu1 %v399_v3  ;;  %v210_v3 = vld [vmem:[%s1049_s23 + $0xb8] sm:$0xff]  ;;  %v330_v17 = vpack.c.bf16 %v282_v13, %v280_v12 }
  0x49   : > { %504 = vmatprep.subr.bf16.mxu0 %v398_v4  ;;  %963 = vmatprep.subr.bf16.mxu1 %v398_v4  ;;  %v256_v4 = vld [vmem:[%s1049_s23 + $0x228] sm:$0xff]  ;;  %v294_v8 = vpack.c.bf16 %v210_v3, %v208_v2 }
  0x4c   : > { %505 = vmatpush2.bf16.msra.mxu0 %v397_v9  ;;  %975 = vmatpush2.bf16.msra.mxu1 %v397_v9  ;;  %v318_v9 = vpack.c.bf16 %v258_v5, %v256_v4  ;;  %v304_v4 = vpack.c.bf16 %v230_v63, %v228_v62  ;;  %v328_v5 = vpack.c.bf16 %v278_v1, %v276_v0 }
  0x4d   : > { %506 = vmatprep.subr.bf16.mxu0 %v396_v10  ;;  %964 = vmatprep.subr.bf16.mxu1 %v396_v10  ;;  %v207_v10 = vld [vmem:[%s1049_s23 + $0xa0] sm:$0xff] }
  0x4e   : > { %v293_v18 = vpack.c.bf16 %v209_v11, %v207_v10  ;;  %v232_v10 = vld [vmem:[%s1049_s23 + $0x168] sm:$0xff]  ;;  %v234_v11 = vld [vmem:[%s1049_s23 + $0x178] sm:$0xff] }
  0x4f   : > { %v306_v16 = vpack.c.bf16 %v234_v11, %v232_v10 }
  0x50   : > { %507 = vmatpush2.bf16.msra.mxu0 %v395_v15  ;;  %976 = vmatpush2.bf16.msra.mxu1 %v395_v15  ;;  %v214_v15 = vld [vmem:[%s1049_s23 + $0xd8] sm:$0xff] }
  0x51   : > { %v296_v20 = vpack.c.bf16 %v214_v15, %v212_v14 }
  0x53   : > { %509 = vmatmul.mubr.bf16.vlgmr.msra.gmra.mxu0 %v283_v22  ;;  %629 = vmatmul.mubr.bf16.vlgmr.msra.gmra.mxu1 %v307_v23  ;;  %v211_v22 = vld [vmem:[%s1049_s23 + $0xc0] sm:$0xff]  ;;  %v213_v23 = vld [vmem:[%s1049_s23 + $0xd0] sm:$0xff] }
  0x54   : > { %926 = vmatprep.mubr.msk.bf16.mxu0 %vm403_vm0, %v286_v24  ;;  %938 = vmatprep.mubr.msk.bf16.mxu1 %vm403_vm0, %v310_v25  ;;  %v259_v24 = vld [vmem:[%s1049_s23 + $0x240] sm:$0xff]  ;;  %v261_v25 = vld [vmem:[%s1049_s23 + $0x250] sm:$0xff]  ;;  %v295_v30 = vpack.c.bf16 %v213_v23, %v211_v22 }
  0x55   : > { %v319_v31 = vpack.c.bf16 %v261_v25, %v259_v24 }
  0x5b   : > { %519 = vmatmul.mubr.bf16.gmra.mxu0 %v285_v34  ;;  %639 = vmatmul.mubr.bf16.gmra.mxu1 %v309_v35  ;;  %v215_v34 = vld [vmem:[%s1049_s23 + $0xe0] sm:$0xff]  ;;  %v217_v35 = vld [vmem:[%s1049_s23 + $0xf0] sm:$0xff] }
  0x5c   : > { %927 = vmatprep.mubr.msk.bf16.mxu0 %vm403_vm0, %v288_v36  ;;  %939 = vmatprep.mubr.msk.bf16.mxu1 %vm403_vm0, %v312_v37  ;;  %v263_v36 = vld [vmem:[%s1049_s23 + $0x260] sm:$0xff]  ;;  %v265_v37 = vld [vmem:[%s1049_s23 + $0x270] sm:$0xff]  ;;  %v297_v42 = vpack.c.bf16 %v217_v35, %v215_v34 }
  0x5d   : > { %v321_v43 = vpack.c.bf16 %v265_v37, %v263_v36 }
  0x63   : > { %529 = vmatmul.mubr.bf16.gmra.mxu0 %v287_v46  ;;  %649 = vmatmul.mubr.bf16.gmra.mxu1 %v311_v47  ;;  %v219_v46 = vld [vmem:[%s1049_s23 + $0x100] sm:$0xff]  ;;  %v221_v47 = vld [vmem:[%s1049_s23 + $0x110] sm:$0xff] }
  0x64   : > { %928 = vmatprep.mubr.msk.bf16.mxu0 %vm403_vm0, %v290_v48  ;;  %940 = vmatprep.mubr.msk.bf16.mxu1 %vm403_vm0, %v314_v49  ;;  %v267_v48 = vld [vmem:[%s1049_s23 + $0x280] sm:$0xff]  ;;  %v269_v49 = vld [vmem:[%s1049_s23 + $0x290] sm:$0xff]  ;;  %v299_v54 = vpack.c.bf16 %v221_v47, %v219_v46 }
  0x65   : > { %v323_v55 = vpack.c.bf16 %v269_v49, %v267_v48 }
  0x6b   : > { %539 = vmatmul.mubr.bf16.gmra.mxu0 %v289_v58  ;;  %659 = vmatmul.mubr.bf16.gmra.mxu1 %v313_v59  ;;  %v223_v58 = vld [vmem:[%s1049_s23 + $0x120] sm:$0xff]  ;;  %v225_v59 = vld [vmem:[%s1049_s23 + $0x130] sm:$0xff] }
  0x6c   : > { %929 = vmatprep.mubr.msk.bf16.mxu0 %vm403_vm0, %v292_v60  ;;  %941 = vmatprep.mubr.msk.bf16.mxu1 %vm403_vm0, %v316_v61  ;;  %v271_v60 = vld [vmem:[%s1049_s23 + $0x2a0] sm:$0xff]  ;;  %v273_v61 = vld [vmem:[%s1049_s23 + $0x2b0] sm:$0xff]  ;;  %v301_v2 = vpack.c.bf16 %v225_v59, %v223_v58 }
  0x6d   : > { %v325_v3 = vpack.c.bf16 %v273_v61, %v271_v60 }
  0x73   : > { %549 = vmatmul.mubr.bf16.gmra.mxu0 %v291_v6  ;;  %669 = vmatmul.mubr.bf16.gmra.mxu1 %v315_v7  ;;  %v227_v6 = vld [vmem:[%s1049_s23 + $0x140] sm:$0xff]  ;;  %v229_v7 = vld [vmem:[%s1049_s23 + $0x150] sm:$0xff] }
  0x74   : > { %930 = vmatprep.mubr.msk.bf16.mxu0 %vm403_vm0, %v294_v8  ;;  %942 = vmatprep.mubr.msk.bf16.mxu1 %vm403_vm0, %v318_v9  ;;  %v275_v8 = vld [vmem:[%s1049_s23 + $0x2c0] sm:$0xff]  ;;  %v277_v9 = vld [vmem:[%s1049_s23 + $0x2d0] sm:$0xff]  ;;  %v303_v14 = vpack.c.bf16 %v229_v7, %v227_v6 }
  0x75   : > { %v327_v15 = vpack.c.bf16 %v277_v9, %v275_v8 }
  0x7b   : > { %559 = vmatmul.mubr.bf16.gmra.mxu0 %v293_v18  ;;  %679 = vmatmul.mubr.bf16.gmra.mxu1 %v317_v19  ;;  %v231_v18 = vld [vmem:[%s1049_s23 + $0x160] sm:$0xff]  ;;  %v233_v19 = vld [vmem:[%s1049_s23 + $0x170] sm:$0xff] }
  0x7c   : > { %931 = vmatprep.mubr.msk.bf16.mxu0 %vm403_vm0, %v296_v20  ;;  %943 = vmatprep.mubr.msk.bf16.mxu1 %vm403_vm0, %v320_v21  ;;  %v279_v20 = vld [vmem:[%s1049_s23 + $0x2e0] sm:$0xff]  ;;  %v281_v21 = vld [vmem:[%s1049_s23 + $0x2f0] sm:$0xff]  ;;  %v305_v22 = vpack.c.bf16 %v233_v19, %v231_v18 }
  0x7d   : > { %v329_v23 = vpack.c.bf16 %v281_v21, %v279_v20 }
  0x83   : > { %569 = vmatmul.mubr.bf16.gmra.mxu0 %v295_v30  ;;  %689 = vmatmul.mubr.bf16.gmra.mxu1 %v319_v31 }
  0x84   : > { %932 = vmatprep.mubr.msk.bf16.mxu0 %vm403_vm0, %v298_v32  ;;  %944 = vmatprep.mubr.msk.bf16.mxu1 %vm403_vm0, %v322_v33 }
  0x8b   : > { %579 = vmatmul.mubr.bf16.gmra.mxu0 %v297_v42  ;;  %699 = vmatmul.mubr.bf16.gmra.mxu1 %v321_v43 }
  0x8c   : > { %933 = vmatprep.mubr.msk.bf16.mxu0 %vm403_vm0, %v300_v44  ;;  %945 = vmatprep.mubr.msk.bf16.mxu1 %vm403_vm0, %v324_v45 }
  0x93   : > { %589 = vmatmul.mubr.bf16.gmra.mxu0 %v299_v54  ;;  %709 = vmatmul.mubr.bf16.gmra.mxu1 %v323_v55 }
  0x94   : > { %934 = vmatprep.mubr.msk.bf16.mxu0 %vm403_vm0, %v302_v56  ;;  %946 = vmatprep.mubr.msk.bf16.mxu1 %vm403_vm0, %v326_v57 }
  0x9b   : > { %599 = vmatmul.mubr.bf16.gmra.mxu0 %v301_v2  ;;  %719 = vmatmul.mubr.bf16.gmra.mxu1 %v325_v3 }
  0x9c   : > { %935 = vmatprep.mubr.msk.bf16.mxu0 %vm403_vm0, %v304_v4  ;;  %947 = vmatprep.mubr.msk.bf16.mxu1 %vm403_vm0, %v328_v5 }
  0xa3   : > { %609 = vmatmul.mubr.bf16.gmra.mxu0 %v303_v14  ;;  %729 = vmatmul.mubr.bf16.gmra.mxu1 %v327_v15 }
  0xa4   : > { %936 = vmatprep.mubr.msk.bf16.mxu0 %vm403_vm0, %v306_v16  ;;  %948 = vmatprep.mubr.msk.bf16.mxu1 %vm403_vm0, %v330_v17 }
  0xab   : > { %619 = vmatmul.mubr.bf16.gmra.mxu0 %v305_v22  ;;  %739 = vmatmul.mubr.bf16.gmra.mxu1 %v329_v23 }
 0x113   : > { %v510_v24 = vpop.f32.mrf.mxu0  ;;  %v630_v25 = vpop.f32.mrf.mxu1 }
 0x114   : > { %749 = vst [vmem:[%s1229_s30] sm:$0xff] %v510_v24  ;;  %797 = vst [vmem:[%s1229_s30 + $0x180] sm:$0xff] %v630_v25 }
 0x115   : > { %v512_v26 = vpop.f32.mrf.mxu0  ;;  %v632_v27 = vpop.f32.mrf.mxu1 }
 0x116   : > { %750 = vst.msk [vmem:[%s1229_s30 + $0x8] sm:$0xff] %vm403_vm0, %v512_v26  ;;  %798 = vst.msk [vmem:[%s1229_s30 + $0x188] sm:$0xff] %vm403_vm0, %v632_v27 }
 0x117   : > { %v514_v28 = vpop.f32.mrf.mxu0  ;;  %v634_v29 = vpop.f32.mrf.mxu1 }
 0x118   : > { %751 = vst [vmem:[%s1229_s30 + $0x10] sm:$0xff] %v514_v28  ;;  %799 = vst [vmem:[%s1229_s30 + $0x190] sm:$0xff] %v634_v29 }
 0x119   : > { %v516_v30 = vpop.f32.mrf.mxu0  ;;  %v636_v31 = vpop.f32.mrf.mxu1 }
 0x11a   : > { %752 = vst.msk [vmem:[%s1229_s30 + $0x18] sm:$0xff] %vm403_vm0, %v516_v30  ;;  %800 = vst.msk [vmem:[%s1229_s30 + $0x198] sm:$0xff] %vm403_vm0, %v636_v31 }
 0x11b   : > { %v520_v32 = vpop.f32.mrf.mxu0  ;;  %v640_v33 = vpop.f32.mrf.mxu1 }
 0x11c   : > { %753 = vst [vmem:[%s1229_s30 + $0x20] sm:$0xff] %v520_v32  ;;  %801 = vst [vmem:[%s1229_s30 + $0x1a0] sm:$0xff] %v640_v33 }
 0x11d   : > { %v522_v34 = vpop.f32.mrf.mxu0  ;;  %v642_v35 = vpop.f32.mrf.mxu1 }
 0x11e   : > { %754 = vst.msk [vmem:[%s1229_s30 + $0x28] sm:$0xff] %vm403_vm0, %v522_v34  ;;  %802 = vst.msk [vmem:[%s1229_s30 + $0x1a8] sm:$0xff] %vm403_vm0, %v642_v35 }
 0x11f   : > { %v524_v36 = vpop.f32.mrf.mxu0  ;;  %v644_v37 = vpop.f32.mrf.mxu1 }
 0x120   : > { %755 = vst [vmem:[%s1229_s30 + $0x30] sm:$0xff] %v524_v36  ;;  %803 = vst [vmem:[%s1229_s30 + $0x1b0] sm:$0xff] %v644_v37 }
 0x121   : > { %v526_v38 = vpop.f32.mrf.mxu0  ;;  %v646_v39 = vpop.f32.mrf.mxu1 }
 0x122   : > { %756 = vst.msk [vmem:[%s1229_s30 + $0x38] sm:$0xff] %vm403_vm0, %v526_v38  ;;  %804 = vst.msk [vmem:[%s1229_s30 + $0x1b8] sm:$0xff] %vm403_vm0, %v646_v39 }
 0x123   : > { %v530_v40 = vpop.f32.mrf.mxu0  ;;  %v650_v41 = vpop.f32.mrf.mxu1 }
 0x124   : > { %757 = vst [vmem:[%s1229_s30 + $0x40] sm:$0xff] %v530_v40  ;;  %805 = vst [vmem:[%s1229_s30 + $0x1c0] sm:$0xff] %v650_v41 }
 0x125   : > { %v532_v42 = vpop.f32.mrf.mxu0  ;;  %v652_v43 = vpop.f32.mrf.mxu1 }
 0x126   : > { %758 = vst.msk [vmem:[%s1229_s30 + $0x48] sm:$0xff] %vm403_vm0, %v532_v42  ;;  %806 = vst.msk [vmem:[%s1229_s30 + $0x1c8] sm:$0xff] %vm403_vm0, %v652_v43 }
 0x127   : > { %v534_v44 = vpop.f32.mrf.mxu0  ;;  %v654_v45 = vpop.f32.mrf.mxu1 }
 0x128   : > { %759 = vst [vmem:[%s1229_s30 + $0x50] sm:$0xff] %v534_v44  ;;  %807 = vst [vmem:[%s1229_s30 + $0x1d0] sm:$0xff] %v654_v45 }
 0x129   : > { %v536_v46 = vpop.f32.mrf.mxu0  ;;  %v656_v47 = vpop.f32.mrf.mxu1 }
 0x12a   : > { %760 = vst.msk [vmem:[%s1229_s30 + $0x58] sm:$0xff] %vm403_vm0, %v536_v46  ;;  %808 = vst.msk [vmem:[%s1229_s30 + $0x1d8] sm:$0xff] %vm403_vm0, %v656_v47 }
 0x12b   : > { %v540_v48 = vpop.f32.mrf.mxu0  ;;  %v660_v49 = vpop.f32.mrf.mxu1 }
 0x12c   : > { %761 = vst [vmem:[%s1229_s30 + $0x60] sm:$0xff] %v540_v48  ;;  %809 = vst [vmem:[%s1229_s30 + $0x1e0] sm:$0xff] %v660_v49 }
 0x12d   : > { %v542_v50 = vpop.f32.mrf.mxu0  ;;  %v662_v51 = vpop.f32.mrf.mxu1 }
 0x12e   : > { %762 = vst.msk [vmem:[%s1229_s30 + $0x68] sm:$0xff] %vm403_vm0, %v542_v50  ;;  %810 = vst.msk [vmem:[%s1229_s30 + $0x1e8] sm:$0xff] %vm403_vm0, %v662_v51 }
 0x12f   : > { %v544_v52 = vpop.f32.mrf.mxu0  ;;  %v664_v53 = vpop.f32.mrf.mxu1 }
 0x130   : > { %763 = vst [vmem:[%s1229_s30 + $0x70] sm:$0xff] %v544_v52  ;;  %811 = vst [vmem:[%s1229_s30 + $0x1f0] sm:$0xff] %v664_v53 }
 0x131   : > { %v546_v54 = vpop.f32.mrf.mxu0  ;;  %v666_v55 = vpop.f32.mrf.mxu1 }
 0x132   : > { %764 = vst.msk [vmem:[%s1229_s30 + $0x78] sm:$0xff] %vm403_vm0, %v546_v54  ;;  %812 = vst.msk [vmem:[%s1229_s30 + $0x1f8] sm:$0xff] %vm403_vm0, %v666_v55 }
 0x133   : > { %v550_v56 = vpop.f32.mrf.mxu0  ;;  %v670_v57 = vpop.f32.mrf.mxu1 }
 0x134   : > { %765 = vst [vmem:[%s1229_s30 + $0x80] sm:$0xff] %v550_v56  ;;  %813 = vst [vmem:[%s1229_s30 + $0x200] sm:$0xff] %v670_v57 }
 0x135   : > { %v552_v58 = vpop.f32.mrf.mxu0  ;;  %v672_v59 = vpop.f32.mrf.mxu1 }
 0x136   : > { %766 = vst.msk [vmem:[%s1229_s30 + $0x88] sm:$0xff] %vm403_vm0, %v552_v58  ;;  %814 = vst.msk [vmem:[%s1229_s30 + $0x208] sm:$0xff] %vm403_vm0, %v672_v59 }
 0x137   : > { %v554_v60 = vpop.f32.mrf.mxu0  ;;  %v674_v61 = vpop.f32.mrf.mxu1 }
 0x138   : > { %767 = vst [vmem:[%s1229_s30 + $0x90] sm:$0xff] %v554_v60  ;;  %815 = vst [vmem:[%s1229_s30 + $0x210] sm:$0xff] %v674_v61 }
 0x139   : > { %v556_v62 = vpop.f32.mrf.mxu0  ;;  %v676_v63 = vpop.f32.mrf.mxu1 }
 0x13a   : > { %768 = vst.msk [vmem:[%s1229_s30 + $0x98] sm:$0xff] %vm403_vm0, %v556_v62  ;;  %816 = vst.msk [vmem:[%s1229_s30 + $0x218] sm:$0xff] %vm403_vm0, %v676_v63 }
 0x13b   : > { %v560_v0 = vpop.f32.mrf.mxu0  ;;  %v680_v1 = vpop.f32.mrf.mxu1 }
 0x13c   : > { %769 = vst [vmem:[%s1229_s30 + $0xa0] sm:$0xff] %v560_v0  ;;  %817 = vst [vmem:[%s1229_s30 + $0x220] sm:$0xff] %v680_v1 }
 0x13d   : > { %v562_v2 = vpop.f32.mrf.mxu0  ;;  %v682_v3 = vpop.f32.mrf.mxu1 }
 0x13e   : > { %770 = vst.msk [vmem:[%s1229_s30 + $0xa8] sm:$0xff] %vm403_vm0, %v562_v2  ;;  %818 = vst.msk [vmem:[%s1229_s30 + $0x228] sm:$0xff] %vm403_vm0, %v682_v3 }
 0x13f   : > { %v564_v4 = vpop.f32.mrf.mxu0  ;;  %v684_v5 = vpop.f32.mrf.mxu1 }
 0x140   : > { %771 = vst [vmem:[%s1229_s30 + $0xb0] sm:$0xff] %v564_v4  ;;  %819 = vst [vmem:[%s1229_s30 + $0x230] sm:$0xff] %v684_v5 }
 0x141   : > { %v566_v6 = vpop.f32.mrf.mxu0  ;;  %v686_v7 = vpop.f32.mrf.mxu1 }
 0x142   : > { %772 = vst.msk [vmem:[%s1229_s30 + $0xb8] sm:$0xff] %vm403_vm0, %v566_v6  ;;  %820 = vst.msk [vmem:[%s1229_s30 + $0x238] sm:$0xff] %vm403_vm0, %v686_v7 }
 0x143   : > { %v570_v8 = vpop.f32.mrf.mxu0  ;;  %v690_v9 = vpop.f32.mrf.mxu1 }
 0x144   : > { %773 = vst [vmem:[%s1229_s30 + $0xc0] sm:$0xff] %v570_v8  ;;  %821 = vst [vmem:[%s1229_s30 + $0x240] sm:$0xff] %v690_v9 }
 0x145   : > { %v572_v10 = vpop.f32.mrf.mxu0  ;;  %v692_v11 = vpop.f32.mrf.mxu1 }
 0x146   : > { %774 = vst.msk [vmem:[%s1229_s30 + $0xc8] sm:$0xff] %vm403_vm0, %v572_v10  ;;  %822 = vst.msk [vmem:[%s1229_s30 + $0x248] sm:$0xff] %vm403_vm0, %v692_v11 }
 0x147   : > { %v574_v12 = vpop.f32.mrf.mxu0  ;;  %v694_v13 = vpop.f32.mrf.mxu1 }
 0x148   : > { %775 = vst [vmem:[%s1229_s30 + $0xd0] sm:$0xff] %v574_v12  ;;  %823 = vst [vmem:[%s1229_s30 + $0x250] sm:$0xff] %v694_v13 }
 0x149   : > { %v576_v14 = vpop.f32.mrf.mxu0  ;;  %v696_v15 = vpop.f32.mrf.mxu1 }
 0x14a   : > { %776 = vst.msk [vmem:[%s1229_s30 + $0xd8] sm:$0xff] %vm403_vm0, %v576_v14  ;;  %824 = vst.msk [vmem:[%s1229_s30 + $0x258] sm:$0xff] %vm403_vm0, %v696_v15 }
 0x14b   : > { %v580_v16 = vpop.f32.mrf.mxu0  ;;  %v700_v17 = vpop.f32.mrf.mxu1 }
 0x14c   : > { %777 = vst [vmem:[%s1229_s30 + $0xe0] sm:$0xff] %v580_v16  ;;  %825 = vst [vmem:[%s1229_s30 + $0x260] sm:$0xff] %v700_v17 }
 0x14d   : > { %v582_v18 = vpop.f32.mrf.mxu0  ;;  %v702_v19 = vpop.f32.mrf.mxu1 }
 0x14e   : > { %778 = vst.msk [vmem:[%s1229_s30 + $0xe8] sm:$0xff] %vm403_vm0, %v582_v18  ;;  %826 = vst.msk [vmem:[%s1229_s30 + $0x268] sm:$0xff] %vm403_vm0, %v702_v19 }
 0x14f   : > { %v584_v20 = vpop.f32.mrf.mxu0  ;;  %v704_v21 = vpop.f32.mrf.mxu1 }
 0x150   : > { %779 = vst [vmem:[%s1229_s30 + $0xf0] sm:$0xff] %v584_v20  ;;  %827 = vst [vmem:[%s1229_s30 + $0x270] sm:$0xff] %v704_v21 }
 0x151   : > { %v586_v22 = vpop.f32.mrf.mxu0  ;;  %v706_v23 = vpop.f32.mrf.mxu1 }
 0x152   : > { %780 = vst.msk [vmem:[%s1229_s30 + $0xf8] sm:$0xff] %vm403_vm0, %v586_v22  ;;  %828 = vst.msk [vmem:[%s1229_s30 + $0x278] sm:$0xff] %vm403_vm0, %v706_v23 }
 0x153   : > { %v590_v24 = vpop.f32.mrf.mxu0  ;;  %v710_v25 = vpop.f32.mrf.mxu1 }
 0x154   : > { %781 = vst [vmem:[%s1229_s30 + $0x100] sm:$0xff] %v590_v24  ;;  %829 = vst [vmem:[%s1229_s30 + $0x280] sm:$0xff] %v710_v25 }
 0x155   : > { %v592_v26 = vpop.f32.mrf.mxu0  ;;  %v712_v27 = vpop.f32.mrf.mxu1 }
 0x156   : > { %782 = vst.msk [vmem:[%s1229_s30 + $0x108] sm:$0xff] %vm403_vm0, %v592_v26  ;;  %830 = vst.msk [vmem:[%s1229_s30 + $0x288] sm:$0xff] %vm403_vm0, %v712_v27 }
 0x157   : > { %v594_v28 = vpop.f32.mrf.mxu0  ;;  %v714_v29 = vpop.f32.mrf.mxu1 }
 0x158   : > { %783 = vst [vmem:[%s1229_s30 + $0x110] sm:$0xff] %v594_v28  ;;  %831 = vst [vmem:[%s1229_s30 + $0x290] sm:$0xff] %v714_v29 }
 0x159   : > { %v596_v30 = vpop.f32.mrf.mxu0  ;;  %v716_v31 = vpop.f32.mrf.mxu1 }
 0x15a   : > { %784 = vst.msk [vmem:[%s1229_s30 + $0x118] sm:$0xff] %vm403_vm0, %v596_v30  ;;  %832 = vst.msk [vmem:[%s1229_s30 + $0x298] sm:$0xff] %vm403_vm0, %v716_v31 }
 0x15b   : > { %v600_v32 = vpop.f32.mrf.mxu0  ;;  %v720_v33 = vpop.f32.mrf.mxu1 }
 0x15c   : > { %785 = vst [vmem:[%s1229_s30 + $0x120] sm:$0xff] %v600_v32  ;;  %833 = vst [vmem:[%s1229_s30 + $0x2a0] sm:$0xff] %v720_v33 }
 0x15d   : > { %v602_v34 = vpop.f32.mrf.mxu0  ;;  %v722_v35 = vpop.f32.mrf.mxu1 }
 0x15e   : > { %786 = vst.msk [vmem:[%s1229_s30 + $0x128] sm:$0xff] %vm403_vm0, %v602_v34  ;;  %834 = vst.msk [vmem:[%s1229_s30 + $0x2a8] sm:$0xff] %vm403_vm0, %v722_v35 }
 0x15f   : > { %v604_v36 = vpop.f32.mrf.mxu0  ;;  %v724_v37 = vpop.f32.mrf.mxu1 }
 0x160   : > { %787 = vst [vmem:[%s1229_s30 + $0x130] sm:$0xff] %v604_v36  ;;  %835 = vst [vmem:[%s1229_s30 + $0x2b0] sm:$0xff] %v724_v37 }
 0x161   : > { %v606_v38 = vpop.f32.mrf.mxu0  ;;  %v726_v39 = vpop.f32.mrf.mxu1 }
 0x162   : > { %788 = vst.msk [vmem:[%s1229_s30 + $0x138] sm:$0xff] %vm403_vm0, %v606_v38  ;;  %836 = vst.msk [vmem:[%s1229_s30 + $0x2b8] sm:$0xff] %vm403_vm0, %v726_v39 }
 0x163   : > { %v610_v40 = vpop.f32.mrf.mxu0  ;;  %v730_v41 = vpop.f32.mrf.mxu1 }
 0x164   : > { %789 = vst [vmem:[%s1229_s30 + $0x140] sm:$0xff] %v610_v40  ;;  %837 = vst [vmem:[%s1229_s30 + $0x2c0] sm:$0xff] %v730_v41 }
 0x165   : > { %v612_v42 = vpop.f32.mrf.mxu0  ;;  %v732_v43 = vpop.f32.mrf.mxu1 }
 0x166   : > { %790 = vst.msk [vmem:[%s1229_s30 + $0x148] sm:$0xff] %vm403_vm0, %v612_v42  ;;  %838 = vst.msk [vmem:[%s1229_s30 + $0x2c8] sm:$0xff] %vm403_vm0, %v732_v43 }
 0x167   : > { %v614_v44 = vpop.f32.mrf.mxu0  ;;  %v734_v45 = vpop.f32.mrf.mxu1 }
 0x168   : > { %791 = vst [vmem:[%s1229_s30 + $0x150] sm:$0xff] %v614_v44  ;;  %839 = vst [vmem:[%s1229_s30 + $0x2d0] sm:$0xff] %v734_v45 }
 0x169   : > { %v616_v46 = vpop.f32.mrf.mxu0  ;;  %v736_v47 = vpop.f32.mrf.mxu1 }
 0x16a   : > { %792 = vst.msk [vmem:[%s1229_s30 + $0x158] sm:$0xff] %vm403_vm0, %v616_v46  ;;  %840 = vst.msk [vmem:[%s1229_s30 + $0x2d8] sm:$0xff] %vm403_vm0, %v736_v47 }
 0x16b   : > { %v620_v48 = vpop.f32.mrf.mxu0  ;;  %v740_v49 = vpop.f32.mrf.mxu1 }
 0x16c   : > { %793 = vst [vmem:[%s1229_s30 + $0x160] sm:$0xff] %v620_v48  ;;  %841 = vst [vmem:[%s1229_s30 + $0x2e0] sm:$0xff] %v740_v49 }
 0x16d   : > { %v622_v50 = vpop.f32.mrf.mxu0  ;;  %v742_v51 = vpop.f32.mrf.mxu1 }
 0x16e   : > { %794 = vst.msk [vmem:[%s1229_s30 + $0x168] sm:$0xff] %vm403_vm0, %v622_v50  ;;  %842 = vst.msk [vmem:[%s1229_s30 + $0x2e8] sm:$0xff] %vm403_vm0, %v742_v51 }
 0x16f   : > { %v624_v52 = vpop.f32.mrf.mxu0  ;;  %v744_v53 = vpop.f32.mrf.mxu1 }
 0x170   : > { %795 = vst [vmem:[%s1229_s30 + $0x170] sm:$0xff] %v624_v52  ;;  %843 = vst [vmem:[%s1229_s30 + $0x2f0] sm:$0xff] %v744_v53 }
 0x171   : > { %v626_v54 = vpop.f32.mrf.mxu0  ;;  %v746_v55 = vpop.f32.mrf.mxu1 }
 0x172   : > { %796 = vst.msk [vmem:[%s1229_s30 + $0x178] sm:$0xff] %vm403_vm0, %v626_v54  ;;  %844 = vst.msk [vmem:[%s1229_s30 + $0x2f8] sm:$0xff] %vm403_vm0, %v746_v55 }
 0x173 PF: > { %s19_s17 = sadd.s32 1, %s1007_s17  }
 0x174   : > { %p16_p10 = scmp.ge.s32.totalorder %s19_s17, 6  }
 0x176   :  { %18 = sbr.rel (!%p16_p10) target bundleno = 16 (0x10), region = 61 }

// kernel: wavelets_forward.23
= control target key start
LH: loop header
LB: loop body
LE: loop exit
PB: predicated region body
PF: predicated region fallthrough
CT: control target
= control target key end

     0   :  { %s235_s6 = smov 0   ;;  %s252_s0 = inlined_call_operand.vmem [shape: f32[24,1024], index: 0, kind: input, shape index: {}]   ;;  %s253_s1 = inlined_call_operand.vmem [shape: f32[24,1024], index: 1, kind: output, shape index: {}]  }
   0x1 LB: > { %s196_s7 = sadd.s32 4294967295, %s223_s6   ;;  %p200_p0 = scmp.ge.s32.totalorder %s223_s6, 1  ;;  %s223_s6 = sphi %s235_s6, %s11_s6  }
   0x2   : > { %p87_p1 = scmp.lt.s32.totalorder %s223_s6, 4 }
   0x4   : > { %p88_p2 = pnand %p200_p0, %p87_p1 }
   0x5   : > { %p107_p3 = scmp.lt.s32.totalorder (!%p88_p2), %s196_s7, 2 }
   0x6   : > { %91 = sbr.rel (%p88_p2) target bundleno = 21 (0x15), region = 24 }
   0xb   : > { %s255_s7 = smov (!%p107_p3, %s196_s7), 2 }
   0xc   : > { %s207_s8 = sshll.u32 %s255_s7, 6 }
   0xd   : > { %s111_s11 = scalar_lea.vmem %s252_s0, %s207_s8  ;;  %s116_s14 = scalar_lea.vmem %s253_s1, %s207_s8 }
   0xe   : > { %v117_v0 = vld [vmem:[%s111_s11] sm:$0xff]  ;;  %v118_v1 = vld [vmem:[%s111_s11 + $0x8] sm:$0xff]  ;;  %v119_v2 = vld [vmem:[%s111_s11 + $0x10] sm:$0xff] }
   0xf   : > { %v125_v3 = vmax.f32 %v117_v0, 0.0  ;;  %v126_v4 = vmax.f32 %v118_v1, 0.0  ;;  %v127_v5 = vmax.f32 %v119_v2, 0.0  ;;  %v120_v6 = vld [vmem:[%s111_s11 + $0x18] sm:$0xff]  ;;  %v121_v7 = vld [vmem:[%s111_s11 + $0x20] sm:$0xff]  ;;  %v122_v8 = vld [vmem:[%s111_s11 + $0x28] sm:$0xff] }
  0x10   : > { %v128_v9 = vmax.f32 %v120_v6, 0.0  ;;  %v129_v10 = vmax.f32 %v121_v7, 0.0  ;;  %v130_v11 = vmax.f32 %v122_v8, 0.0  ;;  %v123_v12 = vld [vmem:[%s111_s11 + $0x30] sm:$0xff]  ;;  %v124_v13 = vld [vmem:[%s111_s11 + $0x38] sm:$0xff] }
  0x11   : > { %133 = vst [vmem:[%s116_s14] sm:$0xff] %v125_v3  ;;  %134 = vst [vmem:[%s116_s14 + $0x8] sm:$0xff] %v126_v4  ;;  %v131_v14 = vmax.f32 %v123_v12, 0.0  ;;  %v132_v15 = vmax.f32 %v124_v13, 0.0 }
  0x12   : > { %135 = vst [vmem:[%s116_s14 + $0x10] sm:$0xff] %v127_v5  ;;  %136 = vst [vmem:[%s116_s14 + $0x18] sm:$0xff] %v128_v9 }
  0x13   : > { %137 = vst [vmem:[%s116_s14 + $0x20] sm:$0xff] %v129_v10  ;;  %138 = vst [vmem:[%s116_s14 + $0x28] sm:$0xff] %v130_v11 }
  0x14   : > { %139 = vst [vmem:[%s116_s14 + $0x30] sm:$0xff] %v131_v14  ;;  %140 = vst [vmem:[%s116_s14 + $0x38] sm:$0xff] %v132_v15 }
  0x15 PF: > { %s11_s6 = sadd.s32 1, %s223_s6  }
  0x16   : > { %p8_p4 = scmp.ge.s32.totalorder %s11_s6, 5  }
  0x18   :  { %10 = sbr.rel (!%p8_p4) target bundleno = 1 (0x1), region = 54 }

// kernel: wavelets_forward.26
= control target key start
LH: loop header
LB: loop body
LE: loop exit
PB: predicated region body
PF: predicated region fallthrough
CT: control target
= control target key end

     0   :  { %s1143_s0 = inlined_call_operand.vmem [shape: s32[4], index: 0, kind: input, shape index: {}]   ;;  %s1144_s1 = inlined_call_operand.vmem [shape: f32[1536,192], index: 1, kind: input, shape index: {}]   ;;  %s1145_s2 = inlined_call_operand.vmem [shape: f32[4,192,128], index: 2, kind: input, shape index: {}]   ;;  %s1146_s3 = inlined_call_operand.vmem [shape: f32[1536,128], index: 3, kind: output, shape index: {}]  }
   0x1   :  { %s8_s14 = sshll.u32 %s1143_s0, 4  ;;  %s9_s14 = int_to_ptr.vmem [resolvable:$true] %s8_s14 }
   0x2   :  { %s850_s15 = scalar_lea.vmem %s9_s14, 16  ;;  %p855_p1 = scmp.lt.s32.totalorder %s9_s14, %s9_s14 }
   0x3   :  { %p851_p0 = scmp.ne.s32.totalorder %s9_s14, %s850_s15  ;;  %p856_p2 = scmp.lt.s32.totalorder %s850_s15, %s850_s15 }
   0x5   :  { %p857_p3 = por %p856_p2, %p855_p1 }
   0x7   :  { %p858_p4 = pnand %p857_p3, %p851_p0 }
   0x9   :  { %861 = shalt.err (!%p858_p4)  }
   0xa   :  { %s872_s16 = smov [#allocation3]  }
   0xb   :  { %11 = dma.vmem_to_smem %s9_s14, 16, %s872_s16, [#allocation2] }
   0xc   :  { %866 = dma.done.wait [#allocation2], 16 }
   0xd   :  { %867 = vsyncadd [#allocation2], 4294967280 }
   0xe   :  { %13 = sfence }
   0xf   :  { %s897_s17 = smov 0  }
  0x10 LB: > { %s779_s0 = sadd.s32 4294967295, %s870_s17   ;;  %p783_p5 = scmp.ge.s32.totalorder %s870_s17, 1  ;;  %s870_s17 = sphi %s897_s17, %s19_s17  }
  0x11   : > { %p135_p6 = scmp.lt.s32.totalorder %s870_s17, 5 }
  0x13   : > { %p136_p7 = pnand %p783_p5, %p135_p6 }
  0x14   : > { %s171_s18 = sld [smem:[#allocation3 + %s779_s0]] (!%p136_p7)  ;;  %s164_s19 = smul.u32 (!%p136_p7), 48, %s779_s0 }
  0x15   : > { %139 = sbr.rel (%p136_p7) target bundleno = 369 (0x171), region = 28 }
  0x16   : > { %p165_p8 = scmp.lt.s32.totalorder (!%p136_p7), %s164_s19, 191 }
  0x1a   : > { %v873_v0 = vmov 0   ;;  %s1148_s19 = smov (!%p165_p8, %s164_s19), 191  ;;  %p172_p9 = scmp.lt.s32.totalorder %s171_s18, 3  ;;  %vm365_vm0 = vcmask 523264  }
  0x1b   : > { %438 = vmatprep.subr.bf16.mxu0 %v873_v0  ;;  %815 = vmatprep.subr.bf16.mxu1 %v873_v0  ;;  %s814_s20 = sshll.u32 %s1148_s19, 4  ;;  %s787_s28 = sshll.u32 %s1148_s19, 3 }
  0x1c   : > { %s913_s23 = scalar_lea.vmem %s1144_s1, %s814_s20  ;;  %s1150_s18 = smov (!%p172_p9, %s171_s18), 3 }
  0x1d   : > { %v186_v1 = vld [vmem:[%s913_s23 + $0x8] sm:$0xff]  ;;  %v188_v2 = vld [vmem:[%s913_s23 + $0x18] sm:$0xff]  ;;  %s839_s24 = smul.u32 192, %s1150_s18  ;;  %v185_v42 = vld [vmem:[%s913_s23] sm:$0xff]  ;;  %s1090_s4 = scalar_lea.vmem %s1146_s3, %s787_s28 }
  0x1e   : > { %v234_v3 = vld [vmem:[%s913_s23 + $0x188] sm:$0xff]  ;;  %v282_v4 = vpack.c.bf16 %v188_v2, %v186_v1  ;;  %v236_v5 = vld [vmem:[%s913_s23 + $0x198] sm:$0xff]  ;;  %v187_v43 = vld [vmem:[%s913_s23 + $0x10] sm:$0xff] }
  0x1f   : > { %v306_v6 = vpack.c.bf16 %v236_v5, %v234_v3  ;;  %s923_s27 = scalar_lea.vmem %s1145_s2, %s839_s24  ;;  %v233_v45 = vld [vmem:[%s913_s23 + $0x180] sm:$0xff]  ;;  %v235_v46 = vld [vmem:[%s913_s23 + $0x190] sm:$0xff]  ;;  %v190_v47 = vld [vmem:[%s913_s23 + $0x28] sm:$0xff]  ;;  %v281_v51 = vpack.c.bf16 %v187_v43, %v185_v42 }
  0x20   : > { %788 = vmatprep.mubr.msk.bf16.mxu0 %vm365_vm0, %v282_v4  ;;  %v343_v7 = vld [vmem:[%s923_s27 + $0x70] sm:$0xff]  ;;  %v344_v8 = vld [vmem:[%s923_s27 + $0x78] sm:$0xff]  ;;  %v341_v9 = vld [vmem:[%s923_s27 + $0x60] sm:$0xff]  ;;  %v305_v52 = vpack.c.bf16 %v235_v46, %v233_v45 }
  0x21   : > { %800 = vmatprep.mubr.msk.bf16.mxu1 %vm365_vm0, %v306_v6  ;;  %v360_v10 = vpack.c.bf16 %v344_v8, %v343_v7  ;;  %v342_v11 = vld [vmem:[%s923_s27 + $0x68] sm:$0xff]  ;;  %v339_v13 = vld [vmem:[%s923_s27 + $0x50] sm:$0xff]  ;;  %v340_v14 = vld [vmem:[%s923_s27 + $0x58] sm:$0xff] }
  0x22   : > { %v359_v12 = vpack.c.bf16 %v342_v11, %v341_v9  ;;  %v358_v15 = vpack.c.bf16 %v340_v14, %v339_v13  ;;  %v337_v16 = vld [vmem:[%s923_s27 + $0x40] sm:$0xff]  ;;  %v338_v17 = vld [vmem:[%s923_s27 + $0x48] sm:$0xff]  ;;  %v335_v19 = vld [vmem:[%s923_s27 + $0x30] sm:$0xff] }
  0x23   : > { %439 = vmatpush1.bf16.msra.mxu0 %v360_v10  ;;  %827 = vmatpush1.bf16.msra.mxu1 %v360_v10  ;;  %v357_v18 = vpack.c.bf16 %v338_v17, %v337_v16  ;;  %v336_v20 = vld [vmem:[%s923_s27 + $0x38] sm:$0xff]  ;;  %v333_v22 = vld [vmem:[%s923_s27 + $0x20] sm:$0xff]  ;;  %v334_v23 = vld [vmem:[%s923_s27 + $0x28] sm:$0xff] }
  0x24   : > { %440 = vmatprep.subr.bf16.mxu0 %v873_v0  ;;  %816 = vmatprep.subr.bf16.mxu1 %v873_v0  ;;  %v356_v21 = vpack.c.bf16 %v336_v20, %v335_v19  ;;  %v355_v24 = vpack.c.bf16 %v334_v23, %v333_v22  ;;  %v331_v25 = vld [vmem:[%s923_s27 + $0x10] sm:$0xff]  ;;  %v332_v26 = vld [vmem:[%s923_s27 + $0x18] sm:$0xff]  ;;  %v329_v28 = vld [vmem:[%s923_s27] sm:$0xff] }
  0x25   : > { %v354_v27 = vpack.c.bf16 %v332_v26, %v331_v25  ;;  %v330_v29 = vld [vmem:[%s923_s27 + $0x8] sm:$0xff]  ;;  %v351_v31 = vld [vmem:[%s923_s27 + $0xb0] sm:$0xff]  ;;  %v352_v32 = vld [vmem:[%s923_s27 + $0xb8] sm:$0xff] }
  0x26   : > { %v353_v30 = vpack.c.bf16 %v330_v29, %v329_v28  ;;  %v364_v33 = vpack.c.bf16 %v352_v32, %v351_v31  ;;  %v349_v34 = vld [vmem:[%s923_s27 + $0xa0] sm:$0xff]  ;;  %v350_v35 = vld [vmem:[%s923_s27 + $0xa8] sm:$0xff]  ;;  %v347_v37 = vld [vmem:[%s923_s27 + $0x90] sm:$0xff] }
  0x27   : > { %441 = vmatpush1.bf16.msra.mxu0 %v359_v12  ;;  %828 = vmatpush1.bf16.msra.mxu1 %v359_v12  ;;  %v363_v36 = vpack.c.bf16 %v350_v35, %v349_v34  ;;  %v348_v38 = vld [vmem:[%s923_s27 + $0x98] sm:$0xff]  ;;  %v345_v40 = vld [vmem:[%s923_s27 + $0x80] sm:$0xff]  ;;  %v346_v41 = vld [vmem:[%s923_s27 + $0x88] sm:$0xff] }
  0x28   : > { %442 = vmatprep.subr.bf16.mxu0 %v873_v0  ;;  %817 = vmatprep.subr.bf16.mxu1 %v873_v0  ;;  %v362_v39 = vpack.c.bf16 %v348_v38, %v347_v37  ;;  %v361_v44 = vpack.c.bf16 %v346_v41, %v345_v40  ;;  %v192_v48 = vld [vmem:[%s913_s23 + $0x38] sm:$0xff]  ;;  %v238_v49 = vld [vmem:[%s913_s23 + $0x1a8] sm:$0xff]  ;;  %v189_v55 = vld [vmem:[%s913_s23 + $0x20] sm:$0xff] }
  0x29   : > { %v240_v50 = vld [vmem:[%s913_s23 + $0x1b8] sm:$0xff]  ;;  %v284_v53 = vpack.c.bf16 %v192_v48, %v190_v47  ;;  %v191_v56 = vld [vmem:[%s913_s23 + $0x30] sm:$0xff]  ;;  %v237_v57 = vld [vmem:[%s913_s23 + $0x1a0] sm:$0xff] }
  0x2a   : > { %v308_v54 = vpack.c.bf16 %v240_v50, %v238_v49  ;;  %v239_v58 = vld [vmem:[%s913_s23 + $0x1b0] sm:$0xff]  ;;  %v194_v59 = vld [vmem:[%s913_s23 + $0x48] sm:$0xff]  ;;  %v196_v60 = vld [vmem:[%s913_s23 + $0x58] sm:$0xff]  ;;  %v283_v63 = vpack.c.bf16 %v191_v56, %v189_v55 }
  0x2b   : > { %443 = vmatpush1.bf16.msra.mxu0 %v358_v15  ;;  %829 = vmatpush1.bf16.msra.mxu1 %v358_v15  ;;  %v242_v61 = vld [vmem:[%s913_s23 + $0x1c8] sm:$0xff]  ;;  %v244_v62 = vld [vmem:[%s913_s23 + $0x1d8] sm:$0xff]  ;;  %v286_v1 = vpack.c.bf16 %v196_v60, %v194_v59  ;;  %v193_v3 = vld [vmem:[%s913_s23 + $0x40] sm:$0xff] }
  0x2c   : > { %444 = vmatprep.subr.bf16.mxu0 %v873_v0  ;;  %818 = vmatprep.subr.bf16.mxu1 %v873_v0  ;;  %v310_v2 = vpack.c.bf16 %v244_v62, %v242_v61  ;;  %v195_v4 = vld [vmem:[%s913_s23 + $0x50] sm:$0xff]  ;;  %v241_v5 = vld [vmem:[%s913_s23 + $0x1c0] sm:$0xff]  ;;  %v198_v7 = vld [vmem:[%s913_s23 + $0x68] sm:$0xff] }
  0x2d   : > { %v243_v6 = vld [vmem:[%s913_s23 + $0x1d0] sm:$0xff]  ;;  %v200_v8 = vld [vmem:[%s913_s23 + $0x78] sm:$0xff]  ;;  %v246_v9 = vld [vmem:[%s913_s23 + $0x1e8] sm:$0xff]  ;;  %v285_v11 = vpack.c.bf16 %v195_v4, %v193_v3 }
  0x2e   : > { %v248_v10 = vld [vmem:[%s913_s23 + $0x1f8] sm:$0xff]  ;;  %v309_v12 = vpack.c.bf16 %v243_v6, %v241_v5  ;;  %v288_v13 = vpack.c.bf16 %v200_v8, %v198_v7  ;;  %v197_v15 = vld [vmem:[%s913_s23 + $0x60] sm:$0xff]  ;;  %v199_v16 = vld [vmem:[%s913_s23 + $0x70] sm:$0xff] }
  0x2f   : > { %445 = vmatpush1.bf16.msra.mxu0 %v357_v18  ;;  %830 = vmatpush1.bf16.msra.mxu1 %v357_v18  ;;  %v312_v14 = vpack.c.bf16 %v248_v10, %v246_v9  ;;  %v245_v17 = vld [vmem:[%s913_s23 + $0x1e0] sm:$0xff]  ;;  %v247_v18 = vld [vmem:[%s913_s23 + $0x1f0] sm:$0xff]  ;;  %v202_v19 = vld [vmem:[%s913_s23 + $0x88] sm:$0xff]  ;;  %v287_v23 = vpack.c.bf16 %v199_v16, %v197_v15 }
  0x30   : > { %446 = vmatprep.subr.bf16.mxu0 %v873_v0  ;;  %819 = vmatprep.subr.bf16.mxu1 %v873_v0  ;;  %v204_v20 = vld [vmem:[%s913_s23 + $0x98] sm:$0xff]  ;;  %v203_v28 = vld [vmem:[%s913_s23 + $0x90] sm:$0xff]  ;;  %v249_v29 = vld [vmem:[%s913_s23 + $0x200] sm:$0xff] }
  0x31   : > { %v252_v22 = vld [vmem:[%s913_s23 + $0x218] sm:$0xff]  ;;  %v290_v25 = vpack.c.bf16 %v204_v20, %v202_v19  ;;  %v206_v31 = vld [vmem:[%s913_s23 + $0xa8] sm:$0xff]  ;;  %v207_v40 = vld [vmem:[%s913_s23 + $0xb0] sm:$0xff] }
  0x32   : > { %v208_v32 = vld [vmem:[%s913_s23 + $0xb8] sm:$0xff]  ;;  %v253_v41 = vld [vmem:[%s913_s23 + $0x220] sm:$0xff]  ;;  %v255_v42 = vld [vmem:[%s913_s23 + $0x230] sm:$0xff] }
  0x33   : > { %447 = vmatpush1.bf16.msra.mxu0 %v356_v21  ;;  %831 = vmatpush1.bf16.msra.mxu1 %v356_v21  ;;  %v250_v21 = vld [vmem:[%s913_s23 + $0x208] sm:$0xff]  ;;  %v256_v34 = vld [vmem:[%s913_s23 + $0x238] sm:$0xff]  ;;  %v292_v37 = vpack.c.bf16 %v208_v32, %v206_v31  ;;  %v315_v48 = vpack.c.bf16 %v255_v42, %v253_v41 }
  0x34   : > { %448 = vmatprep.subr.bf16.mxu0 %v873_v0  ;;  %820 = vmatprep.subr.bf16.mxu1 %v873_v0  ;;  %v314_v26 = vpack.c.bf16 %v252_v22, %v250_v21  ;;  %v210_v43 = vld [vmem:[%s913_s23 + $0xc8] sm:$0xff]  ;;  %v260_v46 = vld [vmem:[%s913_s23 + $0x258] sm:$0xff] }
  0x35   : > { %v258_v45 = vld [vmem:[%s913_s23 + $0x248] sm:$0xff]  ;;  %v216_v56 = vld [vmem:[%s913_s23 + $0xf8] sm:$0xff] }
  0x36   : > { %v318_v50 = vpack.c.bf16 %v260_v46, %v258_v45  ;;  %v214_v55 = vld [vmem:[%s913_s23 + $0xe8] sm:$0xff]  ;;  %v220_v4 = vld [vmem:[%s913_s23 + $0x118] sm:$0xff] }
  0x37   : > { %449 = vmatpush1.bf16.msra.mxu0 %v355_v24  ;;  %832 = vmatpush1.bf16.msra.mxu1 %v355_v24  ;;  %v311_v24 = vpack.c.bf16 %v247_v18, %v245_v17  ;;  %v296_v61 = vpack.c.bf16 %v216_v56, %v214_v55  ;;  %v218_v3 = vld [vmem:[%s913_s23 + $0x108] sm:$0xff]  ;;  %v268_v6 = vld [vmem:[%s913_s23 + $0x298] sm:$0xff] }
  0x38   : > { %450 = vmatprep.subr.bf16.mxu0 %v873_v0  ;;  %821 = vmatprep.subr.bf16.mxu1 %v873_v0  ;;  %v266_v5 = vld [vmem:[%s913_s23 + $0x288] sm:$0xff]  ;;  %v298_v9 = vpack.c.bf16 %v220_v4, %v218_v3  ;;  %v224_v16 = vld [vmem:[%s913_s23 + $0x138] sm:$0xff] }
  0x39   : > { %v322_v10 = vpack.c.bf16 %v268_v6, %v266_v5  ;;  %v222_v15 = vld [vmem:[%s913_s23 + $0x128] sm:$0xff]  ;;  %v272_v18 = vld [vmem:[%s913_s23 + $0x2b8] sm:$0xff] }
  0x3a   : > { %v270_v17 = vld [vmem:[%s913_s23 + $0x2a8] sm:$0xff]  ;;  %v300_v21 = vpack.c.bf16 %v224_v16, %v222_v15  ;;  %v280_v42 = vld [vmem:[%s913_s23 + $0x2f8] sm:$0xff] }
  0x3b   : > { %451 = vmatpush1.bf16.msra.mxu0 %v354_v27  ;;  %833 = vmatpush1.bf16.msra.mxu1 %v354_v27  ;;  %v201_v27 = vld [vmem:[%s913_s23 + $0x80] sm:$0xff]  ;;  %v324_v22 = vpack.c.bf16 %v272_v18, %v270_v17  ;;  %v278_v41 = vld [vmem:[%s913_s23 + $0x2e8] sm:$0xff] }
  0x3c   : > { %452 = vmatprep.subr.bf16.mxu0 %v873_v0  ;;  %822 = vmatprep.subr.bf16.mxu1 %v873_v0  ;;  %v289_v35 = vpack.c.bf16 %v203_v28, %v201_v27  ;;  %v226_v27 = vld [vmem:[%s913_s23 + $0x148] sm:$0xff]  ;;  %v228_v28 = vld [vmem:[%s913_s23 + $0x158] sm:$0xff]  ;;  %v328_v46 = vpack.c.bf16 %v280_v42, %v278_v41 }
  0x3f   : > { %453 = vmatpush1.bf16.msra.mxu0 %v353_v30  ;;  %834 = vmatpush1.bf16.msra.mxu1 %v353_v30  ;;  %v251_v30 = vld [vmem:[%s913_s23 + $0x210] sm:$0xff] }
  0x40   : > { %462 = vmatprep.subr.bf16.mxu0 %v873_v0  ;;  %823 = vmatprep.subr.bf16.mxu1 %v873_v0 }
  0x43   : > { %463 = vmatpush2.bf16.msra.mxu0 %v364_v33  ;;  %835 = vmatpush2.bf16.msra.mxu1 %v364_v33  ;;  %v254_v33 = vld [vmem:[%s913_s23 + $0x228] sm:$0xff] }
  0x44   : > { %464 = vmatprep.subr.bf16.mxu0 %v873_v0  ;;  %824 = vmatprep.subr.bf16.mxu1 %v873_v0  ;;  %v316_v38 = vpack.c.bf16 %v256_v34, %v254_v33  ;;  %v302_v33 = vpack.c.bf16 %v228_v28, %v226_v27 }
  0x47   : > { %465 = vmatpush2.bf16.msra.mxu0 %v363_v36  ;;  %836 = vmatpush2.bf16.msra.mxu1 %v363_v36  ;;  %v313_v36 = vpack.c.bf16 %v251_v30, %v249_v29  ;;  %v274_v29 = vld [vmem:[%s913_s23 + $0x2c8] sm:$0xff]  ;;  %v276_v30 = vld [vmem:[%s913_s23 + $0x2d8] sm:$0xff] }
  0x48   : > { %466 = vmatprep.subr.bf16.mxu0 %v873_v0  ;;  %825 = vmatprep.subr.bf16.mxu1 %v873_v0  ;;  %v326_v34 = vpack.c.bf16 %v276_v30, %v274_v29 }
  0x4b   : > { %467 = vmatpush2.bf16.msra.mxu0 %v362_v39  ;;  %837 = vmatpush2.bf16.msra.mxu1 %v362_v39  ;;  %v205_v39 = vld [vmem:[%s913_s23 + $0xa0] sm:$0xff] }
  0x4c   : > { %468 = vmatprep.subr.bf16.mxu0 %v873_v0  ;;  %826 = vmatprep.subr.bf16.mxu1 %v873_v0  ;;  %v307_v0 = vpack.c.bf16 %v239_v58, %v237_v57  ;;  %v291_v47 = vpack.c.bf16 %v207_v40, %v205_v39  ;;  %v262_v57 = vld [vmem:[%s913_s23 + $0x268] sm:$0xff]  ;;  %v264_v58 = vld [vmem:[%s913_s23 + $0x278] sm:$0xff] }
  0x4d   : > { %v320_v62 = vpack.c.bf16 %v264_v58, %v262_v57  ;;  %v230_v39 = vld [vmem:[%s913_s23 + $0x168] sm:$0xff]  ;;  %v232_v40 = vld [vmem:[%s913_s23 + $0x178] sm:$0xff] }
  0x4e   : > { %v304_v45 = vpack.c.bf16 %v232_v40, %v230_v39 }
  0x4f   : > { %469 = vmatpush2.bf16.msra.mxu0 %v361_v44  ;;  %838 = vmatpush2.bf16.msra.mxu1 %v361_v44  ;;  %v212_v44 = vld [vmem:[%s913_s23 + $0xd8] sm:$0xff] }
  0x50   : > { %v294_v49 = vpack.c.bf16 %v212_v44, %v210_v43 }
  0x52   : > { %471 = vmatmul.mubr.bf16.vlgmr.msra.gmra.mxu0 %v281_v51  ;;  %567 = vmatmul.mubr.bf16.vlgmr.msra.gmra.mxu1 %v305_v52  ;;  %v209_v51 = vld [vmem:[%s913_s23 + $0xc0] sm:$0xff]  ;;  %v211_v52 = vld [vmem:[%s913_s23 + $0xd0] sm:$0xff] }
  0x53   : > { %789 = vmatprep.mubr.msk.bf16.mxu0 %vm365_vm0, %v284_v53  ;;  %801 = vmatprep.mubr.msk.bf16.mxu1 %vm365_vm0, %v308_v54  ;;  %v257_v53 = vld [vmem:[%s913_s23 + $0x240] sm:$0xff]  ;;  %v259_v54 = vld [vmem:[%s913_s23 + $0x250] sm:$0xff]  ;;  %v293_v59 = vpack.c.bf16 %v211_v52, %v209_v51 }
  0x54   : > { %v317_v60 = vpack.c.bf16 %v259_v54, %v257_v53 }
  0x5a   : > { %479 = vmatmul.mubr.bf16.gmra.mxu0 %v283_v63  ;;  %575 = vmatmul.mubr.bf16.gmra.mxu1 %v307_v0  ;;  %v213_v63 = vld [vmem:[%s913_s23 + $0xe0] sm:$0xff]  ;;  %v215_v0 = vld [vmem:[%s913_s23 + $0xf0] sm:$0xff] }
  0x5b   : > { %790 = vmatprep.mubr.msk.bf16.mxu0 %vm365_vm0, %v286_v1  ;;  %802 = vmatprep.mubr.msk.bf16.mxu1 %vm365_vm0, %v310_v2  ;;  %v261_v1 = vld [vmem:[%s913_s23 + $0x260] sm:$0xff]  ;;  %v263_v2 = vld [vmem:[%s913_s23 + $0x270] sm:$0xff]  ;;  %v295_v7 = vpack.c.bf16 %v215_v0, %v213_v63 }
  0x5c   : > { %v319_v8 = vpack.c.bf16 %v263_v2, %v261_v1 }
  0x62   : > { %487 = vmatmul.mubr.bf16.gmra.mxu0 %v285_v11  ;;  %583 = vmatmul.mubr.bf16.gmra.mxu1 %v309_v12  ;;  %v217_v11 = vld [vmem:[%s913_s23 + $0x100] sm:$0xff]  ;;  %v219_v12 = vld [vmem:[%s913_s23 + $0x110] sm:$0xff] }
  0x63   : > { %791 = vmatprep.mubr.msk.bf16.mxu0 %vm365_vm0, %v288_v13  ;;  %803 = vmatprep.mubr.msk.bf16.mxu1 %vm365_vm0, %v312_v14  ;;  %v265_v13 = vld [vmem:[%s913_s23 + $0x280] sm:$0xff]  ;;  %v267_v14 = vld [vmem:[%s913_s23 + $0x290] sm:$0xff]  ;;  %v297_v19 = vpack.c.bf16 %v219_v12, %v217_v11 }
  0x64   : > { %v321_v20 = vpack.c.bf16 %v267_v14, %v265_v13 }
  0x6a   : > { %495 = vmatmul.mubr.bf16.gmra.mxu0 %v287_v23  ;;  %591 = vmatmul.mubr.bf16.gmra.mxu1 %v311_v24  ;;  %v221_v23 = vld [vmem:[%s913_s23 + $0x120] sm:$0xff]  ;;  %v223_v24 = vld [vmem:[%s913_s23 + $0x130] sm:$0xff] }
  0x6b   : > { %792 = vmatprep.mubr.msk.bf16.mxu0 %vm365_vm0, %v290_v25  ;;  %804 = vmatprep.mubr.msk.bf16.mxu1 %vm365_vm0, %v314_v26  ;;  %v269_v25 = vld [vmem:[%s913_s23 + $0x2a0] sm:$0xff]  ;;  %v271_v26 = vld [vmem:[%s913_s23 + $0x2b0] sm:$0xff]  ;;  %v299_v31 = vpack.c.bf16 %v223_v24, %v221_v23 }
  0x6c   : > { %v323_v32 = vpack.c.bf16 %v271_v26, %v269_v25 }
  0x72   : > { %503 = vmatmul.mubr.bf16.gmra.mxu0 %v289_v35  ;;  %599 = vmatmul.mubr.bf16.gmra.mxu1 %v313_v36  ;;  %v225_v35 = vld [vmem:[%s913_s23 + $0x140] sm:$0xff]  ;;  %v227_v36 = vld [vmem:[%s913_s23 + $0x150] sm:$0xff] }
  0x73   : > { %793 = vmatprep.mubr.msk.bf16.mxu0 %vm365_vm0, %v292_v37  ;;  %805 = vmatprep.mubr.msk.bf16.mxu1 %vm365_vm0, %v316_v38  ;;  %v273_v37 = vld [vmem:[%s913_s23 + $0x2c0] sm:$0xff]  ;;  %v275_v38 = vld [vmem:[%s913_s23 + $0x2d0] sm:$0xff]  ;;  %v301_v43 = vpack.c.bf16 %v227_v36, %v225_v35 }
  0x74   : > { %v325_v44 = vpack.c.bf16 %v275_v38, %v273_v37 }
  0x7a   : > { %511 = vmatmul.mubr.bf16.gmra.mxu0 %v291_v47  ;;  %607 = vmatmul.mubr.bf16.gmra.mxu1 %v315_v48  ;;  %v229_v47 = vld [vmem:[%s913_s23 + $0x160] sm:$0xff]  ;;  %v231_v48 = vld [vmem:[%s913_s23 + $0x170] sm:$0xff] }
  0x7b   : > { %794 = vmatprep.mubr.msk.bf16.mxu0 %vm365_vm0, %v294_v49  ;;  %806 = vmatprep.mubr.msk.bf16.mxu1 %vm365_vm0, %v318_v50  ;;  %v277_v49 = vld [vmem:[%s913_s23 + $0x2e0] sm:$0xff]  ;;  %v279_v50 = vld [vmem:[%s913_s23 + $0x2f0] sm:$0xff]  ;;  %v303_v51 = vpack.c.bf16 %v231_v48, %v229_v47 }
  0x7c   : > { %v327_v52 = vpack.c.bf16 %v279_v50, %v277_v49 }
  0x82   : > { %519 = vmatmul.mubr.bf16.gmra.mxu0 %v293_v59  ;;  %615 = vmatmul.mubr.bf16.gmra.mxu1 %v317_v60 }
  0x83   : > { %795 = vmatprep.mubr.msk.bf16.mxu0 %vm365_vm0, %v296_v61  ;;  %807 = vmatprep.mubr.msk.bf16.mxu1 %vm365_vm0, %v320_v62 }
  0x8a   : > { %527 = vmatmul.mubr.bf16.gmra.mxu0 %v295_v7  ;;  %623 = vmatmul.mubr.bf16.gmra.mxu1 %v319_v8 }
  0x8b   : > { %796 = vmatprep.mubr.msk.bf16.mxu0 %vm365_vm0, %v298_v9  ;;  %808 = vmatprep.mubr.msk.bf16.mxu1 %vm365_vm0, %v322_v10 }
  0x92   : > { %535 = vmatmul.mubr.bf16.gmra.mxu0 %v297_v19  ;;  %631 = vmatmul.mubr.bf16.gmra.mxu1 %v321_v20 }
  0x93   : > { %797 = vmatprep.mubr.msk.bf16.mxu0 %vm365_vm0, %v300_v21  ;;  %809 = vmatprep.mubr.msk.bf16.mxu1 %vm365_vm0, %v324_v22 }
  0x9a   : > { %543 = vmatmul.mubr.bf16.gmra.mxu0 %v299_v31  ;;  %639 = vmatmul.mubr.bf16.gmra.mxu1 %v323_v32 }
  0x9b   : > { %798 = vmatprep.mubr.msk.bf16.mxu0 %vm365_vm0, %v302_v33  ;;  %810 = vmatprep.mubr.msk.bf16.mxu1 %vm365_vm0, %v326_v34 }
  0xa2   : > { %551 = vmatmul.mubr.bf16.gmra.mxu0 %v301_v43  ;;  %647 = vmatmul.mubr.bf16.gmra.mxu1 %v325_v44 }
  0xa3   : > { %799 = vmatprep.mubr.msk.bf16.mxu0 %vm365_vm0, %v304_v45  ;;  %811 = vmatprep.mubr.msk.bf16.mxu1 %vm365_vm0, %v328_v46 }
  0xaa   : > { %559 = vmatmul.mubr.bf16.gmra.mxu0 %v303_v51  ;;  %655 = vmatmul.mubr.bf16.gmra.mxu1 %v327_v52 }
 0x112   : > { %v472_v53 = vpop.f32.mrf.mxu0  ;;  %v568_v54 = vpop.f32.mrf.mxu1 }
 0x113   : > { %663 = vst [vmem:[%s1090_s4] sm:$0xff] %v472_v53  ;;  %687 = vst [vmem:[%s1090_s4 + $0xc0] sm:$0xff] %v568_v54 }
 0x114   : > { %v474_v55 = vpop.f32.mrf.mxu0  ;;  %v570_v56 = vpop.f32.mrf.mxu1 }
 0x116   : > { %v475_v57 = vpop.f32.mrf.mxu0  ;;  %v571_v58 = vpop.f32.mrf.mxu1 }
 0x117   : > { %664 = vst [vmem:[%s1090_s4 + $0x8] sm:$0xff] %v475_v57  ;;  %688 = vst [vmem:[%s1090_s4 + $0xc8] sm:$0xff] %v571_v58 }
 0x118   : > { %v477_v59 = vpop.f32.mrf.mxu0  ;;  %v573_v60 = vpop.f32.mrf.mxu1 }
 0x11a   : > { %v480_v61 = vpop.f32.mrf.mxu0  ;;  %v576_v62 = vpop.f32.mrf.mxu1 }
 0x11b   : > { %665 = vst [vmem:[%s1090_s4 + $0x10] sm:$0xff] %v480_v61  ;;  %689 = vst [vmem:[%s1090_s4 + $0xd0] sm:$0xff] %v576_v62 }
 0x11c   : > { %v482_v63 = vpop.f32.mrf.mxu0  ;;  %v578_v0 = vpop.f32.mrf.mxu1 }
 0x11e   : > { %v483_v1 = vpop.f32.mrf.mxu0  ;;  %v579_v2 = vpop.f32.mrf.mxu1 }
 0x11f   : > { %666 = vst [vmem:[%s1090_s4 + $0x18] sm:$0xff] %v483_v1  ;;  %690 = vst [vmem:[%s1090_s4 + $0xd8] sm:$0xff] %v579_v2 }
 0x120   : > { %v485_v3 = vpop.f32.mrf.mxu0  ;;  %v581_v4 = vpop.f32.mrf.mxu1 }
 0x122   : > { %v488_v5 = vpop.f32.mrf.mxu0  ;;  %v584_v6 = vpop.f32.mrf.mxu1 }
 0x123   : > { %667 = vst [vmem:[%s1090_s4 + $0x20] sm:$0xff] %v488_v5  ;;  %691 = vst [vmem:[%s1090_s4 + $0xe0] sm:$0xff] %v584_v6 }
 0x124   : > { %v490_v7 = vpop.f32.mrf.mxu0  ;;  %v586_v8 = vpop.f32.mrf.mxu1 }
 0x126   : > { %v491_v9 = vpop.f32.mrf.mxu0  ;;  %v587_v10 = vpop.f32.mrf.mxu1 }
 0x127   : > { %668 = vst [vmem:[%s1090_s4 + $0x28] sm:$0xff] %v491_v9  ;;  %692 = vst [vmem:[%s1090_s4 + $0xe8] sm:$0xff] %v587_v10 }
 0x128   : > { %v493_v11 = vpop.f32.mrf.mxu0  ;;  %v589_v12 = vpop.f32.mrf.mxu1 }
 0x12a   : > { %v496_v13 = vpop.f32.mrf.mxu0  ;;  %v592_v14 = vpop.f32.mrf.mxu1 }
 0x12b   : > { %669 = vst [vmem:[%s1090_s4 + $0x30] sm:$0xff] %v496_v13  ;;  %693 = vst [vmem:[%s1090_s4 + $0xf0] sm:$0xff] %v592_v14 }
 0x12c   : > { %v498_v15 = vpop.f32.mrf.mxu0  ;;  %v594_v16 = vpop.f32.mrf.mxu1 }
 0x12e   : > { %v499_v17 = vpop.f32.mrf.mxu0  ;;  %v595_v18 = vpop.f32.mrf.mxu1 }
 0x12f   : > { %670 = vst [vmem:[%s1090_s4 + $0x38] sm:$0xff] %v499_v17  ;;  %694 = vst [vmem:[%s1090_s4 + $0xf8] sm:$0xff] %v595_v18 }
 0x130   : > { %v501_v19 = vpop.f32.mrf.mxu0  ;;  %v597_v20 = vpop.f32.mrf.mxu1 }
 0x132   : > { %v504_v21 = vpop.f32.mrf.mxu0  ;;  %v600_v22 = vpop.f32.mrf.mxu1 }
 0x133   : > { %671 = vst [vmem:[%s1090_s4 + $0x40] sm:$0xff] %v504_v21  ;;  %695 = vst [vmem:[%s1090_s4 + $0x100] sm:$0xff] %v600_v22 }
 0x134   : > { %v506_v23 = vpop.f32.mrf.mxu0  ;;  %v602_v24 = vpop.f32.mrf.mxu1 }
 0x136   : > { %v507_v25 = vpop.f32.mrf.mxu0  ;;  %v603_v26 = vpop.f32.mrf.mxu1 }
 0x137   : > { %672 = vst [vmem:[%s1090_s4 + $0x48] sm:$0xff] %v507_v25  ;;  %696 = vst [vmem:[%s1090_s4 + $0x108] sm:$0xff] %v603_v26 }
 0x138   : > { %v509_v27 = vpop.f32.mrf.mxu0  ;;  %v605_v28 = vpop.f32.mrf.mxu1 }
 0x13a   : > { %v512_v29 = vpop.f32.mrf.mxu0  ;;  %v608_v30 = vpop.f32.mrf.mxu1 }
 0x13b   : > { %673 = vst [vmem:[%s1090_s4 + $0x50] sm:$0xff] %v512_v29  ;;  %697 = vst [vmem:[%s1090_s4 + $0x110] sm:$0xff] %v608_v30 }
 0x13c   : > { %v514_v31 = vpop.f32.mrf.mxu0  ;;  %v610_v32 = vpop.f32.mrf.mxu1 }
 0x13e   : > { %v515_v33 = vpop.f32.mrf.mxu0  ;;  %v611_v34 = vpop.f32.mrf.mxu1 }
 0x13f   : > { %674 = vst [vmem:[%s1090_s4 + $0x58] sm:$0xff] %v515_v33  ;;  %698 = vst [vmem:[%s1090_s4 + $0x118] sm:$0xff] %v611_v34 }
 0x140   : > { %v517_v35 = vpop.f32.mrf.mxu0  ;;  %v613_v36 = vpop.f32.mrf.mxu1 }
 0x142   : > { %v520_v37 = vpop.f32.mrf.mxu0  ;;  %v616_v38 = vpop.f32.mrf.mxu1 }
 0x143   : > { %675 = vst [vmem:[%s1090_s4 + $0x60] sm:$0xff] %v520_v37  ;;  %699 = vst [vmem:[%s1090_s4 + $0x120] sm:$0xff] %v616_v38 }
 0x144   : > { %v522_v39 = vpop.f32.mrf.mxu0  ;;  %v618_v40 = vpop.f32.mrf.mxu1 }
 0x146   : > { %v523_v41 = vpop.f32.mrf.mxu0  ;;  %v619_v42 = vpop.f32.mrf.mxu1 }
 0x147   : > { %676 = vst [vmem:[%s1090_s4 + $0x68] sm:$0xff] %v523_v41  ;;  %700 = vst [vmem:[%s1090_s4 + $0x128] sm:$0xff] %v619_v42 }
 0x148   : > { %v525_v43 = vpop.f32.mrf.mxu0  ;;  %v621_v44 = vpop.f32.mrf.mxu1 }
 0x14a   : > { %v528_v45 = vpop.f32.mrf.mxu0  ;;  %v624_v46 = vpop.f32.mrf.mxu1 }
 0x14b   : > { %677 = vst [vmem:[%s1090_s4 + $0x70] sm:$0xff] %v528_v45  ;;  %701 = vst [vmem:[%s1090_s4 + $0x130] sm:$0xff] %v624_v46 }
 0x14c   : > { %v530_v47 = vpop.f32.mrf.mxu0  ;;  %v626_v48 = vpop.f32.mrf.mxu1 }
 0x14e   : > { %v531_v49 = vpop.f32.mrf.mxu0  ;;  %v627_v50 = vpop.f32.mrf.mxu1 }
 0x14f   : > { %678 = vst [vmem:[%s1090_s4 + $0x78] sm:$0xff] %v531_v49  ;;  %702 = vst [vmem:[%s1090_s4 + $0x138] sm:$0xff] %v627_v50 }
 0x150   : > { %v533_v51 = vpop.f32.mrf.mxu0  ;;  %v629_v52 = vpop.f32.mrf.mxu1 }
 0x152   : > { %v536_v53 = vpop.f32.mrf.mxu0  ;;  %v632_v54 = vpop.f32.mrf.mxu1 }
 0x153   : > { %679 = vst [vmem:[%s1090_s4 + $0x80] sm:$0xff] %v536_v53  ;;  %703 = vst [vmem:[%s1090_s4 + $0x140] sm:$0xff] %v632_v54 }
 0x154   : > { %v538_v55 = vpop.f32.mrf.mxu0  ;;  %v634_v56 = vpop.f32.mrf.mxu1 }
 0x156   : > { %v539_v57 = vpop.f32.mrf.mxu0  ;;  %v635_v58 = vpop.f32.mrf.mxu1 }
 0x157   : > { %680 = vst [vmem:[%s1090_s4 + $0x88] sm:$0xff] %v539_v57  ;;  %704 = vst [vmem:[%s1090_s4 + $0x148] sm:$0xff] %v635_v58 }
 0x158   : > { %v541_v59 = vpop.f32.mrf.mxu0  ;;  %v637_v60 = vpop.f32.mrf.mxu1 }
 0x15a   : > { %v544_v61 = vpop.f32.mrf.mxu0  ;;  %v640_v62 = vpop.f32.mrf.mxu1 }
 0x15b   : > { %681 = vst [vmem:[%s1090_s4 + $0x90] sm:$0xff] %v544_v61  ;;  %705 = vst [vmem:[%s1090_s4 + $0x150] sm:$0xff] %v640_v62 }
 0x15c   : > { %v546_v63 = vpop.f32.mrf.mxu0  ;;  %v642_v0 = vpop.f32.mrf.mxu1 }
 0x15e   : > { %v547_v1 = vpop.f32.mrf.mxu0  ;;  %v643_v2 = vpop.f32.mrf.mxu1 }
 0x15f   : > { %682 = vst [vmem:[%s1090_s4 + $0x98] sm:$0xff] %v547_v1  ;;  %706 = vst [vmem:[%s1090_s4 + $0x158] sm:$0xff] %v643_v2 }
 0x160   : > { %v549_v3 = vpop.f32.mrf.mxu0  ;;  %v645_v4 = vpop.f32.mrf.mxu1 }
 0x162   : > { %v552_v5 = vpop.f32.mrf.mxu0  ;;  %v648_v6 = vpop.f32.mrf.mxu1 }
 0x163   : > { %683 = vst [vmem:[%s1090_s4 + $0xa0] sm:$0xff] %v552_v5  ;;  %707 = vst [vmem:[%s1090_s4 + $0x160] sm:$0xff] %v648_v6 }
 0x164   : > { %v554_v7 = vpop.f32.mrf.mxu0  ;;  %v650_v8 = vpop.f32.mrf.mxu1 }
 0x166   : > { %v555_v9 = vpop.f32.mrf.mxu0  ;;  %v651_v10 = vpop.f32.mrf.mxu1 }
 0x167   : > { %684 = vst [vmem:[%s1090_s4 + $0xa8] sm:$0xff] %v555_v9  ;;  %708 = vst [vmem:[%s1090_s4 + $0x168] sm:$0xff] %v651_v10 }
 0x168   : > { %v557_v11 = vpop.f32.mrf.mxu0  ;;  %v653_v12 = vpop.f32.mrf.mxu1 }
 0x16a   : > { %v560_v13 = vpop.f32.mrf.mxu0  ;;  %v656_v14 = vpop.f32.mrf.mxu1 }
 0x16b   : > { %685 = vst [vmem:[%s1090_s4 + $0xb0] sm:$0xff] %v560_v13  ;;  %709 = vst [vmem:[%s1090_s4 + $0x170] sm:$0xff] %v656_v14 }
 0x16c   : > { %v562_v15 = vpop.f32.mrf.mxu0  ;;  %v658_v16 = vpop.f32.mrf.mxu1 }
 0x16e   : > { %v563_v17 = vpop.f32.mrf.mxu0  ;;  %v659_v18 = vpop.f32.mrf.mxu1 }
 0x16f   : > { %686 = vst [vmem:[%s1090_s4 + $0xb8] sm:$0xff] %v563_v17  ;;  %710 = vst [vmem:[%s1090_s4 + $0x178] sm:$0xff] %v659_v18 }
 0x170   : > { %v565_v19 = vpop.f32.mrf.mxu0  ;;  %v661_v20 = vpop.f32.mrf.mxu1 }
 0x171 PF: > { %s19_s17 = sadd.s32 1, %s870_s17  }
 0x172   : > { %p16_p10 = scmp.ge.s32.totalorder %s19_s17, 6  }
 0x174   :  { %18 = sbr.rel (!%p16_p10) target bundleno = 16 (0x10), region = 61 }

// kernel: wavelets_forward.27
= control target key start
LH: loop header
LB: loop body
LE: loop exit
PB: predicated region body
PF: predicated region fallthrough
CT: control target
= control target key end

     0   :  { %s237_s6 = smov 0   ;;  %s266_s0 = inlined_call_operand.vmem [shape: f32[2,8,8,10], index: 0, kind: input, shape index: {}]   ;;  %s267_s1 = inlined_call_operand.vmem [shape: f32[2,1,10], index: 1, kind: output, shape index: {}]  }
   0x1 LB: > { %s201_s7 = sadd.s32 4294967295, %s225_s6   ;;  %p205_p0 = scmp.ge.s32.totalorder %s225_s6, 1  ;;  %s225_s6 = sphi %s237_s6, %s11_s6  }
   0x2   : > { %p87_p1 = scmp.lt.s32.totalorder %s225_s6, 3 }
   0x4   : > { %p88_p2 = pnand %p205_p0, %p87_p1 }
   0x5   : > { %p105_p3 = scmp.lt.s32.totalorder (!%p88_p2), %s201_s7, 1 }
   0x6   : > { %91 = sbr.rel (%p88_p2) target bundleno = 47 (0x2f), region = 24 }
   0xb   : > { %s269_s7 = smov (!%p105_p3, %s201_s7), 1  ;;  %vm129_vm0 = vcmask 80896   ;;  %vm152_vm1 = vcmask 73728  }
   0xc   : > { %s210_s8 = sshll.u32 %s269_s7, 6  ;;  %s112_s14 = scalar_lea.vmem %s267_s1, %s269_s7 }
   0xd   : > { %s109_s11 = scalar_lea.vmem %s266_s0, %s210_s8 }
   0xe   : > { %v113_v0 = vld [vmem:[%s109_s11] sm:$0xff]  ;;  %v114_v1 = vld [vmem:[%s109_s11 + $0x8] sm:$0xff]  ;;  %v115_v2 = vld [vmem:[%s109_s11 + $0x10] sm:$0xff] }
   0xf   : > { %v116_v3 = vld [vmem:[%s109_s11 + $0x18] sm:$0xff]  ;;  %v117_v4 = vld [vmem:[%s109_s11 + $0x20] sm:$0xff]  ;;  %v121_v5 = vmax.f32 %v113_v0, 0.0  ;;  %v122_v6 = vmax.f32 %v114_v1, 0.0  ;;  %v123_v7 = vmax.f32 %v115_v2, 0.0  ;;  %v118_v8 = vld [vmem:[%s109_s11 + $0x28] sm:$0xff] }
  0x10   : > { %v124_v9 = vmax.f32 %v116_v3, 0.0  ;;  %v125_v10 = vmax.f32 %v117_v4, 0.0  ;;  %v119_v13 = vld [vmem:[%s109_s11 + $0x30] sm:$0xff]  ;;  %v126_v16 = vmax.f32 %v118_v8, 0.0  ;;  %v120_v18 = vld [vmem:[%s109_s11 + $0x38] sm:$0xff] }
  0x11   : > { %v130_v11 = vsel %vm129_vm0, %v121_v5, 0.0  ;;  %v131_v12 = vsel %vm129_vm0, %v122_v6, 0.0  ;;  %v133_v15 = vsel %vm129_vm0, %v123_v7, 0.0  ;;  %v127_v20 = vmax.f32 %v119_v13, 0.0 }
  0x12   : > { %v132_v14 = vadd.f32 %v131_v12, %v130_v11  ;;  %v135_v17 = vsel %vm129_vm0, %v124_v9, 0.0  ;;  %v137_v21 = vsel %vm129_vm0, %v125_v10, 0.0  ;;  %v128_v23 = vmax.f32 %v120_v18, 0.0 }
  0x13   : > { %v139_v24 = vsel %vm129_vm0, %v126_v16, 0.0  ;;  %v141_v26 = vsel %vm129_vm0, %v127_v20, 0.0 }
  0x14   : > { %v134_v19 = vadd.f32 %v133_v15, %v132_v14  ;;  %v143_v28 = vsel %vm129_vm0, %v128_v23, 0.0 }
  0x16   : > { %v136_v22 = vadd.f32 %v135_v17, %v134_v19 }
  0x18   : > { %v138_v25 = vadd.f32 %v137_v21, %v136_v22 }
  0x1a   : > { %v140_v27 = vadd.f32 %v139_v24, %v138_v25 }
  0x1c   : > { %v142_v29 = vadd.f32 %v141_v26, %v140_v27 }
  0x1e   : > { %v144_v30 = vadd.f32 %v143_v28, %v142_v29 }
  0x20   : > { %v145_v31 = vrot.slane %v144_v30, 4 }
  0x22   : > { %v146_v32 = vadd.f32 %v145_v31, %v144_v30 }
  0x24   : > { %v147_v33 = vrot.slane %v146_v32, 2 }
  0x26   : > { %v148_v34 = vadd.f32 %v147_v33, %v146_v32 }
  0x28   : > { %v149_v35 = vrot.slane %v148_v34, 1 }
  0x2a   : > { %v150_v36 = vadd.f32 %v149_v35, %v148_v34 }
  0x2c   : > { %v151_v37 = vmul.f32 0.015625, %v150_v36 }
  0x2e   : > { %153 = vst.msk [vmem:[%s112_s14] sm:$0x1] %vm152_vm1, %v151_v37 }
  0x2f PF: > { %s11_s6 = sadd.s32 1, %s225_s6  }
  0x30   : > { %p8_p4 = scmp.ge.s32.totalorder %s11_s6, 4  }
  0x32   :  { %10 = sbr.rel (!%p8_p4) target bundleno = 1 (0x1), region = 54 }

</bundles_post_ra>
